<compile_context>
chip_gen: v7x
topology: tpu7x:2x2x1
jax: 0.10.0
libtpu: 0.0.40
codegen_flags: <defaults>
</compile_context>

<pallas_src>
import functools

import numpy as np
import jax
import jax.numpy as jnp
from jax.experimental import pallas as pl
from jax.experimental.pallas import tpu as pltpu

OFFSET = 0.0195141            # GBNeck dielectric offset (nm)
FRACTION = 0.5
SOLVENT_DIELECTRIC = 78.5
GNN_CUTOFF = 0.4              # module default `radius` for the GNN graph (nm)
HIDDEN = 64                   # hidden=64 in GNN3_scale_64
COULOMB = 138.935485          # kJ nm / (mol e^2)
SA_GAMMA = 0.00542
MASK_NEG = -1.0e4             # additive edge mask; SiLU(x + MASK_NEG) == 0

# ---- packed f32 "vector" parameter rows (all HIDDEN columns wide) ----
_VW11 = 0      # rows 0..6 : interaction1 lin1 weights for [x_i(3), x_j(3), d(1)]
_VB11 = 7      # interaction1 lin1 bias
_VB12 = 8      # interaction1 lin2 bias
_VWD2 = 9      # interaction2 lin1 distance row
_VB21 = 10     # interaction2 lin1 bias
_VB22 = 11     # interaction2 lin2 bias
_VWD3 = 12     # interaction3 lin1 distance row
_VB31 = 13     # interaction3 lin1 bias
_VB32 = 14     # interaction3 lin2 bias (cols 0/1 used)
_VROWS = 16    # padded to a sublane-aligned row count


def _sigmoid(x):
    # 1 EUP op (tanh) instead of 2 (exp + reciprocal).
    return 0.5 * jnp.tanh(0.5 * x) + 0.5


def _silu(x):
    return x * _sigmoid(x)


def gnn3_kernel(pos_ref, feat_ref, vec_ref, w1_ref, w2_ref, out_ref, *, cdt):
    rt = pos_ref.shape[0]
    a = pos_ref.shape[2]
    h = HIDDEN

    pos = pos_ref[...]          # (Rt, 3, A) positions, coordinates lane-dense
    feat = feat_ref[...]        # (3, A): [charge, radius - offset, scale]
    vec = vec_ref[...]          # (16, H) f32 biases / small weight rows
    w1p = w1_ref[...]           # (128, 128) bf16: [W21_xi|W21_xj ; W31_xi|W31_xj]
    w2p = w2_ref[...]           # (192, H)  bf16: [W12 ; W22 ; W32 (padded)]

    q = feat[0]                 # (A,)
    rho = feat[1]               # offset radius
    scale = feat[2]

    # structural masks generated in-kernel (no one-hot / off-diagonal DMAs)
    ii = jax.lax.broadcasted_iota(jnp.int32, (a, a), 0)
    jj = jax.lax.broadcasted_iota(jnp.int32, (a, a), 1)
    off = ii != jj                                               # (A, A)

    # ---- build_graph: all-pair distances, lane-packed as (Rt, A, A) ----
    px, py, pz = pos[:, 0, :], pos[:, 1, :], pos[:, 2, :]
    dx = px[:, :, None] - px[:, None, :]
    dy = py[:, :, None] - py[:, None, :]
    dz = pz[:, :, None] - pz[:, None, :]
    d2 = dx * dx + dy * dy + dz * dz                             # (Rt, A, A)
    d2s = jnp.where(off, d2, 1.0)                                # safe on diagonal
    inv_d = jax.lax.rsqrt(d2s)
    d = d2s * inv_d                                              # sqrt(d2) off-diag

    # ---- GBNeck_interaction: HCT descreening integral -> Born radii ----
    # Exact divides (physically sensitive path; ~5-10% of the kernel).
    rho_i = rho[None, :, None]
    sr2_j = (scale * rho)[None, None, :]
    upper = d + sr2_j
    lower = jnp.maximum(rho_i, jnp.abs(d - sr2_j))
    inv_l = 1.0 / lower
    inv_u = 1.0 / upper
    core = 0.5 * (inv_l - inv_u
                  + 0.25 * (d - sr2_j * sr2_j * inv_d) * (inv_u * inv_u - inv_l * inv_l)
                  + 0.5 * jnp.log(lower * inv_u) * inv_d)
    inside = jnp.where(sr2_j - d > rho_i, 1.0 / rho_i - inv_l, 0.0)
    i_e = jnp.where(jnp.logical_and(off[None], upper > rho_i), core + inside, 0.0)
    # TODO(synk): GBNeck2 neck-integral correction (d0/m0 radius lookup tables)
    # is not reproduced -- reference GBNeck_interaction source unavailable.
    i_node = jnp.sum(i_e, axis=2)                                # (Rt, A)
    psi = i_node * rho[None, :]
    radius_full = rho[None, :] + OFFSET
    born = 1.0 / (1.0 / rho[None, :]
                  - jnp.tanh(psi - 0.8 * psi * psi + 4.85 * psi * psi * psi)
                  / radius_full)                                 # (Rt, A)

    # ---- GNN message-passing graph (r < 0.4, no self loops), shared by all
    # three interaction layers: degree + the hoisted lane-expansions over H ----
    gnn_edge = jnp.logical_and(off[None], d < GNN_CUTOFF)        # (Rt, A, A) bool
    deg = jnp.sum(jnp.where(gnn_edge, 1.0, 0.0), axis=2)         # (Rt, A)
    dexp = jnp.broadcast_to(d.astype(cdt)[..., None], (rt, a, a, h))
    mbias = jnp.broadcast_to(
        jnp.where(gnn_edge, 0.0, MASK_NEG).astype(cdt)[..., None], (rt, a, a, h))

    def edge_mlp(hi, hj, wd, b1, w2, b2):
        # IN_layer_all_swish_2pass (assumed): per-edge Lin2(SiLU(Lin1([x_i,x_j,d]))),
        # sum-aggregated over neighbours j.  Lin1 is pre-factorised into the node
        # projections hi/hj (cdt) plus the distance row wd; non-edges are removed
        # by the additive MASK_NEG (SiLU underflows to exactly 0).
        # TODO(synk): exact IN_layer_all_swish_2pass source unavailable; a 2-layer
        # SiLU MLP on [x_i, x_j, d] with sum aggregation is assumed.
        pre = (hi[:, :, None, :] + hj[:, None, :, :]
               + (dexp * wd.astype(cdt) + mbias) + b1.astype(cdt))   # (Rt,A,A,H) cdt
        act = _silu(pre)
        agg = jnp.sum(act.astype(jnp.float32), axis=2)               # f32, (Rt,A,H)
        lin2 = jnp.dot(agg.reshape(rt * a, h).astype(jnp.bfloat16), w2,
                       preferred_element_type=jnp.float32).reshape(rt, a, h)
        return lin2 + deg[..., None] * b2          # per-edge lin2 bias => deg * b2

    # ---- interaction1 / interaction2 / interaction3 (hidden = 64) ----
    w11 = vec[_VW11:_VW11 + 7]                                    # (7, H) f32
    bn = born[..., None]                                          # (Rt, A, 1)
    qn = q[None, :, None]
    rn = rho[None, :, None]
    hi1 = (bn * w11[0] + qn * w11[1] + rn * w11[2]).astype(cdt)   # (Rt, A, H)
    hj1 = (bn * w11[3] + qn * w11[4] + rn * w11[5]).astype(cdt)
    x1 = _silu(edge_mlp(hi1, hj1, w11[6], vec[_VB11], w2p[:h], vec[_VB12]))

    x1b = x1.reshape(rt * a, h).astype(jnp.bfloat16)
    hij2 = jnp.dot(x1b, w1p[:h], preferred_element_type=jnp.float32)   # (Rt*A, 128)
    hi2 = hij2[:, :h].reshape(rt, a, h).astype(cdt)
    hj2 = hij2[:, h:].reshape(rt, a, h).astype(cdt)
    x2 = _silu(edge_mlp(hi2, hj2, vec[_VWD2], vec[_VB21], w2p[h:2 * h], vec[_VB22]))

    x2b = x2.reshape(rt * a, h).astype(jnp.bfloat16)
    hij3 = jnp.dot(x2b, w1p[h:], preferred_element_type=jnp.float32)
    hi3 = hij3[:, :h].reshape(rt, a, h).astype(cdt)
    hj3 = hij3[:, h:].reshape(rt, a, h).astype(cdt)
    x3 = edge_mlp(hi3, hj3, vec[_VWD3], vec[_VB31], w2p[2 * h:], vec[_VB32])
    c_scale = x3[..., 0]                                          # (Rt, A)
    sa_scale = x3[..., 1]

    # ---- SA term and scaled Born radii ----
    sasa = _sigmoid(sa_scale) * (radius_full + 0.14) ** 2
    sa_energies = 4.184 * SA_GAMMA * 100.0 * sasa
    born_scaled = born * (FRACTION + _sigmoid(c_scale) * (1.0 - FRACTION) * 2.0)

    # ---- GBNeck_energies: pairwise generalized-Born + self energies ----
    prefac = -0.5 * COULOMB * (1.0 - 1.0 / SOLVENT_DIELECTRIC)
    qq = q[None, :, None] * q[None, None, :]                      # (1, A, A)
    bij = born_scaled[:, :, None] * born_scaled[:, None, :]       # (Rt, A, A)
    expo = jnp.exp(-0.25 * d2 / bij)
    inv_fgb = jax.lax.rsqrt(d2 + bij * expo)
    e_pair = jnp.where(off[None], prefac * qq * inv_fgb, 0.0)
    e_cross = jnp.sum(e_pair, axis=2)                             # (Rt, A)
    e_self = prefac * (q * q)[None, :] / born_scaled
    energies = e_cross + e_self + sa_energies                     # (Rt, A)

    out_ref[...] = energies[None]                                 # (1, Rt, A)


def pack_params(params):
    """Pack the 12 weight/bias arrays: f32 vector table + bf16 matrix blocks."""
    (w11, b11, w12, b12, w21, b21, w22, b22, w31, b31, w32, b32) = params
    h = HIDDEN

    vecs = jnp.zeros((_VROWS, h), jnp.float32)
    vecs = vecs.at[_VW11:_VW11 + 7].set(w11.astype(jnp.float32))
    vecs = vecs.at[_VB11].set(b11[0])
    vecs = vecs.at[_VB12].set(b12[0])
    vecs = vecs.at[_VWD2].set(w21[2 * h])
    vecs = vecs.at[_VB21].set(b21[0])
    vecs = vecs.at[_VB22].set(b22[0])
    vecs = vecs.at[_VWD3].set(w31[2 * h])
    vecs = vecs.at[_VB31].set(b31[0])
    vecs = vecs.at[_VB32, :2].set(b32[0])

    # Layer-2/3 lin1 node projections packed side by side -> one matmul each.
    w1pack = jnp.concatenate([
        jnp.concatenate([w21[:h], w21[h:2 * h]], axis=1),    # (64, 128)
        jnp.concatenate([w31[:h], w31[h:2 * h]], axis=1),    # (64, 128)
    ], axis=0).astype(jnp.bfloat16)                          # (128, 128)

    w32p = jnp.zeros((h, h), jnp.float32).at[:, :2].set(w32)
    w2pack = jnp.concatenate([w12, w22, w32p], axis=0).astype(jnp.bfloat16)  # (192, 64)
    return vecs, w1pack, w2pack


def make_params(key, hidden=HIDDEN):
    def linear(k, fan_in, fan_out):
        kw, kb = jax.random.split(k)
        bound = 1.0 / np.sqrt(fan_in)
        w = jax.random.uniform(kw, (fan_in, fan_out), jnp.float32, -bound, bound)
        b = jax.random.uniform(kb, (1, fan_out), jnp.float32, -bound, bound)
        return w, b
    ks = jax.random.split(key, 6)
    w11, b11 = linear(ks[0], 3 + 3 + 1, hidden)        # interaction1 lin1
    w12, b12 = linear(ks[1], hidden, hidden)           # interaction1 lin2
    w21, b21 = linear(ks[2], 2 * hidden + 1, hidden)   # interaction2 lin1
    w22, b22 = linear(ks[3], hidden, hidden)           # interaction2 lin2
    w31, b31 = linear(ks[4], 2 * hidden + 1, hidden)   # interaction3 lin1
    w32, b32 = linear(ks[5], hidden, 2)                # interaction3 lin2
    return (w11, b11, w12, b12, w21, b21, w22, b22, w31, b31, w32, b32)


def _choose_reps_per_step(r):
    # Cap Rt at 16 (fits v7x's 64 MiB VMEM and v5e's default scoped limit with
    # headroom) and prefer an EVEN number of grid steps (>= 2) so the two v7x
    # TensorCores split the 'parallel' axis evenly.
    for cand in (16, 8, 4, 2, 1):
        if r % cand == 0 and (r // cand) >= 2 and (r // cand) % 2 == 0:
            return cand
    for cand in (16, 8, 4, 2, 1):
        if r % cand == 0 and (r // cand) >= 2:
            return cand
    return r


def gnn3_scale_64_beta_flex(positions, atom_features, params, beta=1.0,
                            reps_per_step=None, edge_dtype=jnp.bfloat16):
    """positions: (R, A, 3); atom_features: (A, 3) = [charge, radius-offset, scale].

    edge_dtype: compute dtype of the per-edge hot path (bf16 for v6e/v7x;
    pass jnp.float32 on v5e which has no bf16 VPU/EUP).
    """
    r, a, _ = positions.shape
    if reps_per_step is None:
        reps_per_step = _choose_reps_per_step(r)
    assert r % reps_per_step == 0
    nblk = r // reps_per_step

    pos_t = jnp.transpose(positions, (0, 2, 1)).astype(jnp.float32)    # (R, 3, A)
    feat_t = jnp.transpose(atom_features, (1, 0)).astype(jnp.float32)  # (3, A)
    vecs, w1pack, w2pack = pack_params(params)

    kernel = functools.partial(gnn3_kernel, cdt=edge_dtype)
    energies = pl.pallas_call(
        kernel,
        out_shape=jax.ShapeDtypeStruct((nblk, reps_per_step, a), jnp.float32),
        grid=(nblk,),
        in_specs=[
            pl.BlockSpec((reps_per_step, 3, a), lambda b: (b, 0, 0)),
            pl.BlockSpec((3, a), lambda b: (0, 0)),
            pl.BlockSpec((_VROWS, HIDDEN), lambda b: (0, 0)),
            pl.BlockSpec((2 * HIDDEN, 2 * HIDDEN), lambda b: (0, 0)),
            pl.BlockSpec((3 * HIDDEN, HIDDEN), lambda b: (0, 0)),
        ],
        out_specs=pl.BlockSpec((1, reps_per_step, a), lambda b: (b, 0, 0)),
        compiler_params=pltpu.CompilerParams(
            dimension_semantics=("parallel",),
            vmem_limit_bytes=48 * 1024 * 1024),
    )(pos_t, feat_t, vecs, w1pack, w2pack)

    # matches `self._beta * energies.sum()` -> shape (1, 1)
    return jnp.reshape(beta * jnp.sum(energies), (1, 1))


def build_inputs(key, num_reps=2, n_waters=8):
    a = 3 * n_waters
    # tip3p-like per-atom GB parameters: [charge, radius - offset, scale]
    oxy = [-0.834, 0.152 - OFFSET, 0.85]
    hyd = [0.417, 0.115 - OFFSET, 0.85]
    feat = np.array([oxy, hyd, hyd] * n_waters, dtype=np.float32)
    centers = [(ix, iy, iz) for ix in range(2) for iy in range(2) for iz in range(2)]
    base = []
    for (ix, iy, iz) in centers[:n_waters]:
        o_pos = np.array([ix, iy, iz], np.float32) * 0.35
        base.append(o_pos)
        base.append(o_pos + np.array([0.09572, 0.0, 0.0], np.float32))
        base.append(o_pos + np.array([-0.0240, 0.0927, 0.0], np.float32))
    base = np.stack(base).astype(np.float32)                 # (A, 3)
    noise = jax.random.uniform(key, (num_reps, a, 3), jnp.float32, -0.02, 0.02)
    positions = (jnp.asarray(base)[None, :, :] + noise).astype(jnp.float32)
    return positions, jnp.asarray(feat)


if __name__ == "__main__":
    key = jax.random.PRNGKey(0)
    k_param, k_pos = jax.random.split(key)
    positions, atom_features = build_inputs(k_pos, num_reps=2, n_waters=8)
    params = make_params(k_param)
    energy = gnn3_scale_64_beta_flex(positions, atom_features, params, beta=1.0)
    jax.block_until_ready(energy)
    print("KERNEL_OK")
</pallas_src>

<mosaic_0001>
module attributes {stable_mosaic.version = 11 : i64} {
  func.func @gnn3_kernel(%arg0: i32, %arg1: memref<1x3x24xf32, #tpu.memory_space<vmem>>, %arg2: memref<3x24xf32, #tpu.memory_space<vmem>>, %arg3: memref<16x64xf32, #tpu.memory_space<vmem>>, %arg4: memref<128x128xbf16, #tpu.memory_space<vmem>>, %arg5: memref<192x64xbf16, #tpu.memory_space<vmem>>, %arg6: memref<1x1x24xf32, #tpu.memory_space<vmem>>) attributes {dimension_semantics = [#tpu.dimension_semantics<parallel>], iteration_bounds = array<i64: 2>, scalar_prefetch = 0 : i64, scratch_operands = 0 : i64, tpu.core_type = #tpu.core_type<tc>, window_params = [{transform_indices = @transform_0, window_bounds = array<i64: 1, 3, 24>}, {pipeline_mode = #tpu.pipeline_mode<synchronous>, transform_indices = @transform_1, window_bounds = array<i64: 3, 24>}, {pipeline_mode = #tpu.pipeline_mode<synchronous>, transform_indices = @transform_2, window_bounds = array<i64: 16, 64>}, {pipeline_mode = #tpu.pipeline_mode<synchronous>, transform_indices = @transform_3, window_bounds = array<i64: 128, 128>}, {pipeline_mode = #tpu.pipeline_mode<synchronous>, transform_indices = @transform_4, window_bounds = array<i64: 192, 64>}, {transform_indices = @transform_5, window_bounds = array<i64: 1, 1, 24>}]} {
    %c0 = arith.constant 0 : index
    %c0_0 = arith.constant 0 : index
    %c0_1 = arith.constant 0 : index
    %0 = vector.load %arg1[%c0, %c0_0, %c0_1] : memref<1x3x24xf32, #tpu.memory_space<vmem>>, vector<1x3x24xf32>
    %c0_2 = arith.constant 0 : index
    %c0_3 = arith.constant 0 : index
    %1 = vector.load %arg2[%c0_2, %c0_3] : memref<3x24xf32, #tpu.memory_space<vmem>>, vector<3x24xf32>
    %c0_4 = arith.constant 0 : index
    %c0_5 = arith.constant 0 : index
    %2 = vector.load %arg3[%c0_4, %c0_5] : memref<16x64xf32, #tpu.memory_space<vmem>>, vector<16x64xf32>
    %c0_6 = arith.constant 0 : index
    %c0_7 = arith.constant 0 : index
    %3 = vector.load %arg4[%c0_6, %c0_7] : memref<128x128xbf16, #tpu.memory_space<vmem>>, vector<128x128xbf16>
    %c0_8 = arith.constant 0 : index
    %c0_9 = arith.constant 0 : index
    %4 = vector.load %arg5[%c0_8, %c0_9] : memref<192x64xbf16, #tpu.memory_space<vmem>>, vector<192x64xbf16>
    %5 = vector.extract_strided_slice %1 {offsets = [0, 0], sizes = [1, 24], strides = [1, 1]} : vector<3x24xf32> to vector<1x24xf32>
    %6 = vector.shape_cast %5 : vector<1x24xf32> to vector<24xf32>
    %7 = vector.extract_strided_slice %1 {offsets = [1, 0], sizes = [1, 24], strides = [1, 1]} : vector<3x24xf32> to vector<1x24xf32>
    %8 = vector.shape_cast %7 : vector<1x24xf32> to vector<24xf32>
    %9 = vector.extract_strided_slice %1 {offsets = [2, 0], sizes = [1, 24], strides = [1, 1]} : vector<3x24xf32> to vector<1x24xf32>
    %10 = vector.shape_cast %9 : vector<1x24xf32> to vector<24xf32>
    %11 = tpu.iota {dimensions = array<i32: 0>} : vector<24x24xi32>
    %12 = tpu.iota {dimensions = array<i32: 1>} : vector<24x24xi32>
    %13 = arith.cmpi ne, %11, %12 : vector<24x24xi32>
    %14 = vector.extract_strided_slice %0 {offsets = [0, 0, 0], sizes = [1, 1, 24], strides = [1, 1, 1]} : vector<1x3x24xf32> to vector<1x1x24xf32>
    %15 = vector.shape_cast %14 : vector<1x1x24xf32> to vector<1x24xf32>
    %16 = vector.extract_strided_slice %0 {offsets = [0, 1, 0], sizes = [1, 1, 24], strides = [1, 1, 1]} : vector<1x3x24xf32> to vector<1x1x24xf32>
    %17 = vector.shape_cast %16 : vector<1x1x24xf32> to vector<1x24xf32>
    %18 = vector.extract_strided_slice %0 {offsets = [0, 2, 0], sizes = [1, 1, 24], strides = [1, 1, 1]} : vector<1x3x24xf32> to vector<1x1x24xf32>
    %19 = vector.shape_cast %18 : vector<1x1x24xf32> to vector<1x24xf32>
    %20 = vector.shape_cast %15 : vector<1x24xf32> to vector<1x24x1xf32>
    %21 = vector.shape_cast %15 : vector<1x24xf32> to vector<1x1x24xf32>
    %22 = vector.broadcast %20 : vector<1x24x1xf32> to vector<1x24x24xf32>
    %23 = vector.broadcast %21 : vector<1x1x24xf32> to vector<1x24x24xf32>
    %24 = arith.subf %22, %23 : vector<1x24x24xf32>
    %25 = vector.shape_cast %17 : vector<1x24xf32> to vector<1x24x1xf32>
    %26 = vector.shape_cast %17 : vector<1x24xf32> to vector<1x1x24xf32>
    %27 = vector.broadcast %25 : vector<1x24x1xf32> to vector<1x24x24xf32>
    %28 = vector.broadcast %26 : vector<1x1x24xf32> to vector<1x24x24xf32>
    %29 = arith.subf %27, %28 : vector<1x24x24xf32>
    %30 = vector.shape_cast %19 : vector<1x24xf32> to vector<1x24x1xf32>
    %31 = vector.shape_cast %19 : vector<1x24xf32> to vector<1x1x24xf32>
    %32 = vector.broadcast %30 : vector<1x24x1xf32> to vector<1x24x24xf32>
    %33 = vector.broadcast %31 : vector<1x1x24xf32> to vector<1x24x24xf32>
    %34 = arith.subf %32, %33 : vector<1x24x24xf32>
    %35 = arith.mulf %24, %24 : vector<1x24x24xf32>
    %36 = arith.mulf %29, %29 : vector<1x24x24xf32>
    %37 = arith.addf %35, %36 : vector<1x24x24xf32>
    %38 = arith.mulf %34, %34 : vector<1x24x24xf32>
    %39 = arith.addf %37, %38 : vector<1x24x24xf32>
    %cst = arith.constant 1.000000e+00 : f32
    %40 = vector.shape_cast %13 : vector<24x24xi1> to vector<1x24x24xi1>
    %41 = vector.broadcast %cst : f32 to vector<1x24x24xf32>
    %42 = arith.select %40, %39, %41 : vector<1x24x24xi1>, vector<1x24x24xf32>
    %43 = math.rsqrt %42 : vector<1x24x24xf32>
    %44 = arith.mulf %42, %43 : vector<1x24x24xf32>
    %45 = vector.shape_cast %8 : vector<24xf32> to vector<1x24x1xf32>
    %46 = arith.mulf %10, %8 : vector<24xf32>
    %47 = vector.shape_cast %46 : vector<24xf32> to vector<1x1x24xf32>
    %48 = vector.broadcast %47 : vector<1x1x24xf32> to vector<1x24x24xf32>
    %49 = arith.addf %44, %48 : vector<1x24x24xf32>
    %50 = vector.broadcast %47 : vector<1x1x24xf32> to vector<1x24x24xf32>
    %51 = arith.subf %44, %50 : vector<1x24x24xf32>
    %52 = math.absf %51 : vector<1x24x24xf32>
    %53 = vector.broadcast %45 : vector<1x24x1xf32> to vector<1x24x24xf32>
    %54 = arith.maximumf %53, %52 : vector<1x24x24xf32>
    %cst_10 = arith.constant 1.000000e+00 : f32
    %55 = vector.broadcast %cst_10 : f32 to vector<1x24x24xf32>
    %56 = arith.divf %55, %54 : vector<1x24x24xf32>
    %cst_11 = arith.constant 1.000000e+00 : f32
    %57 = vector.broadcast %cst_11 : f32 to vector<1x24x24xf32>
    %58 = arith.divf %57, %49 : vector<1x24x24xf32>
    %59 = arith.subf %56, %58 : vector<1x24x24xf32>
    %60 = arith.mulf %47, %47 : vector<1x1x24xf32>
    %61 = vector.broadcast %60 : vector<1x1x24xf32> to vector<1x24x24xf32>
    %62 = arith.mulf %61, %43 : vector<1x24x24xf32>
    %63 = arith.subf %44, %62 : vector<1x24x24xf32>
    %cst_12 = arith.constant 2.500000e-01 : f32
    %64 = vector.broadcast %cst_12 : f32 to vector<1x24x24xf32>
    %65 = arith.mulf %64, %63 : vector<1x24x24xf32>
    %66 = arith.mulf %58, %58 : vector<1x24x24xf32>
    %67 = arith.mulf %56, %56 : vector<1x24x24xf32>
    %68 = arith.subf %66, %67 : vector<1x24x24xf32>
    %69 = arith.mulf %65, %68 : vector<1x24x24xf32>
    %70 = arith.addf %59, %69 : vector<1x24x24xf32>
    %71 = arith.mulf %54, %58 : vector<1x24x24xf32>
    %72 = math.log %71 : vector<1x24x24xf32>
    %cst_13 = arith.constant 5.000000e-01 : f32
    %73 = vector.broadcast %cst_13 : f32 to vector<1x24x24xf32>
    %74 = arith.mulf %73, %72 : vector<1x24x24xf32>
    %75 = arith.mulf %74, %43 : vector<1x24x24xf32>
    %76 = arith.addf %70, %75 : vector<1x24x24xf32>
    %cst_14 = arith.constant 5.000000e-01 : f32
    %77 = vector.broadcast %cst_14 : f32 to vector<1x24x24xf32>
    %78 = arith.mulf %77, %76 : vector<1x24x24xf32>
    %79 = vector.broadcast %47 : vector<1x1x24xf32> to vector<1x24x24xf32>
    %80 = arith.subf %79, %44 : vector<1x24x24xf32>
    %81 = vector.broadcast %45 : vector<1x24x1xf32> to vector<1x24x24xf32>
    %82 = arith.cmpf ogt, %80, %81 : vector<1x24x24xf32>
    %cst_15 = arith.constant 1.000000e+00 : f32
    %83 = vector.broadcast %cst_15 : f32 to vector<1x24x1xf32>
    %84 = arith.divf %83, %45 : vector<1x24x1xf32>
    %85 = vector.broadcast %84 : vector<1x24x1xf32> to vector<1x24x24xf32>
    %86 = arith.subf %85, %56 : vector<1x24x24xf32>
    %cst_16 = arith.constant 0.000000e+00 : f32
    %87 = vector.broadcast %cst_16 : f32 to vector<1x24x24xf32>
    %88 = arith.select %82, %86, %87 : vector<1x24x24xi1>, vector<1x24x24xf32>
    %89 = vector.shape_cast %13 : vector<24x24xi1> to vector<1x24x24xi1>
    %90 = vector.broadcast %45 : vector<1x24x1xf32> to vector<1x24x24xf32>
    %91 = arith.cmpf ogt, %49, %90 : vector<1x24x24xf32>
    %92 = arith.andi %89, %91 : vector<1x24x24xi1>
    %93 = arith.addf %78, %88 : vector<1x24x24xf32>
    %cst_17 = arith.constant 0.000000e+00 : f32
    %94 = vector.broadcast %cst_17 : f32 to vector<1x24x24xf32>
    %95 = arith.select %92, %93, %94 : vector<1x24x24xi1>, vector<1x24x24xf32>
    %cst_18 = arith.constant dense<0.000000e+00> : vector<1x24xf32>
    %96 = vector.multi_reduction <add>, %95, %cst_18 [2] : vector<1x24x24xf32> to vector<1x24xf32>
    %97 = vector.shape_cast %8 : vector<24xf32> to vector<1x24xf32>
    %98 = arith.mulf %96, %97 : vector<1x24xf32>
    %99 = vector.shape_cast %8 : vector<24xf32> to vector<1x24xf32>
    %cst_19 = arith.constant 1.951410e-02 : f32
    %100 = vector.broadcast %cst_19 : f32 to vector<1x24xf32>
    %101 = arith.addf %99, %100 : vector<1x24xf32>
    %102 = vector.shape_cast %8 : vector<24xf32> to vector<1x24xf32>
    %cst_20 = arith.constant 1.000000e+00 : f32
    %103 = vector.broadcast %cst_20 : f32 to vector<1x24xf32>
    %104 = arith.divf %103, %102 : vector<1x24xf32>
    %cst_21 = arith.constant 8.000000e-01 : f32
    %105 = vector.broadcast %cst_21 : f32 to vector<1x24xf32>
    %106 = arith.mulf %105, %98 : vector<1x24xf32>
    %107 = arith.mulf %106, %98 : vector<1x24xf32>
    %108 = arith.subf %98, %107 : vector<1x24xf32>
    %cst_22 = arith.constant 4.850000e+00 : f32
    %109 = vector.broadcast %cst_22 : f32 to vector<1x24xf32>
    %110 = arith.mulf %109, %98 : vector<1x24xf32>
    %111 = arith.mulf %110, %98 : vector<1x24xf32>
    %112 = arith.mulf %111, %98 : vector<1x24xf32>
    %113 = arith.addf %108, %112 : vector<1x24xf32>
    %114 = math.tanh %113 : vector<1x24xf32>
    %115 = arith.divf %114, %101 : vector<1x24xf32>
    %116 = arith.subf %104, %115 : vector<1x24xf32>
    %cst_23 = arith.constant 1.000000e+00 : f32
    %117 = vector.broadcast %cst_23 : f32 to vector<1x24xf32>
    %118 = arith.divf %117, %116 : vector<1x24xf32>
    %119 = vector.shape_cast %13 : vector<24x24xi1> to vector<1x24x24xi1>
    %cst_24 = arith.constant 4.000000e-01 : f32
    %120 = vector.broadcast %cst_24 : f32 to vector<1x24x24xf32>
    %121 = arith.cmpf olt, %44, %120 : vector<1x24x24xf32>
    %122 = arith.andi %119, %121 : vector<1x24x24xi1>
    %cst_25 = arith.constant 1.000000e+00 : f32
    %cst_26 = arith.constant 0.000000e+00 : f32
    %123 = vector.broadcast %cst_25 : f32 to vector<1x24x24xf32>
    %124 = vector.broadcast %cst_26 : f32 to vector<1x24x24xf32>
    %125 = arith.select %122, %123, %124 : vector<1x24x24xi1>, vector<1x24x24xf32>
    %cst_27 = arith.constant dense<0.000000e+00> : vector<1x24xf32>
    %126 = vector.multi_reduction <add>, %125, %cst_27 [2] : vector<1x24x24xf32> to vector<1x24xf32>
    %127 = arith.truncf %44 : vector<1x24x24xf32> to vector<1x24x24xbf16>
    %128 = vector.shape_cast %127 : vector<1x24x24xbf16> to vector<1x24x24x1xbf16>
    %129 = vector.shape_cast %128 : vector<1x24x24x1xbf16> to vector<1x24x24x1xbf16>
    %130 = vector.broadcast %129 : vector<1x24x24x1xbf16> to vector<1x24x24x64xbf16>
    %cst_28 = arith.constant 0.000000e+00 : f32
    %cst_29 = arith.constant -1.000000e+04 : f32
    %131 = vector.broadcast %cst_28 : f32 to vector<1x24x24xf32>
    %132 = vector.broadcast %cst_29 : f32 to vector<1x24x24xf32>
    %133 = arith.select %122, %131, %132 : vector<1x24x24xi1>, vector<1x24x24xf32>
    %134 = arith.truncf %133 : vector<1x24x24xf32> to vector<1x24x24xbf16>
    %135 = vector.shape_cast %134 : vector<1x24x24xbf16> to vector<1x24x24x1xbf16>
    %136 = vector.shape_cast %135 : vector<1x24x24x1xbf16> to vector<1x24x24x1xbf16>
    %137 = vector.broadcast %136 : vector<1x24x24x1xbf16> to vector<1x24x24x64xbf16>
    %138 = vector.extract_strided_slice %2 {offsets = [0, 0], sizes = [7, 64], strides = [1, 1]} : vector<16x64xf32> to vector<7x64xf32>
    %139 = vector.shape_cast %118 : vector<1x24xf32> to vector<1x24x1xf32>
    %140 = vector.shape_cast %6 : vector<24xf32> to vector<1x24x1xf32>
    %141 = vector.shape_cast %8 : vector<24xf32> to vector<1x24x1xf32>
    %142 = vector.extract_strided_slice %138 {offsets = [0, 0], sizes = [1, 64], strides = [1, 1]} : vector<7x64xf32> to vector<1x64xf32>
    %143 = vector.shape_cast %142 : vector<1x64xf32> to vector<64xf32>
    %144 = vector.shape_cast %143 : vector<64xf32> to vector<1x1x64xf32>
    %145 = vector.broadcast %139 : vector<1x24x1xf32> to vector<1x24x64xf32>
    %146 = vector.broadcast %144 : vector<1x1x64xf32> to vector<1x24x64xf32>
    %147 = arith.mulf %145, %146 : vector<1x24x64xf32>
    %148 = vector.extract_strided_slice %138 {offsets = [1, 0], sizes = [1, 64], strides = [1, 1]} : vector<7x64xf32> to vector<1x64xf32>
    %149 = vector.shape_cast %148 : vector<1x64xf32> to vector<64xf32>
    %150 = vector.shape_cast %149 : vector<64xf32> to vector<1x1x64xf32>
    %151 = vector.broadcast %140 : vector<1x24x1xf32> to vector<1x24x64xf32>
    %152 = vector.broadcast %150 : vector<1x1x64xf32> to vector<1x24x64xf32>
    %153 = arith.mulf %151, %152 : vector<1x24x64xf32>
    %154 = arith.addf %147, %153 : vector<1x24x64xf32>
    %155 = vector.extract_strided_slice %138 {offsets = [2, 0], sizes = [1, 64], strides = [1, 1]} : vector<7x64xf32> to vector<1x64xf32>
    %156 = vector.shape_cast %155 : vector<1x64xf32> to vector<64xf32>
    %157 = vector.shape_cast %156 : vector<64xf32> to vector<1x1x64xf32>
    %158 = vector.broadcast %141 : vector<1x24x1xf32> to vector<1x24x64xf32>
    %159 = vector.broadcast %157 : vector<1x1x64xf32> to vector<1x24x64xf32>
    %160 = arith.mulf %158, %159 : vector<1x24x64xf32>
    %161 = arith.addf %154, %160 : vector<1x24x64xf32>
    %162 = arith.truncf %161 : vector<1x24x64xf32> to vector<1x24x64xbf16>
    %163 = vector.extract_strided_slice %138 {offsets = [3, 0], sizes = [1, 64], strides = [1, 1]} : vector<7x64xf32> to vector<1x64xf32>
    %164 = vector.shape_cast %163 : vector<1x64xf32> to vector<64xf32>
    %165 = vector.shape_cast %164 : vector<64xf32> to vector<1x1x64xf32>
    %166 = vector.broadcast %139 : vector<1x24x1xf32> to vector<1x24x64xf32>
    %167 = vector.broadcast %165 : vector<1x1x64xf32> to vector<1x24x64xf32>
    %168 = arith.mulf %166, %167 : vector<1x24x64xf32>
    %169 = vector.extract_strided_slice %138 {offsets = [4, 0], sizes = [1, 64], strides = [1, 1]} : vector<7x64xf32> to vector<1x64xf32>
    %170 = vector.shape_cast %169 : vector<1x64xf32> to vector<64xf32>
    %171 = vector.shape_cast %170 : vector<64xf32> to vector<1x1x64xf32>
    %172 = vector.broadcast %140 : vector<1x24x1xf32> to vector<1x24x64xf32>
    %173 = vector.broadcast %171 : vector<1x1x64xf32> to vector<1x24x64xf32>
    %174 = arith.mulf %172, %173 : vector<1x24x64xf32>
    %175 = arith.addf %168, %174 : vector<1x24x64xf32>
    %176 = vector.extract_strided_slice %138 {offsets = [5, 0], sizes = [1, 64], strides = [1, 1]} : vector<7x64xf32> to vector<1x64xf32>
    %177 = vector.shape_cast %176 : vector<1x64xf32> to vector<64xf32>
    %178 = vector.shape_cast %177 : vector<64xf32> to vector<1x1x64xf32>
    %179 = vector.broadcast %141 : vector<1x24x1xf32> to vector<1x24x64xf32>
    %180 = vector.broadcast %178 : vector<1x1x64xf32> to vector<1x24x64xf32>
    %181 = arith.mulf %179, %180 : vector<1x24x64xf32>
    %182 = arith.addf %175, %181 : vector<1x24x64xf32>
    %183 = arith.truncf %182 : vector<1x24x64xf32> to vector<1x24x64xbf16>
    %184 = vector.extract_strided_slice %138 {offsets = [6, 0], sizes = [1, 64], strides = [1, 1]} : vector<7x64xf32> to vector<1x64xf32>
    %185 = vector.shape_cast %184 : vector<1x64xf32> to vector<64xf32>
    %186 = vector.extract_strided_slice %2 {offsets = [7, 0], sizes = [1, 64], strides = [1, 1]} : vector<16x64xf32> to vector<1x64xf32>
    %187 = vector.shape_cast %186 : vector<1x64xf32> to vector<64xf32>
    %188 = vector.extract_strided_slice %4 {offsets = [0, 0], sizes = [64, 64], strides = [1, 1]} : vector<192x64xbf16> to vector<64x64xbf16>
    %189 = vector.extract_strided_slice %2 {offsets = [8, 0], sizes = [1, 64], strides = [1, 1]} : vector<16x64xf32> to vector<1x64xf32>
    %190 = vector.shape_cast %189 : vector<1x64xf32> to vector<64xf32>
    %191 = vector.shape_cast %162 : vector<1x24x64xbf16> to vector<1x24x1x64xbf16>
    %192 = vector.shape_cast %183 : vector<1x24x64xbf16> to vector<1x1x24x64xbf16>
    %193 = vector.broadcast %191 : vector<1x24x1x64xbf16> to vector<1x24x24x64xbf16>
    %194 = vector.broadcast %192 : vector<1x1x24x64xbf16> to vector<1x24x24x64xbf16>
    %195 = arith.addf %193, %194 : vector<1x24x24x64xbf16>
    %196 = arith.truncf %185 : vector<64xf32> to vector<64xbf16>
    %197 = vector.shape_cast %196 : vector<64xbf16> to vector<1x1x1x64xbf16>
    %198 = vector.broadcast %197 : vector<1x1x1x64xbf16> to vector<1x24x24x64xbf16>
    %199 = arith.mulf %130, %198 : vector<1x24x24x64xbf16>
    %200 = arith.addf %199, %137 : vector<1x24x24x64xbf16>
    %201 = arith.addf %195, %200 : vector<1x24x24x64xbf16>
    %202 = arith.truncf %187 : vector<64xf32> to vector<64xbf16>
    %203 = vector.shape_cast %202 : vector<64xbf16> to vector<1x1x1x64xbf16>
    %204 = vector.broadcast %203 : vector<1x1x1x64xbf16> to vector<1x24x24x64xbf16>
    %205 = arith.addf %201, %204 : vector<1x24x24x64xbf16>
    %cst_30 = arith.constant 5.000000e-01 : bf16
    %206 = vector.broadcast %cst_30 : bf16 to vector<1x24x24x64xbf16>
    %207 = arith.mulf %206, %205 : vector<1x24x24x64xbf16>
    %208 = math.tanh %207 : vector<1x24x24x64xbf16>
    %cst_31 = arith.constant 5.000000e-01 : bf16
    %209 = vector.broadcast %cst_31 : bf16 to vector<1x24x24x64xbf16>
    %210 = arith.mulf %209, %208 : vector<1x24x24x64xbf16>
    %cst_32 = arith.constant 5.000000e-01 : bf16
    %211 = vector.broadcast %cst_32 : bf16 to vector<1x24x24x64xbf16>
    %212 = arith.addf %210, %211 : vector<1x24x24x64xbf16>
    %213 = arith.mulf %205, %212 : vector<1x24x24x64xbf16>
    %214 = arith.extf %213 : vector<1x24x24x64xbf16> to vector<1x24x24x64xf32>
    %cst_33 = arith.constant dense<0.000000e+00> : vector<1x24x64xf32>
    %215 = vector.multi_reduction <add>, %214, %cst_33 [2] : vector<1x24x24x64xf32> to vector<1x24x64xf32>
    %216 = vector.shape_cast %215 : vector<1x24x64xf32> to vector<24x64xf32>
    %217 = arith.truncf %216 : vector<24x64xf32> to vector<24x64xbf16>
    %cst_34 = arith.constant dense<0.000000e+00> : vector<24x64xf32>
    %218 = tpu.matmul %217, %188, %cst_34 {dimension_numbers = #tpu.dot_dimension_numbers<[1], [0], [0], [1], [0, 0, 1, 1], [], []>} : vector<24x64xbf16>, vector<64x64xbf16>, vector<24x64xf32> -> vector<24x64xf32>
    %219 = vector.shape_cast %218 : vector<24x64xf32> to vector<1x24x64xf32>
    %220 = vector.shape_cast %126 : vector<1x24xf32> to vector<1x24x1xf32>
    %221 = vector.shape_cast %190 : vector<64xf32> to vector<1x1x64xf32>
    %222 = vector.broadcast %220 : vector<1x24x1xf32> to vector<1x24x64xf32>
    %223 = vector.broadcast %221 : vector<1x1x64xf32> to vector<1x24x64xf32>
    %224 = arith.mulf %222, %223 : vector<1x24x64xf32>
    %225 = arith.addf %219, %224 : vector<1x24x64xf32>
    %cst_35 = arith.constant 5.000000e-01 : f32
    %226 = vector.broadcast %cst_35 : f32 to vector<1x24x64xf32>
    %227 = arith.mulf %226, %225 : vector<1x24x64xf32>
    %228 = math.tanh %227 : vector<1x24x64xf32>
    %cst_36 = arith.constant 5.000000e-01 : f32
    %229 = vector.broadcast %cst_36 : f32 to vector<1x24x64xf32>
    %230 = arith.mulf %229, %228 : vector<1x24x64xf32>
    %cst_37 = arith.constant 5.000000e-01 : f32
    %231 = vector.broadcast %cst_37 : f32 to vector<1x24x64xf32>
    %232 = arith.addf %230, %231 : vector<1x24x64xf32>
    %233 = arith.mulf %225, %232 : vector<1x24x64xf32>
    %234 = vector.shape_cast %233 : vector<1x24x64xf32> to vector<24x64xf32>
    %235 = arith.truncf %234 : vector<24x64xf32> to vector<24x64xbf16>
    %236 = vector.extract_strided_slice %3 {offsets = [0, 0], sizes = [64, 128], strides = [1, 1]} : vector<128x128xbf16> to vector<64x128xbf16>
    %cst_38 = arith.constant dense<0.000000e+00> : vector<24x128xf32>
    %237 = tpu.matmul %235, %236, %cst_38 {dimension_numbers = #tpu.dot_dimension_numbers<[1], [0], [0], [1], [0, 0, 1, 1], [], []>} : vector<24x64xbf16>, vector<64x128xbf16>, vector<24x128xf32> -> vector<24x128xf32>
    %238 = vector.extract_strided_slice %237 {offsets = [0, 0], sizes = [24, 64], strides = [1, 1]} : vector<24x128xf32> to vector<24x64xf32>
    %239 = vector.shape_cast %238 : vector<24x64xf32> to vector<1x24x64xf32>
    %240 = arith.truncf %239 : vector<1x24x64xf32> to vector<1x24x64xbf16>
    %241 = vector.extract_strided_slice %237 {offsets = [0, 64], sizes = [24, 64], strides = [1, 1]} : vector<24x128xf32> to vector<24x64xf32>
    %242 = vector.shape_cast %241 : vector<24x64xf32> to vector<1x24x64xf32>
    %243 = arith.truncf %242 : vector<1x24x64xf32> to vector<1x24x64xbf16>
    %244 = vector.extract_strided_slice %2 {offsets = [9, 0], sizes = [1, 64], strides = [1, 1]} : vector<16x64xf32> to vector<1x64xf32>
    %245 = vector.shape_cast %244 : vector<1x64xf32> to vector<64xf32>
    %246 = vector.extract_strided_slice %2 {offsets = [10, 0], sizes = [1, 64], strides = [1, 1]} : vector<16x64xf32> to vector<1x64xf32>
    %247 = vector.shape_cast %246 : vector<1x64xf32> to vector<64xf32>
    %248 = vector.extract_strided_slice %4 {offsets = [64, 0], sizes = [64, 64], strides = [1, 1]} : vector<192x64xbf16> to vector<64x64xbf16>
    %249 = vector.extract_strided_slice %2 {offsets = [11, 0], sizes = [1, 64], strides = [1, 1]} : vector<16x64xf32> to vector<1x64xf32>
    %250 = vector.shape_cast %249 : vector<1x64xf32> to vector<64xf32>
    %251 = vector.shape_cast %240 : vector<1x24x64xbf16> to vector<1x24x1x64xbf16>
    %252 = vector.shape_cast %243 : vector<1x24x64xbf16> to vector<1x1x24x64xbf16>
    %253 = vector.broadcast %251 : vector<1x24x1x64xbf16> to vector<1x24x24x64xbf16>
    %254 = vector.broadcast %252 : vector<1x1x24x64xbf16> to vector<1x24x24x64xbf16>
    %255 = arith.addf %253, %254 : vector<1x24x24x64xbf16>
    %256 = arith.truncf %245 : vector<64xf32> to vector<64xbf16>
    %257 = vector.shape_cast %256 : vector<64xbf16> to vector<1x1x1x64xbf16>
    %258 = vector.broadcast %257 : vector<1x1x1x64xbf16> to vector<1x24x24x64xbf16>
    %259 = arith.mulf %130, %258 : vector<1x24x24x64xbf16>
    %260 = arith.addf %259, %137 : vector<1x24x24x64xbf16>
    %261 = arith.addf %255, %260 : vector<1x24x24x64xbf16>
    %262 = arith.truncf %247 : vector<64xf32> to vector<64xbf16>
    %263 = vector.shape_cast %262 : vector<64xbf16> to vector<1x1x1x64xbf16>
    %264 = vector.broadcast %263 : vector<1x1x1x64xbf16> to vector<1x24x24x64xbf16>
    %265 = arith.addf %261, %264 : vector<1x24x24x64xbf16>
    %cst_39 = arith.constant 5.000000e-01 : bf16
    %266 = vector.broadcast %cst_39 : bf16 to vector<1x24x24x64xbf16>
    %267 = arith.mulf %266, %265 : vector<1x24x24x64xbf16>
    %268 = math.tanh %267 : vector<1x24x24x64xbf16>
    %cst_40 = arith.constant 5.000000e-01 : bf16
    %269 = vector.broadcast %cst_40 : bf16 to vector<1x24x24x64xbf16>
    %270 = arith.mulf %269, %268 : vector<1x24x24x64xbf16>
    %cst_41 = arith.constant 5.000000e-01 : bf16
    %271 = vector.broadcast %cst_41 : bf16 to vector<1x24x24x64xbf16>
    %272 = arith.addf %270, %271 : vector<1x24x24x64xbf16>
    %273 = arith.mulf %265, %272 : vector<1x24x24x64xbf16>
    %274 = arith.extf %273 : vector<1x24x24x64xbf16> to vector<1x24x24x64xf32>
    %cst_42 = arith.constant dense<0.000000e+00> : vector<1x24x64xf32>
    %275 = vector.multi_reduction <add>, %274, %cst_42 [2] : vector<1x24x24x64xf32> to vector<1x24x64xf32>
    %276 = vector.shape_cast %275 : vector<1x24x64xf32> to vector<24x64xf32>
    %277 = arith.truncf %276 : vector<24x64xf32> to vector<24x64xbf16>
    %cst_43 = arith.constant dense<0.000000e+00> : vector<24x64xf32>
    %278 = tpu.matmul %277, %248, %cst_43 {dimension_numbers = #tpu.dot_dimension_numbers<[1], [0], [0], [1], [0, 0, 1, 1], [], []>} : vector<24x64xbf16>, vector<64x64xbf16>, vector<24x64xf32> -> vector<24x64xf32>
    %279 = vector.shape_cast %278 : vector<24x64xf32> to vector<1x24x64xf32>
    %280 = vector.shape_cast %126 : vector<1x24xf32> to vector<1x24x1xf32>
    %281 = vector.shape_cast %250 : vector<64xf32> to vector<1x1x64xf32>
    %282 = vector.broadcast %280 : vector<1x24x1xf32> to vector<1x24x64xf32>
    %283 = vector.broadcast %281 : vector<1x1x64xf32> to vector<1x24x64xf32>
    %284 = arith.mulf %282, %283 : vector<1x24x64xf32>
    %285 = arith.addf %279, %284 : vector<1x24x64xf32>
    %cst_44 = arith.constant 5.000000e-01 : f32
    %286 = vector.broadcast %cst_44 : f32 to vector<1x24x64xf32>
    %287 = arith.mulf %286, %285 : vector<1x24x64xf32>
    %288 = math.tanh %287 : vector<1x24x64xf32>
    %cst_45 = arith.constant 5.000000e-01 : f32
    %289 = vector.broadcast %cst_45 : f32 to vector<1x24x64xf32>
    %290 = arith.mulf %289, %288 : vector<1x24x64xf32>
    %cst_46 = arith.constant 5.000000e-01 : f32
    %291 = vector.broadcast %cst_46 : f32 to vector<1x24x64xf32>
    %292 = arith.addf %290, %291 : vector<1x24x64xf32>
    %293 = arith.mulf %285, %292 : vector<1x24x64xf32>
    %294 = vector.shape_cast %293 : vector<1x24x64xf32> to vector<24x64xf32>
    %295 = arith.truncf %294 : vector<24x64xf32> to vector<24x64xbf16>
    %296 = vector.extract_strided_slice %3 {offsets = [64, 0], sizes = [64, 128], strides = [1, 1]} : vector<128x128xbf16> to vector<64x128xbf16>
    %cst_47 = arith.constant dense<0.000000e+00> : vector<24x128xf32>
    %297 = tpu.matmul %295, %296, %cst_47 {dimension_numbers = #tpu.dot_dimension_numbers<[1], [0], [0], [1], [0, 0, 1, 1], [], []>} : vector<24x64xbf16>, vector<64x128xbf16>, vector<24x128xf32> -> vector<24x128xf32>
    %298 = vector.extract_strided_slice %297 {offsets = [0, 0], sizes = [24, 64], strides = [1, 1]} : vector<24x128xf32> to vector<24x64xf32>
    %299 = vector.shape_cast %298 : vector<24x64xf32> to vector<1x24x64xf32>
    %300 = arith.truncf %299 : vector<1x24x64xf32> to vector<1x24x64xbf16>
    %301 = vector.extract_strided_slice %297 {offsets = [0, 64], sizes = [24, 64], strides = [1, 1]} : vector<24x128xf32> to vector<24x64xf32>
    %302 = vector.shape_cast %301 : vector<24x64xf32> to vector<1x24x64xf32>
    %303 = arith.truncf %302 : vector<1x24x64xf32> to vector<1x24x64xbf16>
    %304 = vector.extract_strided_slice %2 {offsets = [12, 0], sizes = [1, 64], strides = [1, 1]} : vector<16x64xf32> to vector<1x64xf32>
    %305 = vector.shape_cast %304 : vector<1x64xf32> to vector<64xf32>
    %306 = vector.extract_strided_slice %2 {offsets = [13, 0], sizes = [1, 64], strides = [1, 1]} : vector<16x64xf32> to vector<1x64xf32>
    %307 = vector.shape_cast %306 : vector<1x64xf32> to vector<64xf32>
    %308 = vector.extract_strided_slice %4 {offsets = [128, 0], sizes = [64, 64], strides = [1, 1]} : vector<192x64xbf16> to vector<64x64xbf16>
    %309 = vector.extract_strided_slice %2 {offsets = [14, 0], sizes = [1, 64], strides = [1, 1]} : vector<16x64xf32> to vector<1x64xf32>
    %310 = vector.shape_cast %309 : vector<1x64xf32> to vector<64xf32>
    %311 = vector.shape_cast %300 : vector<1x24x64xbf16> to vector<1x24x1x64xbf16>
    %312 = vector.shape_cast %303 : vector<1x24x64xbf16> to vector<1x1x24x64xbf16>
    %313 = vector.broadcast %311 : vector<1x24x1x64xbf16> to vector<1x24x24x64xbf16>
    %314 = vector.broadcast %312 : vector<1x1x24x64xbf16> to vector<1x24x24x64xbf16>
    %315 = arith.addf %313, %314 : vector<1x24x24x64xbf16>
    %316 = arith.truncf %305 : vector<64xf32> to vector<64xbf16>
    %317 = vector.shape_cast %316 : vector<64xbf16> to vector<1x1x1x64xbf16>
    %318 = vector.broadcast %317 : vector<1x1x1x64xbf16> to vector<1x24x24x64xbf16>
    %319 = arith.mulf %130, %318 : vector<1x24x24x64xbf16>
    %320 = arith.addf %319, %137 : vector<1x24x24x64xbf16>
    %321 = arith.addf %315, %320 : vector<1x24x24x64xbf16>
    %322 = arith.truncf %307 : vector<64xf32> to vector<64xbf16>
    %323 = vector.shape_cast %322 : vector<64xbf16> to vector<1x1x1x64xbf16>
    %324 = vector.broadcast %323 : vector<1x1x1x64xbf16> to vector<1x24x24x64xbf16>
    %325 = arith.addf %321, %324 : vector<1x24x24x64xbf16>
    %cst_48 = arith.constant 5.000000e-01 : bf16
    %326 = vector.broadcast %cst_48 : bf16 to vector<1x24x24x64xbf16>
    %327 = arith.mulf %326, %325 : vector<1x24x24x64xbf16>
    %328 = math.tanh %327 : vector<1x24x24x64xbf16>
    %cst_49 = arith.constant 5.000000e-01 : bf16
    %329 = vector.broadcast %cst_49 : bf16 to vector<1x24x24x64xbf16>
    %330 = arith.mulf %329, %328 : vector<1x24x24x64xbf16>
    %cst_50 = arith.constant 5.000000e-01 : bf16
    %331 = vector.broadcast %cst_50 : bf16 to vector<1x24x24x64xbf16>
    %332 = arith.addf %330, %331 : vector<1x24x24x64xbf16>
    %333 = arith.mulf %325, %332 : vector<1x24x24x64xbf16>
    %334 = arith.extf %333 : vector<1x24x24x64xbf16> to vector<1x24x24x64xf32>
    %cst_51 = arith.constant dense<0.000000e+00> : vector<1x24x64xf32>
    %335 = vector.multi_reduction <add>, %334, %cst_51 [2] : vector<1x24x24x64xf32> to vector<1x24x64xf32>
    %336 = vector.shape_cast %335 : vector<1x24x64xf32> to vector<24x64xf32>
    %337 = arith.truncf %336 : vector<24x64xf32> to vector<24x64xbf16>
    %cst_52 = arith.constant dense<0.000000e+00> : vector<24x64xf32>
    %338 = tpu.matmul %337, %308, %cst_52 {dimension_numbers = #tpu.dot_dimension_numbers<[1], [0], [0], [1], [0, 0, 1, 1], [], []>} : vector<24x64xbf16>, vector<64x64xbf16>, vector<24x64xf32> -> vector<24x64xf32>
    %339 = vector.shape_cast %338 : vector<24x64xf32> to vector<1x24x64xf32>
    %340 = vector.shape_cast %126 : vector<1x24xf32> to vector<1x24x1xf32>
    %341 = vector.shape_cast %310 : vector<64xf32> to vector<1x1x64xf32>
    %342 = vector.broadcast %340 : vector<1x24x1xf32> to vector<1x24x64xf32>
    %343 = vector.broadcast %341 : vector<1x1x64xf32> to vector<1x24x64xf32>
    %344 = arith.mulf %342, %343 : vector<1x24x64xf32>
    %345 = arith.addf %339, %344 : vector<1x24x64xf32>
    %346 = vector.extract_strided_slice %345 {offsets = [0, 0, 0], sizes = [1, 24, 1], strides = [1, 1, 1]} : vector<1x24x64xf32> to vector<1x24x1xf32>
    %347 = vector.shape_cast %346 : vector<1x24x1xf32> to vector<1x24xf32>
    %348 = vector.extract_strided_slice %345 {offsets = [0, 0, 1], sizes = [1, 24, 1], strides = [1, 1, 1]} : vector<1x24x64xf32> to vector<1x24x1xf32>
    %349 = vector.shape_cast %348 : vector<1x24x1xf32> to vector<1x24xf32>
    %cst_53 = arith.constant 5.000000e-01 : f32
    %350 = vector.broadcast %cst_53 : f32 to vector<1x24xf32>
    %351 = arith.mulf %350, %349 : vector<1x24xf32>
    %352 = math.tanh %351 : vector<1x24xf32>
    %cst_54 = arith.constant 5.000000e-01 : f32
    %353 = vector.broadcast %cst_54 : f32 to vector<1x24xf32>
    %354 = arith.mulf %353, %352 : vector<1x24xf32>
    %cst_55 = arith.constant 5.000000e-01 : f32
    %355 = vector.broadcast %cst_55 : f32 to vector<1x24xf32>
    %356 = arith.addf %354, %355 : vector<1x24xf32>
    %cst_56 = arith.constant 1.400000e-01 : f32
    %357 = vector.broadcast %cst_56 : f32 to vector<1x24xf32>
    %358 = arith.addf %101, %357 : vector<1x24xf32>
    %359 = arith.mulf %358, %358 : vector<1x24xf32>
    %360 = arith.mulf %356, %359 : vector<1x24xf32>
    %cst_57 = arith.constant 2.26772809 : f32
    %361 = vector.broadcast %cst_57 : f32 to vector<1x24xf32>
    %362 = arith.mulf %361, %360 : vector<1x24xf32>
    %cst_58 = arith.constant 5.000000e-01 : f32
    %363 = vector.broadcast %cst_58 : f32 to vector<1x24xf32>
    %364 = arith.mulf %363, %347 : vector<1x24xf32>
    %365 = math.tanh %364 : vector<1x24xf32>
    %cst_59 = arith.constant 5.000000e-01 : f32
    %366 = vector.broadcast %cst_59 : f32 to vector<1x24xf32>
    %367 = arith.mulf %366, %365 : vector<1x24xf32>
    %cst_60 = arith.constant 5.000000e-01 : f32
    %368 = vector.broadcast %cst_60 : f32 to vector<1x24xf32>
    %369 = arith.addf %367, %368 : vector<1x24xf32>
    %cst_61 = arith.constant 5.000000e-01 : f32
    %370 = vector.broadcast %cst_61 : f32 to vector<1x24xf32>
    %371 = arith.mulf %369, %370 : vector<1x24xf32>
    %cst_62 = arith.constant 2.000000e+00 : f32
    %372 = vector.broadcast %cst_62 : f32 to vector<1x24xf32>
    %373 = arith.mulf %371, %372 : vector<1x24xf32>
    %cst_63 = arith.constant 5.000000e-01 : f32
    %374 = vector.broadcast %cst_63 : f32 to vector<1x24xf32>
    %375 = arith.addf %374, %373 : vector<1x24xf32>
    %376 = arith.mulf %118, %375 : vector<1x24xf32>
    %377 = vector.shape_cast %6 : vector<24xf32> to vector<1x24x1xf32>
    %378 = vector.shape_cast %6 : vector<24xf32> to vector<1x1x24xf32>
    %379 = vector.broadcast %377 : vector<1x24x1xf32> to vector<1x24x24xf32>
    %380 = vector.broadcast %378 : vector<1x1x24xf32> to vector<1x24x24xf32>
    %381 = arith.mulf %379, %380 : vector<1x24x24xf32>
    %382 = vector.shape_cast %376 : vector<1x24xf32> to vector<1x24x1xf32>
    %383 = vector.shape_cast %376 : vector<1x24xf32> to vector<1x1x24xf32>
    %384 = vector.broadcast %382 : vector<1x24x1xf32> to vector<1x24x24xf32>
    %385 = vector.broadcast %383 : vector<1x1x24xf32> to vector<1x24x24xf32>
    %386 = arith.mulf %384, %385 : vector<1x24x24xf32>
    %cst_64 = arith.constant -2.500000e-01 : f32
    %387 = vector.broadcast %cst_64 : f32 to vector<1x24x24xf32>
    %388 = arith.mulf %387, %39 : vector<1x24x24xf32>
    %389 = arith.divf %388, %386 : vector<1x24x24xf32>
    %390 = math.exp %389 : vector<1x24x24xf32>
    %391 = arith.mulf %386, %390 : vector<1x24x24xf32>
    %392 = arith.addf %39, %391 : vector<1x24x24xf32>
    %393 = math.rsqrt %392 : vector<1x24x24xf32>
    %394 = vector.shape_cast %13 : vector<24x24xi1> to vector<1x24x24xi1>
    %cst_65 = arith.constant -6.858280e+01 : f32
    %395 = vector.broadcast %cst_65 : f32 to vector<1x24x24xf32>
    %396 = arith.mulf %395, %381 : vector<1x24x24xf32>
    %397 = arith.mulf %396, %393 : vector<1x24x24xf32>
    %cst_66 = arith.constant 0.000000e+00 : f32
    %398 = vector.broadcast %cst_66 : f32 to vector<1x24x24xf32>
    %399 = arith.select %394, %397, %398 : vector<1x24x24xi1>, vector<1x24x24xf32>
    %cst_67 = arith.constant dense<0.000000e+00> : vector<1x24xf32>
    %400 = vector.multi_reduction <add>, %399, %cst_67 [2] : vector<1x24x24xf32> to vector<1x24xf32>
    %401 = arith.mulf %6, %6 : vector<24xf32>
    %402 = vector.shape_cast %401 : vector<24xf32> to vector<1x24xf32>
    %cst_68 = arith.constant -6.858280e+01 : f32
    %403 = vector.broadcast %cst_68 : f32 to vector<1x24xf32>
    %404 = arith.mulf %403, %402 : vector<1x24xf32>
    %405 = arith.divf %404, %376 : vector<1x24xf32>
    %406 = arith.addf %400, %405 : vector<1x24xf32>
    %407 = arith.addf %406, %362 : vector<1x24xf32>
    %408 = vector.shape_cast %407 : vector<1x24xf32> to vector<1x1x24xf32>
    %c0_69 = arith.constant 0 : index
    %c0_70 = arith.constant 0 : index
    %c0_71 = arith.constant 0 : index
    %409 = vector.load %arg6[%c0_69, %c0_70, %c0_71] : memref<1x1x24xf32, #tpu.memory_space<vmem>>, vector<1x1x24xf32>
    tpu.vector_store %arg6[%c0_69, %c0_70, %c0_71], %408 {strides = array<i32>} : memref<1x1x24xf32, #tpu.memory_space<vmem>>, vector<1x1x24xf32>,
    return
  }
  func.func @transform_0(%arg0: i32) -> (i32, i32, i32) {
    %c0_i32 = arith.constant 0 : i32
    %c0_i32_0 = arith.constant 0 : i32
    %c0_i32_1 = arith.constant 0 : i32
    return %arg0, %c0_i32, %c0_i32_0 : i32, i32, i32
  }
  func.func @transform_1(%arg0: i32) -> (i32, i32) {
    %c0_i32 = arith.constant 0 : i32
    %c0_i32_0 = arith.constant 0 : i32
    %c0_i32_1 = arith.constant 0 : i32
    return %c0_i32, %c0_i32_0 : i32, i32
  }
  func.func @transform_2(%arg0: i32) -> (i32, i32) {
    %c0_i32 = arith.constant 0 : i32
    %c0_i32_0 = arith.constant 0 : i32
    %c0_i32_1 = arith.constant 0 : i32
    return %c0_i32, %c0_i32_0 : i32, i32
  }
  func.func @transform_3(%arg0: i32) -> (i32, i32) {
    %c0_i32 = arith.constant 0 : i32
    %c0_i32_0 = arith.constant 0 : i32
    %c0_i32_1 = arith.constant 0 : i32
    return %c0_i32, %c0_i32_0 : i32, i32
  }
  func.func @transform_4(%arg0: i32) -> (i32, i32) {
    %c0_i32 = arith.constant 0 : i32
    %c0_i32_0 = arith.constant 0 : i32
    %c0_i32_1 = arith.constant 0 : i32
    return %c0_i32, %c0_i32_0 : i32, i32
  }
  func.func @transform_5(%arg0: i32) -> (i32, i32, i32) {
    %c0_i32 = arith.constant 0 : i32
    %c0_i32_0 = arith.constant 0 : i32
    %c0_i32_1 = arith.constant 0 : i32
    return %arg0, %c0_i32, %c0_i32_0 : i32, i32, i32
  }
}

</mosaic_0001>

<bundles_post_ra>
// kernel: tpu_custom_call.1
= control target key start
LH: loop header
LB: loop body
LE: loop exit
PB: predicated region body
PF: predicated region fallthrough
CT: control target
= control target key end

     0   :  { %10 = vsyncpa [#allocation3], 0  ;;  %s11122_s0 = inlined_call_operand.vmem [shape: f32[2,3,24], index: 0, kind: input, shape index: {}]   ;;  %s11123_s1 = inlined_call_operand.vmem [shape: f32[3,24], index: 1, kind: input, shape index: {}]   ;;  %s11124_s2 = inlined_call_operand.vmem [shape: f32[16,64], index: 2, kind: input, shape index: {}]   ;;  %s11125_s3 = inlined_call_operand.vmem [shape: bf16[128,128], index: 3, kind: input, shape index: {}]   ;;  %s11126_s4 = inlined_call_operand.vmem [shape: bf16[192,64], index: 4, kind: input, shape index: {}]   ;;  %s11127_s5 = inlined_call_operand.hbm [shape: f32[2,1,24], index: 5, kind: output, shape index: {}]  }
   0x1   :  { %12 = vsyncpa [#allocation3 + $0x1], 0  ;;  %s6665_s18 = smov 0   ;;  %s6667_s19 = smov 0  }
   0x2   :  { %s6669_s20 = smov 0   ;;  %s6671_s21 = smov 0  }
   0x3 LB: > { %s6686_s22 = sadd.s32 4294967295, %s6626_s21   ;;  %s5954_s23 = sadd.s32 4294967294, %s6626_s21   ;;  %s6626_s21 = sphi %s6671_s21, %s12093_s21   ;;  %s6622_s20 = sphi %s6669_s20, %s12092_s20   ;;  %s6618_s19 = sphi %s6667_s19, %s12091_s19   ;;  %s6614_s18 = sphi %s6665_s18, %s12090_s18  }
   0x4   : > { %s6690_s24 = sadd.s32 1, %s6626_s21   ;;  %s135_s25 = sadd.s32 1, %s6622_s20 }
   0x5   : > { %s132_s26 = ssub.s32 %s6626_s21, %s6690_s24  ;;  %p145_p0 = scmp.ne.s32.totalorder %s6622_s20, %s6618_s19 }
   0x6   : > { %p133_p1 = scmp.eq.s32.totalorder %s132_s26, 0  ;;  %p146_p2 = scmp.eq.s32.totalorder %s6686_s22, 1 }
   0x7   : > { %p151_p3 = scmp.ne.s32.totalorder %s6618_s19, %s6614_s18  ;;  %p152_p4 = scmp.eq.s32.totalorder %s5954_s23, 1 }
   0x8   : > { %s6701_s27 = scalar_select %p133_p1, %s6622_s20, %s135_s25  }
   0x9   : > { %p6703_p5 = por %p146_p2, %p145_p0  ;;  %p6707_p6 = por %p152_p4, %p151_p3 }
   0xa   : > { %p5957_p7 = scmp.ge.s32.totalorder %s6626_s21, 1  ;;  %p189_p8 = scmp.lt.s32.totalorder %s6626_s21, 3 }
   0xc   : > { %p190_p9 = pnand %p5957_p7, %p189_p8 }
   0xe   : > { %193 = sbr.rel (%p190_p9) target bundleno = 3359 (0xd1f), region = 40 }
  0x15   : > { %p215_p10 = scmp.lt.s32.totalorder %s6686_s22, 1  ;;  %v265_v0 = vlaneseq  ;;  %v6735_v9 = vld [vmem:[%s11123_s1] sm:$0x7]  ;;  %v11364_v61 = vmov 0  ;;  %vm482_vm12 = vcmask 195584   ;;  %s6632_s10 = smov 64  }
  0x16   : > { %v6740_v11 = vadd.f32 0.0195141, %v6735_v9  ;;  %v368_v53 = vrot.slane %v6735_v9, 7  ;;  %s6633_s17 = smov 127   ;;  %s213_s23 = sand.u32 1, %s6618_s19  }
  0x17   : > { %s216_s30 = scalar_select %p215_p10, %s6686_s22, 1  ;;  %v6715_v1 = vshrl.u32 %v265_v0, 7  ;;  %v6754_v31 = vand.u32 127, %v265_v0 }
  0x18   : > { %11356 = vst [vmem:[#allocation9_spill] sm:$0xff] %v6740_v11  ;;  %v370_v54 = vmul.f32 %v368_v53, %v6735_v9  ;;  %s6028_s25 = sshll.u32 %s6686_s22, 4  ;;  %s214_s26 = scalar_lea.vmem [#allocation2], %s213_s23 }
  0x19   : > { %11352 = vst [vmem:[#allocation5_spill] sm:$0xff] %v6715_v1  ;;  %s5958_s6 = sshll.u32 %s216_s30, 2  ;;  %v6718_v2 = vsub.s32 0, %v6715_v1  ;;  %v6721_v3 = vsub.s32 1, %v6715_v1  ;;  %v6729_v7 = vsub.s32 2, %v6715_v1  ;;  %v6752_v30 = vadd.s32 8, %v6715_v1  ;;  %s11079_s8 = scalar_lea.hbm %s11127_s5, %s6028_s25 }
  0x1a   : > { %s218_s9 = scalar_lea.vmem %s11122_s0, %s5958_s6  ;;  %11359 = vst [vmem:[#allocation12_spill] sm:$0xff] %v6754_v31  ;;  %vm271_vm1 = vcmp.ne.s32.totalorder %v6715_v1, %v6754_v31  ;;  %v6765_v45 = vadd.s32 16, %v6715_v1  ;;  %v6800_v60 = vsub.s32 5, %v6715_v1  ;;  %s5899_s30 = sshll.u32 %s214_s26, 4  ;;  %s11081_s30 = int_to_ptr.vmem [resolvable:$true] %s5899_s30 }
  0x1b   : > { %11353 = vst [vmem:[#allocation6_spill] sm:$0xff] %v6718_v2  ;;  %11354 = vst [vmem:[#allocation7_spill] sm:$0xff] %v6721_v3  ;;  %v221_v4 = vld [vmem:[%s218_s9] sm:$0x7]  ;;  %v355_v10 = vrot.slane %v6735_v9, %v6721_v3  ;;  %v544_v12 = vrot.slane %v6740_v11, %v6721_v3  ;;  %v6746_v13 = vrot.slane %v6735_v9, %v6718_v2  ;;  %s5887_s22 = scalar_lea.sflag [#allocation3], %s213_s23  ;;  %s6564_s9 = scalar_lea.vmem %s11081_s30, 16 }
  0x1c   : > { %v295_v5 = vrot.slane %v221_v4, %v6721_v3  ;;  %v277_v6 = vrot.slane %v221_v4, %v6718_v2  ;;  %11355 = vst [vmem:[#allocation8_spill] sm:$0xff] %v6729_v7  ;;  %v313_v8 = vrot.slane %v221_v4, %v6729_v7  ;;  %11358 = vst [vmem:[#allocation11_spill] sm:$0xff] %v6752_v30  ;;  %p6565_p11 = scmp.ne.s32.totalorder %s11081_s30, %s6564_s9  ;;  %s6634_s11 = smov [#allocation2]  }
  0x1d   : > { %11357 = vst [vmem:[#allocation10_spill] sm:$0xff] %v6746_v13  ;;  %vm272_vm0 = vcmp.ne.s32.totalorder %v6752_v30, %v6754_v31  ;;  %11362 = vst [vmem:[#allocation15_spill] sm:$0xff] %v6765_v45  ;;  %vm273_vm2 = vcmp.ne.s32.totalorder %v6765_v45, %v6754_v31  ;;  %v6788_v56 = vrot.slane %v370_v54, %v6729_v7  ;;  %s6568_s12 = sshll.u32 %s6634_s11, 4  ;;  %s6569_s12 = int_to_ptr.vmem [resolvable:$false] %s6568_s12 }
  0x1e   : > { %297 = vbcast.lane.b32.xlu1 %v295_v5, 256  ;;  %279 = vbcast.lane.b32.xlu0 %v277_v6, 256  ;;  %p6566_p12 = pnand %p6565_p11, %p6703_p5  ;;  %s6570_s13 = scalar_lea.vmem %s6569_s12, 32 }
  0x1f   : > { %p6571_p0 = scmp.lt.s32.totalorder %s11081_s30, %s6569_s12  ;;  %p6572_p1 = scmp.lt.s32.totalorder %s6570_s13, %s6564_s9 }
  0x20   : > { %p6567_p13 = pneg %p6566_p12 }
  0x21   : > { %p6573_p2 = por %p6572_p1, %p6571_p0 }
  0x22   : > { %301 = vbcast.lane.b32.xlu1 %v295_v5, 264  ;;  %283 = vbcast.lane.b32.xlu0 %v277_v6, 264 }
  0x23   : > { %p6574_p3 = pnand %p6573_p2, %p6567_p13 }
  0x26   : > { %305 = vbcast.lane.b32.xlu1 %v295_v5, 272  ;;  %287 = vbcast.lane.b32.xlu0 %v277_v6, 272 }
  0x2a   : > { %319 = vbcast.lane.b32.xlu1 %v313_v8, 264  ;;  %315 = vbcast.lane.b32.xlu0 %v313_v8, 256 }
  0x2e   : > { %323 = vbcast.lane.b32.xlu0 %v313_v8, 272  ;;  %357 = vbcast.lane.b32.xlu1 %v355_v10, 256 }
  0x32   : > { %361 = vbcast.lane.b32.xlu0 %v355_v10, 264  ;;  %365 = vbcast.lane.b32.xlu1 %v355_v10, 272 }
  0x36   : > { %497 = vbcast.lane.b32.xlu0 %v355_v10, 256  ;;  %501 = vbcast.lane.b32.xlu1 %v355_v10, 264 }
  0x3a   : > { %546 = vbcast.lane.b32.xlu0 %v544_v12, 256  ;;  %505 = vbcast.lane.b32.xlu1 %v355_v10, 272 }
  0x3e   : > { %554 = vbcast.lane.b32.xlu0 %v544_v12, 272  ;;  %550 = vbcast.lane.b32.xlu1 %v544_v12, 264 }
  0x42   : > { %1200 = vbcast.lane.b32.xlu0 %v6746_v13, 264  ;;  %1196 = vbcast.lane.b32.xlu1 %v6746_v13, 256 }
  0x46   : > { %1204 = vbcast.lane.b32.xlu0 %v6746_v13, 272 }
  0x90   : > { %v298_v14 = vpop.permute.xlu1 %297  ;;  %v280_v15 = vpop.permute.xlu0 %279 }
  0x91   : > { %v307_v18 = vsub.f32 %v298_v14, %v295_v5  ;;  %v289_v19 = vsub.f32 %v280_v15, %v277_v6 }
  0x93   : > { %v331_v24 = vmul.f32 %v307_v18, %v307_v18  ;;  %v328_v25 = vmul.f32 %v289_v19, %v289_v19 }
  0x94   : > { %v302_v16 = vpop.permute.xlu1 %301  ;;  %v284_v17 = vpop.permute.xlu0 %283 }
  0x95   : > { %v308_v20 = vsub.f32 %v302_v16, %v295_v5  ;;  %v290_v21 = vsub.f32 %v284_v17, %v277_v6  ;;  %v334_v36 = vadd.f32 %v331_v24, %v328_v25 }
  0x97   : > { %v332_v26 = vmul.f32 %v308_v20, %v308_v20  ;;  %v329_v27 = vmul.f32 %v290_v21, %v290_v21  ;;  %v6843_v20 = vsub.s32 4, %v6715_v1 }
  0x98   : > { %v306_v22 = vpop.permute.xlu1 %305  ;;  %v288_v23 = vpop.permute.xlu0 %287 }
  0x99   : > { %v309_v28 = vsub.f32 %v306_v22, %v295_v5  ;;  %v291_v29 = vsub.f32 %v288_v23, %v277_v6  ;;  %v335_v37 = vadd.f32 %v332_v26, %v329_v27  ;;  %v11128_v5 = vmov -10000.0   ;;  %11370 = vst [vmem:[#allocation19_spill] sm:$0xff] %v6843_v20 }
  0x9b   : > { %v333_v40 = vmul.f32 %v309_v28, %v309_v28  ;;  %v330_v41 = vmul.f32 %v291_v29, %v291_v29 }
  0x9c   : > { %v320_v32 = vpop.permute.xlu1 %319  ;;  %v316_v33 = vpop.permute.xlu0 %315 }
  0x9d   : > { %v326_v34 = vsub.f32 %v320_v32, %v313_v8  ;;  %v325_v35 = vsub.f32 %v316_v33, %v313_v8  ;;  %v336_v49 = vadd.f32 %v333_v40, %v330_v41 }
  0x9f   : > { %v338_v38 = vmul.f32 %v326_v34, %v326_v34  ;;  %v337_v39 = vmul.f32 %v325_v35, %v325_v35 }
  0xa0   : > { %v324_v42 = vpop.permute.xlu0 %323  ;;  %v6840_v18 = vpop.permute.xlu1 %357 }
  0xa1   : > { %v6760_v43 = vadd.f32 %v338_v38, %v335_v37  ;;  %v6762_v44 = vadd.f32 %v337_v39, %v334_v36  ;;  %v327_v46 = vsub.f32 %v324_v42, %v313_v8  ;;  %v11367_v8 = vmov 0 }
  0xa2   : > { %v402_v38 = vmul.f32 %v370_v54, %v370_v54 }
  0xa3   : > { %11360 = vst [vmem:[#allocation13_spill] sm:$0xff] %v6760_v43  ;;  %11361 = vst [vmem:[#allocation14_spill] sm:$0xff] %v6762_v44  ;;  %v344_v47 = vsel %vm272_vm0, %v6760_v43, 1.0  ;;  %v343_v48 = vsel %vm271_vm1, %v6762_v44, 1.0  ;;  %v339_v50 = vmul.f32 %v327_v46, %v327_v46 }
  0xa4   : > { %6188 = vrsqrt.f32 %v344_v47  ;;  %v6872_v35 = vpop.permute.xlu0 %361  ;;  %v6874_v36 = vpop.permute.xlu1 %365  ;;  %v406_v53 = vrot.slane %v402_v38, %v6729_v7 }
  0xa5   : > { %6190 = vrsqrt.f32 %v343_v48  ;;  %v6777_v51 = vadd.f32 %v339_v50, %v336_v49 }
  0xa7   : > { %11363 = vst [vmem:[#allocation16_spill] sm:$0xff] %v6777_v51  ;;  %v345_v52 = vsel %vm273_vm2, %v6777_v51, 1.0 }
  0xa8   : > { %6192 = vrsqrt.f32 %v345_v52 }
  0xae   : > { %v6785_v55 = vpop.eup %6188 }
  0xaf   : > { %v6790_v57 = vpop.eup %6190  ;;  %v6793_v58 = vmul.f32 %v6785_v55, %v344_v47  ;;  %v408_v51 = vmul.f32 %v6785_v55, %v406_v53 }
  0xb0   : > { %v6796_v59 = vmul.f32 %v6790_v57, %v343_v48 }
  0xb1   : > { %vm600_vm3 = vcmp.lt.f32.partialorder %v6793_v58, 0.4  ;;  %v379_v10 = vsub.f32 %v6793_v58, %v6788_v56  ;;  %v6870_v34 = vadd.f32 %v6788_v56, %v6793_v58  ;;  %v411_v44 = vsub.f32 %v6793_v58, %v408_v51 }
  0xb2   : > { %vm6805_vm4 = vmand %vm272_vm0, %vm600_vm3  ;;  %vm599_vm5 = vcmp.lt.f32.partialorder %v6796_v59, 0.4  ;;  %v617_v62 = vpack.c.bf16 %v6793_v58, %v6796_v59  ;;  %v378_v63 = vsub.f32 %v6796_v59, %v6788_v56  ;;  %v6816_v0 = vadd.f32 %v6788_v56, %v6796_v59  ;;  %v6818_v4 = vpop.eup %6192 }
  0xb3   : > { %v11365_v61 = vsel %vm6805_vm4, 4294967295, %v11364_v61  ;;  %v896_v6 = vsel %vm6805_vm4, 0.0, %v11128_v5  ;;  %vm6826_vm6 = vmand %vm271_vm1, %vm599_vm5  ;;  %v6838_v16 = vmul.f32 %v6818_v4, %v345_v52  ;;  %v382_v26 = vand.u32 2147483647, %v379_v10 }
  0xb4   : > { %11366 = vst [vmem:[#allocation17_spill] sm:$0xff] %v11365_v61  ;;  %v11368_v8 = vsel %vm6826_vm6, 4294967295, %v11367_v8  ;;  %v6832_v12 = vpack.i.b16 %v617_v62, %v617_v62  ;;  %v633_v14 = vshrl.u32 %v617_v62, 16  ;;  %v895_v15 = vsel %vm6826_vm6, 0.0, %v11128_v5 }
  0xb5   : > { %11369 = vst [vmem:[#allocation18_spill] sm:$0xff] %v11368_v8  ;;  %v898_v17 = vpack.c.bf16 %v896_v6, %v895_v15  ;;  %v381_v19 = vand.u32 2147483647, %v378_v63  ;;  %6194 = vrcp.f32 %v6816_v0  ;;  %v380_v22 = vsub.f32 %v6838_v16, %v6788_v56 }
  0xb6   : > { %v6846_v21 = vpack.i.b16 %v633_v14, %v633_v14  ;;  %v6852_v23 = vrot.slane %v6832_v12, %v6800_v60  ;;  %v625_v24 = vrot.slane %v6832_v12, %v6718_v2  ;;  %v618_v29 = vpack.c.bf16 %v6838_v16, %v6838_v16 }
  0xb7   : > { %v384_v25 = vmax.f32 %v6840_v18, %v381_v19  ;;  %v383_v27 = vand.u32 2147483647, %v380_v22  ;;  %v914_v28 = vshrl.u32 %v898_v17, 16  ;;  %v6866_v33 = vrot.slane %v6832_v12, %v6843_v20 }
  0xb8   : > { %740 = vbcast.lane.c.b16.xlu0 %v6852_v23, 256  ;;  %627 = vbcast.lane.c.b16.xlu1 %v625_v24, 256  ;;  %v6862_v32 = vrot.slane %v6846_v21, %v6718_v2  ;;  %v815_v37 = vshrl.u32 %v618_v29, 16  ;;  %v6878_v39 = vadd.f32 %v6788_v56, %v6838_v16  ;;  %v385_v40 = vmax.f32 %v6872_v35, %v382_v26 }
  0xb9   : > { %6196 = vrcp.f32 %v384_v25  ;;  %v386_v41 = vmax.f32 %v6874_v36, %v383_v27  ;;  %v6884_v42 = vpack.i.b16 %v898_v17, %v898_v17  ;;  %v6886_v46 = vpack.i.b16 %v914_v28, %v914_v28 }
  0xba   : > { %v6890_v47 = vrot.slane %v6846_v21, %v6843_v20  ;;  %6198 = vrcp.f32 %v6878_v39  ;;  %v6895_v48 = vrot.slane %v6832_v12, %v6721_v3  ;;  %v6897_v49 = vpack.i.b16 %v815_v37, %v815_v37 }
  0xbb   : > { %v6899_v50 = vpack.i.b16 %v618_v29, %v618_v29  ;;  %6200 = vrcp.f32 %v6870_v34  ;;  %v6907_v62 = vrot.slane %v6884_v42, %v6843_v20  ;;  %v6919_v10 = vrot.slane %v6886_v46, %v6843_v20 }
  0xbc   : > { %641 = vbcast.lane.c.b16.xlu0 %v6862_v32, 256  ;;  %718 = vbcast.lane.c.b16.xlu1 %v6866_v33, 256  ;;  %6202 = vrcp.f32 %v386_v41  ;;  %v6911_v63 = vrot.slane %v6897_v49, %v6718_v2  ;;  %v407_v15 = vmul.f32 %v6790_v57, %v406_v53  ;;  %v409_v5 = vmul.f32 %v6818_v4, %v406_v53 }
  0xbd   : > { %6204 = vrcp.f32 %v385_v40  ;;  %v6915_v6 = vrot.slane %v6899_v50, %v6718_v2  ;;  %v414_v8 = vmul.f32 0.25, %v411_v44  ;;  %vm470_vm8 = vcmp.gt.f32.partialorder %v6816_v0, %v6840_v18 }
  0xbe   : > { %v410_v22 = vsub.f32 %v6796_v59, %v407_v15  ;;  %vm473_vm10 = vmand %vm271_vm1, %vm470_vm8  ;;  %vm472_vm11 = vcmp.gt.f32.partialorder %v6878_v39, %v6874_v36  ;;  %vm471_vm15 = vcmp.gt.f32.partialorder %v6870_v34, %v6872_v35  ;;  %v749_v34 = vrot.slane %v6846_v21, %v6800_v60 }
  0xbf   : > { %v6195_v52 = vpop.eup %6194  ;;  %vm475_vm13 = vmand %vm273_vm2, %vm472_vm11  ;;  %vm601_vm5 = vcmp.lt.f32.partialorder %v6838_v16, 0.4  ;;  %vm586_vm8 = vcmask 130112   ;;  %vm2559_vm11 = vcmask 1043459  }
  0xc0   : > { %729 = vbcast.lane.c.b16.xlu0 %v6890_v47, 256  ;;  %652 = vbcast.lane.c.b16.xlu1 %v6895_v48, 256  ;;  %v431_v54 = vmul.f32 %v6195_v52, %v384_v25  ;;  %v416_v25 = vmul.f32 %v6195_v52, %v6195_v52  ;;  %vm474_vm3 = vmand %vm272_vm0, %vm471_vm15  ;;  %vm2565_vm15 = vcmask 1046534  }
  0xc2   : > { %6206 = vlog2.f32 %v431_v54  ;;  %v413_v54 = vmul.f32 0.25, %v410_v22 }
  0xc3   : > { %v6921_v14 = vpop.eup %6196  ;;  %6208 = vrcp.f32 %v6840_v18 }
  0xc4   : > { %823 = vbcast.lane.c.b16.xlu0 %v6911_v63, 256  ;;  %809 = vbcast.lane.c.b16.xlu1 %v6915_v6, 256  ;;  %v419_v17 = vmul.f32 %v6921_v14, %v6921_v14  ;;  %v6199_v19 = vpop.eup %6198 }
  0xc5   : > { %v6201_v26 = vpop.eup %6200  ;;  %v433_v27 = vmul.f32 %v6199_v19, %v386_v41  ;;  %v418_v22 = vmul.f32 %v6199_v19, %v6199_v19 }
  0xc6   : > { %v422_v28 = vsub.f32 %v416_v25, %v419_v17  ;;  %v432_v29 = vmul.f32 %v6201_v26, %v385_v40  ;;  %v6203_v37 = vpop.eup %6202  ;;  %v399_v40 = vsub.f32 %v6921_v14, %v6195_v52 }
  0xc7   : > { %6210 = vlog2.f32 %v433_v27  ;;  %v6930_v38 = vpop.eup %6204  ;;  %v421_v41 = vmul.f32 %v6203_v37, %v6203_v37  ;;  %v412_v27 = vsub.f32 %v6838_v16, %v409_v5 }
  0xc8   : > { %631 = vbcast.lane.c.b16.xlu1 %v625_v24, 272  ;;  %6212 = vlog2.f32 %v432_v29  ;;  %v425_v15 = vmul.f32 %v422_v28, %v413_v54  ;;  %v420_v17 = vmul.f32 %v6930_v38, %v6930_v38  ;;  %v417_v29 = vmul.f32 %v6201_v26, %v6201_v26 }
  0xc9   : > { %6214 = vrcp.f32 %v6874_v36  ;;  %v424_v11 = vsub.f32 %v418_v22, %v421_v41  ;;  %v6943_v28 = vsub.s32 7, %v6715_v1  ;;  %v415_v52 = vmul.f32 0.25, %v412_v27 }
  0xca   : > { %v428_v43 = vadd.f32 %v425_v15, %v399_v40  ;;  %6216 = vrcp.f32 %v6872_v35  ;;  %v401_v22 = vsub.f32 %v6203_v37, %v6199_v19 }
  0xcb   : > { %v6947_v5 = vrot.slane %v6884_v42, %v6943_v28  ;;  %v427_v15 = vmul.f32 %v424_v11, %v415_v52  ;;  %v454_v52 = vsub.f32 %v6788_v56, %v6838_v16 }
  0xcc   : > { %v6207_v13 = vpop.eup %6206 }
  0xcd   : > { %v435_v24 = vmul.f32 0.6931472, %v6207_v13  ;;  %v423_v13 = vsub.f32 %v417_v29, %v420_v17  ;;  %v6209_v54 = vpop.eup %6208  ;;  %v6953_v17 = vrot.slane %v6886_v46, %v6943_v28  ;;  %vm457_vm9 = vcmp.gt.f32.partialorder %v454_v52, %v6874_v36 }
  0xce   : > { %v464_v40 = vsub.f32 %v6209_v54, %v6921_v14 }
  0xcf   : > { %v440_v25 = vmul.f32 0.5, %v435_v24  ;;  %11371 = vst [vmem:[#allocation20_spill] sm:$0xff] %v6953_v17 }
  0xd1   : > { %v443_v53 = vmul.f32 %v6790_v57, %v440_v25  ;;  %v6211_v24 = vpop.eup %6210  ;;  %v452_v57 = vsub.f32 %v6788_v56, %v6796_v59  ;;  %v430_v59 = vadd.f32 %v427_v15, %v401_v22 }
  0xd2   : > { %v6213_v51 = vpop.eup %6212  ;;  %v439_v41 = vmul.f32 0.6931472, %v6211_v24 }
  0xd3   : > { %v446_v20 = vadd.f32 %v443_v53, %v428_v43  ;;  %v426_v43 = vmul.f32 %v423_v13, %v414_v8  ;;  %v437_v25 = vmul.f32 0.6931472, %v6213_v51  ;;  %v6215_v27 = vpop.eup %6214  ;;  %v400_v53 = vsub.f32 %v6930_v38, %v6201_v26 }
  0xd4   : > { %v442_v29 = vmul.f32 0.5, %v439_v41  ;;  %vm455_vm7 = vcmp.gt.f32.partialorder %v452_v57, %v6840_v18  ;;  %v466_v17 = vsub.f32 %v6215_v27, %v6203_v37  ;;  %v6217_v26 = vpop.eup %6216  ;;  %v453_v37 = vsub.f32 %v6788_v56, %v6793_v58 }
  0xd5   : > { %v449_v44 = vmul.f32 0.5, %v446_v20  ;;  %v441_v61 = vmul.f32 0.5, %v437_v25  ;;  %v467_v24 = vsel %vm455_vm7, %v464_v40, 0.0  ;;  %v429_v14 = vadd.f32 %v426_v43, %v400_v53  ;;  %vm7013_vm7 = vmand %vm273_vm2, %vm601_vm5 }
  0xd6   : > { %v445_v11 = vmul.f32 %v6818_v4, %v442_v29  ;;  %v469_v4 = vsel %vm457_vm9, %v466_v17, 0.0  ;;  %vm456_vm14 = vcmp.gt.f32.partialorder %v453_v37, %v6872_v35  ;;  %v661_v17 = vrot.slane %v6846_v21, %v6721_v3 }
  0xd7   : > { %v444_v8 = vmul.f32 %v6785_v55, %v441_v61  ;;  %v476_v20 = vadd.f32 %v467_v24, %v449_v44  ;;  %v465_v61 = vsub.f32 %v6217_v26, %v6930_v38  ;;  %v832_v40 = vrot.slane %v6899_v50, %v6721_v3 }
  0xd8   : > { %v448_v19 = vadd.f32 %v445_v11, %v430_v59  ;;  %v6629_v43 = vmov 0   ;;  %v906_v25 = vrot.slane %v6884_v42, %v6718_v2  ;;  %v11375_v44 = vmov -10000.0  }
  0xd9   : > { %v447_v13 = vadd.f32 %v444_v8, %v429_v14  ;;  %v479_v51 = vsel %vm473_vm10, %v476_v20, 0.0  ;;  %v468_v56 = vsel %vm456_vm14, %v465_v61, 0.0  ;;  %6166 = vset.pattern.permute.xlu1 %v6629_v43  ;;  %6167 = vset.pattern.permute.xlu0 %v6629_v43  ;;  %v897_v22 = vsel %vm7013_vm7, 0.0, %v11375_v44 }
  0xda   : > { %v451_v54 = vmul.f32 0.5, %v448_v19  ;;  %v483_v57 = vsel %vm482_vm12, %v479_v51, 0.0  ;;  %v7030_v29 = vrot.slane %v6897_v49, %v6721_v3  ;;  %v7034_v53 = vrot.slane %v6884_v42, %v6721_v3  ;;  %v498_v19 = vpop.permute.xlu0 %497 }
  0xdb   : > { %v450_v0 = vmul.f32 0.5, %v447_v13  ;;  %v7059_v24 = vrot.slane %v6846_v21, %v6729_v7  ;;  %v7069_v8 = vrot.slane %v6899_v50, %v6729_v7  ;;  %v7074_v20 = vrot.slane %v6886_v46, %v6721_v3  ;;  %v502_v13 = vpop.permute.xlu1 %501 }
  0xdc   : > { %v478_v55 = vadd.f32 %v469_v4, %v451_v54  ;;  %vm593_vm9 = vcmask 195712   ;;  %vm2557_vm10 = vcmask 1042434   ;;  %vm2563_vm14 = vcmask 1045509  }
  0xdd   : > { %v477_v58 = vadd.f32 %v468_v56, %v450_v0 }
  0xde   : > { %v481_v15 = vsel %vm475_vm13, %v478_v55, 0.0  ;;  %v547_v26 = vpop.permute.xlu0 %546  ;;  %vm2561_vm13 = vcmask 1044484  }
  0xdf   : > { %v489_v39 = vsel %vm482_vm12, %v481_v15, 0.0  ;;  %v480_v38 = vsel %vm474_vm3, %v477_v58, 0.0  ;;  %v506_v4 = vpop.permute.xlu1 %505  ;;  %6218 = vrcp.f32 %v547_v26  ;;  %vm2567_vm3 = vcmask 1047559  }
  0xe0   : > { %v486_v41 = vsel %vm482_vm12, %v480_v38, 0.0 }
  0xe2   : > { %v555_v54 = vpop.permute.xlu0 %554 }
  0xe3   : > { %484 = vadd.xlane.f32.xlu0 %v483_v57  ;;  %v551_v51 = vpop.permute.xlu1 %550 }
  0xe6   : > { %v7079_v37 = vpop.permute.xlu0 %1200 }
  0xe7   : > { %490 = vadd.xlane.f32.xlu0 %v489_v39  ;;  %11376 = vst [vmem:[#allocation22_spill] sm:$0xff] %v7079_v37  ;;  %v7083_v61 = vpop.permute.xlu1 %1196 }
  0xe8   : > { %11378 = vst [vmem:[#allocation24_spill] sm:$0xff] %v7083_v61 }
  0xea   : > { %v7081_v55 = vpop.permute.xlu0 %1204 }
  0xeb   : > { %11377 = vst [vmem:[#allocation23_spill] sm:$0xff] %v7081_v55 }
  0xec   : > { %487 = vadd.xlane.f32.xlu1 %v486_v41 }
  0xfd   : > { %645 = vbcast.lane.c.b16.xlu0 %v6862_v32, 272  ;;  %663 = vbcast.lane.c.b16.xlu1 %v661_v17, 256  ;;  %v920_v32 = vrot.slane %v6886_v46, %v6718_v2 }
 0x101   : > { %722 = vbcast.lane.c.b16.xlu0 %v6866_v33, 272  ;;  %733 = vbcast.lane.c.b16.xlu1 %v6890_v47, 272  ;;  %v7003_v33 = vrot.slane %v6832_v12, %v6729_v7  ;;  %v7006_v47 = vsub.s32 6, %v6715_v1 }
 0x103   : > { %11372 = vst [vmem:[#allocation21_spill] sm:$0xff] %v7006_v47  ;;  %v7019_v16 = vrot.slane %v6832_v12, %v7006_v47  ;;  %v7064_v14 = vrot.slane %v6846_v21, %v7006_v47 }
 0x105   : > { %751 = vbcast.lane.c.b16.xlu0 %v749_v34, 256  ;;  %834 = vbcast.lane.c.b16.xlu1 %v832_v40, 256 }
 0x109   : > { %908 = vbcast.lane.c.b16.xlu0 %v906_v25, 256  ;;  %922 = vbcast.lane.c.b16.xlu1 %v920_v32, 256 }
 0x10d   : > { %999 = vbcast.lane.c.b16.xlu0 %v6907_v62, 256  ;;  %1010 = vbcast.lane.c.b16.xlu1 %v6919_v10, 256 }
 0x111   : > { %656 = vbcast.lane.c.b16.xlu0 %v6895_v48, 272  ;;  %674 = vbcast.lane.c.b16.xlu1 %v7003_v33, 256  ;;  %v899_v48 = vpack.c.bf16 %v897_v22, %v897_v22 }
 0x113   : > { %v7036_v59 = vpack.i.b16 %v899_v48, %v899_v48  ;;  %v1096_v11 = vshrl.u32 %v899_v48, 16 }
 0x115   : > { %744 = vbcast.lane.c.b16.xlu0 %v6852_v23, 272  ;;  %762 = vbcast.lane.c.b16.xlu1 %v7019_v16, 256  ;;  %v7042_v23 = vrot.slane %v6884_v42, %v6800_v60 }
 0x119   : > { %813 = vbcast.lane.c.b16.xlu0 %v6915_v6, 272  ;;  %827 = vbcast.lane.c.b16.xlu1 %v6911_v63, 272  ;;  %v7046_v63 = vrot.slane %v7036_v59, %v6718_v2  ;;  %v7048_v6 = vpack.i.b16 %v1096_v11, %v1096_v11 }
 0x11b   : > { %v7054_v52 = vrot.slane %v7048_v6, %v6718_v2 }
 0x11d   : > { %845 = vbcast.lane.c.b16.xlu0 %v7030_v29, 256  ;;  %933 = vbcast.lane.c.b16.xlu1 %v7034_v53, 256 }
 0x121   : > { %1021 = vbcast.lane.c.b16.xlu0 %v7042_v23, 256  ;;  %1090 = vbcast.lane.c.b16.xlu1 %v7046_v63, 256 }
 0x125   : > { %1104 = vbcast.lane.c.b16.xlu0 %v7054_v52, 256  ;;  %667 = vbcast.lane.c.b16.xlu1 %v661_v17, 272 }
 0x129   : > { %685 = vbcast.lane.c.b16.xlu0 %v7059_v24, 256  ;;  %755 = vbcast.lane.c.b16.xlu1 %v749_v34, 272 }
 0x12a   : > { %v7085_v0 = vpop.permute.xlu0 %740  ;;  %v7087_v57 = vpop.permute.xlu1 %627 }
 0x12b   : > { %11379 = vst [vmem:[#allocation25_spill] sm:$0xff] %v7085_v0  ;;  %11380 = vst [vmem:[#allocation26_spill] sm:$0xff] %v7087_v57 }
 0x12d   : > { %773 = vbcast.lane.c.b16.xlu0 %v7064_v14, 256  ;;  %838 = vbcast.lane.c.b16.xlu1 %v832_v40, 272 }
 0x12e   : > { %v7089_v15 = vpop.permute.xlu0 %641 }
 0x12f   : > { %11381 = vst [vmem:[#allocation27_spill] sm:$0xff] %v7089_v15 }
 0x131   : > { %856 = vbcast.lane.c.b16.xlu0 %v7069_v8, 256  ;;  %912 = vbcast.lane.c.b16.xlu1 %v906_v25, 272 }
 0x135   : > { %926 = vbcast.lane.c.b16.xlu0 %v920_v32, 272  ;;  %944 = vbcast.lane.c.b16.xlu1 %v7074_v20, 256 }
 0x139   : > { %1003 = vbcast.lane.c.b16.xlu0 %v6907_v62, 272  ;;  %1014 = vbcast.lane.c.b16.xlu1 %v6919_v10, 272  ;;  %v7091_v62 = vpop.permute.xlu1 %718  ;;  %v7093_v10 = vpop.permute.xlu0 %729 }
 0x13a   : > { %11382 = vst [vmem:[#allocation28_spill] sm:$0xff] %v7091_v62  ;;  %11383 = vst [vmem:[#allocation29_spill] sm:$0xff] %v7093_v10 }
 0x13d   : > { %v7095_v56 = vpop.permute.xlu1 %652  ;;  %v7097_v58 = vpop.permute.xlu0 %823 }
 0x13e   : > { %11384 = vst [vmem:[#allocation30_spill] sm:$0xff] %v7095_v56  ;;  %11385 = vst [vmem:[#allocation31_spill] sm:$0xff] %v7097_v58 }
 0x141   : > { %v7099_v39 = vpop.permute.xlu1 %809 }
 0x142   : > { %11386 = vst [vmem:[#allocation32_spill] sm:$0xff] %v7099_v39 }
 0x145   : > { %v7101_v43 = vpop.permute.xlu1 %631 }
 0x146   : > { %11387 = vst [vmem:[#allocation33_spill] sm:$0xff] %v7101_v43 }
 0x170   : > { %v485_v38 = vpop.xlane.xlu0 %484 }
 0x171   : > { %v510_v41 = vmul.f32 %v498_v19, %v485_v38 }
 0x173   : > { %v516_v17 = vmul.f32 0.8, %v510_v41  ;;  %v525_v34 = vmul.f32 4.85, %v510_v41 }
 0x174   : > { %v491_v40 = vpop.xlane.xlu0 %490 }
 0x175   : > { %v512_v25 = vmul.f32 %v506_v4, %v491_v40  ;;  %v519_v32 = vmul.f32 %v516_v17, %v510_v41  ;;  %v528_v44 = vmul.f32 %v525_v34, %v510_v41 }
 0x177   : > { %v518_v22 = vmul.f32 0.8, %v512_v25  ;;  %v527_v48 = vmul.f32 4.85, %v512_v25  ;;  %v522_v11 = vsub.f32 %v510_v41, %v519_v32  ;;  %v531_v45 = vmul.f32 %v528_v44, %v510_v41  ;;  %v6219_v41 = vpop.eup %6218 }
 0x179   : > { %v488_v30 = vpop.xlane.xlu1 %487  ;;  %v534_v10 = vadd.f32 %v531_v45, %v522_v11  ;;  %v521_v56 = vmul.f32 %v518_v22, %v512_v25  ;;  %v530_v58 = vmul.f32 %v527_v48, %v512_v25  ;;  %v1041_v22 = vrot.slane %v6884_v42, %v7006_v47 }
 0x17a   : > { %v511_v39 = vmul.f32 %v502_v13, %v488_v30  ;;  %v7158_v48 = vrot.slane %v6886_v46, %v6729_v7  ;;  %v7174_v11 = vrot.slane %v7036_v59, %v6729_v7 }
 0x17b   : > { %6220 = vtanh.f32 %v534_v10  ;;  %v524_v19 = vsub.f32 %v512_v25, %v521_v56  ;;  %v533_v38 = vmul.f32 %v530_v58, %v512_v25  ;;  %v782_v58 = vrot.slane %v6832_v12, %v6943_v28 }
 0x17c   : > { %v517_v15 = vmul.f32 0.8, %v511_v39  ;;  %v526_v62 = vmul.f32 4.85, %v511_v39  ;;  %6222 = vrcp.f32 %v555_v54  ;;  %v7104_v54 = vsub.s32 3, %v6715_v1 }
 0x17d   : > { %v536_v0 = vadd.f32 %v533_v38, %v524_v19  ;;  %v953_v25 = vrot.slane %v6884_v42, %v6729_v7 }
 0x17e   : > { %v520_v4 = vmul.f32 %v517_v15, %v511_v39  ;;  %v529_v17 = vmul.f32 %v526_v62, %v511_v39  ;;  %11388 = vst [vmem:[#allocation34_spill] sm:$0xff] %v7104_v54  ;;  %v1030_v62 = vrot.slane %v6886_v46, %v6800_v60 }
 0x17f   : > { %6224 = vtanh.f32 %v536_v0  ;;  %v1113_v0 = vrot.slane %v7036_v59, %v6721_v3 }
 0x180   : > { %v523_v34 = vsub.f32 %v511_v39, %v520_v4  ;;  %v532_v40 = vmul.f32 %v529_v17, %v511_v39  ;;  %6226 = vrcp.f32 %v551_v51  ;;  %v694_v51 = vrot.slane %v6832_v12, %v7104_v54  ;;  %v7125_v12 = vpop.permute.xlu1 %663 }
 0x181   : > { %v865_v39 = vrot.slane %v6897_v49, %v6729_v7  ;;  %11389 = vst [vmem:[#allocation35_spill] sm:$0xff] %v7125_v12  ;;  %v7183_v4 = vrot.slane %v6897_v49, %v7104_v54  ;;  %v7202_v49 = vrot.slane %v7048_v6, %v6729_v7 }
 0x182   : > { %v535_v32 = vadd.f32 %v532_v40, %v523_v34  ;;  %v7192_v40 = vrot.slane %v6884_v42, %v7104_v54 }
 0x184   : > { %6228 = vtanh.f32 %v535_v32 }
 0x185   : > { %v6221_v45 = vpop.eup %6220  ;;  %6230 = vrcp.f32 %v6735_v9 }
 0x186   : > { %v560_v44 = vmul.f32 %v6221_v45, %v6219_v41  ;;  %v6223_v26 = vpop.eup %6222 }
 0x188   : > { %569 = vperm.xlu1 %6166, %v560_v44  }
 0x189   : > { %v6225_v30 = vpop.eup %6224 }
 0x18a   : > { %v564_v13 = vmul.f32 %v6225_v30, %v6223_v26  ;;  %v6227_v10 = vpop.eup %6226 }
 0x18c   : > { %575 = vperm.xlu1 %6166, %v564_v13  }
 0x18e   : > { %v6229_v56 = vpop.eup %6228 }
 0x18f   : > { %v562_v15 = vmul.f32 %v6229_v56, %v6227_v10 }
 0x190   : > { %1115 = vbcast.lane.c.b16.xlu1 %v1113_v0, 256 }
 0x191   : > { %572 = vperm.xlu0 %6167, %v562_v15  }
 0x194   : > { %696 = vbcast.lane.c.b16.xlu1 %v694_v51, 256 }
 0x195   : > { %1032 = vbcast.lane.c.b16.xlu0 %v1030_v62, 256 }
 0x198   : > { %784 = vbcast.lane.c.b16.xlu1 %v782_v58, 256 }
 0x199   : > { %678 = vbcast.lane.c.b16.xlu0 %v7003_v33, 272  ;;  %v7130_v33 = vpop.permute.xlu1 %733 }
 0x19a   : > { %11390 = vst [vmem:[#allocation36_spill] sm:$0xff] %v7130_v33 }
 0x19c   : > { %867 = vbcast.lane.c.b16.xlu1 %v865_v39, 256 }
 0x19d   : > { %766 = vbcast.lane.c.b16.xlu0 %v7019_v16, 272  ;;  %v1124_v16 = vrot.slane %v7048_v6, %v6721_v3 }
 0x1a0   : > { %955 = vbcast.lane.c.b16.xlu1 %v953_v25, 256 }
 0x1a1   : > { %849 = vbcast.lane.c.b16.xlu0 %v7030_v29, 272  ;;  %v7135_v29 = vpop.permute.xlu0 %645 }
 0x1a2   : > { %11391 = vst [vmem:[#allocation37_spill] sm:$0xff] %v7135_v29 }
 0x1a4   : > { %1043 = vbcast.lane.c.b16.xlu1 %v1041_v22, 256 }
 0x1a5   : > { %937 = vbcast.lane.c.b16.xlu0 %v7034_v53, 272  ;;  %v705_v53 = vrot.slane %v6846_v21, %v7104_v54 }
 0x1a8   : > { %1108 = vbcast.lane.c.b16.xlu1 %v7054_v52, 272  ;;  %v7144_v52 = vpop.permute.xlu0 %722 }
 0x1a9   : > { %1025 = vbcast.lane.c.b16.xlu0 %v7042_v23, 272  ;;  %v7140_v23 = vpop.permute.xlu1 %834  ;;  %11393 = vst [vmem:[#allocation39_spill] sm:$0xff] %v7144_v52 }
 0x1aa   : > { %11392 = vst [vmem:[#allocation38_spill] sm:$0xff] %v7140_v23 }
 0x1ac   : > { %689 = vbcast.lane.c.b16.xlu1 %v7059_v24, 272 }
 0x1ad   : > { %1094 = vbcast.lane.c.b16.xlu0 %v7046_v63, 272  ;;  %v793_v63 = vrot.slane %v6846_v21, %v6943_v28  ;;  %v7147_v24 = vpop.permute.xlu1 %922  ;;  %v7165_v28 = vrot.slane %v6886_v46, %v7006_v47 }
 0x1ae   : > { %11394 = vst [vmem:[#allocation40_spill] sm:$0xff] %v7147_v24 }
 0x1b0   : > { %777 = vbcast.lane.c.b16.xlu1 %v7064_v14, 272  ;;  %v7151_v14 = vrot.slane %v6899_v50, %v7104_v54 }
 0x1b1   : > { %1126 = vbcast.lane.c.b16.xlu0 %v1124_v16, 256  ;;  %v7160_v21 = vpop.permute.xlu1 %1010 }
 0x1b2   : > { %11396 = vst [vmem:[#allocation42_spill] sm:$0xff] %v7160_v21 }
 0x1b4   : > { %860 = vbcast.lane.c.b16.xlu1 %v7069_v8, 272  ;;  %v7154_v8 = vpop.permute.xlu0 %751 }
 0x1b5   : > { %707 = vbcast.lane.c.b16.xlu0 %v705_v53, 256  ;;  %11395 = vst [vmem:[#allocation41_spill] sm:$0xff] %v7154_v8 }
 0x1b8   : > { %948 = vbcast.lane.c.b16.xlu1 %v7074_v20, 272  ;;  %v7167_v50 = vpop.permute.xlu0 %908  ;;  %v7170_v20 = vpop.permute.xlu1 %674 }
 0x1b9   : > { %795 = vbcast.lane.c.b16.xlu0 %v793_v63, 256  ;;  %11397 = vst [vmem:[#allocation43_spill] sm:$0xff] %v7167_v50  ;;  %11398 = vst [vmem:[#allocation44_spill] sm:$0xff] %v7170_v20 }
 0x1bc   : > { %1036 = vbcast.lane.c.b16.xlu1 %v1030_v62, 272  ;;  %v7177_v19 = vpop.permute.xlu0 %999  ;;  %v7179_v38 = vpop.permute.xlu1 %762 }
 0x1bd   : > { %878 = vbcast.lane.c.b16.xlu0 %v7151_v14, 256  ;;  %11399 = vst [vmem:[#allocation45_spill] sm:$0xff] %v7177_v19  ;;  %11400 = vst [vmem:[#allocation46_spill] sm:$0xff] %v7179_v38 }
 0x1c0   : > { %1119 = vbcast.lane.c.b16.xlu1 %v1113_v0, 272  ;;  %v7185_v17 = vpop.permute.xlu0 %656  ;;  %v7188_v34 = vpop.permute.xlu1 %827 }
 0x1c1   : > { %966 = vbcast.lane.c.b16.xlu0 %v7158_v48, 256  ;;  %11401 = vst [vmem:[#allocation47_spill] sm:$0xff] %v7185_v17  ;;  %11402 = vst [vmem:[#allocation48_spill] sm:$0xff] %v7188_v34 }
 0x1c4   : > { %700 = vbcast.lane.c.b16.xlu1 %v694_v51, 272  ;;  %v7195_v32 = vpop.permute.xlu0 %744  ;;  %v7197_v41 = vpop.permute.xlu1 %933 }
 0x1c5   : > { %1054 = vbcast.lane.c.b16.xlu0 %v7165_v28, 256  ;;  %11403 = vst [vmem:[#allocation49_spill] sm:$0xff] %v7195_v32  ;;  %11404 = vst [vmem:[#allocation50_spill] sm:$0xff] %v7197_v41 }
 0x1c8   : > { %871 = vbcast.lane.c.b16.xlu1 %v865_v39, 272  ;;  %v7204_v45 = vpop.permute.xlu0 %813  ;;  %v7207_v42 = vpop.permute.xlu1 %1090 }
 0x1c9   : > { %1137 = vbcast.lane.c.b16.xlu0 %v7174_v11, 256  ;;  %11405 = vst [vmem:[#allocation51_spill] sm:$0xff] %v7204_v45  ;;  %11406 = vst [vmem:[#allocation52_spill] sm:$0xff] %v7207_v42 }
 0x1cc   : > { %959 = vbcast.lane.c.b16.xlu1 %v953_v25, 272  ;;  %v7209_v44 = vpop.permute.xlu0 %845  ;;  %v7211_v26 = vpop.permute.xlu1 %667 }
 0x1cd   : > { %788 = vbcast.lane.c.b16.xlu0 %v782_v58, 272  ;;  %11407 = vst [vmem:[#allocation53_spill] sm:$0xff] %v7209_v44  ;;  %11408 = vst [vmem:[#allocation54_spill] sm:$0xff] %v7211_v26 }
 0x1d0   : > { %1047 = vbcast.lane.c.b16.xlu1 %v1041_v22, 272  ;;  %v7213_v30 = vpop.permute.xlu0 %1021  ;;  %v7215_v13 = vpop.permute.xlu1 %755 }
 0x1d1   : > { %889 = vbcast.lane.c.b16.xlu0 %v7183_v4, 256  ;;  %11409 = vst [vmem:[#allocation55_spill] sm:$0xff] %v7213_v30  ;;  %11410 = vst [vmem:[#allocation56_spill] sm:$0xff] %v7215_v13  ;;  %v7242_v13 = vsub.s32 %v6754_v31, %v6715_v1 }
 0x1d3   : > { %11417 = vst [vmem:[#allocation63_spill] sm:$0xff] %v7242_v13 }
 0x1d4   : > { %1130 = vbcast.lane.c.b16.xlu1 %v1124_v16, 272  ;;  %v7217_v10 = vpop.permute.xlu0 %1104  ;;  %v7219_v56 = vpop.permute.xlu1 %838  ;;  %v581_v16 = vadd.s32 4294967288, %v6754_v31 }
 0x1d5   : > { %977 = vbcast.lane.c.b16.xlu0 %v7192_v40, 256  ;;  %11411 = vst [vmem:[#allocation57_spill] sm:$0xff] %v7217_v10 }
 0x1d8   : > { %711 = vbcast.lane.c.b16.xlu1 %v705_v53, 272  ;;  %v7221_v0 = vpop.permute.xlu0 %685  ;;  %v7223_v15 = vpop.permute.xlu1 %912  ;;  %v588_v53 = vadd.s32 4294967280, %v6754_v31 }
 0x1d9   : > { %1065 = vbcast.lane.c.b16.xlu0 %v6947_v5, 256  ;;  %11412 = vst [vmem:[#allocation58_spill] sm:$0xff] %v7223_v15 }
 0x1dc   : > { %v7225_v51 = vpop.permute.xlu0 %773  ;;  %v7227_v62 = vpop.permute.xlu1 %944 }
 0x1dd   : > { %1148 = vbcast.lane.c.b16.xlu0 %v7202_v49, 256  ;;  %11413 = vst [vmem:[#allocation59_spill] sm:$0xff] %v7227_v62  ;;  %v7245_v62 = vsub.s32 %v581_v16, %v6715_v1 }
 0x1df   : > { %11418 = vst [vmem:[#allocation64_spill] sm:$0xff] %v7245_v62 }
 0x1e0   : > { %v7229_v58 = vpop.permute.xlu0 %856  ;;  %v7231_v39 = vpop.permute.xlu1 %1014 }
 0x1e1   : > { %799 = vbcast.lane.c.b16.xlu0 %v793_v63, 272  ;;  %11414 = vst [vmem:[#allocation60_spill] sm:$0xff] %v7231_v39  ;;  %v7248_v39 = vsub.s32 %v588_v53, %v6715_v1 }
 0x1e3   : > { %11419 = vst [vmem:[#allocation65_spill] sm:$0xff] %v7248_v39 }
 0x1e4   : > { %v7233_v25 = vpop.permute.xlu0 %926 }
 0x1e5   : > { %11415 = vst [vmem:[#allocation61_spill] sm:$0xff] %v7233_v25 }
 0x1e8   : > { %v7238_v47 = vpop.permute.xlu0 %1003 }
 0x1e9   : > { %11416 = vst [vmem:[#allocation62_spill] sm:$0xff] %v7238_v47  ;;  %v6231_v47 = vpop.eup %6230 }
 0x207   : > { %v570_v22 = vpop.permute.xlu1 %569 }
 0x208   : > { %v580_v25 = vrot.slane %v570_v22, %v7242_v13  ;;  %v986_v13 = vrot.slane %v6886_v46, %v7104_v54 }
 0x20b   : > { %v576_v63 = vpop.permute.xlu1 %575 }
 0x20c   : > { %v592_v42 = vrot.slane %v576_v63, %v7248_v39  ;;  %v224_v39 = vld [vmem:[%s11124_s2 + $0x8] sm:$0xff] }
 0x20f   : > { %v7250_v15 = vpop.permute.xlu1 %1115 }
 0x210   : > { %11420 = vst [vmem:[#allocation66_spill] sm:$0xff] %v7250_v15  ;;  %v573_v9 = vpop.permute.xlu0 %572 }
 0x211   : > { %v585_v26 = vrot.slane %v573_v9, %v7245_v62 }
 0x213   : > { %v587_v31 = vsel %vm586_vm8, %v585_v26, %v580_v25  ;;  %v7256_v10 = vpop.permute.xlu1 %696 }
 0x214   : > { %v594_v16 = vsel %vm593_vm9, %v592_v42, %v587_v31  ;;  %v7259_v53 = vpop.permute.xlu0 %1032 }
 0x215   : > { %11421 = vst [vmem:[#allocation67_spill] sm:$0xff] %v7259_v53  ;;  %v596_v44 = vsub.f32 %v6231_v47, %v594_v16 }
 0x217   : > { %6232 = vrcp.f32 %v596_v44  ;;  %v7261_v15 = vpop.permute.xlu1 %784 }
 0x218   : > { %v7263_v34 = vpop.permute.xlu0 %678 }
 0x21b   : > { %v7265_v22 = vpop.permute.xlu1 %867 }
 0x21c   : > { %v7267_v9 = vpop.permute.xlu0 %766 }
 0x21f   : > { %v7269_v62 = vpop.permute.xlu1 %955 }
 0x220   : > { %11422 = vst [vmem:[#allocation68_spill] sm:$0xff] %v7269_v62  ;;  %v7271_v63 = vpop.permute.xlu0 %849 }
 0x221   : > { %v7273_v26 = vpop.eup %6232 }
 0x222   : > { %11423 = vst [vmem:[#allocation69_spill] sm:$0xff] %v7273_v26  ;;  %v1179_v31 = vrot.slane %v7273_v26, %v6721_v3 }
 0x223   : > { %v7277_v42 = vpop.permute.xlu1 %1043 }
 0x224   : > { %11424 = vst [vmem:[#allocation70_spill] sm:$0xff] %v7277_v42  ;;  %1185 = vbcast.lane.b32.xlu0 %v1179_v31, 264  ;;  %1181 = vbcast.lane.b32.xlu1 %v1179_v31, 256  ;;  %v7279_v47 = vpop.permute.xlu0 %937 }
 0x225   : > { %11425 = vst [vmem:[#allocation71_spill] sm:$0xff] %v7279_v47 }
 0x227   : > { %v7281_v44 = vpop.permute.xlu1 %1108 }
 0x228   : > { %11426 = vst [vmem:[#allocation72_spill] sm:$0xff] %v7281_v44  ;;  %970 = vbcast.lane.c.b16.xlu0 %v7158_v48, 272  ;;  %1189 = vbcast.lane.b32.xlu1 %v1179_v31, 272  ;;  %v7284_v25 = vpop.permute.xlu0 %1025  ;;  %v3211_v48 = vpack.c.bf16 %v224_v39, %v224_v39  ;;  %v11433_v39 = vld [vmem:[#allocation20_spill] sm:$0xff] }
 0x229   : > { %11427 = vst [vmem:[#allocation73_spill] sm:$0xff] %v7284_v25 }
 0x22a   : > { %v3213_v46 = vshrl.u32 %v3211_v48, 16  ;;  %v7325_v25 = vpack.i.b16 %v3211_v48, %v3211_v48 }
 0x22b   : > { %v7286_v16 = vpop.permute.xlu1 %689 }
 0x22c   : > { %11428 = vst [vmem:[#allocation74_spill] sm:$0xff] %v7286_v16  ;;  %1058 = vbcast.lane.c.b16.xlu0 %v7165_v28, 272  ;;  %882 = vbcast.lane.c.b16.xlu1 %v7151_v14, 272  ;;  %v7290_v26 = vpop.permute.xlu0 %1094  ;;  %v7305_v14 = vld [vmem:[%s11124_s2] sm:$0xff]  ;;  %11437 = vst [vmem:[#allocation81_spill] sm:$0xff] %v7325_v25  ;;  %v7343_v48 = vrot.slane %v7325_v25, %v6729_v7 }
 0x22d   : > { %11429 = vst [vmem:[#allocation75_spill] sm:$0xff] %v7290_v26  ;;  %v7311_v26 = vpack.c.bf16 %v7305_v14, %v7305_v14  ;;  %v1255_v27 = vrot.slane %v7305_v14, %v6800_v60 }
 0x22e   : > { %11440 = vst [vmem:[#allocation84_spill] sm:$0xff] %v7343_v48  ;;  %v4729_v25 = vmul.bf16 %v7343_v48, %v7221_v0 }
 0x22f   : > { %v7297_v44 = vpop.permute.xlu1 %777  ;;  %v1701_v16 = vpack.i.b16 %v7311_v26, %v7311_v26  ;;  %v7509_v60 = vmul.f32 %v1255_v27, %v6872_v35 }
 0x230   : > { %11430 = vst [vmem:[#allocation76_spill] sm:$0xff] %v7297_v44  ;;  %1141 = vbcast.lane.c.b16.xlu0 %v7174_v11, 272  ;;  %988 = vbcast.lane.c.b16.xlu1 %v986_v13, 256  ;;  %v7300_v31 = vpop.permute.xlu0 %1126 }
 0x231   : > { %11431 = vst [vmem:[#allocation77_spill] sm:$0xff] %v7300_v31  ;;  %v1157_v31 = vrot.slane %v7036_v59, %v7104_v54  ;;  %v7335_v59 = vrot.slane %v1701_v16, %v7104_v54 }
 0x233   : > { %v7307_v28 = vpop.permute.xlu1 %860 }
 0x234   : > { %11432 = vst [vmem:[#allocation78_spill] sm:$0xff] %v7307_v28  ;;  %893 = vbcast.lane.c.b16.xlu0 %v7183_v4, 272  ;;  %1076 = vbcast.lane.c.b16.xlu1 %v11433_v39, 256  ;;  %v7315_v11 = vpop.permute.xlu0 %707  ;;  %v7323_v28 = vpack.i.b16 %v3213_v46, %v3213_v46  ;;  %v4756_v46 = vmul.bf16 %v7343_v48, %v7219_v56 }
 0x235   : > { %11434 = vst [vmem:[#allocation20_spill] sm:$0xff] %v7315_v11  ;;  %v1168_v11 = vrot.slane %v7048_v6, %v7104_v54  ;;  %v1744_v6 = vmul.bf16 %v7335_v59, %v7219_v56 }
 0x236   : > { %11436 = vst [vmem:[#allocation80_spill] sm:$0xff] %v7323_v28 }
 0x237   : > { %v7319_v44 = vpop.permute.xlu1 %948 }
 0x238   : > { %11435 = vst [vmem:[#allocation79_spill] sm:$0xff] %v7319_v44  ;;  %1069 = vbcast.lane.c.b16.xlu0 %v6947_v5, 272  ;;  %1159 = vbcast.lane.c.b16.xlu1 %v1157_v31, 256  ;;  %v7328_v4 = vpop.permute.xlu0 %795  ;;  %v7339_v44 = vrot.slane %v7323_v28, %v6718_v2 }
 0x239   : > { %11438 = vst [vmem:[#allocation82_spill] sm:$0xff] %v7328_v4 }
 0x23a   : > { %v3257_v16 = vmul.bf16 %v7339_v44, %v7219_v56  ;;  %v3230_v28 = vmul.bf16 %v7339_v44, %v7221_v0 }
 0x23b   : > { %v7332_v47 = vpop.permute.xlu1 %1036 }
 0x23c   : > { %11439 = vst [vmem:[#allocation83_spill] sm:$0xff] %v7332_v47  ;;  %1170 = vbcast.lane.c.b16.xlu0 %v1168_v11, 256  ;;  %981 = vbcast.lane.c.b16.xlu1 %v7192_v40, 272  ;;  %v7346_v5 = vpop.permute.xlu0 %878 }
 0x23d   : > { %11441 = vst [vmem:[#allocation85_spill] sm:$0xff] %v7346_v5 }
 0x23f   : > { %v1120_v47 = vpop.permute.xlu1 %1119 }
 0x240   : > { %v7358_v4 = vadd.bf16 %v1744_v6, %v1120_v47  ;;  %v7360_v40 = vadd.bf16 %v3257_v16, %v1120_v47  ;;  %v7362_v5 = vadd.bf16 %v4756_v46, %v1120_v47  ;;  %1080 = vbcast.lane.c.b16.xlu0 %v11433_v39, 272  ;;  %1152 = vbcast.lane.c.b16.xlu1 %v7202_v49, 272  ;;  %v7366_v42 = vpop.permute.xlu0 %966 }
 0x241   : > { %v7369_v56 = vadd.bf16 %v3230_v28, %v7366_v42  ;;  %v7372_v62 = vadd.bf16 %v4729_v25, %v7366_v42  ;;  %v3246_v6 = vmul.bf16 %v7339_v44, %v7225_v51  ;;  %v4745_v16 = vmul.bf16 %v7343_v48, %v7225_v51 }
 0x242   : > { %11442 = vst [vmem:[#allocation86_spill] sm:$0xff] %v7358_v4  ;;  %11443 = vst [vmem:[#allocation87_spill] sm:$0xff] %v7360_v40  ;;  %v1747_v25 = vmul.bf16 %v7335_v59, %v7229_v58  ;;  %v3260_v46 = vmul.bf16 %v7339_v44, %v7229_v58 }
 0x243   : > { %11444 = vst [vmem:[#allocation88_spill] sm:$0xff] %v7362_v5  ;;  %11445 = vst [vmem:[#allocation89_spill] sm:$0xff] %v7369_v56  ;;  %v7378_v47 = vpop.permute.xlu1 %700  ;;  %v4759_v5 = vmul.bf16 %v7343_v48, %v7229_v58  ;;  %v3232_v56 = vmul.bf16 %v7339_v44, %v7256_v10 }
 0x244   : > { %11446 = vst [vmem:[#allocation90_spill] sm:$0xff] %v7372_v62  ;;  %11447 = vst [vmem:[#allocation91_spill] sm:$0xff] %v7378_v47  ;;  %1174 = vbcast.lane.c.b16.xlu0 %v1168_v11, 272  ;;  %992 = vbcast.lane.c.b16.xlu1 %v986_v13, 272  ;;  %v7380_v39 = vpop.permute.xlu0 %1054 }
 0x245   : > { %v7383_v49 = vadd.bf16 %v3246_v6, %v7380_v39  ;;  %v7386_v28 = vadd.bf16 %v4745_v16, %v7380_v39  ;;  %v3229_v16 = vmul.bf16 %v7339_v44, %v7263_v34 }
 0x247   : > { %11448 = vst [vmem:[#allocation92_spill] sm:$0xff] %v7383_v49  ;;  %11449 = vst [vmem:[#allocation93_spill] sm:$0xff] %v7386_v28  ;;  %v7394_v62 = vpop.permute.xlu1 %871  ;;  %v4728_v28 = vmul.bf16 %v7343_v48, %v7263_v34 }
 0x248   : > { %11450 = vst [vmem:[#allocation94_spill] sm:$0xff] %v7394_v62  ;;  %1163 = vbcast.lane.c.b16.xlu1 %v1157_v31, 272  ;;  %v1138_v13 = vpop.permute.xlu0 %1137 }
 0x249   : > { %v7396_v11 = vadd.bf16 %v1747_v25, %v1138_v13  ;;  %v7398_v6 = vadd.bf16 %v3260_v46, %v1138_v13  ;;  %v7400_v40 = vadd.bf16 %v4759_v5, %v1138_v13  ;;  %v3245_v5 = vmul.bf16 %v7339_v44, %v7267_v9 }
 0x24a   : > { %v4744_v46 = vmul.bf16 %v7343_v48, %v7267_v9 }
 0x24b   : > { %11451 = vst [vmem:[#allocation95_spill] sm:$0xff] %v7396_v11  ;;  %11452 = vst [vmem:[#allocation96_spill] sm:$0xff] %v7398_v6  ;;  %v7406_v49 = vpop.permute.xlu1 %959 }
 0x24c   : > { %11453 = vst [vmem:[#allocation97_spill] sm:$0xff] %v7400_v40  ;;  %v7409_v58 = vadd.bf16 %v3229_v16, %v7406_v49  ;;  %v7412_v31 = vadd.bf16 %v4728_v28, %v7406_v49  ;;  %v7414_v25 = vpop.permute.xlu0 %788  ;;  %v3259_v28 = vmul.bf16 %v7339_v44, %v7271_v63 }
 0x24d   : > { %11456 = vst [vmem:[#allocation100_spill] sm:$0xff] %v7414_v25 }
 0x24e   : > { %11454 = vst [vmem:[#allocation98_spill] sm:$0xff] %v7409_v58  ;;  %11455 = vst [vmem:[#allocation99_spill] sm:$0xff] %v7412_v31  ;;  %v4758_v31 = vmul.bf16 %v7343_v48, %v7271_v63  ;;  %v4731_v58 = vmul.bf16 %v7343_v48, %v7256_v10 }
 0x24f   : > { %v7420_v13 = vpop.permute.xlu1 %1047 }
 0x250   : > { %11457 = vst [vmem:[#allocation101_spill] sm:$0xff] %v7420_v13  ;;  %v7423_v40 = vadd.bf16 %v3245_v5, %v7420_v13  ;;  %v7426_v6 = vadd.bf16 %v4744_v46, %v7420_v13  ;;  %v7428_v16 = vpop.permute.xlu0 %889  ;;  %v4747_v13 = vmul.bf16 %v7343_v48, %v7261_v15 }
 0x251   : > { %11460 = vst [vmem:[#allocation104_spill] sm:$0xff] %v7428_v16  ;;  %v3248_v16 = vmul.bf16 %v7339_v44, %v7261_v15 }
 0x252   : > { %11458 = vst [vmem:[#allocation102_spill] sm:$0xff] %v7423_v40  ;;  %11459 = vst [vmem:[#allocation103_spill] sm:$0xff] %v7426_v6 }
 0x253   : > { %v7438_v11 = vpop.permute.xlu1 %1130 }
 0x254   : > { %11461 = vst [vmem:[#allocation105_spill] sm:$0xff] %v7438_v11  ;;  %v7441_v5 = vadd.bf16 %v3259_v28, %v7438_v11  ;;  %v7444_v46 = vadd.bf16 %v4758_v31, %v7438_v11  ;;  %v7446_v6 = vpop.permute.xlu0 %977 }
 0x255   : > { %11464 = vst [vmem:[#allocation108_spill] sm:$0xff] %v7446_v6  ;;  %v7449_v40 = vadd.bf16 %v3232_v56, %v7446_v6  ;;  %v7452_v4 = vadd.bf16 %v4731_v58, %v7446_v6  ;;  %v3262_v56 = vmul.bf16 %v7339_v44, %v7265_v22  ;;  %v4761_v58 = vmul.bf16 %v7343_v48, %v7265_v22 }
 0x256   : > { %11462 = vst [vmem:[#allocation106_spill] sm:$0xff] %v7441_v5  ;;  %11463 = vst [vmem:[#allocation107_spill] sm:$0xff] %v7444_v46 }
 0x257   : > { %11465 = vst [vmem:[#allocation109_spill] sm:$0xff] %v7449_v40  ;;  %11466 = vst [vmem:[#allocation110_spill] sm:$0xff] %v7452_v4  ;;  %v6630_v40 = vmov 0.0  }
 0x258   : > { %v7458_v25 = vpop.permute.xlu0 %1065 }
 0x259   : > { %11467 = vst [vmem:[#allocation111_spill] sm:$0xff] %v7458_v25  ;;  %v7461_v28 = vadd.bf16 %v3248_v16, %v7458_v25  ;;  %v7464_v31 = vadd.bf16 %v4747_v13, %v7458_v25  ;;  %v1851_v16 = vshrl.u32 %v7311_v26, 16  ;;  %v7503_v26 = vmul.f32 %v1255_v27, %v6840_v18 }
 0x25b   : > { %11468 = vst [vmem:[#allocation112_spill] sm:$0xff] %v7461_v28  ;;  %11469 = vst [vmem:[#allocation113_spill] sm:$0xff] %v7464_v31  ;;  %v606_v28 = vsel %vm6805_vm4, 1.0, %v6630_v40  ;;  %v607_v31 = vsel %vm7013_vm7, 1.0, %v6630_v40  ;;  %v1852_v6 = vpack.i.b16 %v1851_v16, %v1851_v16  ;;  %vm2218_vm4 = vcmask 523264  }
 0x25c   : > { %v7470_v46 = vpop.permute.xlu0 %1148  ;;  %v611_v13 = vsel %vm482_vm12, %v606_v28, 0.0  ;;  %v614_v25 = vsel %vm482_vm12, %v607_v31, 0.0  ;;  %v1226_v28 = vrot.slane %v7305_v14, %v6729_v7  ;;  %v11475_v31 = vld [vmem:[#allocation19_spill] sm:$0xff]  ;;  %v11480_v7 = vld [vmem:[#allocation25_spill] sm:$0xff] }
 0x25d   : > { %11470 = vst [vmem:[#allocation114_spill] sm:$0xff] %v7470_v46  ;;  %v7473_v4 = vadd.bf16 %v3262_v56, %v7470_v46  ;;  %v7476_v5 = vadd.bf16 %v4761_v58, %v7470_v46  ;;  %v605_v56 = vsel %vm6826_vm6, 1.0, %v6630_v40  ;;  %v6631_v58 = vmov 1966171168  }
 0x25e   : > { %v1245_v40 = vrot.slane %v7305_v14, %v11475_v31  ;;  %v7527_v31 = vrot.slane %v1852_v6, %v7104_v54  ;;  %v11482_v6 = vld [vmem:[#allocation27_spill] sm:$0xff]  ;;  %vm2555_vm6 = vcmask 1041409  }
 0x25f   : > { %11471 = vst [vmem:[#allocation115_spill] sm:$0xff] %v7473_v4  ;;  %11472 = vst [vmem:[#allocation116_spill] sm:$0xff] %v7476_v5  ;;  %v608_v4 = vsel %vm482_vm12, %v605_v56, 0.0  ;;  %v1268_v5 = vunpack.c.l.s4 %v6631_v58  ;;  %v7512_v56 = vmul.f32 %v1226_v28, %v6874_v36 }
 0x260   : > { %11478 = vst [vmem:[#allocation19_spill] sm:$0xff] %v7527_v31 }
 0x261   : > { %v1269_v46 = vunpack.c.0.s8 %v1268_v5  ;;  %v7506_v5 = vmul.f32 %v1226_v28, %v6872_v35  ;;  %v7530_v35 = vmul.f32 %v1245_v40, %v7079_v37 }
 0x263   : > { %612 = vadd.xlane.f32.xlu0 %v611_v13  ;;  %v7500_v13 = vmul.f32 %v1226_v28, %v6840_v18  ;;  %v7524_v18 = vmul.f32 %v1255_v27, %v6874_v36  ;;  %v11481_v36 = vld [vmem:[#allocation28_spill] sm:$0xff] }
 0x264   : > { %v1723_v27 = vmul.bf16 %v7335_v59, %v11481_v36  ;;  %v1708_v36 = vmul.bf16 %v7335_v59, %v7101_v43 }
 0x265   : > { %11477 = vst [vmem:[#allocation18_spill] sm:$0xff] %v7524_v18  ;;  %v1709_v18 = vmul.bf16 %v7335_v59, %v11482_v6  ;;  %v1724_v6 = vmul.bf16 %v7335_v59, %v7144_v52 }
 0x266   : > { %v7572_v43 = vadd.bf16 %v1723_v27, %v7177_v19  ;;  %v1740_v27 = vmul.bf16 %v7335_v59, %v7204_v45  ;;  %v11491_v19 = vld [vmem:[#allocation57_spill] sm:$0xff]  ;;  %v11503_v45 = vld [vmem:[#allocation62_spill] sm:$0xff] }
 0x267   : > { %615 = vadd.xlane.f32.xlu0 %v614_v25  ;;  %v1216_v25 = vrot.slane %v7305_v14, %v6721_v3  ;;  %v1727_v3 = vmul.bf16 %v7335_v59, %v11480_v7  ;;  %v1710_v7 = vmul.bf16 %v7335_v59, %v7135_v29  ;;  %v1729_v29 = vmul.bf16 %v7335_v59, %v7154_v8 }
 0x268   : > { %v7575_v52 = vadd.bf16 %v1709_v18, %v7147_v24  ;;  %v1728_v8 = vmul.bf16 %v7335_v59, %v7195_v32  ;;  %v11490_v24 = vld [vmem:[#allocation53_spill] sm:$0xff] }
 0x269   : > { %v7515_v58 = vmul.f32 %v1216_v25, %v7083_v61  ;;  %v7521_v16 = vmul.f32 %v1216_v25, %v7079_v37  ;;  %v7533_v28 = vmul.f32 %v1216_v25, %v7081_v55  ;;  %v11483_v37 = vld [vmem:[#allocation30_spill] sm:$0xff]  ;;  %v11484_v25 = vld [vmem:[#allocation29_spill] sm:$0xff]  ;;  %v7591_v18 = vadd.bf16 %v1727_v3, %v7213_v30 }
 0x26a   : > { %v1711_v11 = vmul.bf16 %v7335_v59, %v11483_v37  ;;  %v1725_v31 = vmul.bf16 %v7335_v59, %v11484_v25  ;;  %v1713_v37 = vmul.bf16 %v7335_v59, %v7125_v12  ;;  %v11495_v3 = vld [vmem:[#allocation54_spill] sm:$0xff] }
 0x26b   : > { %11488 = vst [vmem:[#allocation119_spill] sm:$0xff] %v7591_v18  ;;  %v1714_v30 = vmul.bf16 %v7335_v59, %v11495_v3  ;;  %v11498_v18 = vld [vmem:[#allocation58_spill] sm:$0xff]  ;;  %v11505_v3 = vld [vmem:[#allocation59_spill] sm:$0xff] }
 0x26c   : > { %609 = vadd.xlane.f32.xlu1 %v608_v4  ;;  %v7497_v4 = vsub.s32 %v1269_v46, %v6715_v1  ;;  %v7518_v46 = vmul.f32 %v1245_v40, %v7083_v61  ;;  %v7536_v1 = vmul.f32 %v1245_v40, %v7081_v55  ;;  %v1707_v61 = vmul.bf16 %v7335_v59, %v7087_v57  ;;  %v11485_v40 = vld [vmem:[#allocation32_spill] sm:$0xff] }
 0x26d   : > { %v1739_v55 = vmul.bf16 %v7335_v59, %v11485_v40  ;;  %v1726_v40 = vmul.bf16 %v7335_v59, %v7130_v33  ;;  %v7578_v12 = vadd.bf16 %v1725_v31, %v7160_v21  ;;  %v7594_v31 = vadd.bf16 %v1711_v11, %v7197_v41  ;;  %v11489_v21 = vld [vmem:[#allocation48_spill] sm:$0xff]  ;;  %v11496_v41 = vld [vmem:[#allocation61_spill] sm:$0xff] }
 0x26e   : > { %11476 = vst [vmem:[#allocation17_spill] sm:$0xff] %v7497_v4  ;;  %11479 = vst [vmem:[#allocation117_spill] sm:$0xff] %v7536_v1  ;;  %v11486_v1 = vld [vmem:[#allocation31_spill] sm:$0xff]  ;;  %v7563_v25 = vadd.bf16 %v1707_v61, %v7167_v50  ;;  %v1712_v61 = vmul.bf16 %v7335_v59, %v7185_v17  ;;  %v1715_v50 = vmul.bf16 %v7335_v59, %v7170_v20  ;;  %v11493_v33 = vld [vmem:[#allocation52_spill] sm:$0xff] }
 0x26f   : > { %v1741_v57 = vmul.bf16 %v7335_v59, %v11486_v1  ;;  %v1743_v1 = vmul.bf16 %v7335_v59, %v7140_v23  ;;  %11487 = vst [vmem:[#allocation118_spill] sm:$0xff] %v7578_v12  ;;  %v1731_v23 = vmul.bf16 %v7335_v59, %v7179_v38  ;;  %v1742_v17 = vmul.bf16 %v7335_v59, %v11489_v21  ;;  %v11506_v11 = vld [vmem:[#allocation60_spill] sm:$0xff] }
 0x270   : > { %v1745_v20 = vmul.bf16 %v7335_v59, %v11490_v24  ;;  %v7604_v32 = vadd.bf16 %v1739_v55, %v11493_v33  ;;  %v7613_v21 = vadd.bf16 %v1710_v7, %v11496_v41  ;;  %v7616_v24 = vadd.bf16 %v1708_v36, %v11498_v18  ;;  %v7620_v55 = vpop.permute.xlu1 %711  ;;  %v7622_v33 = vpop.permute.xlu0 %799  ;;  %v11508_v36 = vld [vmem:[#allocation66_spill] sm:$0xff]  ;;  %v11510_v41 = vld [vmem:[#allocation68_spill] sm:$0xff] }
 0x271   : > { %v7601_v38 = vadd.bf16 %v1741_v57, %v11491_v19  ;;  %v11500_v57 = vld [vmem:[#allocation56_spill] sm:$0xff]  ;;  %11501 = vst [vmem:[#allocation124_spill] sm:$0xff] %v7620_v55  ;;  %11502 = vst [vmem:[#allocation125_spill] sm:$0xff] %v7622_v33  ;;  %v7631_v12 = vadd.bf16 %v1726_v40, %v11506_v11  ;;  %v7635_v7 = vrot.slane %v7305_v14, %v6718_v2 }
 0x272   : > { %11494 = vst [vmem:[#allocation121_spill] sm:$0xff] %v7604_v32  ;;  %11497 = vst [vmem:[#allocation122_spill] sm:$0xff] %v7613_v21  ;;  %v1730_v19 = vmul.bf16 %v7335_v59, %v11500_v57  ;;  %v7628_v32 = vadd.bf16 %v1713_v37, %v11505_v3  ;;  %v7638_v18 = vadd.bf16 %v1743_v1, %v11508_v36  ;;  %v11515_v1 = vld [vmem:[#allocation73_spill] sm:$0xff] }
 0x273   : > { %11492 = vst [vmem:[#allocation120_spill] sm:$0xff] %v7601_v38  ;;  %11499 = vst [vmem:[#allocation123_spill] sm:$0xff] %v7616_v24  ;;  %v7625_v38 = vadd.bf16 %v1724_v6, %v11503_v45  ;;  %v7643_v57 = vadd.bf16 %v1729_v29, %v7259_v53  ;;  %v7647_v37 = vrot.slane %v7305_v14, %v7104_v54  ;;  %v11511_v14 = vld [vmem:[#allocation70_spill] sm:$0xff]  ;;  %v11512_v53 = vld [vmem:[#allocation71_spill] sm:$0xff] }
 0x274   : > { %11507 = vst [vmem:[#allocation127_spill] sm:$0xff] %v7631_v12  ;;  %11509 = vst [vmem:[#allocation128_spill] sm:$0xff] %v7638_v18  ;;  %v7658_v11 = vadd.bf16 %v1715_v50, %v11510_v41  ;;  %v7663_v54 = vadd.bf16 %v1731_v23, %v11511_v14  ;;  %v7666_v6 = vadd.bf16 %v1712_v61, %v11512_v53  ;;  %v11514_v45 = vld [vmem:[#allocation72_spill] sm:$0xff]  ;;  %v11517_v41 = vld [vmem:[#allocation74_spill] sm:$0xff] }
 0x275   : > { %11504 = vst [vmem:[#allocation126_spill] sm:$0xff] %v7625_v38  ;;  %v7669_v12 = vadd.bf16 %v1742_v17, %v11514_v45  ;;  %v7672_v38 = vadd.bf16 %v1728_v8, %v11515_v1  ;;  %v3231_v23 = vmul.bf16 %v7339_v44, %v11517_v41  ;;  %v4730_v61 = vmul.bf16 %v7343_v48, %v11517_v41  ;;  %v11518_v53 = vld [vmem:[#allocation75_spill] sm:$0xff]  ;;  %v11519_v17 = vld [vmem:[#allocation76_spill] sm:$0xff] }
 0x276   : > { %11513 = vst [vmem:[#allocation129_spill] sm:$0xff] %v7666_v6  ;;  %v7683_v14 = vadd.bf16 %v1740_v27, %v11518_v53  ;;  %v3247_v1 = vmul.bf16 %v7339_v44, %v11519_v17  ;;  %v4746_v29 = vmul.bf16 %v7343_v48, %v11519_v17  ;;  %v11520_v6 = vld [vmem:[#allocation77_spill] sm:$0xff] }
 0x277   : > { %11516 = vst [vmem:[#allocation130_spill] sm:$0xff] %v7672_v38  ;;  %v7694_v21 = vadd.bf16 %v1745_v20, %v11520_v6 }
 0x296   : > { %v1182_v3 = vpop.permute.xlu1 %1181  ;;  %v1186_v40 = vpop.permute.xlu0 %1185 }
 0x297   : > { %v1210_v50 = vmul.f32 %v7635_v7, %v1182_v3  ;;  %v1211_v36 = vmul.f32 %v7635_v7, %v1186_v40  ;;  %v1239_v24 = vmul.f32 %v7647_v37, %v1182_v3  ;;  %v1240_v27 = vmul.f32 %v7647_v37, %v1186_v40 }
 0x299   : > { %v1220_v45 = vadd.f32 %v7515_v58, %v1210_v50  ;;  %v1221_v38 = vadd.f32 %v7521_v16, %v1211_v36  ;;  %v11522_v50 = vld [vmem:[#allocation20_spill] sm:$0xff]  ;;  %v1249_v3 = vadd.f32 %v7518_v46, %v1239_v24  ;;  %v1250_v40 = vadd.f32 %v7530_v35, %v1240_v27 }
 0x29a   : > { %v7698_v53 = vpop.permute.xlu0 %970  ;;  %v11532_v46 = vmul.bf16 %v7335_v59, %v7221_v0 }
 0x29b   : > { %v1230_v16 = vadd.f32 %v7500_v13, %v1220_v45  ;;  %v1231_v36 = vadd.f32 %v7506_v5, %v1221_v38  ;;  %v7713_v6 = vadd.bf16 %v3231_v23, %v7698_v53  ;;  %v7718_v45 = vadd.bf16 %v4730_v61, %v7698_v53  ;;  %v11525_v38 = vld [vmem:[#allocation79_spill] sm:$0xff] }
 0x29c   : > { %v7721_v13 = vadd.bf16 %v1714_v30, %v11525_v38  ;;  %v11529_v30 = vld [vmem:[#allocation83_spill] sm:$0xff]  ;;  %v7744_v35 = vadd.bf16 %v11532_v46, %v7366_v42 }
 0x29d   : > { %11523 = vst [vmem:[#allocation74_spill] sm:$0xff] %v7713_v6  ;;  %v1233_v58 = vpack.c.bf16 %v1231_v36, %v1230_v16  ;;  %v5959_v17 = vpack.c.bf16 %v1231_v36, %v1231_v36  ;;  %11524 = vst [vmem:[#allocation20_spill] sm:$0xff] %v7718_v45  ;;  %v7736_v45 = vadd.bf16 %v1730_v19, %v11529_v30 }
 0x29e   : > { %11526 = vst [vmem:[#allocation131_spill] sm:$0xff] %v7721_v13  ;;  %v7733_v18 = vpop.permute.xlu0 %1058  ;;  %11533 = vst [vmem:[#allocation134_spill] sm:$0xff] %v7744_v35  ;;  %v1259_v19 = vadd.f32 %v7503_v26, %v1249_v3  ;;  %v1260_v6 = vadd.f32 %v7509_v60, %v1250_v40 }
 0x29f   : > { %v1273_v36 = vrot.slane %v1233_v58, %v7497_v4  ;;  %v1280_v61 = vrot.slane %v5959_v17, %v7497_v4  ;;  %11528 = vst [vmem:[#allocation132_spill] sm:$0xff] %v7733_v18  ;;  %11530 = vst [vmem:[#allocation133_spill] sm:$0xff] %v7736_v45  ;;  %v7753_v24 = vadd.bf16 %v3247_v1, %v7733_v18 }
 0x2a0   : > { %v7756_v0 = vadd.bf16 %v4746_v29, %v7733_v18  ;;  %v7788_v18 = vpack.c.bf16 %v1260_v6, %v1259_v19  ;;  %v11540_v6 = vmul.bf16 %v7335_v59, %v7225_v51 }
 0x2a1   : > { %v1281_v58 = vcombine.high %v1273_v36, %v1273_v36  ;;  %v1282_v16 = vcombine.high %v1280_v61, %v1280_v61  ;;  %v1289_v17 = vrot.slane %v1273_v36, %v7497_v4  ;;  %v1296_v23 = vrot.slane %v1280_v61, %v7497_v4  ;;  %11534 = vst [vmem:[#allocation135_spill] sm:$0xff] %v7753_v24  ;;  %v1190_v61 = vpop.permute.xlu1 %1189 }
 0x2a2   : > { %11535 = vst [vmem:[#allocation136_spill] sm:$0xff] %v7756_v0  ;;  %v1212_v38 = vmul.f32 %v7635_v7, %v1190_v61 }
 0x2a3   : > { %v7759_v42 = vrot.slane %v1281_v58, %v7497_v4  ;;  %v7762_v46 = vrot.slane %v1282_v16, %v7497_v4  ;;  %v7764_v27 = vcombine.high %v1289_v17, %v1289_v17  ;;  %v7766_v36 = vcombine.high %v1296_v23, %v1296_v23 }
 0x2a4   : > { %v1340_v26 = vunpack.i.h.s16 %v1289_v17  ;;  %v1348_v3 = vunpack.i.h.s16 %v1296_v23  ;;  %v5960_v60 = vpack.i.b16 %v1289_v17, %v1289_v17  ;;  %v5964_v40 = vpack.i.b16 %v1296_v23, %v1296_v23 }
 0x2a5   : > { %11536 = vst [vmem:[#allocation137_spill] sm:$0xff] %v7762_v46  ;;  %v1342_v1 = vunpack.i.h.s16 %v7759_v42  ;;  %v1350_v29 = vunpack.i.h.s16 %v7762_v46  ;;  %v5961_v58 = vpack.i.b16 %v7759_v42, %v7759_v42  ;;  %v5962_v16 = vpack.i.b16 %v7764_v27, %v7764_v27 }
 0x2a6   : > { %v1364_v0 = vpack.i.b16 %v1340_v26, %v1340_v26  ;;  %v1372_v24 = vpack.i.b16 %v1348_v3, %v1348_v3  ;;  %v5966_v30 = vpack.i.b16 %v7766_v36, %v7766_v36  ;;  %v1390_v23 = vrot.slane %v5960_v60, %v6718_v2 }
 0x2a7   : > { %v1366_v45 = vpack.i.b16 %v1342_v1, %v1342_v1  ;;  %v1374_v17 = vpack.i.b16 %v1350_v29, %v1350_v29  ;;  %v1398_v13 = vrot.slane %v5961_v58, %v6718_v2  ;;  %v5965_v47 = vpack.i.b16 %v7762_v46, %v7762_v46 }
 0x2a8   : > { %v1394_v20 = vrot.slane %v1364_v0, %v6718_v2  ;;  %v1406_v5 = vrot.slane %v5962_v16, %v6718_v2  ;;  %v1422_v26 = vrot.slane %v5964_v40, %v6718_v2  ;;  %v1426_v8 = vrot.slane %v1372_v24, %v6718_v2 }
 0x2a9   : > { %v1402_v3 = vrot.slane %v1366_v45, %v6718_v2  ;;  %v1434_v7 = vrot.slane %v1374_v17, %v6718_v2  ;;  %v1438_v1 = vrot.slane %v5966_v30, %v6718_v2  ;;  %v1484_v60 = vpack.i.b16 %v1390_v23, %v1390_v23 }
 0x2aa   : > { %v1491_v29 = vpack.i.b16 %v1394_v20, %v1394_v20  ;;  %v1498_v58 = vpack.i.b16 %v1398_v13, %v1398_v13  ;;  %v1512_v35 = vpack.i.b16 %v1406_v5, %v1406_v5  ;;  %v1540_v0 = vpack.i.b16 %v1422_v26, %v1422_v26 }
 0x2ab   : > { %v1505_v46 = vpack.i.b16 %v1402_v3, %v1402_v3  ;;  %v1222_v16 = vadd.f32 %v7533_v28, %v1212_v38  ;;  %v7792_v40 = vrot.slane %v1484_v60, %v6718_v2  ;;  %v7807_v20 = vadd.bf16 %v11540_v6, %v7380_v39  ;;  %v11548_v6 = vld [vmem:[#allocation117_spill] sm:$0xff] }
 0x2ac   : > { %v7795_v45 = vrot.slane %v1491_v29, %v6718_v2  ;;  %v7798_v24 = vrot.slane %v1498_v58, %v6718_v2  ;;  %v7801_v30 = vrot.slane %v1512_v35, %v6718_v2  ;;  %v1430_v28 = vrot.slane %v5965_v47, %v6718_v2 }
 0x2ad   : > { %v7811_v38 = vrot.slane %v1505_v46, %v6718_v2  ;;  %v1241_v13 = vmul.f32 %v7647_v37, %v1190_v61  ;;  %v1547_v5 = vpack.i.b16 %v1426_v8, %v1426_v8  ;;  %v1561_v19 = vpack.i.b16 %v1434_v7, %v1434_v7 }
 0x2ae   : > { %11537 = vst [vmem:[#allocation138_spill] sm:$0xff] %v7795_v45  ;;  %11538 = vst [vmem:[#allocation139_spill] sm:$0xff] %v7798_v24  ;;  %v1568_v17 = vpack.i.b16 %v1438_v1, %v1438_v1  ;;  %v1651_v35 = vadd.bf16 %v7792_v40, %v7788_v18  ;;  %v1653_v23 = vadd.bf16 %v7795_v45, %v7788_v18 }
 0x2af   : > { %11539 = vst [vmem:[#allocation140_spill] sm:$0xff] %v7801_v30  ;;  %11541 = vst [vmem:[#allocation141_spill] sm:$0xff] %v7811_v38  ;;  %v1657_v51 = vadd.bf16 %v7811_v38, %v7788_v18  ;;  %v1659_v47 = vadd.bf16 %v7801_v30, %v7788_v18  ;;  %v1232_v39 = vadd.f32 %v7512_v56, %v1222_v16 }
 0x2b0   : > { %v7824_v46 = vrot.slane %v1540_v0, %v6718_v2  ;;  %v7827_v37 = vrot.slane %v1561_v19, %v6718_v2  ;;  %v7830_v8 = vrot.slane %v1568_v17, %v6718_v2  ;;  %v1655_v61 = vadd.bf16 %v7798_v24, %v7788_v18 }
 0x2b1   : > { %v1554_v3 = vpack.i.b16 %v1430_v28, %v1430_v28  ;;  %v1803_v7 = vadd.bf16 %v7563_v25, %v1651_v35  ;;  %v1809_v56 = vadd.bf16 %v7628_v32, %v1657_v51  ;;  %v7839_v1 = vrot.slane %v1547_v5, %v6718_v2  ;;  %v11549_v35 = vld [vmem:[#allocation100_spill] sm:$0xff] }
 0x2b2   : > { %11542 = vst [vmem:[#allocation142_spill] sm:$0xff] %v7824_v46  ;;  %11543 = vst [vmem:[#allocation143_spill] sm:$0xff] %v7827_v37  ;;  %v1673_v60 = vadd.bf16 %v7827_v37, %v7788_v18  ;;  %v1675_v29 = vadd.bf16 %v7830_v8, %v7788_v18  ;;  %v1811_v58 = vadd.bf16 %v7658_v11, %v1659_v47  ;;  %v11554_v47 = vld [vmem:[#allocation19_spill] sm:$0xff] }
 0x2b3   : > { %11544 = vst [vmem:[#allocation144_spill] sm:$0xff] %v7830_v8  ;;  %11545 = vst [vmem:[#allocation145_spill] sm:$0xff] %v7839_v1  ;;  %v11546_v0 = vmul.bf16 %v7335_v59, %v7263_v34  ;;  %v1805_v25 = vadd.bf16 %v7575_v52, %v1653_v23  ;;  %v1234_v32 = vpack.c.bf16 %v1232_v39, %v1232_v39 }
 0x2b4   : > { %v1251_v28 = vadd.f32 %v11548_v6, %v1241_v13  ;;  %v1667_v5 = vadd.bf16 %v7824_v46, %v7788_v18  ;;  %v1807_v19 = vadd.bf16 %v7594_v31, %v1655_v61  ;;  %v7858_v17 = vadd.bf16 %v7643_v57, %v1673_v60  ;;  %v11553_v13 = vld [vmem:[#allocation104_spill] sm:$0xff]  ;;  %v11555_v57 = vld [vmem:[#allocation105_spill] sm:$0xff] }
 0x2b5   : > { %v7850_v16 = vadd.bf16 %v11546_v0, %v7406_v49  ;;  %v7861_v11 = vadd.bf16 %v7663_v54, %v1675_v29  ;;  %v11550_v49 = vld [vmem:[#allocation101_spill] sm:$0xff]  ;;  %v11551_v52 = vmul.bf16 %v7335_v59, %v7267_v9  ;;  %v7874_v31 = vadd.bf16 %v11554_v47, %v1803_v7  ;;  %v11557_v61 = vld [vmem:[#allocation108_spill] sm:$0xff] }
 0x2b6   : > { %v11556_v54 = vmul.bf16 %v7335_v59, %v7271_v63  ;;  %v11558_v60 = vmul.bf16 %v7335_v59, %v7256_v10  ;;  %v7889_v9 = vrot.slane %v1554_v3, %v6718_v2  ;;  %v1669_v0 = vadd.bf16 %v7839_v1, %v7788_v18  ;;  %v11560_v63 = vld [vmem:[#allocation18_spill] sm:$0xff]  ;;  %v11561_v10 = vld [vmem:[#allocation111_spill] sm:$0xff]  ;;  %v11575_v1 = vld [vmem:[#allocation128_spill] sm:$0xff] }
 0x2b7   : > { %11547 = vst [vmem:[#allocation146_spill] sm:$0xff] %v7850_v16  ;;  %v7869_v23 = vadd.bf16 %v11551_v52, %v11550_v49  ;;  %v7896_v6 = vadd.bf16 %v11554_v47, %v1805_v25  ;;  %v1261_v49 = vadd.f32 %v11560_v63, %v1251_v28  ;;  %v1321_v52 = vrot.slane %v1234_v32, %v7497_v4 }
 0x2b8   : > { %v7880_v39 = vadd.bf16 %v11556_v54, %v11555_v57  ;;  %v7886_v29 = vadd.bf16 %v11558_v60, %v11557_v61  ;;  %11559 = vst [vmem:[#allocation101_spill] sm:$0xff] %v7889_v9  ;;  %v7900_v57 = vpop.permute.xlu1 %882  ;;  %v11562_v3 = vmul.bf16 %v7335_v59, %v7261_v15  ;;  %v11563_v61 = vld [vmem:[#allocation114_spill] sm:$0xff]  ;;  %v11564_v60 = vmul.bf16 %v7335_v59, %v7265_v22 }
 0x2b9   : > { %11552 = vst [vmem:[#allocation117_spill] sm:$0xff] %v7869_v23  ;;  %v1819_v25 = vadd.bf16 %v7572_v43, %v1667_v5  ;;  %v7916_v28 = vadd.bf16 %v11554_v47, %v1807_v19  ;;  %v1906_v63 = vmul.bf16 1056980736, %v7874_v31  ;;  %v1322_v26 = vcombine.high %v1321_v52, %v1321_v52  ;;  %v11567_v19 = vld [vmem:[#allocation119_spill] sm:$0xff] }
 0x2ba   : > { %v7906_v54 = vadd.bf16 %v11562_v3, %v11561_v10  ;;  %v7912_v7 = vadd.bf16 %v11564_v60, %v11563_v61  ;;  %v11565_v15 = vmul.bf16 %v7335_v59, %v11517_v41  ;;  %v1671_v22 = vadd.bf16 %v7889_v9, %v7788_v18  ;;  %v11566_v3 = vld [vmem:[#allocation118_spill] sm:$0xff]  ;;  %v11574_v9 = vld [vmem:[#allocation121_spill] sm:$0xff] }
 0x2bb   : > { %v1821_v43 = vadd.bf16 %v11566_v3, %v1669_v0  ;;  %v7931_v5 = vrot.slane %v1321_v52, %v7497_v4  ;;  %v1908_v61 = vmul.bf16 1056980736, %v7896_v6  ;;  %v7936_v60 = vpack.c.bf16 %v1261_v49, %v1261_v49 }
 0x2bc   : > { %v7925_v10 = vadd.bf16 %v11565_v15, %v7698_v53  ;;  %v7939_v51 = vrot.slane %v1322_v26, %v7497_v4  ;;  %v7944_v53 = vadd.bf16 %v11554_v47, %v1819_v25  ;;  %v1910_v0 = vmul.bf16 1056980736, %v7916_v28 }
 0x2bd   : > { %v1356_v52 = vunpack.i.h.s16 %v7931_v5  ;;  %v5968_v15 = vpack.i.b16 %v7931_v5, %v7931_v5  ;;  %6234 = vtanh.bf16 %v1906_v63  ;;  %v1344_v3 = vunpack.i.h.s16 %v7764_v27 }
 0x2be   : > { %v1358_v49 = vunpack.i.h.s16 %v7939_v51  ;;  %v5969_v26 = vpack.i.b16 %v7939_v51, %v7939_v51  ;;  %v1823_v41 = vadd.bf16 %v11567_v19, %v1671_v22  ;;  %v7956_v25 = vadd.bf16 %v11554_v47, %v1821_v43  ;;  %v7965_v22 = vpop.permute.xlu1 %988 }
 0x2bf   : > { %v1380_v32 = vpack.i.b16 %v1356_v52, %v1356_v52  ;;  %v1454_v34 = vrot.slane %v5968_v15, %v6718_v2  ;;  %v7960_v4 = vadd.bf16 %v11554_v47, %v1809_v56  ;;  %6236 = vtanh.bf16 %v1908_v61 }
 0x2c0   : > { %v1382_v63 = vpack.i.b16 %v1358_v49, %v1358_v49  ;;  %v1462_v23 = vrot.slane %v5969_v26, %v6718_v2  ;;  %v1922_v37 = vmul.bf16 1056980736, %v7944_v53  ;;  %6238 = vtanh.bf16 %v1910_v0 }
 0x2c1   : > { %11568 = vst [vmem:[#allocation19_spill] sm:$0xff] %v7960_v4  ;;  %v1458_v27 = vrot.slane %v1380_v32, %v6718_v2  ;;  %v1596_v16 = vpack.i.b16 %v1454_v34, %v1454_v34  ;;  %v7968_v43 = vadd.bf16 %v11554_v47, %v1811_v58  ;;  %v1368_v56 = vpack.i.b16 %v1344_v3, %v1344_v3 }
 0x2c2   : > { %v1466_v19 = vrot.slane %v1382_v63, %v6718_v2  ;;  %v1610_v52 = vpack.i.b16 %v1462_v23, %v1462_v23  ;;  %v7972_v61 = vadd.bf16 %v11554_v47, %v1823_v41  ;;  %v1924_v15 = vmul.bf16 1056980736, %v7956_v25 }
 0x2c3   : > { %11569 = vst [vmem:[#allocation105_spill] sm:$0xff] %v7968_v43  ;;  %v1601_v49 = vrot.slane %v1596_v16, %v6718_v2  ;;  %v1603_v0 = vpack.i.b16 %v1458_v27, %v1458_v27  ;;  %v1352_v26 = vunpack.i.h.s16 %v7766_v36  ;;  %v11570_v58 = vmul.bf16 %v7339_v44, %v11522_v50 }
 0x2c4   : > { %v1615_v32 = vrot.slane %v1610_v52, %v6718_v2  ;;  %v1617_v34 = vpack.i.b16 %v1466_v19, %v1466_v19  ;;  %v7986_v23 = vadd.bf16 %v11554_v47, %v7858_v17  ;;  %6240 = vtanh.bf16 %v1922_v37 }
 0x2c5   : > { %v7982_v63 = vadd.bf16 %v11570_v58, %v7965_v22  ;;  %v1608_v41 = vrot.slane %v1603_v0, %v6718_v2  ;;  %v1684_v16 = vadd.bf16 %v1601_v49, %v7936_v60  ;;  %v1683_v27 = vadd.bf16 %v1601_v49, %v7788_v18 }
 0x2c6   : > { %11572 = vst [vmem:[#allocation18_spill] sm:$0xff] %v7986_v23  ;;  %v1622_v3 = vrot.slane %v1617_v34, %v6718_v2  ;;  %v1687_v36 = vadd.bf16 %v1615_v32, %v7788_v18  ;;  %v1410_v19 = vrot.slane %v1368_v56, %v6718_v2  ;;  %v7996_v52 = vadd.bf16 %v11554_v47, %v7861_v11  ;;  %v6168_v56 = vld [vmem:[%s11126_s4] sm:$0xff]   ;;  %v6169_v11 = vld [vmem:[%s11126_s4 + $0x8] sm:$0xff]  }
 0x2c7   : > { %11571 = vst [vmem:[#allocation108_spill] sm:$0xff] %v7982_v63  ;;  %v1912_v17 = vmul.bf16 1056980736, %v7960_v4  ;;  %v1685_v37 = vadd.bf16 %v1608_v41, %v7788_v18  ;;  %v1686_v0 = vadd.bf16 %v1608_v41, %v7936_v60  ;;  %v1914_v58 = vmul.bf16 1056980736, %v7968_v43  ;;  %6061 = vmatprep.subr.bf16.mxu0 %v6168_v56 }
 0x2c8   : > { %11573 = vst [vmem:[#allocation111_spill] sm:$0xff] %v7996_v52  ;;  %v1926_v34 = vmul.bf16 1056980736, %v7972_v61  ;;  %6242 = vtanh.bf16 %v1924_v15  ;;  %v1376_v49 = vpack.i.b16 %v1352_v26, %v1352_v26  ;;  %v6235_v63 = vpop.eup %6234  ;;  %v1688_v4 = vadd.bf16 %v1615_v32, %v7936_v60  ;;  %v11576_v32 = vld [vmem:[#allocation120_spill] sm:$0xff]  ;;  %6062 = vmatpush3.bf16.msra.mxu0 %v6168_v56 }
 0x2c9   : > { %v1689_v8 = vadd.bf16 %v1622_v3, %v7788_v18  ;;  %v1690_v41 = vadd.bf16 %v1622_v3, %v7936_v60  ;;  %v1836_v43 = vadd.bf16 %v7683_v14, %v1684_v16  ;;  %v1835_v15 = vadd.bf16 %v11574_v9, %v1683_v27  ;;  %6063 = vmatprep.subr.bf16.mxu0 %v6169_v11  ;;  %v6170_v16 = vld [vmem:[%s11126_s4 + $0x10] sm:$0xff]  }
 0x2ca   : > { %v1838_v26 = vadd.bf16 %v7669_v12, %v1686_v0  ;;  %v8016_v46 = vadd.bf16 %v11575_v1, %v1687_v36  ;;  %v1519_v30 = vpack.i.b16 %v1410_v19, %v1410_v19  ;;  %v6237_v38 = vpop.eup %6236  ;;  %v1928_v24 = vmul.bf16 1056980736, %v7986_v23  ;;  %v11577_v27 = vld [vmem:[#allocation86_spill] sm:$0xff] }
 0x2cb   : > { %6244 = vtanh.bf16 %v1912_v17  ;;  %v1837_v45 = vadd.bf16 %v11576_v32, %v1685_v37  ;;  %v6239_v14 = vpop.eup %6238  ;;  %v1930_v9 = vmul.bf16 1056980736, %v7996_v52  ;;  %v2002_v12 = vmul.bf16 1056980736, %v6235_v63 }
 0x2cc   : > { %6246 = vtanh.bf16 %v1926_v34  ;;  %v8025_v1 = vcombine.high %v7759_v42, %v7759_v42  ;;  %v8031_v36 = vadd.bf16 %v11577_v27, %v1688_v4  ;;  %v8034_v19 = vadd.bf16 %v7694_v21, %v1689_v8  ;;  %6064 = vmatpush3.bf16.msra.mxu0 %v6169_v11 }
 0x2cd   : > { %v8037_v17 = vadd.bf16 %v7880_v39, %v1690_v41  ;;  %v1442_v63 = vrot.slane %v1376_v49, %v6718_v2  ;;  %6248 = vtanh.bf16 %v1914_v58  ;;  %v8041_v42 = vadd.bf16 %v11554_v47, %v1835_v15  ;;  %v11578_v58 = vld [vmem:[#allocation132_spill] sm:$0xff]  ;;  %6065 = vmatprep.subr.bf16.mxu0 %v6170_v16 }
 0x2ce   : > { %v8044_v37 = vadd.bf16 %v11554_v47, %v1836_v43  ;;  %v1524_v0 = vrot.slane %v1519_v30, %v6718_v2  ;;  %v2004_v34 = vmul.bf16 1056980736, %v6237_v38  ;;  %v2006_v4 = vmul.bf16 1056980736, %v6239_v14  ;;  %v11579_v49 = vld [vmem:[#allocation76_spill] sm:$0xff] }
 0x2cf   : > { %v8048_v56 = vadd.bf16 %v11554_v47, %v1837_v45  ;;  %v8051_v21 = vadd.bf16 %v11554_v47, %v1838_v26  ;;  %v6241_v8 = vpop.eup %6240  ;;  %6250 = vtanh.bf16 %v1928_v24  ;;  %v2050_v39 = vadd.bf16 1056980736, %v2002_v12 }
 0x2d0   : > { %v11580_v41 = vmul.bf16 %v7335_v59, %v11579_v49  ;;  %v11581_v30 = vmul.bf16 %v7335_v59, %v11522_v50  ;;  %6252 = vtanh.bf16 %v1930_v9  ;;  %v8065_v45 = vcombine.high %v7931_v5, %v7931_v5  ;;  %6066 = vmatpush3.bf16.msra.mxu0 %v6170_v16 }
 0x2d1   : > { %v1575_v11 = vpack.i.b16 %v1442_v63, %v1442_v63  ;;  %v1346_v24 = vunpack.i.h.s16 %v8025_v1  ;;  %v1938_v15 = vmul.bf16 1056980736, %v8041_v42  ;;  %v1939_v26 = vmul.bf16 1056980736, %v8044_v37 }
 0x2d2   : > { %v1782_v43 = vadd.bf16 %v11580_v41, %v11578_v58  ;;  %v8061_v38 = vadd.bf16 %v11581_v30, %v7965_v22  ;;  %v1940_v32 = vmul.bf16 1056980736, %v8048_v56  ;;  %v1661_v14 = vadd.bf16 %v1524_v0, %v7788_v18  ;;  %v11583_v41 = vld [vmem:[#allocation134_spill] sm:$0xff] }
 0x2d3   : > { %v8072_v12 = vpop.eup %6242  ;;  %v2052_v27 = vadd.bf16 1056980736, %v2004_v34  ;;  %v2054_v58 = vadd.bf16 1056980736, %v2006_v4  ;;  %v1941_v9 = vmul.bf16 1056980736, %v8051_v21  ;;  %v1662_v5 = vadd.bf16 %v1524_v0, %v7936_v60 }
 0x2d4   : > { %v2018_v63 = vmul.bf16 1056980736, %v6241_v8  ;;  %v8077_v49 = vmul.bf16 %v2050_v39, %v7874_v31  ;;  %6254 = vtanh.bf16 %v1938_v15  ;;  %v1813_v30 = vadd.bf16 %v11583_v41, %v1661_v14 }
 0x2d5   : > { %6256 = vtanh.bf16 %v1939_v26  ;;  %v1814_v3 = vadd.bf16 %v7925_v10, %v1662_v5  ;;  %v1580_v52 = vrot.slane %v1575_v11, %v6718_v2  ;;  %v1370_v23 = vpack.i.b16 %v1346_v24, %v1346_v24  ;;  %v1142_v26 = vpop.permute.xlu0 %1141 }
 0x2d6   : > { %11582 = vst [vmem:[#allocation114_spill] sm:$0xff] %v8077_v49  ;;  %v8082_v34 = vpop.eup %6244  ;;  %6258 = vtanh.bf16 %v1940_v32  ;;  %v8085_v4 = vadd.bf16 %v11554_v47, %v1813_v30  ;;  %v11585_v31 = vmul.bf16 %v7343_v48, %v11522_v50  ;;  %v5970_v0 = vpack.i.b16 %v8065_v45, %v8065_v45 }
 0x2d7   : > { %11584 = vst [vmem:[#allocation118_spill] sm:$0xff] %v8082_v34  ;;  %v8095_v8 = vpop.eup %6246  ;;  %6260 = vtanh.bf16 %v1941_v9  ;;  %v8098_v10 = vadd.bf16 %v11554_v47, %v1814_v3  ;;  %v1677_v39 = vadd.bf16 %v1580_v52, %v7788_v18  ;;  %v1678_v11 = vadd.bf16 %v1580_v52, %v7936_v60 }
 0x2d8   : > { %v8091_v16 = vadd.bf16 %v11585_v31, %v7965_v22  ;;  %v2020_v24 = vmul.bf16 1056980736, %v8072_v12  ;;  %v8104_v15 = vmul.bf16 %v2052_v27, %v7896_v6  ;;  %v1418_v50 = vrot.slane %v1370_v23, %v6718_v2  ;;  %v8108_v32 = vpop.eup %6248 }
 0x2d9   : > { %v1470_v22 = vrot.slane %v5970_v0, %v6718_v2  ;;  %11588 = vst [vmem:[#allocation128_spill] sm:$0xff] %v8108_v32  ;;  %v8111_v14 = vmul.bf16 %v2054_v58, %v7916_v28  ;;  %v1829_v9 = vadd.bf16 %v7807_v20, %v1677_v39  ;;  %v1830_v52 = vadd.bf16 %v1782_v43, %v1678_v11  ;;  %v11591_v58 = vld [vmem:[#allocation78_spill] sm:$0xff] }
 0x2da   : > { %11586 = vst [vmem:[#allocation119_spill] sm:$0xff] %v8091_v16  ;;  %11587 = vst [vmem:[#allocation121_spill] sm:$0xff] %v8104_v15  ;;  %v2022_v12 = vmul.bf16 1056980736, %v8095_v8  ;;  %v1916_v6 = vmul.bf16 1056980736, %v8085_v4  ;;  %v1533_v27 = vpack.i.b16 %v1418_v50, %v1418_v50  ;;  %v8117_v23 = vpop.eup %6250  ;;  %v11592_v20 = vmul.bf16 %v7339_v44, %v11591_v58 }
 0x2db   : > { %11589 = vst [vmem:[#allocation120_spill] sm:$0xff] %v8111_v14  ;;  %v1624_v5 = vpack.i.b16 %v1470_v22, %v1470_v22  ;;  %11590 = vst [vmem:[#allocation86_spill] sm:$0xff] %v8117_v23  ;;  %v1917_v41 = vmul.bf16 1056980736, %v8098_v10  ;;  %v8121_v30 = vadd.bf16 %v11554_v47, %v1829_v9  ;;  %v8124_v28 = vadd.bf16 %v11554_v47, %v1830_v52  ;;  %v8131_v31 = vpop.eup %6252  ;;  %v8144_v22 = vpop.permute.xlu1 %1076  ;;  %v11603_v23 = vld [vmem:[#allocation95_spill] sm:$0xff] }
 0x2dc   : > { %v8129_v43 = vadd.bf16 %v11592_v20, %v1142_v26  ;;  %11594 = vst [vmem:[#allocation76_spill] sm:$0xff] %v8131_v31  ;;  %v8133_v0 = vadd.bf16 1056980736, %v2018_v63  ;;  %v8136_v8 = vrot.slane %v1533_v27, %v6718_v2  ;;  %v11595_v11 = vmul.bf16 %v7343_v48, %v11591_v58 }
 0x2dd   : > { %v1629_v39 = vrot.slane %v1624_v5, %v6718_v2  ;;  %v8148_v9 = vadd.bf16 %v11554_v47, %v8016_v46  ;;  %v8152_v63 = vadd.bf16 %v11554_v47, %v8031_v36  ;;  %v1932_v52 = vmul.bf16 1056980736, %v8121_v30  ;;  %v11598_v36 = vld [vmem:[#allocation82_spill] sm:$0xff] }
 0x2de   : > { %11593 = vst [vmem:[#allocation132_spill] sm:$0xff] %v8129_v43  ;;  %v8142_v50 = vadd.bf16 %v11595_v11, %v1142_v26  ;;  %v1933_v27 = vmul.bf16 1056980736, %v8124_v28  ;;  %6262 = vtanh.bf16 %v1916_v6  ;;  %v1665_v5 = vadd.bf16 %v8136_v8, %v7788_v18 }
 0x2df   : > { %v1691_v20 = vadd.bf16 %v1629_v39, %v7788_v18  ;;  %v1692_v11 = vadd.bf16 %v1629_v39, %v7936_v60  ;;  %v6255_v3 = vpop.eup %6254  ;;  %6264 = vtanh.bf16 %v1917_v41  ;;  %v11597_v46 = vmul.bf16 %v7335_v59, %v11591_v58 }
 0x2e0   : > { %11596 = vst [vmem:[#allocation134_spill] sm:$0xff] %v8142_v50  ;;  %v11599_v16 = vmul.bf16 %v7339_v44, %v11598_v36  ;;  %v11601_v6 = vmul.bf16 %v7343_v48, %v11598_v36  ;;  %v6257_v31 = vpop.eup %6256  ;;  %v2034_v39 = vmul.bf16 1056980736, %v6255_v3  ;;  %6266 = vtanh.bf16 %v1932_v52 }
 0x2e1   : > { %v1796_v50 = vadd.bf16 %v11597_v46, %v1142_v26  ;;  %v1817_v41 = vadd.bf16 %v8061_v38, %v1665_v5  ;;  %v1843_v58 = vadd.bf16 %v11603_v23, %v1691_v20  ;;  %v6259_v26 = vpop.eup %6258  ;;  %v2035_v46 = vmul.bf16 1056980736, %v6257_v31 }
 0x2e2   : > { %v8167_v43 = vadd.bf16 %v11599_v16, %v8144_v22  ;;  %v8173_v14 = vadd.bf16 %v11601_v6, %v8144_v22  ;;  %6268 = vtanh.bf16 %v1933_v27  ;;  %v11604_v16 = vld [vmem:[#allocation137_spill] sm:$0xff]  ;;  %v6261_v34 = vpop.eup %6260  ;;  %v2036_v3 = vmul.bf16 1056980736, %v6259_v26 }
 0x2e3   : > { %v1844_v32 = vadd.bf16 %v1796_v50, %v1692_v11  ;;  %v2082_v52 = vadd.bf16 1056980736, %v2034_v39  ;;  %v8186_v23 = vadd.bf16 %v11554_v47, %v8034_v19  ;;  %v2037_v31 = vmul.bf16 1056980736, %v6261_v34 }
 0x2e4   : > { %11600 = vst [vmem:[#allocation78_spill] sm:$0xff] %v8167_v43  ;;  %11602 = vst [vmem:[#allocation82_spill] sm:$0xff] %v8173_v14  ;;  %v8179_v43 = vcombine.high %v11604_v16, %v11604_v16  ;;  %v1942_v14 = vmul.bf16 1056980736, %v8148_v9  ;;  %v2083_v27 = vadd.bf16 1056980736, %v2035_v46  ;;  %v8190_v5 = vadd.bf16 %v11554_v47, %v8037_v17 }
 0x2e5   : > { %v2068_v50 = vadd.bf16 1056980736, %v2020_v24  ;;  %v2084_v20 = vadd.bf16 1056980736, %v2036_v3  ;;  %v2130_v11 = vmul.bf16 %v2082_v52, %v8041_v42  ;;  %v1943_v16 = vmul.bf16 1056980736, %v8152_v63 }
 0x2e6   : > { %v2085_v26 = vadd.bf16 1056980736, %v2037_v31  ;;  %v2131_v39 = vmul.bf16 %v2083_v27, %v8044_v37  ;;  %v1354_v38 = vunpack.i.h.s16 %v8179_v43  ;;  %v2070_v6 = vadd.bf16 1056980736, %v2022_v12 }
 0x2e7   : > { %6270 = vtanh.bf16 %v1942_v14  ;;  %v2132_v19 = vmul.bf16 %v2084_v20, %v8048_v56  ;;  %v2194_v34 = vunpack.c.l.bf16 %v2130_v11  ;;  %v1944_v24 = vmul.bf16 1056980736, %v8186_v23 }
 0x2e8   : > { %v2133_v17 = vmul.bf16 %v2085_v26, %v8051_v21  ;;  %v2195_v46 = vunpack.c.h.bf16 %v2130_v11  ;;  %v8200_v3 = vadd.bf16 %v11554_v47, %v1817_v41  ;;  %v1945_v52 = vmul.bf16 1056980736, %v8190_v5 }
 0x2e9   : > { %v2197_v37 = vunpack.c.l.bf16 %v2132_v19  ;;  %v8205_v31 = vadd.bf16 %v11554_v47, %v1843_v58  ;;  %v6263_v14 = vpop.eup %6262  ;;  %6272 = vtanh.bf16 %v1943_v16  ;;  %v2196_v56 = vunpack.c.l.bf16 %v2131_v39 }
 0x2ea   : > { %v2198_v12 = vunpack.c.h.bf16 %v2132_v19  ;;  %v1378_v27 = vpack.i.b16 %v1354_v38, %v1354_v38  ;;  %v6265_v20 = vpop.eup %6264  ;;  %v8209_v21 = vmul.bf16 %v8133_v0, %v7944_v53  ;;  %v8212_v41 = vmul.bf16 %v2068_v50, %v7956_v25 }
 0x2eb   : > { %v2199_v11 = vunpack.c.l.bf16 %v2133_v17  ;;  %v2395_v26 = vsel %vm2218_vm4, %v2194_v34, 0.0  ;;  %v6267_v42 = vpop.eup %6266  ;;  %v8216_v58 = vmul.bf16 %v2070_v6, %v7972_v61  ;;  %6274 = vtanh.bf16 %v1944_v24 }
 0x2ec   : > { %v2396_v16 = vsel %vm2218_vm4, %v2195_v46, 0.0  ;;  %v1920_v38 = vmul.bf16 1056980736, %v8200_v3  ;;  %v2406_v53 = vsel %vm2218_vm4, %v2197_v37, 0.0  ;;  %v1946_v0 = vmul.bf16 1056980736, %v8205_v31 }
 0x2ed   : > { %v6269_v39 = vpop.eup %6268  ;;  %v2397_v19 = vadd.f32 %v2396_v16, %v2395_v26  ;;  %v8223_v25 = vadd.bf16 %v11554_v47, %v1844_v32  ;;  %6276 = vtanh.bf16 %v1945_v52  ;;  %v2398_v50 = vsel %vm2218_vm4, %v2196_v56, 0.0 }
 0x2ee   : > { %v2407_v61 = vsel %vm2218_vm4, %v2198_v12, 0.0  ;;  %v1450_v6 = vrot.slane %v1378_v27, %v6718_v2  ;;  %v2409_v17 = vsel %vm2218_vm4, %v2199_v11, 0.0  ;;  %v2012_v46 = vmul.bf16 1056980736, %v6263_v14 }
 0x2ef   : > { %v8228_v34 = vadd.f32 %v2398_v50, %v2397_v19  ;;  %v2408_v24 = vadd.f32 %v2407_v61, %v2406_v53  ;;  %v2013_v26 = vmul.bf16 1056980736, %v6265_v20  ;;  %v2028_v37 = vmul.bf16 1056980736, %v6267_v42 }
 0x2f0   : > { %v2029_v16 = vmul.bf16 1056980736, %v6269_v39  ;;  %6278 = vtanh.bf16 %v1920_v38  ;;  %v2060_v32 = vadd.bf16 1056980736, %v2012_v46  ;;  %v1947_v52 = vmul.bf16 1056980736, %v8223_v25 }
 0x2f1   : > { %v8231_v15 = vadd.f32 %v2409_v17, %v2408_v24  ;;  %6280 = vtanh.bf16 %v1946_v0  ;;  %v2061_v12 = vadd.bf16 1056980736, %v2013_v26  ;;  %v2076_v49 = vadd.bf16 1056980736, %v2028_v37 }
 0x2f2   : > { %v6271_v56 = vpop.eup %6270  ;;  %v2077_v27 = vadd.bf16 1056980736, %v2029_v16  ;;  %v1589_v19 = vpack.i.b16 %v1450_v6, %v1450_v6  ;;  %v2108_v11 = vmul.bf16 %v2060_v32, %v8085_v4  ;;  %6282 = vtanh.bf16 %v1947_v52 }
 0x2f3   : > { %v11605_v42 = vmul.bf16 %v7335_v59, %v11598_v36  ;;  %v2109_v20 = vmul.bf16 %v2061_v12, %v8098_v10  ;;  %v2124_v38 = vmul.bf16 %v2076_v49, %v8121_v30  ;;  %v2038_v61 = vmul.bf16 1056980736, %v6271_v56 }
 0x2f4   : > { %v2125_v39 = vmul.bf16 %v2077_v27, %v8124_v28  ;;  %v8244_v0 = vrot.slane %v1589_v19, %v6718_v2  ;;  %v6273_v50 = vpop.eup %6272  ;;  %v2161_v6 = vunpack.c.l.bf16 %v2108_v11  ;;  %v2162_v24 = vunpack.c.h.bf16 %v2108_v11 }
 0x2f5   : > { %v1785_v14 = vadd.bf16 %v11605_v42, %v8144_v22  ;;  %v8248_v4 = vcombine.high %v7939_v51, %v7939_v51  ;;  %v2163_v17 = vunpack.c.l.bf16 %v2109_v20  ;;  %v2185_v36 = vunpack.c.l.bf16 %v2124_v38 }
 0x2f6   : > { %v2186_v22 = vunpack.c.h.bf16 %v2124_v38  ;;  %v2187_v46 = vunpack.c.l.bf16 %v2125_v39  ;;  %v6275_v10 = vpop.eup %6274  ;;  %v2274_v49 = vsel %vm2218_vm4, %v2161_v6, 0.0  ;;  %v2275_v30 = vsel %vm2218_vm4, %v2162_v24, 0.0 }
 0x2f7   : > { %v1681_v28 = vadd.bf16 %v8244_v0, %v7788_v18  ;;  %v5971_v26 = vpack.i.b16 %v8248_v4, %v8248_v4  ;;  %v2039_v37 = vmul.bf16 1056980736, %v6273_v50  ;;  %v2276_v16 = vadd.f32 %v2275_v30, %v2274_v49 }
 0x2f8   : > { %v2362_v51 = vsel %vm2218_vm4, %v2185_v36, 0.0  ;;  %v2363_v32 = vsel %vm2218_vm4, %v2186_v22, 0.0  ;;  %v6277_v52 = vpop.eup %6276  ;;  %v2277_v56 = vsel %vm2218_vm4, %v2163_v17, 0.0  ;;  %v2040_v11 = vmul.bf16 1056980736, %v6275_v10  ;;  %v8270_v17 = vpop.permute.xlu0 %893 }
 0x2f9   : > { %v2364_v12 = vadd.f32 %v2363_v32, %v2362_v51  ;;  %v1833_v27 = vadd.bf16 %v1785_v14, %v1681_v28  ;;  %v1478_v19 = vrot.slane %v5971_v26, %v6718_v2  ;;  %v8260_v42 = vadd.f32 %v2277_v56, %v2276_v16  ;;  %11606 = vst [vmem:[#allocation95_spill] sm:$0xff] %v8270_v17  ;;  %v8279_v26 = vpop.permute.xlu1 %1159 }
 0x2fa   : > { %v2365_v20 = vsel %vm2218_vm4, %v2187_v46, 0.0  ;;  %v5967_v38 = vpack.i.b16 %v8179_v43, %v8179_v43  ;;  %v2086_v50 = vadd.bf16 1056980736, %v2038_v61  ;;  %v2041_v49 = vmul.bf16 1056980736, %v6277_v52  ;;  %11607 = vst [vmem:[#allocation137_spill] sm:$0xff] %v8279_v26 }
 0x2fb   : > { %v6279_v39 = vpop.eup %6278  ;;  %v8265_v6 = vadd.f32 %v2365_v20, %v2364_v12  ;;  %v8268_v24 = vadd.bf16 %v11554_v47, %v1833_v27  ;;  %v1638_v14 = vpack.i.b16 %v1478_v19, %v1478_v19  ;;  %v2087_v30 = vadd.bf16 1056980736, %v2039_v37 }
 0x2fc   : > { %v6281_v36 = vpop.eup %6280  ;;  %v1446_v46 = vrot.slane %v5967_v38, %v6718_v2  ;;  %v2088_v32 = vadd.bf16 1056980736, %v2040_v11  ;;  %v8285_v52 = vmul.bf16 %v2086_v50, %v8148_v9  ;;  %v2089_v19 = vadd.bf16 1056980736, %v2041_v49  ;;  %v11608_v38 = vld [vmem:[#allocation85_spill] sm:$0xff] }
 0x2fd   : > { %v2042_v43 = vmul.bf16 1056980736, %v6281_v36  ;;  %v1936_v61 = vmul.bf16 1056980736, %v8268_v24  ;;  %v8277_v28 = vrot.slane %v1638_v14, %v6718_v2  ;;  %v6283_v16 = vpop.eup %6282  ;;  %v11609_v14 = vmul.bf16 %v7335_v59, %v11608_v38 }
 0x2fe   : > { %v1582_v12 = vpack.i.b16 %v1446_v46, %v1446_v46  ;;  %v2043_v27 = vmul.bf16 1056980736, %v6283_v16  ;;  %v2135_v51 = vmul.bf16 %v2087_v30, %v8152_v63  ;;  %v2016_v46 = vmul.bf16 1056980736, %v6279_v39 }
 0x2ff   : > { %v2090_v37 = vadd.bf16 1056980736, %v2042_v43  ;;  %6284 = vtanh.bf16 %v1936_v61  ;;  %v1695_v20 = vadd.bf16 %v8277_v28, %v7788_v18  ;;  %v1799_v36 = vadd.bf16 %v11609_v14, %v8279_v26  ;;  %v8296_v43 = vpop.permute.xlu0 %1069 }
 0x300   : > { %v1587_v11 = vrot.slane %v1582_v12, %v6718_v2  ;;  %v2091_v50 = vadd.bf16 1056980736, %v2043_v27  ;;  %11610 = vst [vmem:[#allocation147_spill] sm:$0xff] %v8296_v43  ;;  %v8299_v49 = vmul.bf16 %v2088_v32, %v8186_v23  ;;  %v5963_v10 = vpack.i.b16 %v8025_v1, %v8025_v1 }
 0x301   : > { %v2138_v9 = vmul.bf16 %v2090_v37, %v8205_v31  ;;  %v1847_v61 = vadd.bf16 %v1799_v36, %v1695_v20  ;;  %v2200_v31 = vunpack.c.l.bf16 %v8285_v52  ;;  %v11611_v30 = vmul.bf16 %v7335_v59, %v11549_v35 }
 0x302   : > { %v1679_v16 = vadd.bf16 %v1587_v11, %v7788_v18  ;;  %v2139_v12 = vmul.bf16 %v2091_v50, %v8223_v25  ;;  %v1680_v63 = vadd.bf16 %v1587_v11, %v7936_v60  ;;  %v2064_v37 = vadd.bf16 1056980736, %v2016_v46 }
 0x303   : > { %v2206_v14 = vunpack.c.l.bf16 %v2138_v9  ;;  %v2207_v22 = vunpack.c.h.bf16 %v2138_v9  ;;  %v8308_v39 = vadd.bf16 %v11554_v47, %v1847_v61  ;;  %v1784_v32 = vadd.bf16 %v11611_v30, %v8296_v43 }
 0x304   : > { %v1831_v23 = vadd.bf16 %v7906_v54, %v1679_v16  ;;  %v2208_v25 = vunpack.c.l.bf16 %v2139_v12  ;;  %v2137_v54 = vmul.bf16 %v2089_v19, %v8190_v5  ;;  %v1414_v61 = vrot.slane %v5963_v10, %v6718_v2  ;;  %v8325_v16 = vpop.permute.xlu0 %1170 }
 0x305   : > { %v2439_v1 = vsel %vm2218_vm4, %v2206_v14, 0.0  ;;  %v2440_v27 = vsel %vm2218_vm4, %v2207_v22, 0.0  ;;  %v1950_v36 = vmul.bf16 1056980736, %v8308_v39  ;;  %v1832_v9 = vadd.bf16 %v1784_v32, %v1680_v63  ;;  %11612 = vst [vmem:[#allocation148_spill] sm:$0xff] %v8325_v16 }
 0x306   : > { %v2441_v20 = vadd.f32 %v2440_v27, %v2439_v1  ;;  %v8319_v11 = vadd.bf16 %v11554_v47, %v1831_v23  ;;  %v2442_v50 = vsel %vm2218_vm4, %v2208_v25, 0.0  ;;  %v1362_v46 = vunpack.i.h.s16 %v8248_v4  ;;  %v8333_v23 = vpop.permute.xlu1 %981  ;;  %v6171_v27 = vld [vmem:[%s11126_s4 + $0x18] sm:$0xff]  }
 0x307   : > { %6286 = vtanh.bf16 %v1950_v36  ;;  %v8331_v12 = vadd.bf16 %v11554_v47, %v1832_v9  ;;  %11613 = vst [vmem:[#allocation149_spill] sm:$0xff] %v8333_v23  ;;  %v2201_v5 = vunpack.c.h.bf16 %v8285_v52  ;;  %v8336_v19 = vunpack.c.l.bf16 %v2135_v51  ;;  %v11614_v51 = vld [vmem:[#allocation91_spill] sm:$0xff]  ;;  %6067 = vmatprep.subr.bf16.mxu0 %v6171_v27 }
 0x308   : > { %v8327_v14 = vadd.f32 %v2442_v50, %v2441_v20  ;;  %v1934_v22 = vmul.bf16 1056980736, %v8319_v11  ;;  %v1526_v63 = vpack.i.b16 %v1414_v61, %v1414_v61  ;;  %v1386_v10 = vpack.i.b16 %v1362_v46, %v1362_v46  ;;  %v8357_v4 = vpop.permute.xlu0 %1080  ;;  %6068 = vmatpush3.bf16.msra.mxu0 %v6171_v27 }
 0x309   : > { %v2112_v32 = vmul.bf16 %v2064_v37, %v8200_v3  ;;  %v1935_v1 = vmul.bf16 1056980736, %v8331_v12  ;;  %v11615_v52 = vmul.bf16 %v7335_v59, %v11614_v51  ;;  %v1360_v9 = vunpack.i.h.s16 %v8065_v45  ;;  %11616 = vst [vmem:[#allocation150_spill] sm:$0xff] %v8357_v4 }
 0x30a   : > { %v6285_v30 = vpop.eup %6284  ;;  %6288 = vtanh.bf16 %v1934_v22  ;;  %v1531_v25 = vrot.slane %v1526_v63, %v6718_v2  ;;  %v1482_v36 = vrot.slane %v1386_v10, %v6718_v2  ;;  %v8352_v37 = vunpack.c.l.bf16 %v2137_v54  ;;  %v8371_v27 = vpop.permute.xlu1 %1152 }
 0x30b   : > { %v1768_v20 = vadd.bf16 %v11615_v52, %v8333_v23  ;;  %v2279_v50 = vrot.slane %v8260_v42, 4  ;;  %6290 = vtanh.bf16 %v1935_v1  ;;  %v2032_v61 = vmul.bf16 1056980736, %v6285_v30  ;;  %11617 = vst [vmem:[#allocation151_spill] sm:$0xff] %v8371_v27 }
 0x30c   : > { %v1663_v46 = vadd.bf16 %v1531_v25, %v7788_v18  ;;  %v1664_v22 = vadd.bf16 %v1531_v25, %v7936_v60  ;;  %v1645_v63 = vpack.i.b16 %v1482_v36, %v1482_v36  ;;  %v8360_v10 = vsel %vm2218_vm4, %v2200_v31, 0.0 }
 0x30d   : > { %v8363_v45 = vsel %vm2218_vm4, %v2201_v5, 0.0  ;;  %v2367_v54 = vrot.slane %v8265_v6, 4  ;;  %v1384_v52 = vpack.i.b16 %v1360_v9, %v1360_v9  ;;  %v2167_v1 = vunpack.c.l.bf16 %v2112_v32 }
 0x30e   : > { %v1815_v30 = vadd.bf16 %v7886_v29, %v1663_v46  ;;  %v1816_v3 = vadd.bf16 %v1768_v20, %v1664_v22  ;;  %v8368_v53 = vrot.slane %v1645_v63, %v6718_v2  ;;  %v2168_v25 = vunpack.c.h.bf16 %v2112_v32 }
 0x30f   : > { %v1474_v36 = vrot.slane %v1384_v52, %v6718_v2  ;;  %v1682_v31 = vadd.bf16 %v8244_v0, %v7936_v60  ;;  %v11618_v5 = vmul.bf16 %v7335_v59, %v7622_v33  ;;  %v8380_v56 = vadd.f32 %v2279_v50, %v8260_v42 }
 0x310   : > { %v2080_v29 = vadd.bf16 1056980736, %v2032_v61  ;;  %v8383_v20 = vadd.bf16 %v11554_v47, %v1815_v30  ;;  %v8386_v32 = vadd.bf16 %v11554_v47, %v1816_v3  ;;  %v1697_v46 = vadd.bf16 %v8368_v53, %v7788_v18 }
 0x311   : > { %v1786_v9 = vadd.bf16 %v11618_v5, %v8357_v4  ;;  %v11619_v0 = vmul.bf16 %v7335_v59, %v11553_v13  ;;  %v1631_v63 = vpack.i.b16 %v1474_v36, %v1474_v36  ;;  %v8395_v42 = vadd.f32 %v2367_v54, %v8265_v6 }
 0x312   : > { %v6287_v5 = vpop.eup %6286  ;;  %v2296_v50 = vsel %vm2218_vm4, %v2167_v1, 0.0  ;;  %v1918_v61 = vmul.bf16 1056980736, %v8383_v20  ;;  %v1919_v3 = vmul.bf16 1056980736, %v8386_v32  ;;  %v2297_v30 = vsel %vm2218_vm4, %v2168_v25, 0.0 }
 0x313   : > { %v1801_v22 = vadd.bf16 %v11619_v0, %v8325_v16  ;;  %v1834_v52 = vadd.bf16 %v1786_v9, %v1682_v31  ;;  %v2046_v4 = vmul.bf16 1056980736, %v6287_v5  ;;  %v11620_v0 = vmul.bf16 %v7335_v59, %v7394_v62 }
 0x314   : > { %v2128_v9 = vmul.bf16 %v2080_v29, %v8268_v24  ;;  %6292 = vtanh.bf16 %v1918_v61  ;;  %v1636_v6 = vrot.slane %v1631_v63, %v6718_v2  ;;  %v2444_v5 = vrot.slane %v8327_v14, 4 }
 0x315   : > { %v1849_v23 = vadd.bf16 %v1801_v22, %v1697_v46  ;;  %v1798_v36 = vadd.bf16 %v11620_v0, %v8371_v27  ;;  %v6289_v31 = vpop.eup %6288  ;;  %v8408_v54 = vadd.bf16 %v11554_v47, %v1834_v52  ;;  %v2094_v1 = vadd.bf16 1056980736, %v2046_v4  ;;  %v8413_v46 = vpop.permute.xlu1 %992 }
 0x316   : > { %v2030_v16 = vmul.bf16 1056980736, %v6289_v31  ;;  %6294 = vtanh.bf16 %v1919_v3  ;;  %11621 = vst [vmem:[#allocation152_spill] sm:$0xff] %v8413_v46  ;;  %v6291_v22 = vpop.eup %6290  ;;  %v1694_v0 = vadd.bf16 %v1636_v6, %v7936_v60  ;;  %v1693_v24 = vadd.bf16 %v1636_v6, %v7788_v18 }
 0x317   : > { %v8411_v25 = vadd.bf16 %v11554_v47, %v1849_v23  ;;  %v1937_v29 = vmul.bf16 1056980736, %v8408_v54  ;;  %v2031_v52 = vmul.bf16 1056980736, %v6291_v22  ;;  %v1666_v61 = vadd.bf16 %v8136_v8, %v7936_v60 }
 0x318   : > { %v2078_v63 = vadd.bf16 1056980736, %v2030_v16  ;;  %v1845_v23 = vadd.bf16 %v7912_v7, %v1693_v24  ;;  %v1846_v3 = vadd.bf16 %v1798_v36, %v1694_v0  ;;  %v11622_v31 = vmul.bf16 %v7335_v59, %v7620_v55 }
 0x319   : > { %v1952_v4 = vmul.bf16 1056980736, %v8411_v25  ;;  %6296 = vtanh.bf16 %v1937_v29  ;;  %v2191_v43 = vunpack.c.l.bf16 %v2128_v9  ;;  %v2142_v18 = vmul.bf16 %v2094_v1, %v8308_v39 }
 0x31a   : > { %v1770_v27 = vadd.bf16 %v11622_v31, %v8413_v46  ;;  %v2126_v16 = vmul.bf16 %v2078_v63, %v8319_v11  ;;  %v2079_v6 = vadd.bf16 1056980736, %v2031_v52  ;;  %v8430_v22 = vadd.bf16 %v11554_v47, %v1845_v23  ;;  %v8443_v63 = vpop.permute.xlu0 %1174 }
 0x31b   : > { %6298 = vtanh.bf16 %v1952_v4  ;;  %v8433_v8 = vadd.bf16 %v11554_v47, %v1846_v3  ;;  %v8435_v36 = vadd.f32 %v2297_v30, %v2296_v50  ;;  %v8438_v0 = vadd.f32 %v2444_v5, %v8327_v14  ;;  %11623 = vst [vmem:[#allocation153_spill] sm:$0xff] %v8443_v63  ;;  %v1164_v3 = vpop.permute.xlu1 %1163 }
 0x31c   : > { %v1818_v7 = vadd.bf16 %v1770_v27, %v1666_v61  ;;  %v2188_v24 = vunpack.c.l.bf16 %v2126_v16  ;;  %v2189_v29 = vunpack.c.h.bf16 %v2126_v16  ;;  %v2192_v31 = vunpack.c.h.bf16 %v2128_v9 }
 0x31d   : > { %v2127_v39 = vmul.bf16 %v2079_v6, %v8331_v12  ;;  %v1948_v11 = vmul.bf16 1056980736, %v8430_v22  ;;  %v1949_v1 = vmul.bf16 1056980736, %v8433_v8  ;;  %v2384_v52 = vsel %vm2218_vm4, %v2191_v43, 0.0 }
 0x31e   : > { %v2373_v27 = vsel %vm2218_vm4, %v2188_v24, 0.0  ;;  %v2374_v50 = vsel %vm2218_vm4, %v2189_v29, 0.0  ;;  %v8449_v14 = vadd.bf16 %v11554_v47, %v1818_v7  ;;  %v2212_v30 = vunpack.c.l.bf16 %v2142_v18 }
 0x31f   : > { %v2375_v5 = vadd.f32 %v2374_v50, %v2373_v27  ;;  %v2190_v9 = vunpack.c.l.bf16 %v2127_v39  ;;  %6300 = vtanh.bf16 %v1948_v11  ;;  %v6293_v12 = vpop.eup %6292  ;;  %v1698_v61 = vadd.bf16 %v8368_v53, %v7936_v60 }
 0x320   : > { %6302 = vtanh.bf16 %v1949_v1  ;;  %v1921_v4 = vmul.bf16 1056980736, %v8449_v14  ;;  %v11624_v43 = vmul.bf16 %v7335_v59, %v8270_v17  ;;  %v2385_v6 = vsel %vm2218_vm4, %v2192_v31, 0.0 }
 0x321   : > { %v6295_v16 = vpop.eup %6294  ;;  %v2213_v7 = vunpack.c.h.bf16 %v2142_v18  ;;  %v2376_v24 = vsel %vm2218_vm4, %v2190_v9, 0.0  ;;  %v2014_v29 = vmul.bf16 1056980736, %v6293_v12  ;;  %v1696_v53 = vadd.bf16 %v8277_v28, %v7936_v60 }
 0x322   : > { %v1802_v23 = vadd.bf16 %v11624_v43, %v8443_v63  ;;  %v8460_v39 = vadd.f32 %v2376_v24, %v2375_v5  ;;  %v2015_v11 = vmul.bf16 1056980736, %v6295_v16  ;;  %6304 = vtanh.bf16 %v1921_v4 }
 0x323   : > { %v2062_v27 = vadd.bf16 1056980736, %v2014_v29  ;;  %v11625_v50 = vmul.bf16 %v7335_v59, %v7900_v57  ;;  %v11626_v31 = vmul.bf16 %v7339_v44, %v7900_v57  ;;  %v2461_v5 = vsel %vm2218_vm4, %v2212_v30, 0.0 }
 0x324   : > { %v1850_v1 = vadd.bf16 %v1802_v23, %v1698_v61  ;;  %v6297_v9 = vpop.eup %6296  ;;  %v2063_v12 = vadd.bf16 1056980736, %v2015_v11  ;;  %v11628_v61 = vmul.bf16 %v7343_v48, %v7900_v57  ;;  %v2462_v59 = vsel %vm2218_vm4, %v2213_v7, 0.0  ;;  %v11640_v48 = vld [vmem:[#allocation129_spill] sm:$0xff] }
 0x325   : > { %v1800_v43 = vadd.bf16 %v11625_v50, %v1164_v3  ;;  %v8470_v18 = vadd.bf16 %v11626_v31, %v1164_v3  ;;  %v2110_v23 = vmul.bf16 %v2062_v27, %v8383_v20  ;;  %v2033_v16 = vmul.bf16 1056980736, %v6297_v9 }
 0x326   : > { %v8474_v4 = vadd.bf16 %v11554_v47, %v1850_v1  ;;  %v8479_v28 = vadd.bf16 %v11628_v61, %v1164_v3  ;;  %v6299_v29 = vpop.eup %6298  ;;  %v2386_v31 = vadd.f32 %v2385_v6, %v2384_v52  ;;  %v2111_v30 = vmul.bf16 %v2063_v12, %v8386_v32 }
 0x327   : > { %11627 = vst [vmem:[#allocation154_spill] sm:$0xff] %v8470_v18  ;;  %v1848_v24 = vadd.bf16 %v1800_v43, %v1696_v53  ;;  %v2164_v1 = vunpack.c.l.bf16 %v2110_v23  ;;  %v2165_v18 = vunpack.c.h.bf16 %v2110_v23  ;;  %v2048_v63 = vmul.bf16 1056980736, %v6299_v29  ;;  %v11631_v29 = vld [vmem:[#allocation139_spill] sm:$0xff] }
 0x328   : > { %11629 = vst [vmem:[#allocation155_spill] sm:$0xff] %v8479_v28  ;;  %v1953_v11 = vmul.bf16 1056980736, %v8474_v4  ;;  %v2081_v57 = vadd.bf16 1056980736, %v2033_v16  ;;  %v8486_v3 = vadd.f32 %v2462_v59, %v2461_v5  ;;  %v2166_v61 = vunpack.c.l.bf16 %v2111_v30  ;;  %v11630_v5 = vld [vmem:[#allocation138_spill] sm:$0xff] }
 0x329   : > { %v8489_v20 = vadd.bf16 %v11554_v47, %v1848_v24  ;;  %v2285_v7 = vsel %vm2218_vm4, %v2164_v1, 0.0  ;;  %v2286_v27 = vsel %vm2218_vm4, %v2165_v18, 0.0  ;;  %v2096_v52 = vadd.bf16 1056980736, %v2048_v63  ;;  %v11639_v28 = vld [vmem:[#allocation122_spill] sm:$0xff] }
 0x32a   : > { %6306 = vtanh.bf16 %v1953_v11  ;;  %v2129_v32 = vmul.bf16 %v2081_v57, %v8408_v54  ;;  %v6301_v6 = vpop.eup %6300  ;;  %v2287_v53 = vadd.f32 %v2286_v27, %v2285_v7  ;;  %v1652_v9 = vadd.bf16 %v7792_v40, %v7936_v60  ;;  %v11632_v7 = vld [vmem:[#allocation141_spill] sm:$0xff] }
 0x32b   : > { %v1951_v43 = vmul.bf16 1056980736, %v8489_v20  ;;  %v1654_v12 = vadd.bf16 %v11630_v5, %v7936_v60  ;;  %v6303_v59 = vpop.eup %6302  ;;  %v2288_v23 = vsel %vm2218_vm4, %v2166_v61, 0.0  ;;  %v2144_v16 = vmul.bf16 %v2096_v52, %v8411_v25  ;;  %v11633_v52 = vld [vmem:[#allocation140_spill] sm:$0xff] }
 0x32c   : > { %v2044_v24 = vmul.bf16 1056980736, %v6301_v6  ;;  %v2193_v18 = vunpack.c.l.bf16 %v2129_v32  ;;  %v8501_v63 = vadd.f32 %v2288_v23, %v2287_v53  ;;  %v2045_v54 = vmul.bf16 1056980736, %v6303_v59  ;;  %v11635_v23 = vld [vmem:[#allocation145_spill] sm:$0xff] }
 0x32d   : > { %6308 = vtanh.bf16 %v1951_v43  ;;  %v1656_v30 = vadd.bf16 %v11631_v29, %v7936_v60  ;;  %v6305_v11 = vpop.eup %6304  ;;  %v2215_v1 = vunpack.c.l.bf16 %v2144_v16  ;;  %v1658_v27 = vadd.bf16 %v11632_v7, %v7936_v60  ;;  %v11634_v43 = vld [vmem:[#allocation142_spill] sm:$0xff] }
 0x32e   : > { %v2092_v40 = vadd.bf16 1056980736, %v2044_v24  ;;  %v2387_v57 = vsel %vm2218_vm4, %v2193_v18, 0.0  ;;  %v2093_v61 = vadd.bf16 1056980736, %v2045_v54  ;;  %v1660_v32 = vadd.bf16 %v11633_v52, %v7936_v60 }
 0x32f   : > { %v8508_v5 = vadd.f32 %v2387_v57, %v2386_v31  ;;  %v2017_v25 = vmul.bf16 1056980736, %v6305_v11  ;;  %v2216_v6 = vunpack.c.h.bf16 %v2144_v16  ;;  %v1668_v59 = vadd.bf16 %v11634_v43, %v7936_v60  ;;  %v11636_v31 = vld [vmem:[#allocation101_spill] sm:$0xff]  ;;  %v11637_v16 = vld [vmem:[#allocation144_spill] sm:$0xff] }
 0x330   : > { %v2140_v53 = vmul.bf16 %v2092_v40, %v8430_v22  ;;  %v1670_v24 = vadd.bf16 %v11635_v23, %v7936_v60  ;;  %v2472_v18 = vsel %vm2218_vm4, %v2215_v1, 0.0  ;;  %v2141_v29 = vmul.bf16 %v2093_v61, %v8433_v8  ;;  %v11638_v22 = vld [vmem:[#allocation123_spill] sm:$0xff] }
 0x331   : > { %v2065_v54 = vadd.bf16 1056980736, %v2017_v25  ;;  %v1672_v11 = vadd.bf16 %v11636_v31, %v7936_v60  ;;  %v1676_v52 = vadd.bf16 %v11637_v16, %v7936_v60  ;;  %v1804_v40 = vadd.bf16 %v11638_v22, %v1652_v9  ;;  %v11641_v25 = vld [vmem:[#allocation131_spill] sm:$0xff]  ;;  %v11646_v22 = vld [vmem:[#allocation117_spill] sm:$0xff] }
 0x332   : > { %v2209_v57 = vunpack.c.l.bf16 %v2140_v53  ;;  %v2210_v7 = vunpack.c.h.bf16 %v2140_v53  ;;  %v2211_v50 = vunpack.c.l.bf16 %v2141_v29  ;;  %v1806_v23 = vadd.bf16 %v11639_v28, %v1654_v12  ;;  %v11642_v53 = vld [vmem:[#allocation146_spill] sm:$0xff]  ;;  %v11643_v9 = vld [vmem:[#allocation143_spill] sm:$0xff] }
 0x333   : > { %v2113_v43 = vmul.bf16 %v2065_v54, %v8449_v14  ;;  %v1808_v1 = vadd.bf16 %v11640_v48, %v1656_v30  ;;  %v1810_v31 = vadd.bf16 %v11641_v25, %v1658_v27  ;;  %v1812_v26 = vadd.bf16 %v11642_v53, %v1660_v32  ;;  %v11644_v48 = vld [vmem:[#allocation126_spill] sm:$0xff] }
 0x334   : > { %v2450_v8 = vsel %vm2218_vm4, %v2209_v57, 0.0  ;;  %v2451_v61 = vsel %vm2218_vm4, %v2210_v7, 0.0  ;;  %v1674_v29 = vadd.bf16 %v11643_v9, %v7936_v60  ;;  %v2473_v14 = vsel %vm2218_vm4, %v2216_v6, 0.0  ;;  %v11645_v30 = vld [vmem:[#allocation130_spill] sm:$0xff]  ;;  %v11647_v60 = vld [vmem:[#allocation127_spill] sm:$0xff] }
 0x335   : > { %v6307_v46 = vpop.eup %6306  ;;  %v2452_v17 = vadd.f32 %v2451_v61, %v2450_v8  ;;  %v2169_v16 = vunpack.c.l.bf16 %v2113_v43  ;;  %v2453_v28 = vsel %vm2218_vm4, %v2211_v50, 0.0  ;;  %v1820_v12 = vadd.bf16 %v11644_v48, %v1668_v59 }
 0x336   : > { %v2049_v33 = vmul.bf16 1056980736, %v6307_v46  ;;  %v1824_v54 = vadd.bf16 %v11645_v30, %v1672_v11  ;;  %v1828_v32 = vadd.bf16 %v11646_v22, %v1676_v52  ;;  %v1822_v6 = vadd.bf16 %v11647_v60, %v1670_v24  ;;  %v11654_v46 = vld [vmem:[#allocation105_spill] sm:$0xff] }
 0x337   : > { %v2454_v57 = vadd.f32 %v2453_v28, %v2452_v17  ;;  %v2299_v7 = vsel %vm2218_vm4, %v2169_v16, 0.0  ;;  %v8545_v50 = vadd.bf16 %v11554_v47, %v1804_v40  ;;  %v11648_v17 = vld [vmem:[#allocation133_spill] sm:$0xff]  ;;  %v2474_v52 = vadd.f32 %v2473_v14, %v2472_v18 }
 0x338   : > { %v2097_v27 = vadd.bf16 1056980736, %v2049_v33  ;;  %v6309_v8 = vpop.eup %6308  ;;  %v8541_v43 = vadd.f32 %v2299_v7, %v8435_v36  ;;  %v1826_v61 = vadd.bf16 %v11648_v17, %v1674_v29  ;;  %v8550_v33 = vadd.bf16 %v11554_v47, %v1806_v23 }
 0x339   : > { %v2047_v11 = vmul.bf16 1056980736, %v6309_v8  ;;  %v2455_v25 = vrot.slane %v2454_v57, 4  ;;  %v8553_v53 = vadd.bf16 %v11554_v47, %v1808_v1  ;;  %v8556_v36 = vadd.bf16 %v11554_v47, %v1810_v31 }
 0x33a   : > { %v2145_v59 = vmul.bf16 %v2097_v27, %v8474_v4  ;;  %v8559_v40 = vadd.bf16 %v11554_v47, %v1812_v26  ;;  %v8562_v4 = vadd.bf16 %v11554_v47, %v1820_v12  ;;  %v8566_v23 = vadd.bf16 %v11554_v47, %v1822_v6 }
 0x33b   : > { %v2095_v16 = vadd.bf16 1056980736, %v2047_v11  ;;  %v8569_v18 = vadd.bf16 %v11554_v47, %v1824_v54  ;;  %v1907_v1 = vmul.bf16 1056980736, %v8545_v50  ;;  %v8575_v26 = vadd.bf16 %v11554_v47, %v1826_v61  ;;  %v11651_v61 = vld [vmem:[#allocation86_spill] sm:$0xff] }
 0x33c   : > { %v2217_v24 = vunpack.c.l.bf16 %v2145_v59  ;;  %v1909_v14 = vmul.bf16 1056980736, %v8550_v33  ;;  %v8578_v28 = vadd.f32 %v2455_v25, %v2454_v57  ;;  %v8581_v12 = vadd.bf16 %v11554_v47, %v1828_v32  ;;  %v11649_v57 = vld [vmem:[#allocation118_spill] sm:$0xff]  ;;  %v11650_v32 = vld [vmem:[#allocation128_spill] sm:$0xff] }
 0x33d   : > { %v2143_v29 = vmul.bf16 %v2095_v16, %v8489_v20  ;;  %v1911_v30 = vmul.bf16 1056980736, %v8553_v53  ;;  %v1913_v7 = vmul.bf16 1056980736, %v8556_v36  ;;  %v1915_v27 = vmul.bf16 1056980736, %v8559_v40 }
 0x33e   : > { %v2475_v31 = vsel %vm2218_vm4, %v2217_v24, 0.0  ;;  %v1923_v20 = vmul.bf16 1056980736, %v8562_v4  ;;  %v1925_v22 = vmul.bf16 1056980736, %v8566_v23  ;;  %6310 = vtanh.bf16 %v1907_v1  ;;  %v11652_v25 = vld [vmem:[#allocation76_spill] sm:$0xff] }
 0x33f   : > { %v2476_v48 = vadd.f32 %v2475_v31, %v2474_v52  ;;  %v2214_v54 = vunpack.c.l.bf16 %v2143_v29  ;;  %v1927_v8 = vmul.bf16 1056980736, %v8569_v18  ;;  %v2008_v60 = vmul.bf16 1056980736, %v11649_v57  ;;  %v11653_v57 = vld [vmem:[#allocation19_spill] sm:$0xff] }
 0x340   : > { %v1929_v47 = vmul.bf16 1056980736, %v8575_v26  ;;  %6312 = vtanh.bf16 %v1909_v14  ;;  %v2010_v59 = vmul.bf16 1056980736, %v11650_v32  ;;  %v2024_v52 = vmul.bf16 1056980736, %v11651_v61 }
 0x341   : > { %v2464_v6 = vsel %vm2218_vm4, %v2214_v54, 0.0  ;;  %v2477_v11 = vrot.slane %v2476_v48, 4  ;;  %6314 = vtanh.bf16 %v1911_v30  ;;  %v2026_v24 = vmul.bf16 1056980736, %v11652_v25 }
 0x342   : > { %v2465_v17 = vadd.f32 %v2464_v6, %v8486_v3  ;;  %6316 = vtanh.bf16 %v1913_v7  ;;  %v2056_v16 = vadd.bf16 1056980736, %v2008_v60  ;;  %v2058_v1 = vadd.bf16 1056980736, %v2010_v59  ;;  %v11655_v7 = vld [vmem:[#allocation18_spill] sm:$0xff]  ;;  %v11656_v59 = vld [vmem:[#allocation111_spill] sm:$0xff] }
 0x343   : > { %v1931_v29 = vmul.bf16 1056980736, %v8581_v12  ;;  %6318 = vtanh.bf16 %v1915_v27  ;;  %v2072_v54 = vadd.bf16 1056980736, %v2024_v52  ;;  %v2074_v14 = vadd.bf16 1056980736, %v2026_v24 }
 0x344   : > { %v2466_v31 = vrot.slane %v2465_v17, 4  ;;  %6320 = vtanh.bf16 %v1923_v20  ;;  %v2104_v32 = vmul.bf16 %v2056_v16, %v11653_v57  ;;  %v2106_v9 = vmul.bf16 %v2058_v1, %v11654_v46  ;;  %v11657_v20 = vld [vmem:[#allocation120_spill] sm:$0xff]  ;;  %v11661_v57 = vld [vmem:[#allocation121_spill] sm:$0xff] }
 0x345   : > { %v8600_v30 = vadd.f32 %v2477_v11, %v2476_v48  ;;  %6322 = vtanh.bf16 %v1925_v22  ;;  %v8603_v6 = vmul.bf16 %v2072_v54, %v11655_v7  ;;  %v8608_v27 = vmul.bf16 %v2074_v14, %v11656_v59 }
 0x346   : > { %v8605_v60 = vadd.f32 %v2466_v31, %v2465_v17  ;;  %6324 = vtanh.bf16 %v1927_v8  ;;  %v2152_v61 = vunpack.c.l.bf16 %v11657_v20  ;;  %v2153_v52 = vunpack.c.h.bf16 %v11657_v20  ;;  %v11658_v31 = vld [vmem:[#allocation114_spill] sm:$0xff] }
 0x347   : > { %6326 = vtanh.bf16 %v1929_v47  ;;  %v2155_v46 = vunpack.c.l.bf16 %v2104_v32  ;;  %v2156_v25 = vunpack.c.h.bf16 %v2104_v32  ;;  %v2158_v48 = vunpack.c.l.bf16 %v2106_v9 }
 0x348   : > { %6328 = vtanh.bf16 %v1931_v29  ;;  %v2159_v11 = vunpack.c.h.bf16 %v2106_v9  ;;  %v11659_v54 = vunpack.c.l.bf16 %v11658_v31  ;;  %v11660_v29 = vunpack.c.h.bf16 %v11658_v31 }
 0x349   : > { %v6311_v1 = vpop.eup %6310  ;;  %v11662_v32 = vunpack.c.l.bf16 %v11661_v57  ;;  %v11663_v16 = vunpack.c.h.bf16 %v11661_v57  ;;  %v2241_v47 = vsel %vm2218_vm4, %v2152_v61, 0.0  ;;  %v2242_v31 = vsel %vm2218_vm4, %v2153_v52, 0.0 }
 0x34a   : > { %v2219_v14 = vsel %vm2218_vm4, %v11659_v54, 0.0  ;;  %v2220_v9 = vsel %vm2218_vm4, %v11660_v29, 0.0  ;;  %v2003_v20 = vmul.bf16 1056980736, %v6311_v1  ;;  %v2252_v29 = vsel %vm2218_vm4, %v2155_v46, 0.0 }
 0x34b   : > { %v2230_v7 = vsel %vm2218_vm4, %v11662_v32, 0.0  ;;  %v6313_v59 = vpop.eup %6312  ;;  %v2221_v3 = vadd.f32 %v2220_v9, %v2219_v14  ;;  %v2231_v8 = vsel %vm2218_vm4, %v11663_v16, 0.0  ;;  %v2243_v32 = vadd.f32 %v2242_v31, %v2241_v47 }
 0x34c   : > { %v6315_v17 = vpop.eup %6314  ;;  %v2005_v24 = vmul.bf16 1056980736, %v6313_v59  ;;  %v2232_v54 = vadd.f32 %v2231_v8, %v2230_v7  ;;  %v2051_v13 = vadd.bf16 1056980736, %v2003_v20  ;;  %v2253_v1 = vsel %vm2218_vm4, %v2156_v25, 0.0 }
 0x34d   : > { %v6317_v22 = vpop.eup %6316  ;;  %v2007_v55 = vmul.bf16 1056980736, %v6315_v17  ;;  %v2254_v35 = vadd.f32 %v2253_v1, %v2252_v29  ;;  %v2263_v16 = vsel %vm2218_vm4, %v2158_v48, 0.0  ;;  %v2264_v52 = vsel %vm2218_vm4, %v2159_v11, 0.0 }
 0x34e   : > { %v6319_v14 = vpop.eup %6318  ;;  %v2009_v9 = vmul.bf16 1056980736, %v6317_v22  ;;  %v2053_v57 = vadd.bf16 1056980736, %v2005_v24  ;;  %v2099_v8 = vmul.bf16 %v2051_v13, %v8545_v50  ;;  %v2265_v20 = vadd.f32 %v2264_v52, %v2263_v16 }
 0x34f   : > { %v6321_v61 = vpop.eup %6320  ;;  %v2011_v62 = vmul.bf16 1056980736, %v6319_v14  ;;  %v2055_v59 = vadd.bf16 1056980736, %v2007_v55 }
 0x350   : > { %v6323_v46 = vpop.eup %6322  ;;  %v2019_v7 = vmul.bf16 1056980736, %v6321_v61  ;;  %v2057_v17 = vadd.bf16 1056980736, %v2009_v9  ;;  %v2101_v47 = vmul.bf16 %v2053_v57, %v8550_v33  ;;  %v2148_v29 = vunpack.c.l.bf16 %v2099_v8 }
 0x351   : > { %v6325_v25 = vpop.eup %6324  ;;  %v2021_v31 = vmul.bf16 1056980736, %v6323_v46  ;;  %v2059_v22 = vadd.bf16 1056980736, %v2011_v62  ;;  %v2103_v24 = vmul.bf16 %v2055_v59, %v8553_v53 }
 0x352   : > { %v6327_v48 = vpop.eup %6326  ;;  %v2023_v1 = vmul.bf16 1056980736, %v6325_v25  ;;  %v2067_v14 = vadd.bf16 1056980736, %v2019_v7  ;;  %v2105_v55 = vmul.bf16 %v2057_v17, %v8556_v36  ;;  %v2151_v13 = vunpack.c.l.bf16 %v2101_v47 }
 0x353   : > { %v6329_v50 = vpop.eup %6328  ;;  %v2025_v11 = vmul.bf16 1056980736, %v6327_v48  ;;  %v2069_v51 = vadd.bf16 1056980736, %v2021_v31  ;;  %v2107_v9 = vmul.bf16 %v2059_v22, %v8559_v40  ;;  %v2154_v61 = vunpack.c.l.bf16 %v2103_v24 }
 0x354   : > { %v2027_v33 = vmul.bf16 1056980736, %v6329_v50  ;;  %v2071_v57 = vadd.bf16 1056980736, %v2023_v1  ;;  %v2115_v16 = vmul.bf16 %v2067_v14, %v8562_v4  ;;  %v2157_v62 = vunpack.c.l.bf16 %v2105_v55 }
 0x355   : > { %v2073_v52 = vadd.bf16 1056980736, %v2025_v11  ;;  %v2117_v53 = vmul.bf16 %v2069_v51, %v8566_v23  ;;  %v2160_v59 = vunpack.c.l.bf16 %v2107_v9  ;;  %v2222_v8 = vsel %vm2218_vm4, %v2148_v29, 0.0 }
 0x356   : > { %v2075_v46 = vadd.bf16 1056980736, %v2027_v33  ;;  %v2119_v36 = vmul.bf16 %v2071_v57, %v8569_v18  ;;  %v2172_v7 = vunpack.c.l.bf16 %v2115_v16  ;;  %v2223_v17 = vadd.f32 %v2222_v8, %v2221_v3 }
 0x357   : > { %v2121_v47 = vmul.bf16 %v2073_v52, %v8575_v26  ;;  %v8646_v40 = vunpack.c.l.bf16 %v2117_v53  ;;  %v2233_v25 = vsel %vm2218_vm4, %v2151_v13, 0.0  ;;  %v2244_v4 = vsel %vm2218_vm4, %v2154_v61, 0.0 }
 0x358   : > { %v2123_v31 = vmul.bf16 %v2075_v46, %v8581_v12  ;;  %v8651_v22 = vunpack.c.l.bf16 %v2119_v36  ;;  %v2224_v51 = vrot.slane %v2223_v17, 4  ;;  %v2234_v23 = vadd.f32 %v2233_v25, %v2232_v54 }
 0x359   : > { %v8653_v24 = vunpack.c.l.bf16 %v2121_v47  ;;  %v2245_v29 = vadd.f32 %v2244_v4, %v2243_v32  ;;  %v2255_v18 = vsel %vm2218_vm4, %v2157_v62, 0.0  ;;  %v2266_v3 = vsel %vm2218_vm4, %v2160_v59, 0.0 }
 0x35a   : > { %v8657_v26 = vunpack.c.l.bf16 %v2123_v31  ;;  %v2225_v48 = vadd.f32 %v2224_v51, %v2223_v17  ;;  %v2235_v1 = vrot.slane %v2234_v23, 4  ;;  %v2256_v14 = vadd.f32 %v2255_v18, %v2254_v35 }
 0x35b   : > { %v2246_v55 = vrot.slane %v2245_v29, 4  ;;  %v2267_v13 = vadd.f32 %v2266_v3, %v2265_v20  ;;  %v2281_v12 = vrot.slane %v8380_v56, 2  ;;  %v11664_v50 = vrot.slane %v8501_v63, 4 }
 0x35c   : > { %v2226_v11 = vrot.slane %v2225_v48, 2  ;;  %v2236_v9 = vadd.f32 %v2235_v1, %v2234_v23  ;;  %v2257_v32 = vrot.slane %v2256_v14, 4  ;;  %v2301_v61 = vrot.slane %v8541_v43, 4 }
 0x35d   : > { %v2291_v54 = vadd.f32 %v11664_v50, %v8501_v63  ;;  %v2247_v33 = vadd.f32 %v2246_v55, %v2245_v29  ;;  %v2268_v57 = vrot.slane %v2267_v13, 4  ;;  %v2282_v16 = vadd.f32 %v2281_v12, %v8380_v56 }
 0x35e   : > { %v2227_v52 = vadd.f32 %v2226_v11, %v2225_v48  ;;  %v2237_v35 = vrot.slane %v2236_v9, 2  ;;  %v2258_v53 = vadd.f32 %v2257_v32, %v2256_v14  ;;  %v2302_v20 = vadd.f32 %v2301_v61, %v8541_v43 }
 0x35f   : > { %v2292_v62 = vrot.slane %v2291_v54, 2  ;;  %v2248_v59 = vrot.slane %v2247_v33, 2  ;;  %v2269_v8 = vadd.f32 %v2268_v57, %v2267_v13  ;;  %v2283_v46 = vrot.slane %v2282_v16, 1 }
 0x360   : > { %v2228_v63 = vrot.slane %v2227_v52, 1  ;;  %v2238_v17 = vadd.f32 %v2237_v35, %v2236_v9  ;;  %v2259_v47 = vrot.slane %v2258_v53, 2  ;;  %v2303_v25 = vrot.slane %v2302_v20, 2 }
 0x361   : > { %v2293_v36 = vadd.f32 %v2292_v62, %v2291_v54  ;;  %v2249_v4 = vadd.f32 %v2248_v59, %v2247_v33  ;;  %v2270_v31 = vrot.slane %v2269_v8, 2  ;;  %v8666_v51 = vadd.f32 %v2283_v46, %v2282_v16 }
 0x362   : > { %v8668_v56 = vadd.f32 %v2228_v63, %v2227_v52  ;;  %v2239_v29 = vrot.slane %v2238_v17, 1  ;;  %v2260_v18 = vadd.f32 %v2259_v47, %v2258_v53  ;;  %v2304_v3 = vadd.f32 %v2303_v25, %v2302_v20 }
 0x363   : > { %v2294_v23 = vrot.slane %v2293_v36, 1  ;;  %v2250_v48 = vrot.slane %v2249_v4, 1  ;;  %v2271_v43 = vadd.f32 %v2270_v31, %v2269_v8  ;;  %v11665_v14 = vunpack.c.l.bf16 %v8209_v21 }
 0x364   : > { %v8675_v13 = vadd.f32 %v2239_v29, %v2238_v17  ;;  %v2261_v12 = vrot.slane %v2260_v18, 1  ;;  %v2305_v50 = vrot.slane %v2304_v3, 1  ;;  %v11666_v54 = vunpack.c.h.bf16 %v8209_v21 }
 0x365   : > { %v8670_v1 = vadd.f32 %v2294_v23, %v2293_v36  ;;  %v2307_v55 = vsel %vm2218_vm4, %v11665_v14, 0.0  ;;  %v8680_v9 = vadd.f32 %v2250_v48, %v2249_v4  ;;  %v2272_v32 = vrot.slane %v2271_v43, 1 }
 0x366   : > { %v2308_v11 = vsel %vm2218_vm4, %v11666_v54, 0.0  ;;  %v2310_v33 = vsel %vm2218_vm4, %v2172_v7, 0.0  ;;  %v8683_v57 = vadd.f32 %v2261_v12, %v2260_v18  ;;  %v8685_v16 = vadd.f32 %v2305_v50, %v2304_v3 }
 0x367   : > { %v2309_v61 = vadd.f32 %v2308_v11, %v2307_v55  ;;  %v11667_v62 = vunpack.c.l.bf16 %v8212_v41  ;;  %v11668_v35 = vunpack.c.h.bf16 %v8212_v41  ;;  %v8693_v53 = vadd.f32 %v2272_v32, %v2271_v43 }
 0x368   : > { %v2321_v8 = vsel %vm2218_vm4, %v8646_v40, 0.0  ;;  %v11669_v7 = vunpack.c.l.bf16 %v8216_v58  ;;  %v11670_v36 = vunpack.c.h.bf16 %v8216_v58  ;;  %v2332_v41 = vsel %vm2218_vm4, %v8651_v22, 0.0 }
 0x369   : > { %v2318_v52 = vsel %vm2218_vm4, %v11667_v62, 0.0  ;;  %v2319_v21 = vsel %vm2218_vm4, %v11668_v35, 0.0  ;;  %v2311_v20 = vadd.f32 %v2310_v33, %v2309_v61  ;;  %v11671_v17 = vunpack.c.l.bf16 %v8603_v6 }
 0x36a   : > { %v2320_v59 = vadd.f32 %v2319_v21, %v2318_v52  ;;  %v2329_v46 = vsel %vm2218_vm4, %v11669_v7, 0.0  ;;  %v2330_v63 = vsel %vm2218_vm4, %v11670_v36, 0.0  ;;  %v11672_v40 = vunpack.c.h.bf16 %v8603_v6 }
 0x36b   : > { %v2340_v47 = vsel %vm2218_vm4, %v11671_v17, 0.0  ;;  %v2312_v25 = vrot.slane %v2311_v20, 4  ;;  %v2331_v31 = vadd.f32 %v2330_v63, %v2329_v46  ;;  %v2343_v58 = vsel %vm2218_vm4, %v8653_v24, 0.0 }
 0x36c   : > { %v2322_v4 = vadd.f32 %v2321_v8, %v2320_v59  ;;  %v2341_v23 = vsel %vm2218_vm4, %v11672_v40, 0.0  ;;  %v11673_v18 = vunpack.c.l.bf16 %v8608_v27  ;;  %v11674_v22 = vunpack.c.h.bf16 %v8608_v27 }
 0x36d   : > { %v2342_v29 = vadd.f32 %v2341_v23, %v2340_v47  ;;  %v2313_v43 = vadd.f32 %v2312_v25, %v2311_v20  ;;  %v2333_v55 = vadd.f32 %v2332_v41, %v2331_v31  ;;  %v2354_v6 = vsel %vm2218_vm4, %v8657_v26, 0.0 }
 0x36e   : > { %v2351_v3 = vsel %vm2218_vm4, %v11673_v18, 0.0  ;;  %v2352_v48 = vsel %vm2218_vm4, %v11674_v22, 0.0  ;;  %v2323_v14 = vrot.slane %v2322_v4, 4  ;;  %v2369_v54 = vrot.slane %v8395_v42, 2 }
 0x36f   : > { %v2353_v12 = vadd.f32 %v2352_v48, %v2351_v3  ;;  %v2344_v50 = vadd.f32 %v2343_v58, %v2342_v29  ;;  %v11675_v24 = vrot.slane %v8460_v39, 4  ;;  %v2314_v32 = vrot.slane %v2313_v43, 2 }
 0x370   : > { %v2324_v61 = vadd.f32 %v2323_v14, %v2322_v4  ;;  %v2334_v33 = vrot.slane %v2333_v55, 4  ;;  %v2370_v52 = vadd.f32 %v2369_v54, %v8395_v42  ;;  %v2389_v21 = vrot.slane %v8508_v5, 4 }
 0x371   : > { %v2379_v11 = vadd.f32 %v11675_v24, %v8460_v39  ;;  %v2355_v27 = vadd.f32 %v2354_v6, %v2353_v12  ;;  %v2345_v62 = vrot.slane %v2344_v50, 4  ;;  %v2315_v20 = vadd.f32 %v2314_v32, %v2313_v43 }
 0x372   : > { %v2325_v59 = vrot.slane %v2324_v61, 2  ;;  %v2335_v8 = vadd.f32 %v2334_v33, %v2333_v55  ;;  %v2371_v46 = vrot.slane %v2370_v52, 1  ;;  %v2390_v63 = vadd.f32 %v2389_v21, %v8508_v5 }
 0x373   : > { %v2380_v35 = vrot.slane %v2379_v11, 2  ;;  %v2356_v26 = vrot.slane %v2355_v27, 4  ;;  %v2346_v7 = vadd.f32 %v2345_v62, %v2344_v50  ;;  %v2316_v39 = vrot.slane %v2315_v20, 1 }
 0x374   : > { %v2326_v41 = vadd.f32 %v2325_v59, %v2324_v61  ;;  %v2336_v17 = vrot.slane %v2335_v8, 2  ;;  %v2372_v4 = vadd.f32 %v2371_v46, %v2370_v52  ;;  %v2391_v42 = vrot.slane %v2390_v63, 2 }
 0x375   : > { %v2381_v36 = vadd.f32 %v2380_v35, %v2379_v11  ;;  %v2357_v47 = vadd.f32 %v2356_v26, %v2355_v27  ;;  %v2347_v25 = vrot.slane %v2346_v7, 2  ;;  %v2317_v40 = vadd.f32 %v2316_v39, %v2315_v20 }
 0x376   : > { %v2327_v23 = vrot.slane %v2326_v41, 1  ;;  %v2337_v29 = vadd.f32 %v2336_v17, %v2335_v8  ;;  %v2392_v22 = vadd.f32 %v2391_v42, %v2390_v63  ;;  %v2483_v48 = vpack.c.bf16 %v8668_v56, %v8668_v56 }
 0x377   : > { %v2382_v31 = vrot.slane %v2381_v36, 1  ;;  %v2358_v58 = vrot.slane %v2357_v47, 2  ;;  %v2348_v18 = vadd.f32 %v2347_v25, %v2346_v7  ;;  %v2484_v55 = vpack.c.bf16 %v8675_v13, %v8675_v13 }
 0x378   : > { %v2328_v43 = vadd.f32 %v2327_v23, %v2326_v41  ;;  %v2338_v5 = vrot.slane %v2337_v29, 1  ;;  %v2393_v50 = vrot.slane %v2392_v22, 1  ;;  %v2485_v6 = vpack.c.bf16 %v8680_v9, %v8680_v9 }
 0x379   : > { %v2383_v3 = vadd.f32 %v2382_v31, %v2381_v36  ;;  %v2359_v14 = vadd.f32 %v2358_v58, %v2357_v47  ;;  %v2349_v12 = vrot.slane %v2348_v18, 1  ;;  %v2486_v54 = vpack.c.bf16 %v8683_v57, %v8683_v57 }
 0x37a   : > { %v2339_v24 = vadd.f32 %v2338_v5, %v2337_v29  ;;  %v2487_v32 = vpack.c.bf16 %v8693_v53, %v8693_v53  ;;  %v2488_v56 = vpack.c.bf16 %v8666_v51, %v8666_v51  ;;  %v2394_v33 = vadd.f32 %v2393_v50, %v2392_v22 }
 0x37b   : > { %v2360_v11 = vrot.slane %v2359_v14, 1  ;;  %v2350_v61 = vadd.f32 %v2349_v12, %v2348_v18  ;;  %v2489_v13 = vpack.c.bf16 %v8670_v1, %v8670_v1  ;;  %v2490_v27 = vpack.c.bf16 %v8685_v16, %v8685_v16 }
 0x37c   : > { %v2491_v62 = vpack.c.bf16 %v2317_v40, %v2317_v40  ;;  %v2492_v52 = vpack.c.bf16 %v2328_v43, %v2328_v43  ;;  %v2493_v57 = vpack.c.bf16 %v2339_v24, %v2339_v24  ;;  %v2496_v21 = vpack.c.bf16 %v2372_v4, %v2372_v4 }
 0x37d   : > { %v2361_v9 = vadd.f32 %v2360_v11, %v2359_v14  ;;  %v2494_v35 = vpack.c.bf16 %v2350_v61, %v2350_v61  ;;  %v2497_v20 = vpack.c.bf16 %v2383_v3, %v2383_v3  ;;  %v2498_v59 = vpack.c.bf16 %v2394_v33, %v2394_v33 }
 0x37e   : > { %v2531_v8 = vunpack.c.l.b16 %v2483_v48  ;;  %v2532_v26 = vunpack.c.l.b16 %v2484_v55  ;;  %v2533_v51 = vunpack.c.l.b16 %v2485_v6  ;;  %v2534_v7 = vunpack.c.l.b16 %v2486_v54 }
 0x37f   : > { %v2495_v53 = vpack.c.bf16 %v2361_v9, %v2361_v9  ;;  %v2535_v46 = vunpack.c.l.b16 %v2487_v32  ;;  %v2536_v36 = vunpack.c.l.b16 %v2488_v56  ;;  %v2537_v63 = vunpack.c.l.b16 %v2489_v13 }
 0x380   : > { %v2538_v1 = vunpack.c.l.b16 %v2490_v27  ;;  %v2539_v39 = vunpack.c.l.b16 %v2491_v62  ;;  %v2540_v41 = vunpack.c.l.b16 %v2492_v52  ;;  %v2541_v16 = vunpack.c.l.b16 %v2493_v57 }
 0x381   : > { %v2542_v17 = vunpack.c.l.b16 %v2494_v35  ;;  %v2543_v47 = vunpack.c.l.b16 %v2495_v53  ;;  %v2544_v25 = vunpack.c.l.b16 %v2496_v21  ;;  %v2545_v31 = vunpack.c.l.b16 %v2497_v20 }
 0x382   : > { %v2546_v42 = vunpack.c.l.b16 %v2498_v59  ;;  %v2556_v4 = vsel %vm2555_vm6, %v2532_v26, %v2531_v8  ;;  %v2569_v23 = vsel %vm2555_vm6, %v2540_v41, %v2539_v39  ;;  %v2400_v29 = vrot.slane %v8228_v34, 4 }
 0x383   : > { %v2558_v40 = vsel %vm2557_vm10, %v2533_v51, %v2556_v4  ;;  %v2570_v18 = vsel %vm2557_vm10, %v2541_v16, %v2569_v23  ;;  %v2411_v3 = vrot.slane %v8231_v15, 4  ;;  %v2419_v22 = vadd.f32 %v8363_v45, %v8360_v10 }
 0x384   : > { %v2560_v58 = vsel %vm2559_vm11, %v2534_v7, %v2558_v40  ;;  %v2571_v43 = vsel %vm2559_vm11, %v2542_v17, %v2570_v18  ;;  %v2401_v5 = vadd.f32 %v2400_v29, %v8228_v34  ;;  %v2420_v14 = vsel %vm2218_vm4, %v8336_v19, 0.0 }
 0x385   : > { %v2562_v48 = vsel %vm2561_vm13, %v2535_v46, %v2560_v58  ;;  %v2572_v12 = vsel %vm2561_vm13, %v2543_v47, %v2571_v43  ;;  %v2412_v50 = vadd.f32 %v2411_v3, %v8231_v15  ;;  %v2421_v6 = vadd.f32 %v2420_v14, %v2419_v22 }
 0x386   : > { %v2564_v55 = vsel %vm2563_vm14, %v2536_v36, %v2562_v48  ;;  %v2573_v10 = vsel %vm2563_vm14, %v2544_v25, %v2572_v12  ;;  %v2402_v45 = vrot.slane %v2401_v5, 2  ;;  %v11676_v24 = vunpack.c.l.bf16 %v8299_v49 }
 0x387   : > { %v2566_v54 = vsel %vm2565_vm15, %v2537_v63, %v2564_v55  ;;  %v2574_v19 = vsel %vm2565_vm15, %v2545_v31, %v2573_v10  ;;  %v2413_v32 = vrot.slane %v2412_v50, 2  ;;  %v2422_v56 = vrot.slane %v2421_v6, 4 }
 0x388   : > { %v2428_v11 = vsel %vm2218_vm4, %v11676_v24, 0.0  ;;  %v2568_v34 = vsel %vm2567_vm3, %v2538_v1, %v2566_v54  ;;  %v2468_v61 = vrot.slane %v8605_v60, 2  ;;  %v2575_v15 = vsel %vm2567_vm3, %v2546_v42, %v2574_v19 }
 0x389   : > { %v2403_v33 = vadd.f32 %v2402_v45, %v2401_v5  ;;  %v11677_v13 = vunpack.c.h.bf16 %v8299_v49  ;;  %v2583_v9 = vpack.c.b16 %v2575_v15, %v2568_v34  ;;  %v2414_v62 = vadd.f32 %v2413_v32, %v2412_v50 }
 0x38a   : > { %v2423_v52 = vadd.f32 %v2422_v56, %v2421_v6  ;;  %v2431_v21 = vsel %vm2218_vm4, %v8352_v37, 0.0  ;;  %v2479_v20 = vrot.slane %v8600_v30, 2  ;;  %v11678_v49 = vrot.slane %v8438_v0, 2 }
 0x38b   : > { %v2429_v27 = vsel %vm2218_vm4, %v11677_v13, 0.0  ;;  %v2404_v35 = vrot.slane %v2403_v33, 1  ;;  %6069 = vmatprep.mubr.msk.bf16.mxu0 %vm2218_vm4, %v2583_v9  ;;  %v2415_v59 = vrot.slane %v2414_v62, 1  ;;  %v11679_v51 = vrot.slane %v8578_v28, 2  ;;  %v6172_v13 = vld [vmem:[%s11125_s3] sm:$0xff]   ;;  %v6174_v9 = vld [vmem:[%s11125_s3 + $0x10] sm:$0xff]  }
 0x38c   : > { %v2430_v57 = vadd.f32 %v2429_v27, %v2428_v11  ;;  %v2424_v53 = vrot.slane %v2423_v52, 2  ;;  %v2447_v26 = vadd.f32 %v11678_v49, %v8438_v0  ;;  %v2469_v46 = vadd.f32 %v2468_v61, %v8605_v60  ;;  %6073 = vmatprep.subr.bf16.mxu1 %v6172_v13  ;;  %v6173_v27 = vld [vmem:[%s11125_s3 + $0x8] sm:$0xff]  }
 0x38d   : > { %v2458_v7 = vadd.f32 %v11679_v51, %v8578_v28  ;;  %v2405_v36 = vadd.f32 %v2404_v35, %v2403_v33  ;;  %v2416_v63 = vadd.f32 %v2415_v59, %v2414_v62  ;;  %v2480_v17 = vadd.f32 %v2479_v20, %v8600_v30  ;;  %6074 = vmatpush3.bf16.msra.mxu1 %v6172_v13  ;;  %v6175_v62 = vld [vmem:[%s11125_s3 + $0x18] sm:$0xff]   ;;  %v8809_v35 = vpop.xlane.xlu1 %609 }
 0x38e   : > { %v2432_v8 = vadd.f32 %v2431_v21, %v2430_v57  ;;  %v2425_v37 = vadd.f32 %v2424_v53, %v2423_v52  ;;  %v2448_v25 = vrot.slane %v2447_v26, 1  ;;  %v2470_v42 = vrot.slane %v2469_v46, 1  ;;  %6075 = vmatprep.subr.bf16.mxu1 %v6173_v27  ;;  %v8805_v52 = vpop.xlane.xlu0 %612  ;;  %11682 = vst [vmem:[#allocation141_spill] sm:$0xff] %v8809_v35  ;;  %v6560_v21 = vld [vmem:[%s11124_s2 + $0x8] sm:$0xff] }
 0x38f   : > { %v2499_v39 = vpack.c.bf16 %v2405_v36, %v2405_v36  ;;  %v2500_v47 = vpack.c.bf16 %v2416_v63, %v2416_v63  ;;  %v2459_v31 = vrot.slane %v2458_v7, 1  ;;  %v2481_v29 = vrot.slane %v2480_v17, 1  ;;  %11680 = vst [vmem:[#allocation138_spill] sm:$0xff] %v8805_v52 }
 0x390   : > { %v2433_v1 = vrot.slane %v2432_v8, 4  ;;  %v2426_v41 = vrot.slane %v2425_v37, 1  ;;  %v2449_v18 = vadd.f32 %v2448_v25, %v2447_v26  ;;  %v2471_v3 = vadd.f32 %v2470_v42, %v2469_v46 }
 0x391   : > { %v2547_v40 = vunpack.c.l.b16 %v2499_v39  ;;  %v2548_v23 = vunpack.c.l.b16 %v2500_v47  ;;  %v2460_v48 = vadd.f32 %v2459_v31, %v2458_v7  ;;  %v2482_v30 = vadd.f32 %v2481_v29, %v2480_v17  ;;  %6076 = vmatpush3.bf16.msra.mxu1 %v6173_v27  ;;  %v11691_v27 = vld [vmem:[#allocation31_spill] sm:$0xff] }
 0x392   : > { %v2434_v16 = vadd.f32 %v2433_v1, %v2432_v8  ;;  %v2427_v0 = vadd.f32 %v2426_v41, %v2425_v37  ;;  %v2503_v55 = vpack.c.bf16 %v2449_v18, %v2449_v18  ;;  %v2505_v12 = vpack.c.bf16 %v2471_v3, %v2471_v3  ;;  %6077 = vmatprep.subr.bf16.mxu1 %v6174_v9  ;;  %v8807_v57 = vpop.xlane.xlu0 %615  ;;  %v6177_v18 = vld [vmem:[%s11126_s4 + $0x28] sm:$0xff]   ;;  %v6178_v3 = vld [vmem:[%s11126_s4 + $0x30] sm:$0xff]  }
 0x393   : > { %v2576_v58 = vsel %vm2555_vm6, %v2548_v23, %v2547_v40  ;;  %v2504_v6 = vpack.c.bf16 %v2460_v48, %v2460_v48  ;;  %v2506_v54 = vpack.c.bf16 %v2482_v30, %v2482_v30  ;;  %11681 = vst [vmem:[#allocation139_spill] sm:$0xff] %v8807_v57  ;;  %v2666_v20 = vrot.slane %v6560_v21, %v6718_v2  ;;  %v6179_v48 = vld [vmem:[%s11126_s4 + $0x38] sm:$0xff]  }
 0x394   : > { %v2435_v4 = vrot.slane %v2434_v16, 2  ;;  %v2501_v60 = vpack.c.bf16 %v2427_v0, %v2427_v0  ;;  %v2551_v45 = vunpack.c.l.b16 %v2503_v55  ;;  %v2553_v24 = vunpack.c.l.b16 %v2505_v12  ;;  %v11683_v12 = vld [vmem:[#allocation17_spill] sm:$0xff] }
 0x395   : > { %v2552_v11 = vunpack.c.l.b16 %v2504_v6  ;;  %v2554_v32 = vunpack.c.l.b16 %v2506_v54  ;;  %6078 = vmatpush3.bf16.msra.mxu1 %v6174_v9  ;;  %v2669_v59 = vmul.f32 %v2666_v20, %v8807_v57  ;;  %v2667_v8 = vmul.f32 %v2666_v20, %v8809_v35  ;;  %v11684_v6 = vld [vmem:[#allocation26_spill] sm:$0xff] }
 0x396   : > { %v2436_v28 = vadd.f32 %v2435_v4, %v2434_v16  ;;  %v2549_v43 = vunpack.c.l.b16 %v2501_v60  ;;  %6079 = vmatprep.subr.bf16.mxu1 %v6175_v62  ;;  %v2668_v46 = vmul.f32 %v2666_v20, %v8805_v52  ;;  %v3220_v54 = vmul.bf16 %v7339_v44, %v11684_v6  ;;  %v11693_v20 = vld [vmem:[#allocation33_spill] sm:$0xff] }
 0x397   : > { %v3254_v9 = vmul.bf16 %v7339_v44, %v11691_v27  ;;  %v11743_v27 = vld [vmem:[#allocation125_spill] sm:$0xff] }
 0x398   : > { %v2437_v22 = vrot.slane %v2436_v28, 1  ;;  %v2577_v14 = vsel %vm2557_vm10, %v2549_v43, %v2576_v58  ;;  %v6176_v58 = vld [vmem:[%s11126_s4 + $0x20] sm:$0xff]   ;;  %v11757_v6 = vld [vmem:[#allocation153_spill] sm:$0xff] }
 0x399   : > { %6080 = vmatpush3.bf16.msra.mxu1 %v6175_v62  ;;  %6085 = vmatprep.subr.bf16.mxu0 %v6176_v58  ;;  %v11692_v62 = vld [vmem:[#allocation37_spill] sm:$0xff] }
 0x39a   : > { %v2438_v5 = vadd.f32 %v2437_v22, %v2436_v28  ;;  %v3223_v21 = vmul.bf16 %v7339_v44, %v11692_v62  ;;  %v11760_v52 = vld [vmem:[#allocation81_spill] sm:$0xff] }
 0x39c   : > { %v2502_v50 = vpack.c.bf16 %v2438_v5, %v2438_v5 }
 0x39e   : > { %v2550_v10 = vunpack.c.l.b16 %v2502_v50 }
 0x3a0   : > { %v2578_v34 = vsel %vm2559_vm11, %v2550_v10, %v2577_v14  ;;  %v11685_v10 = vld [vmem:[#allocation25_spill] sm:$0xff] }
 0x3a1   : > { %v2579_v19 = vsel %vm2561_vm13, %v2551_v45, %v2578_v34  ;;  %v3240_v45 = vmul.bf16 %v7339_v44, %v11685_v10  ;;  %v11687_v34 = vld [vmem:[#allocation27_spill] sm:$0xff] }
 0x3a2   : > { %v2580_v56 = vsel %vm2563_vm14, %v2552_v11, %v2579_v19  ;;  %v3222_v19 = vmul.bf16 %v7339_v44, %v11687_v34 }
 0x3a3   : > { %v2581_v61 = vsel %vm2565_vm15, %v2553_v24, %v2580_v56  ;;  %v11686_v24 = vld [vmem:[#allocation28_spill] sm:$0xff] }
 0x3a4   : > { %v2582_v15 = vsel %vm2567_vm3, %v2554_v32, %v2581_v61  ;;  %v3236_v11 = vmul.bf16 %v7339_v44, %v11686_v24  ;;  %v11688_v32 = vld [vmem:[#allocation30_spill] sm:$0xff]  ;;  %v11689_v61 = vld [vmem:[#allocation29_spill] sm:$0xff]  ;;  %v11747_v24 = vld [vmem:[#allocation147_spill] sm:$0xff] }
 0x3a5   : > { %v2584_v33 = vpack.c.b16 %v2582_v15, %v2582_v15  ;;  %v3224_v56 = vmul.bf16 %v7339_v44, %v11688_v32  ;;  %v3238_v15 = vmul.bf16 %v7339_v44, %v11689_v61 }
 0x3a7   : > { %6070 = vmatmul.mubr.msk.bf16.vlgmr.msra.gmra.mrb[0].mxu0 %vm2218_vm4, %v2584_v33  ;;  %v11690_v33 = vld [vmem:[#allocation32_spill] sm:$0xff] }
 0x3a8   : > { %6086 = vmatpush3.bf16.msra.mxu0 %v6176_v58  ;;  %v3252_v13 = vmul.bf16 %v7339_v44, %v11690_v33  ;;  %v11744_v33 = vld [vmem:[#allocation95_spill] sm:$0xff] }
 0x3a9   : > { %6087 = vmatprep.subr.bf16.mxu0 %v6177_v18 }
 0x3ac   : > { %6088 = vmatpush3.bf16.msra.mxu0 %v6177_v18  ;;  %v11707_v18 = vld [vmem:[#allocation51_spill] sm:$0xff] }
 0x3ad   : > { %6089 = vmatprep.subr.bf16.mxu0 %v6178_v3 }
 0x3b0   : > { %6090 = vmatpush3.bf16.msra.mxu0 %v6178_v3  ;;  %v3253_v3 = vmul.bf16 %v7339_v44, %v11707_v18  ;;  %v11714_v18 = vld [vmem:[#allocation52_spill] sm:$0xff] }
 0x3b1   : > { %6091 = vmatprep.subr.bf16.mxu0 %v6179_v48 }
 0x3b4   : > { %6092 = vmatpush3.bf16.msra.mxu0 %v6179_v48 }
 0x47a   : > { %v6071_v53 = vpop.f32.mrb[0].mxu0 }
 0x47b   : > { %v2672_v49 = vadd.f32 %v6071_v53, %v2669_v59  ;;  %v2649_v26 = vpop.f32.mrb[1].mxu0  ;;  %v3221_v59 = vmul.bf16 %v7339_v44, %v11693_v20  ;;  %v11694_v53 = vld [vmem:[#allocation39_spill] sm:$0xff] }
 0x47c   : > { %v2670_v51 = vadd.f32 %v2667_v8, %v2649_v26  ;;  %v6072_v7 = vpop.f32.mrb[2].mxu0  ;;  %v3237_v8 = vmul.bf16 %v7339_v44, %v11694_v53 }
 0x47d   : > { %v2675_v36 = vmul.f32 0.5, %v2672_v49  ;;  %v2652_v63 = vpop.f32.mrb[3].mxu0 }
 0x47e   : > { %v2673_v37 = vmul.f32 0.5, %v2670_v51  ;;  %v2671_v1 = vadd.f32 %v2668_v46, %v2652_v63  ;;  %v11697_v46 = vld [vmem:[#allocation41_spill] sm:$0xff] }
 0x47f   : > { %6330 = vtanh.f32 %v2675_v36  ;;  %v3242_v36 = vmul.bf16 %v7339_v44, %v11697_v46 }
 0x480   : > { %6332 = vtanh.f32 %v2673_v37  ;;  %v2674_v39 = vmul.f32 0.5, %v2671_v1  ;;  %v11698_v37 = vld [vmem:[#allocation43_spill] sm:$0xff] }
 0x482   : > { %6334 = vtanh.f32 %v2674_v39  ;;  %v11699_v39 = vld [vmem:[#allocation45_spill] sm:$0xff] }
 0x489   : > { %v6331_v41 = vpop.eup %6330 }
 0x48a   : > { %v6333_v16 = vpop.eup %6332  ;;  %v2681_v17 = vmul.f32 0.5, %v6331_v41  ;;  %v8870_v41 = vadd.bf16 %v3236_v11, %v11699_v39  ;;  %v11725_v39 = vld [vmem:[#allocation67_spill] sm:$0xff] }
 0x48b   : > { %v2679_v47 = vmul.f32 0.5, %v6333_v16  ;;  %v11700_v16 = vld [vmem:[#allocation40_spill] sm:$0xff] }
 0x48c   : > { %v6335_v25 = vpop.eup %6334  ;;  %v2684_v31 = vadd.f32 0.5, %v2681_v17  ;;  %v8873_v17 = vadd.bf16 %v3222_v19, %v11700_v16  ;;  %v11711_v19 = vld [vmem:[#allocation48_spill] sm:$0xff]  ;;  %v11723_v16 = vld [vmem:[#allocation66_spill] sm:$0xff] }
 0x48d   : > { %v2682_v42 = vadd.f32 0.5, %v2679_v47  ;;  %v2680_v0 = vmul.f32 0.5, %v6335_v25  ;;  %v11701_v47 = vld [vmem:[#allocation38_spill] sm:$0xff] }
 0x48e   : > { %v2687_v40 = vmul.f32 %v2684_v31, %v2672_v49  ;;  %v11695_v49 = vld [vmem:[#allocation35_spill] sm:$0xff]  ;;  %v3256_v25 = vmul.bf16 %v7339_v44, %v11701_v47  ;;  %v11702_v31 = vld [vmem:[#allocation42_spill] sm:$0xff] }
 0x48f   : > { %v2683_v4 = vadd.f32 0.5, %v2680_v0  ;;  %v2685_v23 = vmul.f32 %v2682_v42, %v2670_v51  ;;  %v3226_v26 = vmul.bf16 %v7339_v44, %v11695_v49  ;;  %v11696_v51 = vld [vmem:[#allocation36_spill] sm:$0xff]  ;;  %v8878_v42 = vadd.bf16 %v3238_v15, %v11702_v31 }
 0x490   : > { %v2689_v60 = vpack.c.bf16 %v2687_v40, %v2687_v40  ;;  %v3239_v7 = vmul.bf16 %v7339_v44, %v11696_v51  ;;  %v11703_v0 = vld [vmem:[#allocation44_spill] sm:$0xff]  ;;  %v11704_v40 = vld [vmem:[#allocation47_spill] sm:$0xff]  ;;  %v3255_v15 = vmul.bf16 %v7339_v44, %v11711_v19  ;;  %v11720_v19 = vld [vmem:[#allocation62_spill] sm:$0xff] }
 0x491   : > { %v2686_v28 = vmul.f32 %v2683_v4, %v2671_v1  ;;  %v8867_v1 = vadd.bf16 %v3220_v54, %v11698_v37  ;;  %v3228_v4 = vmul.bf16 %v7339_v44, %v11703_v0  ;;  %v11710_v54 = vld [vmem:[#allocation50_spill] sm:$0xff]  ;;  %v8906_v0 = vadd.bf16 %v3252_v13, %v11714_v18  ;;  %v11717_v31 = vld [vmem:[#allocation56_spill] sm:$0xff] }
 0x492   : > { %v8897_v11 = vadd.bf16 %v3224_v56, %v11710_v54  ;;  %v11719_v54 = vld [vmem:[#allocation58_spill] sm:$0xff]  ;;  %v11722_v13 = vld [vmem:[#allocation60_spill] sm:$0xff] }
 0x493   : > { %v2688_v29 = vpack.c.bf16 %v2686_v28, %v2685_v23  ;;  %v3225_v23 = vmul.bf16 %v7339_v44, %v11704_v40  ;;  %v11705_v28 = vld [vmem:[#allocation49_spill] sm:$0xff]  ;;  %11715 = vst [vmem:[#allocation142_spill] sm:$0xff] %v8906_v0  ;;  %v8916_v47 = vadd.bf16 %v3221_v59, %v11719_v54  ;;  %v8925_v18 = vadd.bf16 %v3239_v7, %v11722_v13  ;;  %v11727_v59 = vld [vmem:[#allocation70_spill] sm:$0xff]  ;;  %v11729_v13 = vld [vmem:[#allocation72_spill] sm:$0xff] }
 0x494   : > { %v11741_v51 = vld [vmem:[#allocation104_spill] sm:$0xff] }
 0x495   : > { %6081 = vmatprep.mubr.msk.bf16.mxu1 %vm2218_vm4, %v2688_v29  ;;  %v3241_v29 = vmul.bf16 %v7339_v44, %v11705_v28 }
 0x496   : > { %6082 = vmatmul.mubr.msk.bf16.vlgmr.msra.gmra.mrb[0].mxu1 %vm2218_vm4, %v2689_v60  ;;  %v11706_v60 = vld [vmem:[#allocation46_spill] sm:$0xff] }
 0x497   : > { %v3244_v58 = vmul.bf16 %v7339_v44, %v11706_v60  ;;  %v11712_v60 = vld [vmem:[#allocation57_spill] sm:$0xff] }
 0x498   : > { %v8903_v40 = vadd.bf16 %v3254_v9, %v11712_v60  ;;  %v11721_v9 = vld [vmem:[#allocation59_spill] sm:$0xff] }
 0x499   : > { %v8922_v60 = vadd.bf16 %v3226_v26, %v11721_v9  ;;  %v8937_v54 = vadd.bf16 %v3244_v58, %v11727_v59  ;;  %v11728_v9 = vld [vmem:[#allocation71_spill] sm:$0xff] }
 0x49a   : > { %11713 = vst [vmem:[#allocation140_spill] sm:$0xff] %v8903_v40  ;;  %v8942_v7 = vadd.bf16 %v3225_v23, %v11728_v9  ;;  %v11736_v59 = vld [vmem:[#allocation79_spill] sm:$0xff] }
 0x49b   : > { %v11737_v23 = vld [vmem:[#allocation83_spill] sm:$0xff] }
 0x569   : > { %v6083_v22 = vpop.f32.mrb[0].mxu1 }
 0x56a   : > { %v2769_v43 = vpack.c.bf16 %v6083_v22, %v6083_v22  ;;  %v2754_v5 = vpop.f32.mrb[1].mxu1  ;;  %v11708_v22 = vld [vmem:[#allocation53_spill] sm:$0xff] }
 0x56b   : > { %v6084_v30 = vpop.f32.mrb[2].mxu1  ;;  %v3258_v48 = vmul.bf16 %v7339_v44, %v11708_v22  ;;  %v11716_v22 = vld [vmem:[#allocation54_spill] sm:$0xff] }
 0x56c   : > { %3159 = vrot.lane.b32.xlu0 %v2769_v43, %s6632_s10  ;;  %v8833_v14 = vpop.f32.mrb[3].mxu1  ;;  %v2827_v50 = vrot.slane %v2769_v43, %v11683_v12 }
 0x56d   : > { %v2768_v55 = vpack.c.bf16 %v8833_v14, %v2754_v5  ;;  %v11709_v5 = vld [vmem:[#allocation55_spill] sm:$0xff]  ;;  %v5984_v26 = vpack.c.bf16 %v8833_v14, %v8833_v14 }
 0x56e   : > { %v2828_v63 = vcombine.high %v2827_v50, %v2827_v50  ;;  %v2835_v43 = vrot.slane %v2827_v50, %v11683_v12  ;;  %v8894_v30 = vadd.bf16 %v3240_v45, %v11709_v5  ;;  %v3227_v50 = vmul.bf16 %v7339_v44, %v11716_v22  ;;  %v11718_v5 = vld [vmem:[#allocation61_spill] sm:$0xff] }
 0x56f   : > { %3157 = vrot.lane.b32.xlu1 %v2768_v55, %s6632_s10  ;;  %v3243_v45 = vmul.bf16 %v7339_v44, %v11717_v31  ;;  %v8913_v56 = vadd.bf16 %v3223_v21, %v11718_v5  ;;  %v8928_v22 = vadd.bf16 %v3256_v25, %v11723_v16  ;;  %v8931_v31 = vadd.bf16 %v3242_v36, %v11725_v39  ;;  %v11726_v5 = vld [vmem:[#allocation68_spill] sm:$0xff]  ;;  %v11731_v16 = vld [vmem:[#allocation73_spill] sm:$0xff] }
 0x570   : > { %v2842_v28 = vrot.slane %v2828_v63, %v11683_v12  ;;  %v8919_v63 = vadd.bf16 %v3237_v8, %v11720_v19  ;;  %v2843_v21 = vcombine.high %v2835_v43, %v2835_v43  ;;  %v8934_v37 = vadd.bf16 %v3228_v4, %v11726_v5  ;;  %v11732_v19 = vld [vmem:[#allocation75_spill] sm:$0xff]  ;;  %v11734_v5 = vld [vmem:[#allocation77_spill] sm:$0xff] }
 0x571   : > { %11724 = vst [vmem:[#allocation145_spill] sm:$0xff] %v8928_v22  ;;  %v8945_v25 = vadd.bf16 %v3255_v15, %v11729_v13  ;;  %v8948_v36 = vadd.bf16 %v3241_v29, %v11731_v16  ;;  %v2862_v39 = vunpack.i.h.s16 %v2835_v43  ;;  %v8951_v4 = vadd.bf16 %v3253_v3, %v11732_v19  ;;  %v11738_v13 = vld [vmem:[#allocation91_spill] sm:$0xff]  ;;  %v11739_v19 = vld [vmem:[#allocation94_spill] sm:$0xff] }
 0x572   : > { %v2844_v8 = vcombine.high %v2842_v28, %v2842_v28  ;;  %v8954_v58 = vadd.bf16 %v3258_v48, %v11734_v5  ;;  %v8957_v46 = vadd.bf16 %v3227_v50, %v11736_v59  ;;  %v2779_v14 = vrot.slane %v2768_v55, %v11683_v12  ;;  %v11740_v59 = vld [vmem:[#allocation100_spill] sm:$0xff] }
 0x573   : > { %11730 = vst [vmem:[#allocation101_spill] sm:$0xff] %v8945_v25  ;;  %11733 = vst [vmem:[#allocation144_spill] sm:$0xff] %v8951_v4  ;;  %v8961_v9 = vadd.bf16 %v3243_v45, %v11737_v23  ;;  %v3264_v15 = vmul.bf16 %v7339_v44, %v11608_v38  ;;  %v2864_v29 = vunpack.i.h.s16 %v2842_v28  ;;  %v2866_v16 = vunpack.i.h.s16 %v2843_v21  ;;  %v11742_v38 = vld [vmem:[#allocation124_spill] sm:$0xff] }
 0x574   : > { %11735 = vst [vmem:[#allocation123_spill] sm:$0xff] %v8954_v58  ;;  %v3233_v3 = vmul.bf16 %v7339_v44, %v11738_v13  ;;  %v3263_v48 = vmul.bf16 %v7339_v44, %v11739_v19  ;;  %v2868_v5 = vunpack.i.h.s16 %v2844_v8  ;;  %v2786_v50 = vrot.slane %v5984_v26, %v11683_v12 }
 0x575   : > { %v3249_v55 = vmul.bf16 %v7339_v44, %v11740_v59  ;;  %v3266_v45 = vmul.bf16 %v7339_v44, %v11741_v51  ;;  %v5993_v23 = vpack.i.b16 %v2835_v43, %v2835_v43  ;;  %v2886_v49 = vpack.i.b16 %v2862_v39, %v2862_v39  ;;  %v11745_v59 = vld [vmem:[#allocation137_spill] sm:$0xff] }
 0x576   : > { %v3235_v53 = vmul.bf16 %v7339_v44, %v11742_v38  ;;  %v5994_v20 = vpack.i.b16 %v2842_v28, %v2842_v28  ;;  %v5995_v62 = vpack.i.b16 %v2843_v21, %v2843_v21  ;;  %v2787_v13 = vcombine.high %v2779_v14, %v2779_v14  ;;  %v11749_v28 = vld [vmem:[#allocation149_spill] sm:$0xff] }
 0x577   : > { %v3251_v19 = vmul.bf16 %v7339_v44, %v11743_v27  ;;  %v3267_v26 = vmul.bf16 %v7339_v44, %v11744_v33  ;;  %v2888_v61 = vpack.i.b16 %v2864_v29, %v2864_v29  ;;  %v2890_v32 = vpack.i.b16 %v2866_v16, %v2866_v16 }
 0x578   : > { %v8981_v34 = vadd.bf16 %v3264_v15, %v11745_v59  ;;  %v5996_v51 = vpack.i.b16 %v2844_v8, %v2844_v8  ;;  %v2892_v43 = vpack.i.b16 %v2868_v5, %v2868_v5  ;;  %v2788_v39 = vcombine.high %v2786_v50, %v2786_v50  ;;  %v11750_v5 = vld [vmem:[#allocation148_spill] sm:$0xff] }
 0x579   : > { %v8984_v10 = vadd.bf16 %v3249_v55, %v11747_v24  ;;  %v8987_v21 = vadd.bf16 %v3233_v3, %v11749_v28  ;;  %v2960_v38 = vrot.slane %v5993_v23, %v6718_v2  ;;  %v2964_v27 = vrot.slane %v2886_v49, %v6718_v2  ;;  %v11752_v55 = vld [vmem:[#allocation151_spill] sm:$0xff]  ;;  %v11754_v28 = vld [vmem:[#allocation150_spill] sm:$0xff] }
 0x57a   : > { %11746 = vst [vmem:[#allocation122_spill] sm:$0xff] %v8981_v34  ;;  %v2968_v44 = vrot.slane %v5994_v20, %v6718_v2  ;;  %v2976_v16 = vrot.slane %v5995_v62, %v6718_v2  ;;  %v2795_v15 = vrot.slane %v2779_v14, %v11683_v12  ;;  %v2809_v8 = vrot.slane %v2787_v13, %v11683_v12 }
 0x57b   : > { %11748 = vst [vmem:[#allocation129_spill] sm:$0xff] %v8984_v10  ;;  %v8996_v29 = vadd.bf16 %v3266_v45, %v11750_v5  ;;  %v8999_v24 = vadd.bf16 %v3263_v48, %v11752_v55  ;;  %v2972_v3 = vrot.slane %v2888_v61, %v6718_v2  ;;  %v2980_v23 = vrot.slane %v2890_v32, %v6718_v2  ;;  %v11756_v45 = vld [vmem:[#allocation152_spill] sm:$0xff]  ;;  %v11772_v10 = vld [vmem:[#allocation98_spill] sm:$0xff] }
 0x57c   : > { %v2984_v49 = vrot.slane %v5996_v51, %v6718_v2  ;;  %v2988_v20 = vrot.slane %v2892_v43, %v6718_v2  ;;  %v2802_v62 = vrot.slane %v2786_v50, %v11683_v12  ;;  %v2816_v14 = vrot.slane %v2788_v39, %v11683_v12  ;;  %v11759_v43 = vld [vmem:[#allocation7_spill] sm:$0xff] }
 0x57d   : > { %11751 = vst [vmem:[#allocation131_spill] sm:$0xff] %v8996_v29  ;;  %11753 = vst [vmem:[#allocation146_spill] sm:$0xff] %v8999_v24  ;;  %v9008_v13 = vadd.bf16 %v3251_v19, %v11754_v28  ;;  %v9011_v5 = vadd.bf16 %v3235_v53, %v11756_v45  ;;  %v3102_v48 = vpack.i.b16 %v2960_v38, %v2960_v38 }
 0x57e   : > { %v3109_v55 = vpack.i.b16 %v2964_v27, %v2964_v27  ;;  %v3116_v59 = vpack.i.b16 %v2968_v44, %v2968_v44  ;;  %v3130_v61 = vpack.i.b16 %v2976_v16, %v2976_v16  ;;  %v2817_v33 = vcombine.high %v2795_v15, %v2795_v15 }
 0x57f   : > { %11755 = vst [vmem:[#allocation143_spill] sm:$0xff] %v9008_v13  ;;  %v2819_v32 = vcombine.high %v2809_v8, %v2809_v8  ;;  %v9014_v51 = vadd.bf16 %v3267_v26, %v11757_v6  ;;  %v9018_v50 = vrot.slane %v11760_v52, %v11759_v43  ;;  %v3123_v39 = vpack.i.b16 %v2972_v3, %v2972_v3 }
 0x580   : > { %v3137_v12 = vpack.i.b16 %v2980_v23, %v2980_v23  ;;  %v3144_v19 = vpack.i.b16 %v2984_v49, %v2984_v49  ;;  %v3151_v28 = vpack.i.b16 %v2988_v20, %v2988_v20  ;;  %v2818_v35 = vcombine.high %v2802_v62, %v2802_v62 }
 0x581   : > { %11758 = vst [vmem:[#allocation126_spill] sm:$0xff] %v9014_v51  ;;  %11761 = vst [vmem:[#allocation130_spill] sm:$0xff] %v9018_v50  ;;  %v2820_v53 = vcombine.high %v2816_v14, %v2816_v14  ;;  %v9021_v38 = vrot.slane %v3102_v48, %v6718_v2  ;;  %v9024_v27 = vrot.slane %v3109_v55, %v6718_v2  ;;  %v2846_v44 = vunpack.i.h.s16 %v2795_v15 }
 0x582   : > { %v2848_v16 = vunpack.i.h.s16 %v2809_v8  ;;  %v9027_v26 = vrot.slane %v3116_v59, %v6718_v2  ;;  %v9030_v52 = vrot.slane %v3130_v61, %v6718_v2  ;;  %v2850_v3 = vunpack.i.h.s16 %v2817_v33 }
 0x583   : > { %11762 = vst [vmem:[#allocation117_spill] sm:$0xff] %v9021_v38  ;;  %11763 = vst [vmem:[#allocation127_spill] sm:$0xff] %v9024_v27  ;;  %v2852_v23 = vunpack.i.h.s16 %v2819_v32  ;;  %v9033_v49 = vrot.slane %v3123_v39, %v6718_v2  ;;  %v9036_v20 = vrot.slane %v3137_v12, %v6718_v2  ;;  %v2854_v48 = vunpack.i.h.s16 %v2802_v62 }
 0x584   : > { %11764 = vst [vmem:[#allocation133_spill] sm:$0xff] %v9027_v26  ;;  %11765 = vst [vmem:[#allocation118_spill] sm:$0xff] %v9030_v52  ;;  %v2856_v43 = vunpack.i.h.s16 %v2816_v14  ;;  %v9039_v55 = vrot.slane %v3144_v19, %v6718_v2  ;;  %v9042_v6 = vrot.slane %v3151_v28, %v6718_v2  ;;  %v2858_v59 = vunpack.i.h.s16 %v2818_v35 }
 0x585   : > { %11766 = vst [vmem:[#allocation128_spill] sm:$0xff] %v9033_v49  ;;  %11767 = vst [vmem:[#allocation86_spill] sm:$0xff] %v9036_v20  ;;  %v2860_v45 = vunpack.i.h.s16 %v2820_v53  ;;  %v5985_v61 = vpack.i.b16 %v2795_v15, %v2795_v15  ;;  %v2870_v57 = vpack.i.b16 %v2846_v44, %v2846_v44  ;;  %v5986_v51 = vpack.i.b16 %v2809_v8, %v2809_v8 }
 0x586   : > { %11768 = vst [vmem:[#allocation76_spill] sm:$0xff] %v9039_v55  ;;  %11769 = vst [vmem:[#allocation19_spill] sm:$0xff] %v9042_v6  ;;  %v2872_v29 = vpack.i.b16 %v2848_v16, %v2848_v16  ;;  %v5987_v34 = vpack.i.b16 %v2817_v33, %v2817_v33  ;;  %v2874_v39 = vpack.i.b16 %v2850_v3, %v2850_v3 }
 0x587   : > { %v5988_v24 = vpack.i.b16 %v2819_v32, %v2819_v32  ;;  %v2876_v58 = vpack.i.b16 %v2852_v23, %v2852_v23  ;;  %v5989_v12 = vpack.i.b16 %v2802_v62, %v2802_v62  ;;  %v2878_v22 = vpack.i.b16 %v2854_v48, %v2854_v48 }
 0x588   : > { %v5990_v25 = vpack.i.b16 %v2816_v14, %v2816_v14  ;;  %v2880_v40 = vpack.i.b16 %v2856_v43, %v2856_v43  ;;  %v5991_v4 = vpack.i.b16 %v2818_v35, %v2818_v35  ;;  %v2882_v19 = vpack.i.b16 %v2858_v59, %v2858_v59 }
 0x589   : > { %v5992_v0 = vpack.i.b16 %v2820_v53, %v2820_v53  ;;  %v2884_v55 = vpack.i.b16 %v2860_v45, %v2860_v45  ;;  %v2896_v28 = vrot.slane %v5985_v61, %v6718_v2  ;;  %v2900_v6 = vrot.slane %v2870_v57, %v6718_v2 }
 0x58a   : > { %v2904_v15 = vrot.slane %v5986_v51, %v6718_v2  ;;  %v2908_v8 = vrot.slane %v2872_v29, %v6718_v2  ;;  %v2912_v33 = vrot.slane %v5987_v34, %v6718_v2  ;;  %v2916_v32 = vrot.slane %v2874_v39, %v6718_v2 }
 0x58b   : > { %v2920_v62 = vrot.slane %v5988_v24, %v6718_v2  ;;  %v2924_v14 = vrot.slane %v2876_v58, %v6718_v2  ;;  %v2928_v35 = vrot.slane %v5989_v12, %v6718_v2  ;;  %v2932_v45 = vrot.slane %v2878_v22, %v6718_v2 }
 0x58c   : > { %v2936_v43 = vrot.slane %v5990_v25, %v6718_v2  ;;  %v2940_v57 = vrot.slane %v2880_v40, %v6718_v2  ;;  %v2944_v51 = vrot.slane %v5991_v4, %v6718_v2  ;;  %v2948_v29 = vrot.slane %v2882_v19, %v6718_v2 }
 0x58d   : > { %v2952_v34 = vrot.slane %v5992_v0, %v6718_v2  ;;  %v2956_v53 = vrot.slane %v2884_v55, %v6718_v2  ;;  %v2990_v44 = vpack.i.b16 %v2896_v28, %v2896_v28  ;;  %v2997_v24 = vpack.i.b16 %v2900_v6, %v2900_v6 }
 0x58e   : > { %v3004_v16 = vpack.i.b16 %v2904_v15, %v2904_v15  ;;  %v3011_v58 = vpack.i.b16 %v2908_v8, %v2908_v8  ;;  %v3018_v3 = vpack.i.b16 %v2912_v33, %v2912_v33  ;;  %v3025_v23 = vpack.i.b16 %v2916_v32, %v2916_v32 }
 0x58f   : > { %v3032_v48 = vpack.i.b16 %v2920_v62, %v2920_v62  ;;  %v3039_v22 = vpack.i.b16 %v2924_v14, %v2924_v14  ;;  %v3046_v59 = vpack.i.b16 %v2928_v35, %v2928_v35  ;;  %v3053_v25 = vpack.i.b16 %v2932_v45, %v2932_v45 }
 0x590   : > { %v3060_v61 = vpack.i.b16 %v2936_v43, %v2936_v43  ;;  %v3067_v40 = vpack.i.b16 %v2940_v57, %v2940_v57  ;;  %v3074_v39 = vpack.i.b16 %v2944_v51, %v2944_v51  ;;  %v3081_v4 = vpack.i.b16 %v2948_v29, %v2948_v29 }
 0x591   : > { %v3088_v12 = vpack.i.b16 %v2952_v34, %v2952_v34  ;;  %v3095_v19 = vpack.i.b16 %v2956_v53, %v2956_v53  ;;  %v2995_v0 = vrot.slane %v2990_v44, %v6718_v2  ;;  %v3002_v55 = vrot.slane %v2997_v24, %v6718_v2 }
 0x592   : > { %v3009_v6 = vrot.slane %v3004_v16, %v6718_v2  ;;  %v3016_v28 = vrot.slane %v3011_v58, %v6718_v2  ;;  %v3023_v15 = vrot.slane %v3018_v3, %v6718_v2  ;;  %v3030_v8 = vrot.slane %v3025_v23, %v6718_v2 }
 0x593   : > { %v3037_v33 = vrot.slane %v3032_v48, %v6718_v2  ;;  %v3044_v32 = vrot.slane %v3039_v22, %v6718_v2  ;;  %v3051_v62 = vrot.slane %v3046_v59, %v6718_v2  ;;  %v3058_v14 = vrot.slane %v3053_v25, %v6718_v2 }
 0x594   : > { %v3065_v35 = vrot.slane %v3060_v61, %v6718_v2  ;;  %v9072_v45 = vrot.slane %v3067_v40, %v6718_v2  ;;  %v9075_v43 = vrot.slane %v3074_v39, %v6718_v2  ;;  %v9078_v57 = vrot.slane %v3081_v4, %v6718_v2 }
 0x595   : > { %v9081_v51 = vrot.slane %v3088_v12, %v6718_v2  ;;  %v9084_v29 = vrot.slane %v3095_v19, %v6718_v2 }
 0x5de   : > { %v9086_v34 = vpop.permute.xlu0 %3159 }
 0x5df   : > { %11770 = vst [vmem:[#allocation105_spill] sm:$0xff] %v9086_v34  ;;  %v3164_v53 = vadd.bf16 %v9086_v34, %v2995_v0  ;;  %v3166_v44 = vadd.bf16 %v9086_v34, %v3002_v55  ;;  %v3168_v24 = vadd.bf16 %v9086_v34, %v3009_v6  ;;  %v3170_v16 = vadd.bf16 %v9086_v34, %v3016_v28 }
 0x5e0   : > { %v3172_v58 = vadd.bf16 %v9086_v34, %v3023_v15  ;;  %v3174_v3 = vadd.bf16 %v9086_v34, %v3030_v8  ;;  %v3176_v23 = vadd.bf16 %v9086_v34, %v3037_v33  ;;  %v3178_v48 = vadd.bf16 %v9086_v34, %v3044_v32 }
 0x5e1   : > { %v9096_v22 = vpop.permute.xlu1 %3157  ;;  %v3180_v59 = vadd.bf16 %v9086_v34, %v3051_v62  ;;  %v3182_v25 = vadd.bf16 %v9086_v34, %v3058_v14  ;;  %v3184_v61 = vadd.bf16 %v9086_v34, %v3065_v35  ;;  %v3186_v40 = vadd.bf16 %v9086_v34, %v9072_v45 }
 0x5e2   : > { %11771 = vst [vmem:[#allocation18_spill] sm:$0xff] %v9096_v22  ;;  %v3163_v39 = vadd.bf16 %v9096_v22, %v2995_v0  ;;  %v3165_v4 = vadd.bf16 %v9096_v22, %v3002_v55  ;;  %v3167_v12 = vadd.bf16 %v9096_v22, %v3009_v6  ;;  %v3169_v19 = vadd.bf16 %v9096_v22, %v3016_v28 }
 0x5e3   : > { %v3171_v2 = vadd.bf16 %v9096_v22, %v3023_v15  ;;  %v3173_v20 = vadd.bf16 %v9096_v22, %v3030_v8  ;;  %v3175_v52 = vadd.bf16 %v9096_v22, %v3037_v33  ;;  %v3177_v49 = vadd.bf16 %v9096_v22, %v3044_v32 }
 0x5e4   : > { %v3179_v26 = vadd.bf16 %v9096_v22, %v3051_v62  ;;  %v3181_v27 = vadd.bf16 %v9096_v22, %v3058_v14  ;;  %v3183_v0 = vadd.bf16 %v9096_v22, %v3065_v35  ;;  %v3185_v55 = vadd.bf16 %v9096_v22, %v9072_v45 }
 0x5e5   : > { %v3187_v6 = vadd.bf16 %v9096_v22, %v9075_v43  ;;  %v3188_v28 = vadd.bf16 %v9086_v34, %v9075_v43  ;;  %v3189_v15 = vadd.bf16 %v9096_v22, %v9078_v57  ;;  %v3190_v8 = vadd.bf16 %v9086_v34, %v9078_v57 }
 0x5e6   : > { %v3191_v33 = vadd.bf16 %v9096_v22, %v9081_v51  ;;  %v3192_v32 = vadd.bf16 %v9086_v34, %v9081_v51  ;;  %v3193_v62 = vadd.bf16 %v9096_v22, %v9084_v29  ;;  %v3194_v14 = vadd.bf16 %v9086_v34, %v9084_v29  ;;  %v11773_v34 = vld [vmem:[#allocation89_spill] sm:$0xff] }
 0x5e7   : > { %v3316_v35 = vadd.bf16 %v8867_v1, %v3163_v39  ;;  %v3317_v45 = vadd.bf16 %v8916_v47, %v3164_v53  ;;  %v3318_v43 = vadd.bf16 %v8873_v17, %v3165_v4  ;;  %v3319_v57 = vadd.bf16 %v8913_v56, %v3166_v44  ;;  %v11774_v39 = vld [vmem:[#allocation74_spill] sm:$0xff]  ;;  %v11775_v53 = vld [vmem:[#allocation109_spill] sm:$0xff]  ;;  %v11776_v44 = vld [vmem:[#allocation108_spill] sm:$0xff] }
 0x5e8   : > { %v3320_v38 = vadd.bf16 %v8897_v11, %v3167_v12  ;;  %v3321_v50 = vadd.bf16 %v8942_v7, %v3168_v24  ;;  %v3322_v51 = vadd.bf16 %v8922_v60, %v3169_v19  ;;  %v3323_v13 = vadd.bf16 %v8957_v46, %v3170_v16  ;;  %v11778_v24 = vld [vmem:[#allocation92_spill] sm:$0xff] }
 0x5e9   : > { %v3324_v22 = vadd.bf16 %v8934_v37, %v3171_v2  ;;  %v3325_v29 = vadd.bf16 %v11772_v10, %v3172_v58  ;;  %v3326_v1 = vadd.bf16 %v11773_v34, %v3173_v20  ;;  %v3327_v47 = vadd.bf16 %v11774_v39, %v3174_v3  ;;  %v11777_v34 = vld [vmem:[#allocation102_spill] sm:$0xff]  ;;  %v11780_v16 = vld [vmem:[#allocation112_spill] sm:$0xff]  ;;  %v11783_v3 = vld [vmem:[#allocation143_spill] sm:$0xff] }
 0x5ea   : > { %v3328_v17 = vadd.bf16 %v11775_v53, %v3175_v52  ;;  %v3329_v56 = vadd.bf16 %v8987_v21, %v3176_v23  ;;  %v3330_v11 = vadd.bf16 %v11776_v44, %v3177_v49  ;;  %v3331_v7 = vadd.bf16 %v9011_v5, %v3178_v48  ;;  %v11782_v58 = vld [vmem:[#allocation78_spill] sm:$0xff] }
 0x5eb   : > { %v3332_v60 = vadd.bf16 %v8870_v41, %v3179_v26  ;;  %v3333_v46 = vadd.bf16 %v8919_v63, %v3180_v59  ;;  %v3334_v2 = vadd.bf16 %v8878_v42, %v3181_v27  ;;  %v3335_v10 = vadd.bf16 %v8925_v18, %v3182_v25  ;;  %v11779_v26 = vld [vmem:[#allocation135_spill] sm:$0xff]  ;;  %v11781_v27 = vld [vmem:[#allocation129_spill] sm:$0xff]  ;;  %v11784_v23 = vld [vmem:[#allocation130_spill] sm:$0xff] }
 0x5ec   : > { %v3336_v37 = vadd.bf16 %v8894_v30, %v3183_v0  ;;  %v3337_v20 = vadd.bf16 %v8948_v36, %v3184_v61  ;;  %v3338_v52 = vadd.bf16 %v8931_v31, %v3185_v55  ;;  %v3339_v21 = vadd.bf16 %v8961_v9, %v3186_v40 }
 0x5ed   : > { %v3340_v49 = vadd.bf16 %v8937_v54, %v3187_v6  ;;  %v3341_v5 = vadd.bf16 %v11777_v34, %v3188_v28  ;;  %v3342_v41 = vadd.bf16 %v11778_v24, %v3189_v15  ;;  %v3343_v63 = vadd.bf16 %v11779_v26, %v3190_v8 }
 0x5ee   : > { %v3344_v42 = vadd.bf16 %v11780_v16, %v3191_v33  ;;  %v3345_v18 = vadd.bf16 %v11781_v27, %v3192_v32  ;;  %v3346_v30 = vadd.bf16 %v11782_v58, %v3193_v62  ;;  %v3347_v36 = vadd.bf16 %v11783_v3, %v3194_v14 }
 0x5ef   : > { %v9165_v31 = vadd.bf16 %v11784_v23, %v3316_v35  ;;  %v9168_v9 = vadd.bf16 %v11784_v23, %v3317_v45  ;;  %v9171_v54 = vadd.bf16 %v11784_v23, %v3318_v43  ;;  %v9174_v48 = vadd.bf16 %v11784_v23, %v3319_v57 }
 0x5f0   : > { %v9177_v59 = vadd.bf16 %v11784_v23, %v3320_v38  ;;  %v9180_v25 = vadd.bf16 %v11784_v23, %v3321_v50  ;;  %v9183_v61 = vadd.bf16 %v11784_v23, %v3322_v51  ;;  %v9186_v40 = vadd.bf16 %v11784_v23, %v3323_v13 }
 0x5f1   : > { %v9189_v4 = vadd.bf16 %v11784_v23, %v3324_v22  ;;  %v9192_v12 = vadd.bf16 %v11784_v23, %v3325_v29  ;;  %v9195_v19 = vadd.bf16 %v11784_v23, %v3326_v1  ;;  %v9198_v38 = vadd.bf16 %v11784_v23, %v3327_v47 }
 0x5f2   : > { %v9201_v50 = vadd.bf16 %v11784_v23, %v3328_v17  ;;  %v9204_v0 = vadd.bf16 %v11784_v23, %v3329_v56  ;;  %v9207_v13 = vadd.bf16 %v11784_v23, %v3330_v11  ;;  %v9210_v22 = vadd.bf16 %v11784_v23, %v3331_v7  ;;  %v11785_v17 = vld [vmem:[#allocation117_spill] sm:$0xff]  ;;  %v11786_v56 = vld [vmem:[#allocation18_spill] sm:$0xff] }
 0x5f3   : > { %v9213_v55 = vadd.bf16 %v11784_v23, %v3332_v60  ;;  %v9216_v6 = vadd.bf16 %v11784_v23, %v3333_v46  ;;  %v9219_v28 = vadd.bf16 %v11784_v23, %v3334_v2  ;;  %v9222_v15 = vadd.bf16 %v11784_v23, %v3335_v10  ;;  %v11787_v46 = vld [vmem:[#allocation105_spill] sm:$0xff] }
 0x5f4   : > { %v9225_v8 = vadd.bf16 %v11784_v23, %v3336_v37  ;;  %v9228_v33 = vadd.bf16 %v11784_v23, %v3337_v20  ;;  %v9231_v32 = vadd.bf16 %v11784_v23, %v3338_v52  ;;  %v9234_v62 = vadd.bf16 %v11784_v23, %v3339_v21 }
 0x5f5   : > { %v9237_v14 = vadd.bf16 %v11784_v23, %v3340_v49  ;;  %v9240_v35 = vadd.bf16 %v11784_v23, %v3341_v5  ;;  %v9243_v45 = vadd.bf16 %v11784_v23, %v3342_v41  ;;  %v9246_v43 = vadd.bf16 %v11784_v23, %v3343_v63 }
 0x5f6   : > { %v9249_v57 = vadd.bf16 %v11784_v23, %v3344_v42  ;;  %v9252_v51 = vadd.bf16 %v11784_v23, %v3345_v18  ;;  %v9255_v29 = vadd.bf16 %v11784_v23, %v3346_v30  ;;  %v9258_v1 = vadd.bf16 %v11784_v23, %v3347_v36 }
 0x5f7   : > { %v3418_v39 = vmul.bf16 1056980736, %v9165_v31  ;;  %v3419_v47 = vmul.bf16 1056980736, %v9168_v9  ;;  %v3420_v53 = vmul.bf16 1056980736, %v9171_v54  ;;  %v3195_v44 = vadd.bf16 %v11786_v56, %v11785_v17 }
 0x5f8   : > { %v3421_v11 = vmul.bf16 1056980736, %v9174_v48  ;;  %v3422_v7 = vmul.bf16 1056980736, %v9177_v59  ;;  %v3423_v60 = vmul.bf16 1056980736, %v9180_v25  ;;  %v3196_v2 = vadd.bf16 %v11787_v46, %v11785_v17 }
 0x5f9   : > { %v3424_v10 = vmul.bf16 1056980736, %v9183_v61  ;;  %v3425_v37 = vmul.bf16 1056980736, %v9186_v40  ;;  %v3426_v20 = vmul.bf16 1056980736, %v9189_v4  ;;  %6336 = vtanh.bf16 %v3418_v39 }
 0x5fa   : > { %v3427_v52 = vmul.bf16 1056980736, %v9192_v12  ;;  %v3428_v21 = vmul.bf16 1056980736, %v9195_v19  ;;  %v3429_v49 = vmul.bf16 1056980736, %v9198_v38  ;;  %6338 = vtanh.bf16 %v3419_v47 }
 0x5fb   : > { %v3430_v34 = vmul.bf16 1056980736, %v9201_v50  ;;  %v3431_v5 = vmul.bf16 1056980736, %v9204_v0  ;;  %v3432_v24 = vmul.bf16 1056980736, %v9207_v13  ;;  %6340 = vtanh.bf16 %v3420_v53 }
 0x5fc   : > { %v3433_v41 = vmul.bf16 1056980736, %v9210_v22  ;;  %v3434_v26 = vmul.bf16 1056980736, %v9213_v55  ;;  %v3435_v63 = vmul.bf16 1056980736, %v9216_v6  ;;  %6342 = vtanh.bf16 %v3421_v11 }
 0x5fd   : > { %v3436_v16 = vmul.bf16 1056980736, %v9219_v28  ;;  %6344 = vtanh.bf16 %v3422_v7  ;;  %v11797_v39 = vld [vmem:[#allocation144_spill] sm:$0xff]  ;;  %v11808_v23 = vmul.bf16 1056980736, %v9249_v57 }
 0x5fe   : > { %6346 = vtanh.bf16 %v3423_v60  ;;  %v11788_v60 = vld [vmem:[#allocation127_spill] sm:$0xff]  ;;  %v9336_v47 = vadd.bf16 %v11797_v39, %v3196_v2 }
 0x5ff   : > { %6348 = vtanh.bf16 %v3424_v10  ;;  %v11789_v10 = vld [vmem:[#allocation133_spill] sm:$0xff] }
 0x600   : > { %6350 = vtanh.bf16 %v3425_v37  ;;  %11798 = vst [vmem:[#allocation120_spill] sm:$0xff] %v9336_v47  ;;  %v11806_v47 = vmul.bf16 1056980736, %v9243_v45 }
 0x601   : > { %6352 = vtanh.bf16 %v3426_v20 }
 0x602   : > { %6354 = vtanh.bf16 %v3427_v52 }
 0x603   : > { %6356 = vtanh.bf16 %v3428_v21 }
 0x604   : > { %v6337_v52 = vpop.eup %6336  ;;  %6358 = vtanh.bf16 %v3429_v49 }
 0x605   : > { %v6339_v53 = vpop.eup %6338  ;;  %6360 = vtanh.bf16 %v3430_v34  ;;  %v3514_v7 = vmul.bf16 1056980736, %v6337_v52  ;;  %v11795_v52 = vld [vmem:[#allocation142_spill] sm:$0xff] }
 0x606   : > { %v6341_v30 = vpop.eup %6340  ;;  %6362 = vtanh.bf16 %v3431_v5  ;;  %v3515_v49 = vmul.bf16 1056980736, %v6339_v53  ;;  %v9328_v20 = vadd.bf16 %v11795_v52, %v3195_v44 }
 0x607   : > { %v6343_v27 = vpop.eup %6342  ;;  %6364 = vtanh.bf16 %v3432_v24  ;;  %v3516_v21 = vmul.bf16 1056980736, %v6341_v30  ;;  %v3562_v34 = vadd.bf16 1056980736, %v3514_v7 }
 0x608   : > { %11796 = vst [vmem:[#allocation111_spill] sm:$0xff] %v9328_v20  ;;  %v6345_v3 = vpop.eup %6344  ;;  %6366 = vtanh.bf16 %v3433_v41  ;;  %v3517_v5 = vmul.bf16 1056980736, %v6343_v27  ;;  %v9330_v53 = vadd.bf16 1056980736, %v3515_v49 }
 0x609   : > { %v6347_v24 = vpop.eup %6346  ;;  %6368 = vtanh.bf16 %v3434_v26  ;;  %v3518_v30 = vmul.bf16 1056980736, %v6345_v3  ;;  %v3564_v7 = vadd.bf16 1056980736, %v3516_v21  ;;  %v9339_v42 = vmul.bf16 %v3562_v34, %v9165_v31 }
 0x60a   : > { %v6349_v44 = vpop.eup %6348  ;;  %6370 = vtanh.bf16 %v3435_v63  ;;  %v3519_v52 = vmul.bf16 1056980736, %v6347_v24  ;;  %v9341_v41 = vadd.bf16 1056980736, %v3517_v5  ;;  %v11799_v31 = vmul.bf16 1056980736, %v9222_v15 }
 0x60b   : > { %v6351_v49 = vpop.eup %6350  ;;  %6372 = vtanh.bf16 %v3436_v16  ;;  %v3520_v17 = vmul.bf16 1056980736, %v6349_v44  ;;  %v3566_v2 = vadd.bf16 1056980736, %v3518_v30  ;;  %v9348_v26 = vmul.bf16 %v3564_v7, %v9171_v54 }
 0x60c   : > { %v6353_v3 = vpop.eup %6352  ;;  %6374 = vtanh.bf16 %v11799_v31  ;;  %v3521_v63 = vmul.bf16 1056980736, %v6351_v49  ;;  %v9352_v39 = vadd.bf16 1056980736, %v3519_v52  ;;  %v11800_v5 = vmul.bf16 1056980736, %v9225_v8 }
 0x60d   : > { %v6355_v34 = vpop.eup %6354  ;;  %v3522_v16 = vmul.bf16 1056980736, %v6353_v3  ;;  %v3568_v24 = vadd.bf16 1056980736, %v3520_v17  ;;  %v9359_v30 = vmul.bf16 %v3566_v2, %v9177_v59  ;;  %v11801_v7 = vmul.bf16 1056980736, %v9228_v33 }
 0x60e   : > { %6376 = vtanh.bf16 %v11800_v5  ;;  %v6357_v54 = vpop.eup %6356  ;;  %v3523_v44 = vmul.bf16 1056980736, %v6355_v34  ;;  %v9363_v49 = vadd.bf16 1056980736, %v3521_v63  ;;  %v11802_v21 = vmul.bf16 1056980736, %v9231_v32 }
 0x60f   : > { %6378 = vtanh.bf16 %v11801_v7  ;;  %v6359_v31 = vpop.eup %6358  ;;  %v3524_v5 = vmul.bf16 1056980736, %v6357_v54  ;;  %v3570_v3 = vadd.bf16 1056980736, %v3522_v16  ;;  %v9370_v17 = vmul.bf16 %v3568_v24, %v9183_v61 }
 0x610   : > { %6380 = vtanh.bf16 %v11802_v21  ;;  %v6361_v59 = vpop.eup %6360  ;;  %v11803_v2 = vmul.bf16 1056980736, %v9234_v62  ;;  %v3525_v7 = vmul.bf16 1056980736, %v6359_v31  ;;  %v9374_v34 = vadd.bf16 1056980736, %v3523_v44 }
 0x611   : > { %v6363_v52 = vpop.eup %6362  ;;  %v11804_v27 = vmul.bf16 1056980736, %v9237_v14  ;;  %v3526_v21 = vmul.bf16 1056980736, %v6361_v59  ;;  %v3572_v54 = vadd.bf16 1056980736, %v3524_v5  ;;  %v9381_v16 = vmul.bf16 %v3570_v3, %v9189_v4 }
 0x612   : > { %6382 = vtanh.bf16 %v11803_v2  ;;  %v6365_v61 = vpop.eup %6364  ;;  %v11805_v24 = vmul.bf16 1056980736, %v9240_v35  ;;  %v3527_v2 = vmul.bf16 1056980736, %v6363_v52  ;;  %v9385_v31 = vadd.bf16 1056980736, %v3525_v7 }
 0x613   : > { %6384 = vtanh.bf16 %v11804_v27  ;;  %v6367_v63 = vpop.eup %6366  ;;  %v3528_v27 = vmul.bf16 1056980736, %v6365_v61  ;;  %v3574_v59 = vadd.bf16 1056980736, %v3526_v21  ;;  %v9392_v5 = vmul.bf16 %v3572_v54, %v9195_v19 }
 0x614   : > { %6386 = vtanh.bf16 %v11805_v24  ;;  %v6369_v4 = vpop.eup %6368  ;;  %v11807_v3 = vmul.bf16 1056980736, %v9246_v43  ;;  %v3529_v24 = vmul.bf16 1056980736, %v6367_v63  ;;  %v9396_v52 = vadd.bf16 1056980736, %v3527_v2 }
 0x615   : > { %6388 = vtanh.bf16 %v11806_v47  ;;  %v6371_v44 = vpop.eup %6370  ;;  %v3530_v47 = vmul.bf16 1056980736, %v6369_v4  ;;  %v3576_v61 = vadd.bf16 1056980736, %v3528_v27  ;;  %v9403_v21 = vmul.bf16 %v3574_v59, %v9201_v50 }
 0x616   : > { %6390 = vtanh.bf16 %v11807_v3  ;;  %v6373_v19 = vpop.eup %6372  ;;  %v11809_v54 = vmul.bf16 1056980736, %v9252_v51  ;;  %v3531_v3 = vmul.bf16 1056980736, %v6371_v44  ;;  %v9407_v63 = vadd.bf16 1056980736, %v3529_v24 }
 0x617   : > { %6392 = vtanh.bf16 %v11808_v23  ;;  %v6375_v7 = vpop.eup %6374  ;;  %v11810_v20 = vmul.bf16 1056980736, %v9255_v29  ;;  %v3532_v23 = vmul.bf16 1056980736, %v6373_v19  ;;  %v3578_v4 = vadd.bf16 1056980736, %v3530_v47 }
 0x618   : > { %6394 = vtanh.bf16 %v11809_v54  ;;  %v9414_v27 = vmul.bf16 %v3576_v61, %v9207_v13  ;;  %v11811_v59 = vmul.bf16 1056980736, %v9258_v1  ;;  %v3533_v54 = vmul.bf16 1056980736, %v6375_v7 }
 0x619   : > { %6396 = vtanh.bf16 %v11810_v20  ;;  %v6377_v50 = vpop.eup %6376  ;;  %v9418_v44 = vadd.bf16 1056980736, %v3531_v3  ;;  %v3580_v36 = vadd.bf16 1056980736, %v3532_v23  ;;  %v9423_v20 = vmul.bf16 %v3578_v4, %v9213_v55 }
 0x61a   : > { %6398 = vtanh.bf16 %v11811_v59  ;;  %v6379_v2 = vpop.eup %6378  ;;  %v3534_v18 = vmul.bf16 1056980736, %v6377_v50  ;;  %v9426_v19 = vadd.bf16 1056980736, %v3533_v54  ;;  %v11812_v55 = vmul.bf16 %v9330_v53, %v9168_v9 }
 0x61b   : > { %v6381_v13 = vpop.eup %6380  ;;  %v3535_v61 = vmul.bf16 1056980736, %v6379_v2  ;;  %v9432_v50 = vmul.bf16 %v3580_v36, %v9219_v28 }
 0x61c   : > { %v3536_v11 = vmul.bf16 1056980736, %v6381_v13  ;;  %v3582_v24 = vadd.bf16 1056980736, %v3534_v18  ;;  %v9437_v23 = vunpack.c.l.bf16 %v11812_v55 }
 0x61d   : > { %v6383_v59 = vpop.eup %6382  ;;  %v9439_v54 = vadd.bf16 1056980736, %v3535_v61 }
 0x61e   : > { %v6385_v4 = vpop.eup %6384  ;;  %v3537_v2 = vmul.bf16 1056980736, %v6383_v59  ;;  %v3584_v18 = vadd.bf16 1056980736, %v3536_v11  ;;  %v9445_v28 = vmul.bf16 %v3582_v24, %v9225_v8  ;;  %v11813_v59 = vmul.bf16 %v9341_v41, %v9174_v48 }
 0x61f   : > { %v6387_v7 = vpop.eup %6386  ;;  %v3538_v13 = vmul.bf16 1056980736, %v6385_v4  ;;  %v3631_v61 = vmul.bf16 %v9439_v54, %v9228_v33  ;;  %v3664_v8 = vunpack.c.l.bf16 %v9359_v30 }
 0x620   : > { %v6389_v9 = vpop.eup %6388  ;;  %v3539_v53 = vmul.bf16 1056980736, %v6387_v7  ;;  %v3585_v55 = vadd.bf16 1056980736, %v3537_v2  ;;  %v9453_v47 = vunpack.c.l.bf16 %v11813_v59  ;;  %v9456_v11 = vmul.bf16 %v3584_v18, %v9231_v32 }
 0x621   : > { %v6391_v3 = vpop.eup %6390  ;;  %v3540_v58 = vmul.bf16 1056980736, %v6389_v9  ;;  %v3586_v4 = vadd.bf16 1056980736, %v3538_v13  ;;  %v11814_v13 = vmul.bf16 %v9352_v39, %v9180_v25  ;;  %v11815_v39 = vmul.bf16 %v9363_v49, %v9186_v40 }
 0x622   : > { %v6393_v24 = vpop.eup %6392  ;;  %v3541_v36 = vmul.bf16 1056980736, %v6391_v3  ;;  %v3587_v7 = vadd.bf16 1056980736, %v3539_v53  ;;  %v3633_v2 = vmul.bf16 %v3585_v55, %v9234_v62  ;;  %v3667_v62 = vunpack.c.l.bf16 %v9370_v17 }
 0x623   : > { %v6395_v54 = vpop.eup %6394  ;;  %v3542_v37 = vmul.bf16 1056980736, %v6393_v24  ;;  %v3588_v48 = vadd.bf16 1056980736, %v3540_v58  ;;  %v9462_v41 = vmul.bf16 %v3586_v4, %v9237_v14  ;;  %v9467_v32 = vunpack.c.l.bf16 %v11814_v13 }
 0x624   : > { %v6397_v18 = vpop.eup %6396  ;;  %v3543_v9 = vmul.bf16 1056980736, %v6395_v54  ;;  %v3589_v59 = vadd.bf16 1056980736, %v3541_v36  ;;  %v3635_v3 = vmul.bf16 %v3587_v7, %v9240_v35  ;;  %v3668_v14 = vunpack.c.h.bf16 %v9370_v17 }
 0x625   : > { %v6399_v53 = vpop.eup %6398  ;;  %v3544_v55 = vmul.bf16 1056980736, %v6397_v18  ;;  %v3590_v33 = vadd.bf16 1056980736, %v3542_v37  ;;  %v9472_v58 = vmul.bf16 %v3588_v48, %v9243_v45  ;;  %v3669_v36 = vunpack.c.l.bf16 %v11815_v39 }
 0x626   : > { %v3545_v4 = vmul.bf16 1056980736, %v6399_v53  ;;  %v3591_v24 = vadd.bf16 1056980736, %v3543_v9  ;;  %v3637_v25 = vmul.bf16 %v3589_v59, %v9246_v43  ;;  %v3670_v7 = vunpack.c.l.bf16 %v9381_v16 }
 0x627   : > { %v3592_v54 = vadd.bf16 1056980736, %v3544_v55  ;;  %v9480_v35 = vmul.bf16 %v3590_v33, %v9249_v57  ;;  %v3671_v37 = vunpack.c.h.bf16 %v9381_v16  ;;  %v11816_v13 = vmul.bf16 %v9374_v34, %v9192_v12 }
 0x628   : > { %v3593_v45 = vadd.bf16 1056980736, %v3545_v4  ;;  %v3639_v48 = vmul.bf16 %v3591_v24, %v9252_v51  ;;  %v3673_v43 = vunpack.c.l.bf16 %v9392_v5  ;;  %v3674_v49 = vunpack.c.h.bf16 %v9392_v5 }
 0x629   : > { %v3672_v18 = vunpack.c.l.bf16 %v11816_v13  ;;  %v9490_v40 = vmul.bf16 %v3592_v54, %v9255_v29  ;;  %v11817_v57 = vmul.bf16 %v9385_v31, %v9198_v38  ;;  %v3676_v16 = vunpack.c.l.bf16 %v9403_v21 }
 0x62a   : > { %v3641_v51 = vmul.bf16 %v3593_v45, %v9258_v1  ;;  %v3677_v9 = vunpack.c.h.bf16 %v9403_v21  ;;  %v11818_v12 = vmul.bf16 %v9396_v52, %v9204_v0  ;;  %v3679_v29 = vunpack.c.l.bf16 %v9414_v27 }
 0x62b   : > { %v9496_v33 = vunpack.c.l.bf16 %v11817_v57  ;;  %v3680_v5 = vunpack.c.h.bf16 %v9414_v27  ;;  %v11819_v38 = vmul.bf16 %v9407_v63, %v9210_v22  ;;  %v3682_v59 = vunpack.c.l.bf16 %v9423_v20 }
 0x62c   : > { %v9504_v34 = vunpack.c.l.bf16 %v11818_v12  ;;  %v3683_v1 = vunpack.c.h.bf16 %v9423_v20  ;;  %v11820_v53 = vmul.bf16 %v9418_v44, %v9216_v6  ;;  %v3685_v0 = vunpack.c.l.bf16 %v9432_v50 }
 0x62d   : > { %v9511_v31 = vunpack.c.l.bf16 %v11819_v38  ;;  %v3686_v52 = vunpack.c.h.bf16 %v9432_v50  ;;  %v11821_v4 = vmul.bf16 %v9426_v19, %v9222_v15  ;;  %v3688_v22 = vunpack.c.l.bf16 %v9445_v28 }
 0x62e   : > { %v9518_v55 = vunpack.c.l.bf16 %v11820_v53  ;;  %v3689_v63 = vunpack.c.h.bf16 %v9445_v28  ;;  %v9529_v39 = vunpack.c.l.bf16 %v3631_v61  ;;  %v3691_v54 = vunpack.c.l.bf16 %v9456_v11 }
 0x62f   : > { %v9525_v24 = vunpack.c.l.bf16 %v11821_v4  ;;  %v9533_v44 = vunpack.c.l.bf16 %v3633_v2  ;;  %v9537_v57 = vunpack.c.l.bf16 %v3635_v3  ;;  %v9541_v12 = vunpack.c.l.bf16 %v3637_v25 }
 0x630   : > { %v9545_v53 = vunpack.c.l.bf16 %v3639_v48  ;;  %v9549_v45 = vunpack.c.l.bf16 %v3641_v51  ;;  %v11822_v3 = vunpack.c.l.bf16 %v9339_v42  ;;  %v11823_v19 = vunpack.c.h.bf16 %v9339_v42 }
 0x631   : > { %v3733_v38 = vsel %vm2218_vm4, %v9437_v23, 0.0  ;;  %v11824_v48 = vunpack.c.l.bf16 %v9348_v26  ;;  %v11825_v4 = vunpack.c.h.bf16 %v9348_v26  ;;  %v3752_v42 = vsel %vm2218_vm4, %v3664_v8, 0.0 }
 0x632   : > { %v3730_v15 = vsel %vm2218_vm4, %v11822_v3, 0.0  ;;  %v3731_v25 = vsel %vm2218_vm4, %v11823_v19, 0.0  ;;  %v3744_v3 = vsel %vm2218_vm4, %v9453_v47, 0.0  ;;  %v3763_v26 = vsel %vm2218_vm4, %v3667_v62, 0.0 }
 0x633   : > { %v3732_v13 = vadd.f32 %v3731_v25, %v3730_v15  ;;  %v3741_v2 = vsel %vm2218_vm4, %v11824_v48, 0.0  ;;  %v3742_v51 = vsel %vm2218_vm4, %v11825_v4, 0.0  ;;  %v11826_v15 = vunpack.c.h.bf16 %v9359_v30 }
 0x634   : > { %v3743_v61 = vadd.f32 %v3742_v51, %v3741_v2  ;;  %v3755_v48 = vsel %vm2218_vm4, %v9467_v32, 0.0  ;;  %v3764_v47 = vsel %vm2218_vm4, %v3668_v14, 0.0  ;;  %v3766_v4 = vsel %vm2218_vm4, %v3669_v36, 0.0 }
 0x635   : > { %v3753_v23 = vsel %vm2218_vm4, %v11826_v15, 0.0  ;;  %v3734_v19 = vadd.f32 %v3733_v38, %v3732_v13  ;;  %v3774_v8 = vsel %vm2218_vm4, %v3670_v7, 0.0  ;;  %v3765_v6 = vadd.f32 %v3764_v47, %v3763_v26 }
 0x636   : > { %v3754_v25 = vadd.f32 %v3753_v23, %v3752_v42  ;;  %v3745_v2 = vadd.f32 %v3744_v3, %v3743_v61  ;;  %v3775_v13 = vsel %vm2218_vm4, %v3671_v37, 0.0  ;;  %v3777_v32 = vsel %vm2218_vm4, %v3672_v18, 0.0 }
 0x637   : > { %v3735_v51 = vrot.slane %v3734_v19, 4  ;;  %v3776_v42 = vadd.f32 %v3775_v13, %v3774_v8  ;;  %v3785_v17 = vsel %vm2218_vm4, %v3673_v43, 0.0  ;;  %v3767_v61 = vadd.f32 %v3766_v4, %v3765_v6 }
 0x638   : > { %v3756_v30 = vadd.f32 %v3755_v48, %v3754_v25  ;;  %v3746_v38 = vrot.slane %v3745_v2, 4  ;;  %v3786_v14 = vsel %vm2218_vm4, %v3674_v49, 0.0  ;;  %v3788_v7 = vsel %vm2218_vm4, %v9496_v33, 0.0 }
 0x639   : > { %v3736_v15 = vadd.f32 %v3735_v51, %v3734_v19  ;;  %v3778_v36 = vadd.f32 %v3777_v32, %v3776_v42  ;;  %v3787_v23 = vadd.f32 %v3786_v14, %v3785_v17  ;;  %v3768_v37 = vrot.slane %v3767_v61, 4 }
 0x63a   : > { %v3757_v62 = vrot.slane %v3756_v30, 4  ;;  %v3747_v3 = vadd.f32 %v3746_v38, %v3745_v2  ;;  %v3796_v18 = vsel %vm2218_vm4, %v3676_v16, 0.0  ;;  %v3797_v49 = vsel %vm2218_vm4, %v3677_v9, 0.0 }
 0x63b   : > { %v3737_v25 = vrot.slane %v3736_v15, 2  ;;  %v3779_v43 = vrot.slane %v3778_v36, 4  ;;  %v3789_v19 = vadd.f32 %v3788_v7, %v3787_v23  ;;  %v3769_v47 = vadd.f32 %v3768_v37, %v3767_v61 }
 0x63c   : > { %v3758_v48 = vadd.f32 %v3757_v62, %v3756_v30  ;;  %v3748_v26 = vrot.slane %v3747_v3, 2  ;;  %v3798_v4 = vadd.f32 %v3797_v49, %v3796_v18  ;;  %v3799_v30 = vsel %vm2218_vm4, %v9504_v34, 0.0 }
 0x63d   : > { %v3738_v6 = vadd.f32 %v3737_v25, %v3736_v15  ;;  %v3780_v33 = vadd.f32 %v3779_v43, %v3778_v36  ;;  %v3790_v51 = vrot.slane %v3789_v19, 4  ;;  %v3770_v16 = vrot.slane %v3769_v47, 2 }
 0x63e   : > { %v3759_v2 = vrot.slane %v3758_v48, 2  ;;  %v3749_v8 = vadd.f32 %v3748_v26, %v3747_v3  ;;  %v3800_v42 = vadd.f32 %v3799_v30, %v3798_v4  ;;  %v3807_v21 = vsel %vm2218_vm4, %v3679_v29, 0.0 }
 0x63f   : > { %v3739_v13 = vrot.slane %v3738_v6, 1  ;;  %v3781_v17 = vrot.slane %v3780_v33, 2  ;;  %v3791_v62 = vadd.f32 %v3790_v51, %v3789_v19  ;;  %v3771_v61 = vadd.f32 %v3770_v16, %v3769_v47 }
 0x640   : > { %v3760_v38 = vadd.f32 %v3759_v2, %v3758_v48  ;;  %v3750_v32 = vrot.slane %v3749_v8, 1  ;;  %v3801_v14 = vrot.slane %v3800_v42, 4  ;;  %v3808_v23 = vsel %vm2218_vm4, %v3680_v5, 0.0 }
 0x641   : > { %v9598_v9 = vadd.f32 %v3739_v13, %v3738_v6  ;;  %v3782_v36 = vadd.f32 %v3781_v17, %v3780_v33  ;;  %v3792_v34 = vrot.slane %v3791_v62, 2  ;;  %v3772_v25 = vrot.slane %v3771_v61, 1 }
 0x642   : > { %v3761_v15 = vrot.slane %v3760_v38, 1  ;;  %v9600_v3 = vadd.f32 %v3750_v32, %v3749_v8  ;;  %v3802_v48 = vadd.f32 %v3801_v14, %v3800_v42  ;;  %v3809_v37 = vadd.f32 %v3808_v23, %v3807_v21 }
 0x643   : > { %v3783_v18 = vrot.slane %v3782_v36, 1  ;;  %v3793_v29 = vadd.f32 %v3792_v34, %v3791_v62  ;;  %v3810_v26 = vsel %vm2218_vm4, %v9511_v31, 0.0  ;;  %v3818_v43 = vsel %vm2218_vm4, %v3682_v59, 0.0 }
 0x644   : > { %v9605_v7 = vadd.f32 %v3761_v15, %v3760_v38  ;;  %v9612_v19 = vadd.f32 %v3772_v25, %v3771_v61  ;;  %v3803_v49 = vrot.slane %v3802_v48, 2  ;;  %v3811_v27 = vadd.f32 %v3810_v26, %v3809_v37 }
 0x645   : > { %v3819_v5 = vsel %vm2218_vm4, %v3683_v1, 0.0  ;;  %v9617_v6 = vadd.f32 %v3783_v18, %v3782_v36  ;;  %v3794_v2 = vrot.slane %v3793_v29, 1  ;;  %v3821_v4 = vsel %vm2218_vm4, %v9518_v55, 0.0 }
 0x646   : > { %v3820_v47 = vadd.f32 %v3819_v5, %v3818_v43  ;;  %v3804_v31 = vadd.f32 %v3803_v49, %v3802_v48  ;;  %v3812_v8 = vrot.slane %v3811_v27, 4  ;;  %v3829_v59 = vsel %vm2218_vm4, %v3685_v0, 0.0 }
 0x647   : > { %v3830_v33 = vsel %vm2218_vm4, %v3686_v52, 0.0  ;;  %v9627_v20 = vadd.f32 %v3794_v2, %v3793_v29  ;;  %v3832_v30 = vsel %vm2218_vm4, %v9525_v24, 0.0  ;;  %v3840_v55 = vsel %vm2218_vm4, %v3688_v22, 0.0 }
 0x648   : > { %v3822_v1 = vadd.f32 %v3821_v4, %v3820_v47  ;;  %v3831_v51 = vadd.f32 %v3830_v33, %v3829_v59  ;;  %v3805_v13 = vrot.slane %v3804_v31, 1  ;;  %v3813_v38 = vadd.f32 %v3812_v8, %v3811_v27 }
 0x649   : > { %v3841_v0 = vsel %vm2218_vm4, %v3689_v63, 0.0  ;;  %v3843_v42 = vsel %vm2218_vm4, %v9529_v39, 0.0  ;;  %v3851_v24 = vsel %vm2218_vm4, %v3691_v54, 0.0  ;;  %v11827_v62 = vunpack.c.h.bf16 %v9456_v11 }
 0x64a   : > { %v3823_v50 = vrot.slane %v3822_v1, 4  ;;  %v3833_v16 = vadd.f32 %v3832_v30, %v3831_v51  ;;  %v3842_v52 = vadd.f32 %v3841_v0, %v3840_v55  ;;  %v9639_v32 = vadd.f32 %v3805_v13, %v3804_v31 }
 0x64b   : > { %v3814_v17 = vrot.slane %v3813_v38, 2  ;;  %v3852_v22 = vsel %vm2218_vm4, %v11827_v62, 0.0  ;;  %v3854_v14 = vsel %vm2218_vm4, %v9533_v44, 0.0  ;;  %v11828_v39 = vunpack.c.l.bf16 %v9462_v41 }
 0x64c   : > { %v3824_v28 = vadd.f32 %v3823_v50, %v3822_v1  ;;  %v3834_v21 = vrot.slane %v3833_v16, 4  ;;  %v3844_v63 = vadd.f32 %v3843_v42, %v3842_v52  ;;  %v3853_v15 = vadd.f32 %v3852_v22, %v3851_v24 }
 0x64d   : > { %v3815_v61 = vadd.f32 %v3814_v17, %v3813_v38  ;;  %v3862_v36 = vsel %vm2218_vm4, %v11828_v39, 0.0  ;;  %v11829_v34 = vunpack.c.h.bf16 %v9462_v41  ;;  %v3865_v29 = vsel %vm2218_vm4, %v9537_v57, 0.0 }
 0x64e   : > { %v3825_v23 = vrot.slane %v3824_v28, 2  ;;  %v3835_v11 = vadd.f32 %v3834_v21, %v3833_v16  ;;  %v3845_v25 = vrot.slane %v3844_v63, 4  ;;  %v3855_v48 = vadd.f32 %v3854_v14, %v3853_v15 }
 0x64f   : > { %v3863_v54 = vsel %vm2218_vm4, %v11829_v34, 0.0  ;;  %v3816_v37 = vrot.slane %v3815_v61, 1  ;;  %v11830_v26 = vunpack.c.l.bf16 %v9472_v58  ;;  %v11831_v47 = vunpack.c.h.bf16 %v9472_v58 }
 0x650   : > { %v3864_v18 = vadd.f32 %v3863_v54, %v3862_v36  ;;  %v3826_v43 = vadd.f32 %v3825_v23, %v3824_v28  ;;  %v3836_v49 = vrot.slane %v3835_v11, 2  ;;  %v3846_v27 = vadd.f32 %v3845_v25, %v3844_v63 }
 0x651   : > { %v3873_v44 = vsel %vm2218_vm4, %v11830_v26, 0.0  ;;  %v3856_v5 = vrot.slane %v3855_v48, 4  ;;  %v9660_v41 = vadd.f32 %v3816_v37, %v3815_v61  ;;  %v3874_v4 = vsel %vm2218_vm4, %v11831_v47, 0.0 }
 0x652   : > { %v3866_v2 = vadd.f32 %v3865_v29, %v3864_v18  ;;  %v3876_v31 = vsel %vm2218_vm4, %v9541_v12, 0.0  ;;  %v3827_v8 = vrot.slane %v3826_v43, 1  ;;  %v3837_v57 = vadd.f32 %v3836_v49, %v3835_v11 }
 0x653   : > { %v3847_v59 = vrot.slane %v3846_v27, 2  ;;  %v3857_v33 = vadd.f32 %v3856_v5, %v3855_v48  ;;  %v3875_v51 = vadd.f32 %v3874_v4, %v3873_v44  ;;  %v11832_v30 = vunpack.c.l.bf16 %v9480_v35 }
 0x654   : > { %v3867_v1 = vrot.slane %v3866_v2, 4  ;;  %v11833_v38 = vunpack.c.h.bf16 %v9480_v35  ;;  %v3828_v58 = vadd.f32 %v3827_v8, %v3826_v43  ;;  %v3838_v0 = vrot.slane %v3837_v57, 1 }
 0x655   : > { %v3884_v13 = vsel %vm2218_vm4, %v11832_v30, 0.0  ;;  %v3848_v50 = vadd.f32 %v3847_v59, %v3846_v27  ;;  %v3858_v16 = vrot.slane %v3857_v33, 2  ;;  %v3877_v12 = vadd.f32 %v3876_v31, %v3875_v51 }
 0x656   : > { %v3885_v55 = vsel %vm2218_vm4, %v11833_v38, 0.0  ;;  %v3868_v52 = vadd.f32 %v3867_v1, %v3866_v2  ;;  %v3887_v17 = vsel %vm2218_vm4, %v9545_v53, 0.0  ;;  %v3839_v24 = vadd.f32 %v3838_v0, %v3837_v57 }
 0x657   : > { %v3886_v42 = vadd.f32 %v3885_v55, %v3884_v13  ;;  %v3849_v62 = vrot.slane %v3848_v50, 1  ;;  %v3859_v22 = vadd.f32 %v3858_v16, %v3857_v33  ;;  %v11834_v28 = vunpack.c.l.bf16 %v9490_v40 }
 0x658   : > { %v3869_v35 = vrot.slane %v3868_v52, 2  ;;  %v3878_v63 = vrot.slane %v3877_v12, 4  ;;  %v11835_v61 = vunpack.c.h.bf16 %v9490_v40  ;;  %v3898_v53 = vsel %vm2218_vm4, %v9549_v45, 0.0 }
 0x659   : > { %v3895_v21 = vsel %vm2218_vm4, %v11834_v28, 0.0  ;;  %v3888_v15 = vadd.f32 %v3887_v17, %v3886_v42  ;;  %v3850_v39 = vadd.f32 %v3849_v62, %v3848_v50  ;;  %v3860_v36 = vrot.slane %v3859_v22, 1 }
 0x65a   : > { %v3896_v14 = vsel %vm2218_vm4, %v11835_v61, 0.0  ;;  %v3870_v54 = vadd.f32 %v3869_v35, %v3868_v52  ;;  %v3879_v23 = vadd.f32 %v3878_v63, %v3877_v12  ;;  %v3994_v25 = vpack.c.bf16 %v9598_v9, %v9598_v9 }
 0x65b   : > { %v3897_v34 = vadd.f32 %v3896_v14, %v3895_v21  ;;  %v3889_v11 = vrot.slane %v3888_v15, 4  ;;  %v3861_v48 = vadd.f32 %v3860_v36, %v3859_v22  ;;  %v3995_v18 = vpack.c.bf16 %v9600_v3, %v9600_v3 }
 0x65c   : > { %v3996_v40 = vpack.c.bf16 %v9605_v7, %v9605_v7  ;;  %v3871_v29 = vrot.slane %v3870_v54, 1  ;;  %v3880_v26 = vrot.slane %v3879_v23, 2  ;;  %v3997_v45 = vpack.c.bf16 %v9612_v19, %v9612_v19 }
 0x65d   : > { %v3899_v37 = vadd.f32 %v3898_v53, %v3897_v34  ;;  %v3890_v44 = vadd.f32 %v3889_v11, %v3888_v15  ;;  %v3998_v49 = vpack.c.bf16 %v9617_v6, %v9617_v6  ;;  %v3999_v9 = vpack.c.bf16 %v9627_v20, %v9627_v20  ;;  %v11839_v11 = vld [vmem:[#allocation101_spill] sm:$0xff] }
 0x65e   : > { %v4000_v27 = vpack.c.bf16 %v9639_v32, %v9639_v32  ;;  %v3872_v3 = vadd.f32 %v3871_v29, %v3870_v54  ;;  %v3881_v5 = vadd.f32 %v3880_v26, %v3879_v23  ;;  %v4001_v7 = vpack.c.bf16 %v9660_v41, %v9660_v41  ;;  %v11841_v29 = vld [vmem:[#allocation145_spill] sm:$0xff] }
 0x65f   : > { %v3900_v43 = vrot.slane %v3899_v37, 4  ;;  %v3891_v2 = vrot.slane %v3890_v44, 2  ;;  %v4002_v4 = vpack.c.bf16 %v3828_v58, %v3828_v58  ;;  %v4003_v31 = vpack.c.bf16 %v3839_v24, %v3839_v24 }
 0x660   : > { %v4004_v19 = vpack.c.bf16 %v3850_v39, %v3850_v39  ;;  %v3882_v8 = vrot.slane %v3881_v5, 1  ;;  %v4005_v59 = vpack.c.bf16 %v3861_v48, %v3861_v48  ;;  %v4006_v6 = vpack.c.bf16 %v3872_v3, %v3872_v3  ;;  %v11837_v39 = vld [vmem:[#allocation140_spill] sm:$0xff]  ;;  %v11846_v3 = vld [vmem:[#allocation123_spill] sm:$0xff] }
 0x661   : > { %v3901_v47 = vadd.f32 %v3900_v43, %v3899_v37  ;;  %v3892_v57 = vadd.f32 %v3891_v2, %v3890_v44  ;;  %v4042_v1 = vunpack.c.l.b16 %v3994_v25  ;;  %v4043_v20 = vunpack.c.l.b16 %v3995_v18 }
 0x662   : > { %v4044_v51 = vunpack.c.l.b16 %v3996_v40  ;;  %v3883_v30 = vadd.f32 %v3882_v8, %v3881_v5  ;;  %v4045_v13 = vunpack.c.l.b16 %v3997_v45  ;;  %v4046_v38 = vunpack.c.l.b16 %v3998_v49 }
 0x663   : > { %v3902_v33 = vrot.slane %v3901_v47, 2  ;;  %v3893_v32 = vrot.slane %v3892_v57, 1  ;;  %v4047_v0 = vunpack.c.l.b16 %v3999_v9  ;;  %v4048_v50 = vunpack.c.l.b16 %v4000_v27  ;;  %v11844_v9 = vld [vmem:[#allocation128_spill] sm:$0xff] }
 0x664   : > { %v4049_v41 = vunpack.c.l.b16 %v4001_v7  ;;  %v4007_v58 = vpack.c.bf16 %v3883_v30, %v3883_v30  ;;  %v4050_v52 = vunpack.c.l.b16 %v4002_v4  ;;  %v4051_v12 = vunpack.c.l.b16 %v4003_v31  ;;  %v11848_v31 = vld [vmem:[#allocation106_spill] sm:$0xff] }
 0x665   : > { %v3903_v55 = vadd.f32 %v3902_v33, %v3901_v47  ;;  %v3894_v16 = vadd.f32 %v3893_v32, %v3892_v57  ;;  %v4052_v17 = vunpack.c.l.b16 %v4004_v19  ;;  %v4053_v24 = vunpack.c.l.b16 %v4005_v59  ;;  %v11851_v59 = vld [vmem:[#allocation96_spill] sm:$0xff]  ;;  %v11856_v32 = vld [vmem:[#allocation115_spill] sm:$0xff] }
 0x666   : > { %v4054_v62 = vunpack.c.l.b16 %v4006_v6  ;;  %v4055_v28 = vunpack.c.l.b16 %v4007_v58  ;;  %v4066_v21 = vsel %vm2555_vm6, %v4043_v20, %v4042_v1  ;;  %v4073_v35 = vsel %vm2555_vm6, %v4051_v12, %v4050_v52  ;;  %v11853_v1 = vld [vmem:[#allocation132_spill] sm:$0xff]  ;;  %v11861_v58 = vld [vmem:[#allocation122_spill] sm:$0xff] }
 0x667   : > { %v3904_v42 = vrot.slane %v3903_v55, 1  ;;  %v4008_v22 = vpack.c.bf16 %v3894_v16, %v3894_v16  ;;  %v4067_v15 = vsel %vm2557_vm10, %v4044_v51, %v4066_v21  ;;  %v4074_v61 = vsel %vm2557_vm10, %v4052_v17, %v4073_v35  ;;  %v11854_v51 = vld [vmem:[#allocation86_spill] sm:$0xff] }
 0x668   : > { %v11836_v14 = vadd.bf16 %v11786_v56, %v11788_v60  ;;  %v4068_v53 = vsel %vm2559_vm11, %v4045_v13, %v4067_v15  ;;  %v4075_v54 = vsel %vm2559_vm11, %v4053_v24, %v4074_v61  ;;  %v11838_v23 = vadd.bf16 %v11787_v46, %v11788_v60  ;;  %v11843_v60 = vld [vmem:[#allocation87_spill] sm:$0xff] }
 0x669   : > { %v3905_v63 = vadd.f32 %v3904_v42, %v3903_v55  ;;  %v4056_v34 = vunpack.c.l.b16 %v4008_v22  ;;  %v4069_v37 = vsel %vm2561_vm13, %v4046_v38, %v4068_v53  ;;  %v4076_v18 = vsel %vm2561_vm13, %v4054_v62, %v4075_v54  ;;  %v11863_v42 = vld [vmem:[#allocation154_spill] sm:$0xff]  ;;  %v11864_v62 = vld [vmem:[#allocation19_spill] sm:$0xff] }
 0x66a   : > { %v3350_v36 = vadd.bf16 %v11837_v39, %v11836_v14  ;;  %v3351_v25 = vadd.bf16 %v11839_v11, %v11838_v23  ;;  %v11840_v40 = vadd.bf16 %v11786_v56, %v11789_v10  ;;  %v4070_v44 = vsel %vm2563_vm14, %v4047_v0, %v4069_v37  ;;  %v11858_v0 = vld [vmem:[#allocation146_spill] sm:$0xff]  ;;  %v11869_v61 = vld [vmem:[#allocation111_spill] sm:$0xff] }
 0x66b   : > { %v4009_v48 = vpack.c.bf16 %v3905_v63, %v3905_v63  ;;  %v4077_v45 = vsel %vm2563_vm14, %v4055_v28, %v4076_v18  ;;  %v11842_v43 = vadd.bf16 %v11787_v46, %v11789_v10  ;;  %v11845_v27 = vadd.bf16 %v11786_v56, %v11844_v9  ;;  %v11849_v10 = vld [vmem:[#allocation118_spill] sm:$0xff]  ;;  %v11866_v28 = vld [vmem:[#allocation131_spill] sm:$0xff] }
 0x66c   : > { %v3352_v26 = vadd.bf16 %v11841_v29, %v11840_v40  ;;  %v4071_v7 = vsel %vm2565_vm15, %v4048_v50, %v4070_v44  ;;  %v4078_v47 = vsel %vm2565_vm15, %v4056_v34, %v4077_v45  ;;  %v11847_v4 = vadd.bf16 %v11787_v46, %v11844_v9  ;;  %v11868_v63 = vld [vmem:[#allocation126_spill] sm:$0xff]  ;;  %v11871_v34 = vld [vmem:[#allocation120_spill] sm:$0xff] }
 0x66d   : > { %v3353_v49 = vadd.bf16 %v11843_v60, %v11842_v43  ;;  %v3354_v5 = vadd.bf16 %v11846_v3, %v11845_v27  ;;  %v4057_v2 = vunpack.c.l.b16 %v4009_v48  ;;  %v4072_v8 = vsel %vm2567_vm3, %v4049_v41, %v4071_v7  ;;  %v11859_v41 = vld [vmem:[#allocation76_spill] sm:$0xff]  ;;  %v11870_v14 = vld [vmem:[#allocation130_spill] sm:$0xff] }
 0x66e   : > { %v3355_v19 = vadd.bf16 %v11848_v31, %v11847_v4  ;;  %v11850_v57 = vadd.bf16 %v11786_v56, %v11849_v10  ;;  %v11852_v33 = vadd.bf16 %v11787_v46, %v11849_v10  ;;  %v11855_v30 = vadd.bf16 %v11786_v56, %v11854_v51 }
 0x66f   : > { %v4079_v38 = vsel %vm2567_vm3, %v4057_v2, %v4078_v47  ;;  %v11857_v55 = vadd.bf16 %v11787_v46, %v11854_v51  ;;  %v11860_v16 = vadd.bf16 %v11786_v56, %v11859_v41  ;;  %v11862_v12 = vadd.bf16 %v11787_v46, %v11859_v41 }
 0x670   : > { %v3356_v6 = vadd.bf16 %v11851_v59, %v11850_v57  ;;  %v3357_v20 = vadd.bf16 %v11853_v1, %v11852_v33  ;;  %v3358_v13 = vadd.bf16 %v11856_v32, %v11855_v30  ;;  %v4087_v24 = vpack.c.b16 %v4079_v38, %v4072_v8 }
 0x671   : > { %v3359_v50 = vadd.bf16 %v11858_v0, %v11857_v55  ;;  %v3360_v52 = vadd.bf16 %v11861_v58, %v11860_v16  ;;  %v3361_v17 = vadd.bf16 %v11863_v42, %v11862_v12  ;;  %v11865_v22 = vadd.bf16 %v11786_v56, %v11864_v62 }
 0x672   : > { %v11867_v35 = vadd.bf16 %v11787_v46, %v11864_v62  ;;  %v9771_v39 = vadd.bf16 %v11870_v14, %v11869_v61  ;;  %v9775_v53 = vadd.bf16 %v11870_v14, %v11871_v34  ;;  %v9778_v54 = vadd.bf16 %v11870_v14, %v3350_v36  ;;  %6093 = vmatprep.mubr.msk.bf16.mxu0 %vm2218_vm4, %v4087_v24 }
 0x673   : > { %v3362_v21 = vadd.bf16 %v11866_v28, %v11865_v22  ;;  %v9781_v56 = vadd.bf16 %v11870_v14, %v3351_v25  ;;  %v9785_v46 = vadd.bf16 %v11870_v14, %v3352_v26  ;;  %v9788_v23 = vadd.bf16 %v11870_v14, %v3353_v49 }
 0x674   : > { %v3363_v15 = vadd.bf16 %v11868_v63, %v11867_v35  ;;  %v9791_v11 = vadd.bf16 %v11870_v14, %v3354_v5  ;;  %v3450_v48 = vmul.bf16 1056980736, %v9771_v39  ;;  %v9795_v37 = vadd.bf16 %v11870_v14, %v3355_v19 }
 0x675   : > { %v3451_v36 = vmul.bf16 1056980736, %v9775_v53  ;;  %v3452_v25 = vmul.bf16 1056980736, %v9778_v54  ;;  %v3453_v18 = vmul.bf16 1056980736, %v9781_v56  ;;  %v9801_v40 = vadd.bf16 %v11870_v14, %v3356_v6 }
 0x676   : > { %v3454_v29 = vmul.bf16 1056980736, %v9785_v46  ;;  %6400 = vtanh.bf16 %v3450_v48  ;;  %v9805_v26 = vadd.bf16 %v11870_v14, %v3357_v20  ;;  %v3455_v44 = vmul.bf16 1056980736, %v9788_v23 }
 0x677   : > { %6402 = vtanh.bf16 %v3451_v36  ;;  %v9809_v45 = vadd.bf16 %v11870_v14, %v3358_v13  ;;  %v3456_v43 = vmul.bf16 1056980736, %v9791_v11  ;;  %v9813_v60 = vadd.bf16 %v11870_v14, %v3359_v50 }
 0x678   : > { %6404 = vtanh.bf16 %v3452_v25  ;;  %v3457_v49 = vmul.bf16 1056980736, %v9795_v37  ;;  %v9817_v9 = vadd.bf16 %v11870_v14, %v3360_v52  ;;  %v3458_v27 = vmul.bf16 1056980736, %v9801_v40 }
 0x679   : > { %6406 = vtanh.bf16 %v3453_v18  ;;  %v9821_v3 = vadd.bf16 %v11870_v14, %v3361_v17  ;;  %v3459_v5 = vmul.bf16 1056980736, %v9805_v26  ;;  %v9825_v2 = vadd.bf16 %v11870_v14, %v3362_v21 }
 0x67a   : > { %6408 = vtanh.bf16 %v3454_v29  ;;  %v3460_v7 = vmul.bf16 1056980736, %v9809_v45  ;;  %v9829_v47 = vadd.bf16 %v11870_v14, %v3363_v15  ;;  %v3461_v4 = vmul.bf16 1056980736, %v9813_v60 }
 0x67b   : > { %6410 = vtanh.bf16 %v3455_v44  ;;  %v3462_v31 = vmul.bf16 1056980736, %v9817_v9  ;;  %v3463_v19 = vmul.bf16 1056980736, %v9821_v3  ;;  %v3464_v8 = vmul.bf16 1056980736, %v9825_v2 }
 0x67c   : > { %6412 = vtanh.bf16 %v3456_v43  ;;  %v3465_v57 = vmul.bf16 1056980736, %v9829_v47 }
 0x67d   : > { %6414 = vtanh.bf16 %v3457_v49 }
 0x67e   : > { %6416 = vtanh.bf16 %v3458_v27 }
 0x67f   : > { %6418 = vtanh.bf16 %v3459_v5 }
 0x680   : > { %6420 = vtanh.bf16 %v3460_v7 }
 0x681   : > { %v6401_v10 = vpop.eup %6400  ;;  %6422 = vtanh.bf16 %v3461_v4 }
 0x682   : > { %v6403_v59 = vpop.eup %6402  ;;  %6424 = vtanh.bf16 %v3462_v31  ;;  %v3546_v6 = vmul.bf16 1056980736, %v6401_v10 }
 0x683   : > { %v6405_v33 = vpop.eup %6404  ;;  %6426 = vtanh.bf16 %v3463_v19  ;;  %v3547_v1 = vmul.bf16 1056980736, %v6403_v59 }
 0x684   : > { %v6407_v20 = vpop.eup %6406  ;;  %6428 = vtanh.bf16 %v3464_v8  ;;  %v3548_v51 = vmul.bf16 1056980736, %v6405_v33  ;;  %v3594_v30 = vadd.bf16 1056980736, %v3546_v6 }
 0x685   : > { %v6409_v32 = vpop.eup %6408  ;;  %6430 = vtanh.bf16 %v3465_v57  ;;  %v3549_v13 = vmul.bf16 1056980736, %v6407_v20  ;;  %v3595_v38 = vadd.bf16 1056980736, %v3547_v1 }
 0x686   : > { %v6411_v55 = vpop.eup %6410  ;;  %v3550_v0 = vmul.bf16 1056980736, %v6409_v32  ;;  %v3596_v50 = vadd.bf16 1056980736, %v3548_v51  ;;  %v9837_v41 = vmul.bf16 %v3594_v30, %v9771_v39 }
 0x687   : > { %v6413_v16 = vpop.eup %6412  ;;  %v3551_v58 = vmul.bf16 1056980736, %v6411_v55  ;;  %v3597_v52 = vadd.bf16 1056980736, %v3549_v13  ;;  %v3643_v12 = vmul.bf16 %v3595_v38, %v9775_v53 }
 0x688   : > { %v6415_v42 = vpop.eup %6414  ;;  %v3552_v17 = vmul.bf16 1056980736, %v6413_v16  ;;  %v3598_v24 = vadd.bf16 1056980736, %v3550_v0  ;;  %v9841_v62 = vmul.bf16 %v3596_v50, %v9778_v54  ;;  %v3706_v22 = vunpack.c.l.bf16 %v9837_v41 }
 0x689   : > { %v6417_v28 = vpop.eup %6416  ;;  %v3553_v21 = vmul.bf16 1056980736, %v6415_v42  ;;  %v3599_v35 = vadd.bf16 1056980736, %v3551_v58  ;;  %v3645_v63 = vmul.bf16 %v3597_v52, %v9781_v56  ;;  %v3707_v15 = vunpack.c.h.bf16 %v9837_v41 }
 0x68a   : > { %v6419_v61 = vpop.eup %6418  ;;  %v3554_v14 = vmul.bf16 1056980736, %v6417_v28  ;;  %v3600_v39 = vadd.bf16 1056980736, %v3552_v17  ;;  %v9847_v34 = vmul.bf16 %v3598_v24, %v9785_v46  ;;  %v3708_v53 = vunpack.c.l.bf16 %v3643_v12 }
 0x68b   : > { %v6421_v48 = vpop.eup %6420  ;;  %v3555_v36 = vmul.bf16 1056980736, %v6419_v61  ;;  %v3601_v54 = vadd.bf16 1056980736, %v3553_v21  ;;  %v3647_v25 = vmul.bf16 %v3599_v35, %v9788_v23  ;;  %v3709_v18 = vunpack.c.l.bf16 %v9841_v62 }
 0x68c   : > { %v6423_v29 = vpop.eup %6422  ;;  %v3556_v44 = vmul.bf16 1056980736, %v6421_v48  ;;  %v3602_v43 = vadd.bf16 1056980736, %v3554_v14  ;;  %v3648_v56 = vmul.bf16 %v3600_v39, %v9791_v11  ;;  %v3710_v49 = vunpack.c.h.bf16 %v9841_v62 }
 0x68d   : > { %v6425_v27 = vpop.eup %6424  ;;  %v3557_v5 = vmul.bf16 1056980736, %v6423_v29  ;;  %v3603_v7 = vadd.bf16 1056980736, %v3555_v36  ;;  %v3649_v46 = vmul.bf16 %v3601_v54, %v9795_v37  ;;  %v3711_v4 = vunpack.c.l.bf16 %v3645_v63 }
 0x68e   : > { %v6427_v31 = vpop.eup %6426  ;;  %v3558_v19 = vmul.bf16 1056980736, %v6425_v27  ;;  %v3604_v8 = vadd.bf16 1056980736, %v3556_v44  ;;  %v3650_v23 = vmul.bf16 %v3602_v43, %v9801_v40  ;;  %v3712_v10 = vunpack.c.l.bf16 %v9847_v34 }
 0x68f   : > { %v6429_v57 = vpop.eup %6428  ;;  %v3559_v59 = vmul.bf16 1056980736, %v6427_v31  ;;  %v3605_v6 = vadd.bf16 1056980736, %v3557_v5  ;;  %v3651_v11 = vmul.bf16 %v3603_v7, %v9805_v26  ;;  %v3713_v33 = vunpack.c.h.bf16 %v9847_v34 }
 0x690   : > { %v6431_v1 = vpop.eup %6430  ;;  %v3560_v20 = vmul.bf16 1056980736, %v6429_v57  ;;  %v3606_v51 = vadd.bf16 1056980736, %v3558_v19  ;;  %v3652_v37 = vmul.bf16 %v3604_v8, %v9809_v45  ;;  %v3714_v30 = vunpack.c.l.bf16 %v3647_v25 }
 0x691   : > { %v3561_v32 = vmul.bf16 1056980736, %v6431_v1  ;;  %v3607_v13 = vadd.bf16 1056980736, %v3559_v59  ;;  %v3653_v38 = vmul.bf16 %v3605_v6, %v9813_v60  ;;  %v3715_v40 = vunpack.c.l.bf16 %v3648_v56 }
 0x692   : > { %v3608_v55 = vadd.bf16 1056980736, %v3560_v20  ;;  %v3654_v0 = vmul.bf16 %v3606_v51, %v9817_v9  ;;  %v3716_v50 = vunpack.c.h.bf16 %v3648_v56  ;;  %v3717_v16 = vunpack.c.l.bf16 %v3649_v46 }
 0x693   : > { %v3609_v58 = vadd.bf16 1056980736, %v3561_v32  ;;  %v3655_v26 = vmul.bf16 %v3607_v13, %v9821_v3  ;;  %v3718_v52 = vunpack.c.l.bf16 %v3650_v23  ;;  %v3719_v12 = vunpack.c.h.bf16 %v3650_v23 }
 0x694   : > { %v9863_v42 = vmul.bf16 %v3608_v55, %v9825_v2  ;;  %v3720_v45 = vunpack.c.l.bf16 %v3651_v11  ;;  %v3721_v17 = vunpack.c.l.bf16 %v3652_v37  ;;  %v3722_v24 = vunpack.c.h.bf16 %v3652_v37 }
 0x695   : > { %v3657_v62 = vmul.bf16 %v3609_v58, %v9829_v47  ;;  %v3723_v60 = vunpack.c.l.bf16 %v3653_v38  ;;  %v3724_v28 = vunpack.c.l.bf16 %v3654_v0  ;;  %v3725_v21 = vunpack.c.h.bf16 %v3654_v0 }
 0x696   : > { %v3726_v35 = vunpack.c.l.bf16 %v3655_v26  ;;  %v3727_v9 = vunpack.c.l.bf16 %v9863_v42  ;;  %v3728_v63 = vunpack.c.h.bf16 %v9863_v42  ;;  %v3906_v3 = vsel %vm2218_vm4, %v3706_v22, 0.0 }
 0x697   : > { %v9871_v61 = vunpack.c.l.bf16 %v3657_v62  ;;  %v3907_v2 = vsel %vm2218_vm4, %v3707_v15, 0.0  ;;  %v3909_v14 = vsel %vm2218_vm4, %v3708_v53, 0.0  ;;  %v3917_v47 = vsel %vm2218_vm4, %v3709_v18, 0.0 }
 0x698   : > { %v3908_v39 = vadd.f32 %v3907_v2, %v3906_v3  ;;  %v3918_v34 = vsel %vm2218_vm4, %v3710_v49, 0.0  ;;  %v3920_v48 = vsel %vm2218_vm4, %v3711_v4, 0.0  ;;  %v3928_v36 = vsel %vm2218_vm4, %v3712_v10, 0.0 }
 0x699   : > { %v3919_v54 = vadd.f32 %v3918_v34, %v3917_v47  ;;  %v3929_v41 = vsel %vm2218_vm4, %v3713_v33, 0.0  ;;  %v3931_v22 = vsel %vm2218_vm4, %v3714_v30, 0.0  ;;  %v3939_v25 = vsel %vm2218_vm4, %v3715_v40, 0.0 }
 0x69a   : > { %v3910_v29 = vadd.f32 %v3909_v14, %v3908_v39  ;;  %v3930_v15 = vadd.f32 %v3929_v41, %v3928_v36  ;;  %v3940_v53 = vsel %vm2218_vm4, %v3716_v50, 0.0  ;;  %v3942_v18 = vsel %vm2218_vm4, %v3717_v16, 0.0 }
 0x69b   : > { %v3921_v44 = vadd.f32 %v3920_v48, %v3919_v54  ;;  %v3941_v43 = vadd.f32 %v3940_v53, %v3939_v25  ;;  %v3950_v56 = vsel %vm2218_vm4, %v3718_v52, 0.0  ;;  %v3951_v49 = vsel %vm2218_vm4, %v3719_v12, 0.0 }
 0x69c   : > { %v3911_v27 = vrot.slane %v3910_v29, 4  ;;  %v3932_v5 = vadd.f32 %v3931_v22, %v3930_v15  ;;  %v3952_v7 = vadd.f32 %v3951_v49, %v3950_v56  ;;  %v3953_v46 = vsel %vm2218_vm4, %v3720_v45, 0.0 }
 0x69d   : > { %v3922_v4 = vrot.slane %v3921_v44, 4  ;;  %v3943_v31 = vadd.f32 %v3942_v18, %v3941_v43  ;;  %v3961_v19 = vsel %vm2218_vm4, %v3721_v17, 0.0  ;;  %v3962_v8 = vsel %vm2218_vm4, %v3722_v24, 0.0 }
 0x69e   : > { %v3912_v23 = vadd.f32 %v3911_v27, %v3910_v29  ;;  %v3933_v10 = vrot.slane %v3932_v5, 4  ;;  %v3954_v57 = vadd.f32 %v3953_v46, %v3952_v7  ;;  %v3963_v59 = vadd.f32 %v3962_v8, %v3961_v19 }
 0x69f   : > { %v3923_v6 = vadd.f32 %v3922_v4, %v3921_v44  ;;  %v3944_v11 = vrot.slane %v3943_v31, 4  ;;  %v3964_v33 = vsel %vm2218_vm4, %v3723_v60, 0.0  ;;  %v3972_v1 = vsel %vm2218_vm4, %v3724_v28, 0.0 }
 0x6a0   : > { %v3913_v20 = vrot.slane %v3912_v23, 2  ;;  %v3934_v51 = vadd.f32 %v3933_v10, %v3932_v5  ;;  %v3955_v37 = vrot.slane %v3954_v57, 4  ;;  %v3965_v30 = vadd.f32 %v3964_v33, %v3963_v59 }
 0x6a1   : > { %v3924_v32 = vrot.slane %v3923_v6, 2  ;;  %v3945_v13 = vadd.f32 %v3944_v11, %v3943_v31  ;;  %v3973_v38 = vsel %vm2218_vm4, %v3725_v21, 0.0  ;;  %v3975_v40 = vsel %vm2218_vm4, %v3726_v35, 0.0 }
 0x6a2   : > { %v3914_v55 = vadd.f32 %v3913_v20, %v3912_v23  ;;  %v3935_v0 = vrot.slane %v3934_v51, 2  ;;  %v3956_v50 = vadd.f32 %v3955_v37, %v3954_v57  ;;  %v3966_v16 = vrot.slane %v3965_v30, 4 }
 0x6a3   : > { %v3925_v58 = vadd.f32 %v3924_v32, %v3923_v6  ;;  %v3946_v26 = vrot.slane %v3945_v13, 2  ;;  %v3974_v52 = vadd.f32 %v3973_v38, %v3972_v1  ;;  %v3983_v12 = vsel %vm2218_vm4, %v3727_v9, 0.0 }
 0x6a4   : > { %v3915_v42 = vrot.slane %v3914_v55, 1  ;;  %v3936_v45 = vadd.f32 %v3935_v0, %v3934_v51  ;;  %v3957_v17 = vrot.slane %v3956_v50, 2  ;;  %v3967_v24 = vadd.f32 %v3966_v16, %v3965_v30 }
 0x6a5   : > { %v3926_v62 = vrot.slane %v3925_v58, 1  ;;  %v3947_v60 = vadd.f32 %v3946_v26, %v3945_v13  ;;  %v3976_v28 = vadd.f32 %v3975_v40, %v3974_v52  ;;  %v3984_v21 = vsel %vm2218_vm4, %v3728_v63, 0.0  ;;  %v6181_v26 = vld [vmem:[%s11125_s3 + $0x28] sm:$0xff]   ;;  %v6182_v52 = vld [vmem:[%s11125_s3 + $0x30] sm:$0xff]  }
 0x6a6   : > { %v3916_v3 = vadd.f32 %v3915_v42, %v3914_v55  ;;  %v3937_v35 = vrot.slane %v3936_v45, 1  ;;  %v3958_v2 = vadd.f32 %v3957_v17, %v3956_v50  ;;  %v3968_v14 = vrot.slane %v3967_v24, 2  ;;  %v6561_v42 = vld [vmem:[%s11124_s2 + $0x8] sm:$0xff] }
 0x6a7   : > { %v3927_v47 = vadd.f32 %v3926_v62, %v3925_v58  ;;  %v3948_v39 = vrot.slane %v3947_v60, 1  ;;  %v3977_v34 = vrot.slane %v3976_v28, 4  ;;  %v3985_v48 = vadd.f32 %v3984_v21, %v3983_v12  ;;  %v6180_v58 = vld [vmem:[%s11125_s3 + $0x20] sm:$0xff]   ;;  %v6183_v12 = vld [vmem:[%s11125_s3 + $0x38] sm:$0xff]  }
 0x6a8   : > { %v3938_v36 = vadd.f32 %v3937_v35, %v3936_v45  ;;  %v3959_v54 = vrot.slane %v3958_v2, 1  ;;  %v3969_v9 = vadd.f32 %v3968_v14, %v3967_v24  ;;  %v3986_v41 = vsel %vm2218_vm4, %v9871_v61, 0.0  ;;  %6097 = vmatprep.subr.bf16.mxu1 %v6180_v58  ;;  %v11872_v45 = vld [vmem:[#allocation34_spill] sm:$0xff]  ;;  %v11873_v24 = vld [vmem:[#allocation139_spill] sm:$0xff] }
 0x6a9   : > { %v3949_v22 = vadd.f32 %v3948_v39, %v3947_v60  ;;  %v3978_v25 = vadd.f32 %v3977_v34, %v3976_v28  ;;  %v3987_v29 = vadd.f32 %v3986_v41, %v3985_v48  ;;  %v4010_v15 = vpack.c.bf16 %v3916_v3, %v3916_v3  ;;  %6098 = vmatpush3.bf16.msra.mxu1 %v6180_v58  ;;  %v11874_v28 = vld [vmem:[#allocation141_spill] sm:$0xff]  ;;  %v11885_v58 = vld [vmem:[#allocation31_spill] sm:$0xff] }
 0x6aa   : > { %v3960_v53 = vadd.f32 %v3959_v54, %v3958_v2  ;;  %v3970_v63 = vrot.slane %v3969_v9, 1  ;;  %v4011_v18 = vpack.c.bf16 %v3927_v47, %v3927_v47  ;;  %v4012_v44 = vpack.c.bf16 %v3938_v36, %v3938_v36  ;;  %6099 = vmatprep.subr.bf16.mxu1 %v6181_v26  ;;  %v11875_v47 = vld [vmem:[#allocation138_spill] sm:$0xff] }
 0x6ab   : > { %v3979_v43 = vrot.slane %v3978_v25, 2  ;;  %v3988_v56 = vrot.slane %v3987_v29, 4  ;;  %v4013_v49 = vpack.c.bf16 %v3949_v22, %v3949_v22  ;;  %v4058_v27 = vunpack.c.l.b16 %v4010_v15 }
 0x6ac   : > { %v3971_v5 = vadd.f32 %v3970_v63, %v3969_v9  ;;  %v4014_v7 = vpack.c.bf16 %v3960_v53, %v3960_v53  ;;  %v4059_v46 = vunpack.c.l.b16 %v4011_v18  ;;  %v4060_v4 = vunpack.c.l.b16 %v4012_v44 }
 0x6ad   : > { %v3980_v31 = vadd.f32 %v3979_v43, %v3978_v25  ;;  %v3989_v19 = vadd.f32 %v3988_v56, %v3987_v29  ;;  %v4061_v61 = vunpack.c.l.b16 %v4013_v49  ;;  %6100 = vmatpush3.bf16.msra.mxu1 %v6181_v26  ;;  %v4170_v17 = vrot.slane %v6561_v42, %v11872_v45  ;;  %v11887_v42 = vld [vmem:[#allocation33_spill] sm:$0xff] }
 0x6ae   : > { %v4015_v8 = vpack.c.bf16 %v3971_v5, %v3971_v5  ;;  %v4080_v23 = vsel %vm2555_vm6, %v4059_v46, %v4058_v27  ;;  %v4062_v59 = vunpack.c.l.b16 %v4014_v7  ;;  %6101 = vmatprep.subr.bf16.mxu1 %v6182_v52  ;;  %v6184_v7 = vld [vmem:[%s11126_s4 + $0x40] sm:$0xff]   ;;  %v6185_v46 = vld [vmem:[%s11126_s4 + $0x48] sm:$0xff]  }
 0x6af   : > { %v3981_v10 = vrot.slane %v3980_v31, 1  ;;  %v3990_v57 = vrot.slane %v3989_v19, 2  ;;  %v4081_v6 = vsel %vm2557_vm10, %v4060_v4, %v4080_v23  ;;  %v4173_v62 = vmul.f32 %v4170_v17, %v11873_v24  ;;  %6109 = vmatprep.subr.bf16.mxu0 %v6184_v7 }
 0x6b0   : > { %v4063_v11 = vunpack.c.l.b16 %v4015_v8  ;;  %v4082_v33 = vsel %vm2559_vm11, %v4061_v61, %v4081_v6  ;;  %v4171_v21 = vmul.f32 %v4170_v17, %v11874_v28  ;;  %v4172_v39 = vmul.f32 %v4170_v17, %v11875_v47  ;;  %v11888_v17 = vld [vmem:[#allocation39_spill] sm:$0xff]  ;;  %v11956_v47 = vld [vmem:[#allocation80_spill] sm:$0xff] }
 0x6b1   : > { %v3982_v1 = vadd.f32 %v3981_v10, %v3980_v31  ;;  %v3991_v20 = vadd.f32 %v3990_v57, %v3989_v19  ;;  %v4083_v51 = vsel %vm2561_vm13, %v4062_v59, %v4082_v33  ;;  %6102 = vmatpush3.bf16.msra.mxu1 %v6182_v52  ;;  %v6186_v31 = vld [vmem:[%s11126_s4 + $0x50] sm:$0xff]   ;;  %v6187_v10 = vld [vmem:[%s11126_s4 + $0x58] sm:$0xff]   ;;  %v11878_v33 = vld [vmem:[#allocation84_spill] sm:$0xff] }
 0x6b2   : > { %v4084_v37 = vsel %vm2563_vm14, %v4063_v11, %v4083_v51  ;;  %6103 = vmatprep.subr.bf16.mxu1 %v6183_v12  ;;  %v11876_v59 = vld [vmem:[#allocation17_spill] sm:$0xff]  ;;  %v11877_v11 = vld [vmem:[#allocation26_spill] sm:$0xff]  ;;  %v4753_v26 = vmul.bf16 %v11878_v33, %v11885_v58  ;;  %v4720_v45 = vmul.bf16 %v11878_v33, %v11887_v42 }
 0x6b3   : > { %v3992_v30 = vrot.slane %v3991_v20, 1  ;;  %v4016_v32 = vpack.c.bf16 %v3982_v1, %v3982_v1  ;;  %v4719_v1 = vmul.bf16 %v11878_v33, %v11877_v11  ;;  %v11886_v52 = vld [vmem:[#allocation37_spill] sm:$0xff]  ;;  %v11905_v11 = vld [vmem:[#allocation48_spill] sm:$0xff] }
 0x6b5   : > { %v3993_v13 = vadd.f32 %v3992_v30, %v3991_v20  ;;  %v4064_v38 = vunpack.c.l.b16 %v4016_v32  ;;  %6104 = vmatpush3.bf16.msra.mxu1 %v6183_v12  ;;  %v11879_v20 = vld [vmem:[#allocation25_spill] sm:$0xff]  ;;  %v11881_v32 = vld [vmem:[#allocation27_spill] sm:$0xff]  ;;  %v4722_v12 = vmul.bf16 %v11878_v33, %v11886_v52  ;;  %v11914_v52 = vld [vmem:[#allocation62_spill] sm:$0xff] }
 0x6b6   : > { %v4739_v51 = vmul.bf16 %v11878_v33, %v11879_v20 }
 0x6b7   : > { %v4017_v40 = vpack.c.bf16 %v3993_v13, %v3993_v13  ;;  %v4085_v55 = vsel %vm2565_vm15, %v4064_v38, %v4084_v37  ;;  %v11880_v37 = vld [vmem:[#allocation28_spill] sm:$0xff]  ;;  %v4721_v13 = vmul.bf16 %v11878_v33, %v11881_v32  ;;  %v11882_v38 = vld [vmem:[#allocation30_spill] sm:$0xff] }
 0x6b8   : > { %v4735_v30 = vmul.bf16 %v11878_v33, %v11880_v37  ;;  %v11906_v37 = vld [vmem:[#allocation57_spill] sm:$0xff]  ;;  %v11908_v32 = vld [vmem:[#allocation52_spill] sm:$0xff] }
 0x6b9   : > { %v4065_v0 = vunpack.c.l.b16 %v4017_v40  ;;  %v4723_v40 = vmul.bf16 %v11878_v33, %v11882_v38  ;;  %v11910_v38 = vld [vmem:[#allocation54_spill] sm:$0xff] }
 0x6bb   : > { %v4086_v50 = vsel %vm2567_vm3, %v4065_v0, %v4085_v55  ;;  %v11883_v55 = vld [vmem:[#allocation29_spill] sm:$0xff] }
 0x6bc   : > { %v4088_v16 = vpack.c.b16 %v4086_v50, %v4086_v50  ;;  %v4737_v0 = vmul.bf16 %v11878_v33, %v11883_v55  ;;  %v11884_v50 = vld [vmem:[#allocation32_spill] sm:$0xff] }
 0x6bd   : > { %v11911_v55 = vld [vmem:[#allocation56_spill] sm:$0xff] }
 0x6be   : > { %6094 = vmatmul.mubr.msk.bf16.vlgmr.msra.gmra.mrb[4].mxu0 %vm2218_vm4, %v4088_v16  ;;  %v4751_v16 = vmul.bf16 %v11878_v33, %v11884_v50  ;;  %v11913_v50 = vld [vmem:[#allocation58_spill] sm:$0xff] }
 0x6bf   : > { %6110 = vmatpush3.bf16.msra.mxu0 %v6184_v7  ;;  %v10025_v58 = vadd.bf16 %v4720_v45, %v11913_v50  ;;  %v11921_v45 = vld [vmem:[#allocation70_spill] sm:$0xff]  ;;  %v11936_v50 = vld [vmem:[#allocation104_spill] sm:$0xff] }
 0x6c0   : > { %6111 = vmatprep.subr.bf16.mxu0 %v6185_v46 }
 0x6c3   : > { %6112 = vmatpush3.bf16.msra.mxu0 %v6185_v46  ;;  %v11902_v46 = vld [vmem:[#allocation53_spill] sm:$0xff] }
 0x6c4   : > { %6113 = vmatprep.subr.bf16.mxu0 %v6186_v31 }
 0x6c7   : > { %6114 = vmatpush3.bf16.msra.mxu0 %v6186_v31 }
 0x6c8   : > { %6115 = vmatprep.subr.bf16.mxu0 %v6187_v10 }
 0x6cb   : > { %6116 = vmatpush3.bf16.msra.mxu0 %v6187_v10  ;;  %v11904_v10 = vld [vmem:[#allocation50_spill] sm:$0xff] }
 0x791   : > { %v6095_v60 = vpop.f32.mrb[4].mxu0 }
 0x792   : > { %v4176_v3 = vadd.f32 %v6095_v60, %v4173_v62  ;;  %v4153_v35 = vpop.f32.mrb[5].mxu0  ;;  %v4736_v62 = vmul.bf16 %v11878_v33, %v11888_v17  ;;  %v11889_v60 = vld [vmem:[#allocation35_spill] sm:$0xff] }
 0x793   : > { %v4174_v2 = vadd.f32 %v4171_v21, %v4153_v35  ;;  %v6096_v14 = vpop.f32.mrb[6].mxu0  ;;  %v4725_v21 = vmul.bf16 %v11878_v33, %v11889_v60 }
 0x794   : > { %v4179_v34 = vmul.f32 0.5, %v4176_v3  ;;  %v4156_v48 = vpop.f32.mrb[7].mxu0  ;;  %v10028_v42 = vadd.bf16 %v4736_v62, %v11914_v52 }
 0x795   : > { %v4177_v36 = vmul.f32 0.5, %v4174_v2  ;;  %v4175_v54 = vadd.f32 %v4172_v39, %v4156_v48 }
 0x796   : > { %6432 = vtanh.f32 %v4179_v34  ;;  %v11892_v34 = vld [vmem:[#allocation43_spill] sm:$0xff] }
 0x797   : > { %6434 = vtanh.f32 %v4177_v36  ;;  %v4178_v9 = vmul.f32 0.5, %v4175_v54  ;;  %v9976_v48 = vadd.bf16 %v4719_v1, %v11892_v34  ;;  %v11893_v36 = vld [vmem:[#allocation45_spill] sm:$0xff]  ;;  %v4754_v1 = vmul.bf16 %v11878_v33, %v11905_v11 }
 0x798   : > { %v11932_v11 = vld [vmem:[#allocation85_spill] sm:$0xff] }
 0x799   : > { %6436 = vtanh.f32 %v4178_v9  ;;  %v11894_v9 = vld [vmem:[#allocation40_spill] sm:$0xff] }
 0x7a0   : > { %v6433_v41 = vpop.eup %6432 }
 0x7a1   : > { %v6435_v22 = vpop.eup %6434  ;;  %v4185_v25 = vmul.f32 0.5, %v6433_v41  ;;  %v9982_v41 = vadd.bf16 %v4721_v13, %v11894_v9  ;;  %v10015_v13 = vadd.bf16 %v4751_v16, %v11908_v32  ;;  %v11916_v16 = vld [vmem:[#allocation60_spill] sm:$0xff]  ;;  %v11933_v32 = vld [vmem:[#allocation91_spill] sm:$0xff] }
 0x7a2   : > { %v4183_v29 = vmul.f32 0.5, %v6435_v22  ;;  %v11895_v22 = vld [vmem:[#allocation38_spill] sm:$0xff] }
 0x7a3   : > { %v6437_v15 = vpop.eup %6436  ;;  %v4188_v53 = vadd.f32 0.5, %v4185_v25  ;;  %v4755_v25 = vmul.bf16 %v11878_v33, %v11895_v22  ;;  %11909 = vst [vmem:[#allocation121_spill] sm:$0xff] %v10015_v13 }
 0x7a4   : > { %v4186_v63 = vadd.f32 0.5, %v4183_v29  ;;  %v4184_v18 = vmul.f32 0.5, %v6437_v15  ;;  %v11896_v29 = vld [vmem:[#allocation42_spill] sm:$0xff] }
 0x7a5   : > { %v4191_v43 = vmul.f32 %v4188_v53, %v4176_v3  ;;  %v11890_v3 = vld [vmem:[#allocation36_spill] sm:$0xff]  ;;  %v9987_v15 = vadd.bf16 %v4737_v0, %v11896_v29  ;;  %v11912_v0 = vld [vmem:[#allocation61_spill] sm:$0xff]  ;;  %v11922_v29 = vld [vmem:[#allocation71_spill] sm:$0xff] }
 0x7a6   : > { %v4187_v44 = vadd.f32 0.5, %v4184_v18  ;;  %v4189_v56 = vmul.f32 %v4186_v63, %v4174_v2  ;;  %v4738_v35 = vmul.bf16 %v11878_v33, %v11890_v3  ;;  %v11891_v2 = vld [vmem:[#allocation41_spill] sm:$0xff]  ;;  %v11897_v53 = vld [vmem:[#allocation44_spill] sm:$0xff]  ;;  %v11898_v18 = vld [vmem:[#allocation47_spill] sm:$0xff] }
 0x7a7   : > { %v4193_v5 = vpack.c.bf16 %v4191_v43, %v4191_v43  ;;  %v4741_v14 = vmul.bf16 %v11878_v33, %v11891_v2  ;;  %v4727_v63 = vmul.bf16 %v11878_v33, %v11897_v53  ;;  %v11899_v43 = vld [vmem:[#allocation49_spill] sm:$0xff]  ;;  %v11917_v3 = vld [vmem:[#allocation66_spill] sm:$0xff]  ;;  %v11923_v53 = vld [vmem:[#allocation72_spill] sm:$0xff] }
 0x7a8   : > { %v4190_v49 = vmul.f32 %v4187_v44, %v4175_v54  ;;  %v9979_v54 = vadd.bf16 %v4735_v30, %v11893_v36  ;;  %v4724_v44 = vmul.bf16 %v11878_v33, %v11898_v18  ;;  %v10012_v30 = vadd.bf16 %v4753_v26, %v11906_v37  ;;  %v11915_v26 = vld [vmem:[#allocation59_spill] sm:$0xff]  ;;  %v11920_v36 = vld [vmem:[#allocation68_spill] sm:$0xff]  ;;  %v11925_v18 = vld [vmem:[#allocation73_spill] sm:$0xff] }
 0x7a9   : > { %v10031_v17 = vadd.bf16 %v4725_v21, %v11915_v26  ;;  %v10034_v60 = vadd.bf16 %v4738_v35, %v11916_v16  ;;  %v10037_v2 = vadd.bf16 %v4755_v25, %v11917_v3  ;;  %v10043_v9 = vadd.bf16 %v4727_v63, %v11920_v36  ;;  %v11937_v16 = vld [vmem:[#allocation124_spill] sm:$0xff] }
 0x7aa   : > { %v4192_v27 = vpack.c.bf16 %v4190_v49, %v4189_v56  ;;  %v4740_v56 = vmul.bf16 %v11878_v33, %v11899_v43  ;;  %v11900_v49 = vld [vmem:[#allocation46_spill] sm:$0xff]  ;;  %11907 = vst [vmem:[#allocation114_spill] sm:$0xff] %v10012_v30  ;;  %v10051_v35 = vadd.bf16 %v4724_v44, %v11922_v29  ;;  %v10054_v25 = vadd.bf16 %v4754_v1, %v11923_v53  ;;  %v11931_v44 = vld [vmem:[#allocation83_spill] sm:$0xff]  ;;  %v11938_v29 = vld [vmem:[#allocation125_spill] sm:$0xff] }
 0x7ab   : > { %11918 = vst [vmem:[#allocation81_spill] sm:$0xff] %v10037_v2  ;;  %v4734_v3 = vmul.bf16 %v11878_v33, %v11937_v16  ;;  %v4750_v53 = vmul.bf16 %v11878_v33, %v11938_v29 }
 0x7ac   : > { %6105 = vmatprep.mubr.msk.bf16.mxu1 %vm2218_vm4, %v4192_v27  ;;  %v4743_v27 = vmul.bf16 %v11878_v33, %v11900_v49  ;;  %11924 = vst [vmem:[#allocation98_spill] sm:$0xff] %v10054_v25  ;;  %v11926_v49 = vld [vmem:[#allocation75_spill] sm:$0xff] }
 0x7ad   : > { %6106 = vmatmul.mubr.msk.bf16.vlgmr.msra.gmra.mrb[4].mxu1 %vm2218_vm4, %v4193_v5  ;;  %v11901_v5 = vld [vmem:[#allocation51_spill] sm:$0xff] }
 0x7ae   : > { %v4752_v7 = vmul.bf16 %v11878_v33, %v11901_v5  ;;  %v10046_v22 = vadd.bf16 %v4743_v27, %v11921_v45  ;;  %v11928_v5 = vld [vmem:[#allocation77_spill] sm:$0xff] }
 0x7b0   : > { %v10060_v63 = vadd.bf16 %v4752_v7, %v11926_v49  ;;  %v4732_v7 = vmul.bf16 %v11878_v33, %v11933_v32  ;;  %v11942_v32 = vld [vmem:[#allocation147_spill] sm:$0xff] }
 0x7b2   : > { %11927 = vst [vmem:[#allocation89_spill] sm:$0xff] %v10060_v63 }
 0x880   : > { %v6107_v4 = vpop.f32.mrb[4].mxu1 }
 0x881   : > { %v4258_v19 = vpop.f32.mrb[5].mxu1  ;;  %v4273_v57 = vpack.c.bf16 %v6107_v4, %v6107_v4  ;;  %v4757_v4 = vmul.bf16 %v11878_v33, %v11902_v46  ;;  %v11930_v46 = vld [vmem:[#allocation79_spill] sm:$0xff] }
 0x882   : > { %v6108_v8 = vpop.f32.mrb[6].mxu1 }
 0x883   : > { %v9935_v61 = vpop.f32.mrb[7].mxu1  ;;  %v4331_v6 = vrot.slane %v4273_v57, %v11876_v59  ;;  %v10063_v27 = vadd.bf16 %v4757_v4, %v11928_v5 }
 0x884   : > { %v9938_v23 = vpack.c.bf16 %v9935_v61, %v4258_v19  ;;  %v11903_v19 = vld [vmem:[#allocation55_spill] sm:$0xff]  ;;  %v6009_v21 = vpack.c.bf16 %v9935_v61, %v9935_v61 }
 0x885   : > { %v4332_v39 = vcombine.high %v4331_v6, %v4331_v6  ;;  %v4339_v31 = vrot.slane %v4331_v6, %v11876_v59  ;;  %v10003_v8 = vadd.bf16 %v4739_v51, %v11903_v19  ;;  %v4726_v6 = vmul.bf16 %v11878_v33, %v11910_v38  ;;  %11929 = vst [vmem:[#allocation74_spill] sm:$0xff] %v10063_v27  ;;  %v11934_v38 = vld [vmem:[#allocation94_spill] sm:$0xff] }
 0x886   : > { %4661 = vrot.lane.b32.xlu1 %v9938_v23, %s6632_s10  ;;  %v4742_v51 = vmul.bf16 %v11878_v33, %v11911_v55  ;;  %v4283_v61 = vrot.slane %v9938_v23, %v11876_v59  ;;  %v4762_v4 = vmul.bf16 %v11878_v33, %v11934_v38 }
 0x887   : > { %v4346_v20 = vrot.slane %v4332_v39, %v11876_v59  ;;  %v11919_v39 = vld [vmem:[#allocation67_spill] sm:$0xff]  ;;  %v4366_v43 = vunpack.i.h.s16 %v4339_v31  ;;  %v10066_v19 = vadd.bf16 %v4726_v6, %v11930_v46  ;;  %v4290_v6 = vrot.slane %v6009_v21, %v11876_v59  ;;  %v11940_v46 = vld [vmem:[#allocation137_spill] sm:$0xff] }
 0x888   : > { %v10040_v34 = vadd.bf16 %v4741_v14, %v11919_v39  ;;  %v10057_v14 = vadd.bf16 %v4740_v56, %v11925_v18  ;;  %v4763_v56 = vmul.bf16 %v11878_v33, %v11932_v11  ;;  %v6018_v52 = vpack.i.b16 %v4339_v31, %v4339_v31  ;;  %v11939_v18 = vld [vmem:[#allocation95_spill] sm:$0xff] }
 0x889   : > { %v4348_v62 = vcombine.high %v4346_v20, %v4346_v20  ;;  %v4368_v1 = vunpack.i.h.s16 %v4346_v20  ;;  %v4390_v26 = vpack.i.b16 %v4366_v43, %v4366_v43  ;;  %v6019_v39 = vpack.i.b16 %v4346_v20, %v4346_v20  ;;  %v11944_v20 = vld [vmem:[#allocation149_spill] sm:$0xff] }
 0x88a   : > { %4663 = vrot.lane.b32.xlu1 %v4273_v57, %s6632_s10  ;;  %v10006_v57 = vadd.bf16 %v4723_v40, %v11904_v10  ;;  %v10022_v40 = vadd.bf16 %v4722_v12, %v11912_v0  ;;  %v4347_v12 = vcombine.high %v4339_v31, %v4339_v31  ;;  %v10071_v10 = vadd.bf16 %v4742_v51, %v11931_v44  ;;  %v11935_v0 = vld [vmem:[#allocation100_spill] sm:$0xff] }
 0x88b   : > { %v4372_v55 = vunpack.i.h.s16 %v4348_v62  ;;  %v4748_v23 = vmul.bf16 %v11878_v33, %v11935_v0  ;;  %v4765_v51 = vmul.bf16 %v11878_v33, %v11936_v50  ;;  %v4291_v45 = vcombine.high %v4283_v61, %v4283_v61  ;;  %v11945_v0 = vld [vmem:[#allocation6_spill] sm:$0xff] }
 0x88c   : > { %v4370_v37 = vunpack.i.h.s16 %v4347_v12  ;;  %v6020_v36 = vpack.i.b16 %v4347_v12, %v4347_v12  ;;  %v4766_v21 = vmul.bf16 %v11878_v33, %v11939_v18  ;;  %v4392_v49 = vpack.i.b16 %v4368_v1, %v4368_v1  ;;  %v11950_v18 = vld [vmem:[#allocation150_spill] sm:$0xff] }
 0x88d   : > { %v10091_v44 = vadd.bf16 %v4763_v56, %v11940_v46  ;;  %v6021_v11 = vpack.i.b16 %v4348_v62, %v4348_v62  ;;  %v4396_v31 = vpack.i.b16 %v4372_v55, %v4372_v55  ;;  %v4292_v43 = vcombine.high %v4290_v6, %v4290_v6 }
 0x88e   : > { %v4394_v5 = vpack.i.b16 %v4370_v37, %v4370_v37  ;;  %v10094_v38 = vadd.bf16 %v4748_v23, %v11942_v32  ;;  %v10097_v12 = vadd.bf16 %v4732_v7, %v11944_v20  ;;  %v4464_v50 = vrot.slane %v6018_v52, %v11945_v0  ;;  %v11946_v37 = vld [vmem:[#allocation148_spill] sm:$0xff]  ;;  %v11948_v23 = vld [vmem:[#allocation151_spill] sm:$0xff] }
 0x88f   : > { %11941 = vst [vmem:[#allocation109_spill] sm:$0xff] %v10091_v44  ;;  %v4468_v16 = vrot.slane %v4390_v26, %v11945_v0  ;;  %v4472_v33 = vrot.slane %v6019_v39, %v11945_v0  ;;  %v4480_v1 = vrot.slane %v6020_v36, %v11945_v0  ;;  %v4299_v56 = vrot.slane %v4283_v61, %v11876_v59 }
 0x890   : > { %11943 = vst [vmem:[#allocation108_spill] sm:$0xff] %v10094_v38  ;;  %v4313_v62 = vrot.slane %v4291_v45, %v11876_v59  ;;  %v10106_v55 = vadd.bf16 %v4765_v51, %v11946_v37  ;;  %v10109_v29 = vadd.bf16 %v4762_v4, %v11948_v23  ;;  %v4476_v7 = vrot.slane %v4392_v49, %v11945_v0  ;;  %v11952_v51 = vld [vmem:[#allocation152_spill] sm:$0xff]  ;;  %v11953_v23 = vld [vmem:[#allocation153_spill] sm:$0xff]  ;;  %v11968_v38 = vld [vmem:[#allocation99_spill] sm:$0xff] }
 0x891   : > { %v4484_v52 = vrot.slane %v4394_v5, %v11945_v0  ;;  %v4488_v26 = vrot.slane %v6021_v11, %v11945_v0  ;;  %v4492_v39 = vrot.slane %v4396_v31, %v11945_v0  ;;  %v4306_v36 = vrot.slane %v4290_v6, %v11876_v59  ;;  %v11955_v31 = vld [vmem:[#allocation8_spill] sm:$0xff] }
 0x892   : > { %11947 = vst [vmem:[#allocation102_spill] sm:$0xff] %v10106_v55  ;;  %11949 = vst [vmem:[#allocation92_spill] sm:$0xff] %v10109_v29  ;;  %v4320_v61 = vrot.slane %v4292_v43, %v11876_v59  ;;  %v10118_v45 = vadd.bf16 %v4750_v53, %v11950_v18  ;;  %v10121_v46 = vadd.bf16 %v4734_v3, %v11952_v51 }
 0x893   : > { %v4606_v4 = vpack.i.b16 %v4464_v50, %v4464_v50  ;;  %v4613_v32 = vpack.i.b16 %v4468_v16, %v4468_v16  ;;  %v4620_v20 = vpack.i.b16 %v4472_v33, %v4472_v33  ;;  %v4634_v49 = vpack.i.b16 %v4480_v1, %v4480_v1 }
 0x894   : > { %11951 = vst [vmem:[#allocation135_spill] sm:$0xff] %v10118_v45  ;;  %v4321_v37 = vcombine.high %v4299_v56, %v4299_v56  ;;  %v4323_v5 = vcombine.high %v4313_v62, %v4313_v62  ;;  %v10124_v11 = vadd.bf16 %v4766_v21, %v11953_v23  ;;  %v10128_v6 = vrot.slane %v11956_v47, %v11955_v31 }
 0x895   : > { %v4627_v59 = vpack.i.b16 %v4476_v7, %v4476_v7  ;;  %v4641_v43 = vpack.i.b16 %v4484_v52, %v4484_v52  ;;  %v4648_v53 = vpack.i.b16 %v4488_v26, %v4488_v26  ;;  %v4655_v18 = vpack.i.b16 %v4492_v39, %v4492_v39 }
 0x896   : > { %11954 = vst [vmem:[#allocation112_spill] sm:$0xff] %v10124_v11  ;;  %11957 = vst [vmem:[#allocation129_spill] sm:$0xff] %v10128_v6  ;;  %v4322_v28 = vcombine.high %v4306_v36, %v4306_v36  ;;  %v4324_v3 = vcombine.high %v4320_v61, %v4320_v61  ;;  %v10131_v50 = vrot.slane %v4606_v4, %v11945_v0  ;;  %v4350_v33 = vunpack.i.h.s16 %v4299_v56 }
 0x897   : > { %v10134_v16 = vrot.slane %v4613_v32, %v11945_v0  ;;  %v4352_v1 = vunpack.i.h.s16 %v4313_v62  ;;  %v10137_v21 = vrot.slane %v4620_v20, %v11945_v0  ;;  %v10140_v47 = vrot.slane %v4634_v49, %v11945_v0 }
 0x898   : > { %11958 = vst [vmem:[#allocation78_spill] sm:$0xff] %v10131_v50  ;;  %v4354_v7 = vunpack.i.h.s16 %v4321_v37  ;;  %v4356_v52 = vunpack.i.h.s16 %v4323_v5  ;;  %v10143_v26 = vrot.slane %v4627_v59, %v11945_v0  ;;  %v10146_v39 = vrot.slane %v4641_v43, %v11945_v0 }
 0x899   : > { %11959 = vst [vmem:[#allocation143_spill] sm:$0xff] %v10134_v16  ;;  %11960 = vst [vmem:[#allocation117_spill] sm:$0xff] %v10137_v21  ;;  %v4358_v51 = vunpack.i.h.s16 %v4306_v36  ;;  %v4360_v4 = vunpack.i.h.s16 %v4320_v61  ;;  %v10149_v32 = vrot.slane %v4648_v53, %v11945_v0  ;;  %v10152_v23 = vrot.slane %v4655_v18, %v11945_v0 }
 0x89a   : > { %11961 = vst [vmem:[#allocation18_spill] sm:$0xff] %v10140_v47  ;;  %11962 = vst [vmem:[#allocation105_spill] sm:$0xff] %v10143_v26  ;;  %v4362_v20 = vunpack.i.h.s16 %v4322_v28  ;;  %v4364_v31 = vunpack.i.h.s16 %v4324_v3  ;;  %v6010_v49 = vpack.i.b16 %v4299_v56, %v4299_v56  ;;  %v4374_v24 = vpack.i.b16 %v4350_v33, %v4350_v33 }
 0x89b   : > { %11963 = vst [vmem:[#allocation127_spill] sm:$0xff] %v10146_v39  ;;  %11964 = vst [vmem:[#allocation133_spill] sm:$0xff] %v10149_v32  ;;  %v6011_v11 = vpack.i.b16 %v4313_v62, %v4313_v62  ;;  %v4376_v55 = vpack.i.b16 %v4352_v1, %v4352_v1  ;;  %v6012_v44 = vpack.i.b16 %v4321_v37, %v4321_v37 }
 0x89c   : > { %11965 = vst [vmem:[#allocation142_spill] sm:$0xff] %v10152_v23  ;;  %v4378_v59 = vpack.i.b16 %v4354_v7, %v4354_v7  ;;  %v6013_v29 = vpack.i.b16 %v4323_v5, %v4323_v5  ;;  %v4380_v27 = vpack.i.b16 %v4356_v52, %v4356_v52  ;;  %v6014_v43 = vpack.i.b16 %v4306_v36, %v4306_v36 }
 0x89d   : > { %v4382_v2 = vpack.i.b16 %v4358_v51, %v4358_v51  ;;  %v6015_v25 = vpack.i.b16 %v4320_v61, %v4320_v61  ;;  %v4384_v30 = vpack.i.b16 %v4360_v4, %v4360_v4  ;;  %v6016_v63 = vpack.i.b16 %v4322_v28, %v4322_v28 }
 0x89e   : > { %v4386_v53 = vpack.i.b16 %v4362_v20, %v4362_v20  ;;  %v6017_v13 = vpack.i.b16 %v4324_v3, %v4324_v3  ;;  %v4388_v32 = vpack.i.b16 %v4364_v31, %v4364_v31  ;;  %v4400_v18 = vrot.slane %v6010_v49, %v11945_v0 }
 0x89f   : > { %v4404_v23 = vrot.slane %v4374_v24, %v11945_v0  ;;  %v4408_v56 = vrot.slane %v6011_v11, %v11945_v0  ;;  %v4412_v62 = vrot.slane %v4376_v55, %v11945_v0  ;;  %v4416_v37 = vrot.slane %v6012_v44, %v11945_v0 }
 0x8a0   : > { %v4420_v5 = vrot.slane %v4378_v59, %v11945_v0  ;;  %v4424_v36 = vrot.slane %v6013_v29, %v11945_v0  ;;  %v4428_v61 = vrot.slane %v4380_v27, %v11945_v0  ;;  %v4432_v28 = vrot.slane %v6014_v43, %v11945_v0 }
 0x8a1   : > { %v4436_v3 = vrot.slane %v4382_v2, %v11945_v0  ;;  %v4440_v33 = vrot.slane %v6015_v25, %v11945_v0  ;;  %v4444_v24 = vrot.slane %v4384_v30, %v11945_v0  ;;  %v4448_v11 = vrot.slane %v6016_v63, %v11945_v0 }
 0x8a2   : > { %v4452_v55 = vrot.slane %v4386_v53, %v11945_v0  ;;  %v4456_v44 = vrot.slane %v6017_v13, %v11945_v0  ;;  %v4460_v1 = vrot.slane %v4388_v32, %v11945_v0  ;;  %v4494_v7 = vpack.i.b16 %v4400_v18, %v4400_v18 }
 0x8a3   : > { %v4501_v29 = vpack.i.b16 %v4404_v23, %v4404_v23  ;;  %v4508_v52 = vpack.i.b16 %v4408_v56, %v4408_v56  ;;  %v4515_v27 = vpack.i.b16 %v4412_v62, %v4412_v62  ;;  %v4522_v51 = vpack.i.b16 %v4416_v37, %v4416_v37 }
 0x8a4   : > { %v4529_v4 = vpack.i.b16 %v4420_v5, %v4420_v5  ;;  %v4536_v20 = vpack.i.b16 %v4424_v36, %v4424_v36  ;;  %v4543_v2 = vpack.i.b16 %v4428_v61, %v4428_v61  ;;  %v4550_v31 = vpack.i.b16 %v4432_v28, %v4432_v28 }
 0x8a5   : > { %v4557_v25 = vpack.i.b16 %v4436_v3, %v4436_v3  ;;  %v4564_v49 = vpack.i.b16 %v4440_v33, %v4440_v33  ;;  %v4571_v30 = vpack.i.b16 %v4444_v24, %v4444_v24  ;;  %v4578_v59 = vpack.i.b16 %v4448_v11, %v4448_v11 }
 0x8a6   : > { %v4585_v63 = vpack.i.b16 %v4452_v55, %v4452_v55  ;;  %v4592_v43 = vpack.i.b16 %v4456_v44, %v4456_v44  ;;  %v4599_v53 = vpack.i.b16 %v4460_v1, %v4460_v1  ;;  %v4499_v13 = vrot.slane %v4494_v7, %v11945_v0 }
 0x8a7   : > { %v4506_v32 = vrot.slane %v4501_v29, %v11945_v0  ;;  %v4513_v23 = vrot.slane %v4508_v52, %v11945_v0  ;;  %v4520_v18 = vrot.slane %v4515_v27, %v11945_v0  ;;  %v4527_v56 = vrot.slane %v4522_v51, %v11945_v0 }
 0x8a8   : > { %v4534_v62 = vrot.slane %v4529_v4, %v11945_v0  ;;  %v4541_v37 = vrot.slane %v4536_v20, %v11945_v0  ;;  %v4548_v5 = vrot.slane %v4543_v2, %v11945_v0  ;;  %v4555_v36 = vrot.slane %v4550_v31, %v11945_v0 }
 0x8a9   : > { %v4562_v61 = vrot.slane %v4557_v25, %v11945_v0  ;;  %v4569_v28 = vrot.slane %v4564_v49, %v11945_v0  ;;  %v10182_v3 = vrot.slane %v4571_v30, %v11945_v0  ;;  %v10185_v33 = vrot.slane %v4578_v59, %v11945_v0 }
 0x8aa   : > { %v10188_v24 = vrot.slane %v4585_v63, %v11945_v0  ;;  %v10191_v11 = vrot.slane %v4592_v43, %v11945_v0  ;;  %v10194_v55 = vrot.slane %v4599_v53, %v11945_v0 }
 0x8f8   : > { %v10196_v44 = vpop.permute.xlu1 %4661 }
 0x8f9   : > { %11966 = vst [vmem:[#allocation144_spill] sm:$0xff] %v10196_v44  ;;  %v4667_v1 = vadd.bf16 %v10196_v44, %v4499_v13  ;;  %v4669_v7 = vadd.bf16 %v10196_v44, %v4506_v32  ;;  %v4671_v29 = vadd.bf16 %v10196_v44, %v4513_v23  ;;  %v4673_v52 = vadd.bf16 %v10196_v44, %v4520_v18 }
 0x8fa   : > { %v4675_v27 = vadd.bf16 %v10196_v44, %v4527_v56  ;;  %v4677_v51 = vadd.bf16 %v10196_v44, %v4534_v62  ;;  %v4679_v4 = vadd.bf16 %v10196_v44, %v4541_v37  ;;  %v4681_v20 = vadd.bf16 %v10196_v44, %v4548_v5 }
 0x8fb   : > { %v4683_v2 = vadd.bf16 %v10196_v44, %v4555_v36  ;;  %v4685_v31 = vadd.bf16 %v10196_v44, %v4562_v61  ;;  %v4687_v25 = vadd.bf16 %v10196_v44, %v4569_v28  ;;  %v4689_v49 = vadd.bf16 %v10196_v44, %v10182_v3 }
 0x8fc   : > { %v10211_v30 = vpop.permute.xlu1 %4663  ;;  %v4691_v59 = vadd.bf16 %v10196_v44, %v10185_v33  ;;  %v4693_v63 = vadd.bf16 %v10196_v44, %v10188_v24  ;;  %v4695_v43 = vadd.bf16 %v10196_v44, %v10191_v11  ;;  %v4697_v53 = vadd.bf16 %v10196_v44, %v10194_v55 }
 0x8fd   : > { %11967 = vst [vmem:[#allocation140_spill] sm:$0xff] %v10211_v30  ;;  %v4668_v0 = vadd.bf16 %v10211_v30, %v4499_v13  ;;  %v4670_v39 = vadd.bf16 %v10211_v30, %v4506_v32  ;;  %v4672_v47 = vadd.bf16 %v10211_v30, %v4513_v23  ;;  %v4674_v26 = vadd.bf16 %v10211_v30, %v4520_v18 }
 0x8fe   : > { %v4676_v21 = vadd.bf16 %v10211_v30, %v4527_v56  ;;  %v4678_v16 = vadd.bf16 %v10211_v30, %v4534_v62  ;;  %v4680_v50 = vadd.bf16 %v10211_v30, %v4541_v37  ;;  %v4682_v6 = vadd.bf16 %v10211_v30, %v4548_v5 }
 0x8ff   : > { %v4684_v45 = vadd.bf16 %v10211_v30, %v4555_v36  ;;  %v4686_v44 = vadd.bf16 %v10211_v30, %v4562_v61  ;;  %v4688_v13 = vadd.bf16 %v10211_v30, %v4569_v28  ;;  %v4690_v32 = vadd.bf16 %v10211_v30, %v10182_v3 }
 0x900   : > { %v4692_v23 = vadd.bf16 %v10211_v30, %v10185_v33  ;;  %v4694_v18 = vadd.bf16 %v10211_v30, %v10188_v24  ;;  %v4696_v56 = vadd.bf16 %v10211_v30, %v10191_v11  ;;  %v4698_v62 = vadd.bf16 %v10211_v30, %v10194_v55  ;;  %v11969_v30 = vld [vmem:[#allocation90_spill] sm:$0xff] }
 0x901   : > { %v4815_v37 = vadd.bf16 %v9976_v48, %v4667_v1  ;;  %v4816_v5 = vadd.bf16 %v10025_v58, %v4668_v0  ;;  %v4817_v36 = vadd.bf16 %v9982_v41, %v4669_v7  ;;  %v4818_v61 = vadd.bf16 %v10022_v40, %v4670_v39  ;;  %v11970_v1 = vld [vmem:[#allocation20_spill] sm:$0xff]  ;;  %v11971_v0 = vld [vmem:[#allocation110_spill] sm:$0xff]  ;;  %v11972_v39 = vld [vmem:[#allocation119_spill] sm:$0xff] }
 0x902   : > { %v4819_v28 = vadd.bf16 %v10006_v57, %v4671_v29  ;;  %v4820_v3 = vadd.bf16 %v10051_v35, %v4672_v47  ;;  %v4821_v33 = vadd.bf16 %v10031_v17, %v4673_v52  ;;  %v4822_v24 = vadd.bf16 %v10066_v19, %v4674_v26  ;;  %v11973_v26 = vld [vmem:[#allocation103_spill] sm:$0xff]  ;;  %v11975_v7 = vld [vmem:[#allocation136_spill] sm:$0xff] }
 0x903   : > { %v4823_v11 = vadd.bf16 %v10043_v9, %v4675_v27  ;;  %v4824_v55 = vadd.bf16 %v11968_v38, %v4676_v21  ;;  %v4825_v48 = vadd.bf16 %v11969_v30, %v4677_v51  ;;  %v4826_v58 = vadd.bf16 %v11970_v1, %v4678_v16  ;;  %v11977_v29 = vld [vmem:[#allocation108_spill] sm:$0xff]  ;;  %v11979_v52 = vld [vmem:[#allocation135_spill] sm:$0xff]  ;;  %v11980_v27 = vld [vmem:[#allocation129_spill] sm:$0xff] }
 0x904   : > { %v4827_v41 = vadd.bf16 %v11971_v0, %v4679_v4  ;;  %v4828_v40 = vadd.bf16 %v10097_v12, %v4680_v50  ;;  %v4829_v57 = vadd.bf16 %v11972_v39, %v4681_v20  ;;  %v4830_v35 = vadd.bf16 %v10121_v46, %v4682_v6  ;;  %v11974_v6 = vld [vmem:[#allocation93_spill] sm:$0xff] }
 0x905   : > { %v4831_v17 = vadd.bf16 %v9979_v54, %v4683_v2  ;;  %v4832_v19 = vadd.bf16 %v10028_v42, %v4684_v45  ;;  %v4833_v9 = vadd.bf16 %v9987_v15, %v4685_v31  ;;  %v4834_v38 = vadd.bf16 %v10034_v60, %v4686_v44  ;;  %v11976_v45 = vld [vmem:[#allocation113_spill] sm:$0xff]  ;;  %v11978_v44 = vld [vmem:[#allocation82_spill] sm:$0xff] }
 0x906   : > { %v4835_v21 = vadd.bf16 %v10003_v8, %v4687_v25  ;;  %v4836_v16 = vadd.bf16 %v10057_v14, %v4688_v13  ;;  %v4837_v47 = vadd.bf16 %v10040_v34, %v4689_v49  ;;  %v4838_v12 = vadd.bf16 %v10071_v10, %v4690_v32 }
 0x907   : > { %v4839_v50 = vadd.bf16 %v10046_v22, %v4691_v59  ;;  %v4840_v46 = vadd.bf16 %v11973_v26, %v4692_v23  ;;  %v4841_v54 = vadd.bf16 %v11974_v6, %v4693_v63  ;;  %v4842_v42 = vadd.bf16 %v11975_v7, %v4694_v18 }
 0x908   : > { %v4843_v15 = vadd.bf16 %v11976_v45, %v4695_v43  ;;  %v4844_v60 = vadd.bf16 %v11977_v29, %v4696_v56  ;;  %v4845_v8 = vadd.bf16 %v11978_v44, %v4697_v53  ;;  %v4846_v14 = vadd.bf16 %v11979_v52, %v4698_v62 }
 0x909   : > { %v10275_v34 = vadd.bf16 %v11980_v27, %v4815_v37  ;;  %v10278_v10 = vadd.bf16 %v11980_v27, %v4816_v5  ;;  %v10281_v22 = vadd.bf16 %v11980_v27, %v4817_v36  ;;  %v10284_v51 = vadd.bf16 %v11980_v27, %v4818_v61 }
 0x90a   : > { %v10287_v4 = vadd.bf16 %v11980_v27, %v4819_v28  ;;  %v10290_v20 = vadd.bf16 %v11980_v27, %v4820_v3  ;;  %v10293_v2 = vadd.bf16 %v11980_v27, %v4821_v33  ;;  %v10296_v31 = vadd.bf16 %v11980_v27, %v4822_v24 }
 0x90b   : > { %v10299_v25 = vadd.bf16 %v11980_v27, %v4823_v11  ;;  %v10302_v49 = vadd.bf16 %v11980_v27, %v4824_v55  ;;  %v10305_v30 = vadd.bf16 %v11980_v27, %v4825_v48  ;;  %v10308_v59 = vadd.bf16 %v11980_v27, %v4826_v58 }
 0x90c   : > { %v10311_v63 = vadd.bf16 %v11980_v27, %v4827_v41  ;;  %v10314_v43 = vadd.bf16 %v11980_v27, %v4828_v40  ;;  %v10317_v53 = vadd.bf16 %v11980_v27, %v4829_v57  ;;  %v10320_v13 = vadd.bf16 %v11980_v27, %v4830_v35  ;;  %v11981_v41 = vld [vmem:[#allocation78_spill] sm:$0xff]  ;;  %v11982_v40 = vld [vmem:[#allocation144_spill] sm:$0xff] }
 0x90d   : > { %v10323_v32 = vadd.bf16 %v11980_v27, %v4831_v17  ;;  %v10326_v23 = vadd.bf16 %v11980_v27, %v4832_v19  ;;  %v10329_v18 = vadd.bf16 %v11980_v27, %v4833_v9  ;;  %v10332_v56 = vadd.bf16 %v11980_v27, %v4834_v38  ;;  %v11983_v19 = vld [vmem:[#allocation140_spill] sm:$0xff] }
 0x90e   : > { %v10335_v62 = vadd.bf16 %v11980_v27, %v4835_v21  ;;  %v10338_v37 = vadd.bf16 %v11980_v27, %v4836_v16  ;;  %v10341_v5 = vadd.bf16 %v11980_v27, %v4837_v47  ;;  %v10344_v36 = vadd.bf16 %v11980_v27, %v4838_v12 }
 0x90f   : > { %v10347_v61 = vadd.bf16 %v11980_v27, %v4839_v50  ;;  %v10350_v28 = vadd.bf16 %v11980_v27, %v4840_v46  ;;  %v10353_v3 = vadd.bf16 %v11980_v27, %v4841_v54  ;;  %v10356_v33 = vadd.bf16 %v11980_v27, %v4842_v42 }
 0x910   : > { %v10359_v24 = vadd.bf16 %v11980_v27, %v4843_v15  ;;  %v10362_v11 = vadd.bf16 %v11980_v27, %v4844_v60  ;;  %v10365_v55 = vadd.bf16 %v11980_v27, %v4845_v8  ;;  %v10368_v48 = vadd.bf16 %v11980_v27, %v4846_v14 }
 0x911   : > { %v4915_v1 = vmul.bf16 1056980736, %v10275_v34  ;;  %v4916_v58 = vmul.bf16 1056980736, %v10278_v10  ;;  %v4917_v0 = vmul.bf16 1056980736, %v10281_v22  ;;  %v4699_v39 = vadd.bf16 %v11982_v40, %v11981_v41 }
 0x912   : > { %v4918_v57 = vmul.bf16 1056980736, %v10284_v51  ;;  %v4919_v35 = vmul.bf16 1056980736, %v10287_v4  ;;  %v4920_v17 = vmul.bf16 1056980736, %v10290_v20  ;;  %v4700_v9 = vadd.bf16 %v11983_v19, %v11981_v41 }
 0x913   : > { %v4921_v38 = vmul.bf16 1056980736, %v10293_v2  ;;  %v4922_v21 = vmul.bf16 1056980736, %v10296_v31  ;;  %v4923_v16 = vmul.bf16 1056980736, %v10299_v25  ;;  %6438 = vtanh.bf16 %v4915_v1 }
 0x914   : > { %v4924_v47 = vmul.bf16 1056980736, %v10302_v49  ;;  %v4925_v12 = vmul.bf16 1056980736, %v10305_v30  ;;  %v4926_v50 = vmul.bf16 1056980736, %v10308_v59  ;;  %6440 = vtanh.bf16 %v4916_v58 }
 0x915   : > { %v4927_v26 = vmul.bf16 1056980736, %v10311_v63  ;;  %v4928_v46 = vmul.bf16 1056980736, %v10314_v43  ;;  %v4929_v6 = vmul.bf16 1056980736, %v10317_v53  ;;  %6442 = vtanh.bf16 %v4917_v0 }
 0x916   : > { %v4930_v54 = vmul.bf16 1056980736, %v10320_v13  ;;  %v4931_v7 = vmul.bf16 1056980736, %v10323_v32  ;;  %v4932_v42 = vmul.bf16 1056980736, %v10326_v23  ;;  %6444 = vtanh.bf16 %v4918_v57 }
 0x917   : > { %v4933_v45 = vmul.bf16 1056980736, %v10329_v18  ;;  %6446 = vtanh.bf16 %v4919_v35  ;;  %v11993_v1 = vld [vmem:[#allocation89_spill] sm:$0xff]  ;;  %v12004_v27 = vmul.bf16 1056980736, %v10359_v24 }
 0x918   : > { %6448 = vtanh.bf16 %v4920_v17  ;;  %v11984_v17 = vld [vmem:[#allocation143_spill] sm:$0xff]  ;;  %v10446_v58 = vadd.bf16 %v11993_v1, %v4700_v9 }
 0x919   : > { %6450 = vtanh.bf16 %v4921_v38  ;;  %v11985_v38 = vld [vmem:[#allocation117_spill] sm:$0xff] }
 0x91a   : > { %6452 = vtanh.bf16 %v4922_v21  ;;  %11994 = vst [vmem:[#allocation145_spill] sm:$0xff] %v10446_v58  ;;  %v12002_v58 = vmul.bf16 1056980736, %v10353_v3 }
 0x91b   : > { %6454 = vtanh.bf16 %v4923_v16 }
 0x91c   : > { %6456 = vtanh.bf16 %v4924_v47 }
 0x91d   : > { %6458 = vtanh.bf16 %v4925_v12 }
 0x91e   : > { %v6439_v47 = vpop.eup %6438  ;;  %6460 = vtanh.bf16 %v4926_v50 }
 0x91f   : > { %v6441_v0 = vpop.eup %6440  ;;  %6462 = vtanh.bf16 %v4927_v26  ;;  %v5011_v35 = vmul.bf16 1056980736, %v6439_v47  ;;  %v11991_v47 = vld [vmem:[#allocation121_spill] sm:$0xff] }
 0x920   : > { %v6443_v8 = vpop.eup %6442  ;;  %6464 = vtanh.bf16 %v4928_v46  ;;  %v5012_v50 = vmul.bf16 1056980736, %v6441_v0  ;;  %v10438_v16 = vadd.bf16 %v11991_v47, %v4699_v39 }
 0x921   : > { %v6445_v29 = vpop.eup %6444  ;;  %6466 = vtanh.bf16 %v4929_v6  ;;  %v5013_v12 = vmul.bf16 1056980736, %v6443_v8  ;;  %v5059_v26 = vadd.bf16 1056980736, %v5011_v35 }
 0x922   : > { %11992 = vst [vmem:[#allocation101_spill] sm:$0xff] %v10438_v16  ;;  %v6447_v52 = vpop.eup %6446  ;;  %6468 = vtanh.bf16 %v4930_v54  ;;  %v5014_v46 = vmul.bf16 1056980736, %v6445_v29  ;;  %v10440_v0 = vadd.bf16 1056980736, %v5012_v50 }
 0x923   : > { %v6449_v6 = vpop.eup %6448  ;;  %6470 = vtanh.bf16 %v4931_v7  ;;  %v5015_v8 = vmul.bf16 1056980736, %v6447_v52  ;;  %v5061_v35 = vadd.bf16 1056980736, %v5013_v12  ;;  %v10449_v15 = vmul.bf16 %v5059_v26, %v10275_v34 }
 0x924   : > { %v6451_v39 = vpop.eup %6450  ;;  %6472 = vtanh.bf16 %v4932_v42  ;;  %v5016_v47 = vmul.bf16 1056980736, %v6449_v6  ;;  %v10451_v54 = vadd.bf16 1056980736, %v5014_v46  ;;  %v11995_v34 = vmul.bf16 1056980736, %v10332_v56 }
 0x925   : > { %v6453_v50 = vpop.eup %6452  ;;  %6474 = vtanh.bf16 %v4933_v45  ;;  %v5017_v41 = vmul.bf16 1056980736, %v6451_v39  ;;  %v5063_v9 = vadd.bf16 1056980736, %v5015_v8  ;;  %v10458_v7 = vmul.bf16 %v5061_v35, %v10281_v22 }
 0x926   : > { %v6455_v52 = vpop.eup %6454  ;;  %6476 = vtanh.bf16 %v11995_v34  ;;  %v5018_v42 = vmul.bf16 1056980736, %v6453_v50  ;;  %v10462_v1 = vadd.bf16 1056980736, %v5016_v47  ;;  %v11996_v46 = vmul.bf16 1056980736, %v10335_v62 }
 0x927   : > { %v6457_v26 = vpop.eup %6456  ;;  %v5019_v45 = vmul.bf16 1056980736, %v6455_v52  ;;  %v5065_v6 = vadd.bf16 1056980736, %v5017_v41  ;;  %v10469_v8 = vmul.bf16 %v5063_v9, %v10287_v4  ;;  %v11997_v35 = vmul.bf16 1056980736, %v10338_v37 }
 0x928   : > { %6478 = vtanh.bf16 %v11996_v46  ;;  %v6459_v22 = vpop.eup %6458  ;;  %v5020_v39 = vmul.bf16 1056980736, %v6457_v26  ;;  %v10473_v50 = vadd.bf16 1056980736, %v5018_v42  ;;  %v11998_v12 = vmul.bf16 1056980736, %v10341_v5 }
 0x929   : > { %6480 = vtanh.bf16 %v11997_v35  ;;  %v6461_v34 = vpop.eup %6460  ;;  %v5021_v46 = vmul.bf16 1056980736, %v6459_v22  ;;  %v5067_v52 = vadd.bf16 1056980736, %v5019_v45  ;;  %v10480_v41 = vmul.bf16 %v5065_v6, %v10293_v2 }
 0x92a   : > { %6482 = vtanh.bf16 %v11998_v12  ;;  %v6463_v4 = vpop.eup %6462  ;;  %v11999_v9 = vmul.bf16 1056980736, %v10344_v36  ;;  %v5022_v35 = vmul.bf16 1056980736, %v6461_v34  ;;  %v10484_v26 = vadd.bf16 1056980736, %v5020_v39 }
 0x92b   : > { %v6465_v47 = vpop.eup %6464  ;;  %v12000_v29 = vmul.bf16 1056980736, %v10347_v61  ;;  %v5023_v12 = vmul.bf16 1056980736, %v6463_v4  ;;  %v5069_v22 = vadd.bf16 1056980736, %v5021_v46  ;;  %v10491_v45 = vmul.bf16 %v5067_v52, %v10299_v25 }
 0x92c   : > { %6484 = vtanh.bf16 %v11999_v9  ;;  %v6467_v2 = vpop.eup %6466  ;;  %v12001_v6 = vmul.bf16 1056980736, %v10350_v28  ;;  %v5024_v9 = vmul.bf16 1056980736, %v6465_v47  ;;  %v10495_v34 = vadd.bf16 1056980736, %v5022_v35 }
 0x92d   : > { %6486 = vtanh.bf16 %v12000_v29  ;;  %v6469_v42 = vpop.eup %6468  ;;  %v5025_v29 = vmul.bf16 1056980736, %v6467_v2  ;;  %v5071_v4 = vadd.bf16 1056980736, %v5023_v12  ;;  %v10502_v46 = vmul.bf16 %v5069_v22, %v10305_v30 }
 0x92e   : > { %6488 = vtanh.bf16 %v12001_v6  ;;  %v6471_v25 = vpop.eup %6470  ;;  %v12003_v52 = vmul.bf16 1056980736, %v10356_v33  ;;  %v5026_v6 = vmul.bf16 1056980736, %v6469_v42  ;;  %v10506_v47 = vadd.bf16 1056980736, %v5024_v9 }
 0x92f   : > { %6490 = vtanh.bf16 %v12002_v58  ;;  %v6473_v39 = vpop.eup %6472  ;;  %v5027_v58 = vmul.bf16 1056980736, %v6471_v25  ;;  %v5073_v2 = vadd.bf16 1056980736, %v5025_v29  ;;  %v10513_v12 = vmul.bf16 %v5071_v4, %v10311_v63 }
 0x930   : > { %6492 = vtanh.bf16 %v12003_v52  ;;  %v6475_v30 = vpop.eup %6474  ;;  %v12005_v22 = vmul.bf16 1056980736, %v10362_v11  ;;  %v5028_v52 = vmul.bf16 1056980736, %v6473_v39  ;;  %v10517_v42 = vadd.bf16 1056980736, %v5026_v6 }
 0x931   : > { %6494 = vtanh.bf16 %v12004_v27  ;;  %v6477_v35 = vpop.eup %6476  ;;  %v12006_v16 = vmul.bf16 1056980736, %v10365_v55  ;;  %v5029_v27 = vmul.bf16 1056980736, %v6475_v30  ;;  %v5075_v25 = vadd.bf16 1056980736, %v5027_v58 }
 0x932   : > { %6496 = vtanh.bf16 %v12005_v22  ;;  %v10524_v29 = vmul.bf16 %v5073_v2, %v10317_v53  ;;  %v12007_v4 = vmul.bf16 1056980736, %v10368_v48  ;;  %v5030_v22 = vmul.bf16 1056980736, %v6477_v35 }
 0x933   : > { %6498 = vtanh.bf16 %v12006_v16  ;;  %v6479_v63 = vpop.eup %6478  ;;  %v10528_v39 = vadd.bf16 1056980736, %v5028_v52  ;;  %v5077_v14 = vadd.bf16 1056980736, %v5029_v27  ;;  %v10533_v16 = vmul.bf16 %v5075_v25, %v10323_v32 }
 0x934   : > { %6500 = vtanh.bf16 %v12007_v4  ;;  %v6481_v9 = vpop.eup %6480  ;;  %v5031_v60 = vmul.bf16 1056980736, %v6479_v63  ;;  %v10536_v30 = vadd.bf16 1056980736, %v5030_v22  ;;  %v12008_v32 = vmul.bf16 %v10440_v0, %v10278_v10 }
 0x935   : > { %v6483_v53 = vpop.eup %6482  ;;  %v5032_v2 = vmul.bf16 1056980736, %v6481_v9  ;;  %v10542_v63 = vmul.bf16 %v5077_v14, %v10329_v18 }
 0x936   : > { %v5033_v57 = vmul.bf16 1056980736, %v6483_v53  ;;  %v5079_v6 = vadd.bf16 1056980736, %v5031_v60  ;;  %v10547_v27 = vunpack.c.l.bf16 %v12008_v32 }
 0x937   : > { %v6485_v4 = vpop.eup %6484  ;;  %v10549_v22 = vadd.bf16 1056980736, %v5032_v2 }
 0x938   : > { %v6487_v25 = vpop.eup %6486  ;;  %v5034_v9 = vmul.bf16 1056980736, %v6485_v4  ;;  %v5081_v60 = vadd.bf16 1056980736, %v5033_v57  ;;  %v10555_v18 = vmul.bf16 %v5079_v6, %v10335_v62  ;;  %v12009_v4 = vmul.bf16 %v10451_v54, %v10284_v51 }
 0x939   : > { %v6489_v35 = vpop.eup %6488  ;;  %v5035_v53 = vmul.bf16 1056980736, %v6487_v25  ;;  %v5128_v2 = vmul.bf16 %v10549_v22, %v10338_v37  ;;  %v5161_v62 = vunpack.c.l.bf16 %v10469_v8 }
 0x93a   : > { %v6491_v10 = vpop.eup %6490  ;;  %v5036_v0 = vmul.bf16 1056980736, %v6489_v35  ;;  %v5082_v32 = vadd.bf16 1056980736, %v5034_v9  ;;  %v10563_v58 = vunpack.c.l.bf16 %v12009_v4  ;;  %v10566_v57 = vmul.bf16 %v5081_v60, %v10341_v5 }
 0x93b   : > { %v6493_v52 = vpop.eup %6492  ;;  %v5037_v44 = vmul.bf16 1056980736, %v6491_v10  ;;  %v5083_v25 = vadd.bf16 1056980736, %v5035_v53  ;;  %v12010_v53 = vmul.bf16 %v10462_v1, %v10290_v20  ;;  %v12011_v1 = vmul.bf16 %v10473_v50, %v10296_v31 }
 0x93c   : > { %v6495_v6 = vpop.eup %6494  ;;  %v5038_v14 = vmul.bf16 1056980736, %v6493_v52  ;;  %v5084_v35 = vadd.bf16 1056980736, %v5036_v0  ;;  %v5130_v9 = vmul.bf16 %v5082_v32, %v10344_v36  ;;  %v5164_v36 = vunpack.c.l.bf16 %v10480_v41 }
 0x93d   : > { %v6497_v22 = vpop.eup %6496  ;;  %v5039_v21 = vmul.bf16 1056980736, %v6495_v6  ;;  %v5085_v51 = vadd.bf16 1056980736, %v5037_v44  ;;  %v10572_v54 = vmul.bf16 %v5083_v25, %v10347_v61  ;;  %v10577_v5 = vunpack.c.l.bf16 %v12010_v53 }
 0x93e   : > { %v6499_v60 = vpop.eup %6498  ;;  %v5040_v10 = vmul.bf16 1056980736, %v6497_v22  ;;  %v5086_v4 = vadd.bf16 1056980736, %v5038_v14  ;;  %v5132_v52 = vmul.bf16 %v5084_v35, %v10350_v28  ;;  %v5165_v61 = vunpack.c.h.bf16 %v10480_v41 }
 0x93f   : > { %v6501_v0 = vpop.eup %6500  ;;  %v5041_v32 = vmul.bf16 1056980736, %v6499_v60  ;;  %v5087_v37 = vadd.bf16 1056980736, %v5039_v21  ;;  %v10582_v44 = vmul.bf16 %v5085_v51, %v10353_v3  ;;  %v5166_v14 = vunpack.c.l.bf16 %v12011_v1 }
 0x940   : > { %v5042_v25 = vmul.bf16 1056980736, %v6501_v0  ;;  %v5088_v6 = vadd.bf16 1056980736, %v5040_v10  ;;  %v5134_v20 = vmul.bf16 %v5086_v4, %v10356_v33  ;;  %v5167_v35 = vunpack.c.l.bf16 %v10491_v45 }
 0x941   : > { %v5089_v22 = vadd.bf16 1056980736, %v5041_v32  ;;  %v10590_v28 = vmul.bf16 %v5087_v37, %v10359_v24  ;;  %v5168_v21 = vunpack.c.h.bf16 %v10491_v45  ;;  %v12012_v53 = vmul.bf16 %v10484_v26, %v10302_v49 }
 0x942   : > { %v5090_v3 = vadd.bf16 1056980736, %v5042_v25  ;;  %v5136_v51 = vmul.bf16 %v5088_v6, %v10362_v11  ;;  %v5170_v33 = vunpack.c.l.bf16 %v10502_v46  ;;  %v5171_v50 = vunpack.c.h.bf16 %v10502_v46 }
 0x943   : > { %v5169_v60 = vunpack.c.l.bf16 %v12012_v53  ;;  %v10600_v31 = vmul.bf16 %v5089_v22, %v10365_v55  ;;  %v12013_v24 = vmul.bf16 %v10495_v34, %v10308_v59  ;;  %v5173_v45 = vunpack.c.l.bf16 %v10513_v12 }
 0x944   : > { %v5138_v11 = vmul.bf16 %v5090_v3, %v10368_v48  ;;  %v5174_v10 = vunpack.c.h.bf16 %v10513_v12  ;;  %v12014_v49 = vmul.bf16 %v10506_v47, %v10314_v43  ;;  %v5176_v55 = vunpack.c.l.bf16 %v10524_v29 }
 0x945   : > { %v10606_v37 = vunpack.c.l.bf16 %v12013_v24  ;;  %v5177_v46 = vunpack.c.h.bf16 %v10524_v29  ;;  %v12015_v59 = vmul.bf16 %v10517_v42, %v10320_v13  ;;  %v5179_v4 = vunpack.c.l.bf16 %v10533_v16 }
 0x946   : > { %v10614_v26 = vunpack.c.l.bf16 %v12014_v49  ;;  %v5180_v48 = vunpack.c.h.bf16 %v10533_v16  ;;  %v12016_v0 = vmul.bf16 %v10528_v39, %v10326_v23  ;;  %v5182_v43 = vunpack.c.l.bf16 %v10542_v63 }
 0x947   : > { %v10621_v34 = vunpack.c.l.bf16 %v12015_v59  ;;  %v5183_v47 = vunpack.c.h.bf16 %v10542_v63  ;;  %v12017_v25 = vmul.bf16 %v10536_v30, %v10332_v56  ;;  %v5185_v13 = vunpack.c.l.bf16 %v10555_v18 }
 0x948   : > { %v10628_v32 = vunpack.c.l.bf16 %v12016_v0  ;;  %v5186_v42 = vunpack.c.h.bf16 %v10555_v18  ;;  %v10639_v1 = vunpack.c.l.bf16 %v5128_v2  ;;  %v5188_v22 = vunpack.c.l.bf16 %v10566_v57 }
 0x949   : > { %v10635_v6 = vunpack.c.l.bf16 %v12017_v25  ;;  %v10643_v39 = vunpack.c.l.bf16 %v5130_v9  ;;  %v10647_v24 = vunpack.c.l.bf16 %v5132_v52  ;;  %v10651_v49 = vunpack.c.l.bf16 %v5134_v20 }
 0x94a   : > { %v10655_v0 = vunpack.c.l.bf16 %v5136_v51  ;;  %v10659_v3 = vunpack.c.l.bf16 %v5138_v11  ;;  %v12018_v52 = vunpack.c.l.bf16 %v10449_v15  ;;  %v12019_v30 = vunpack.c.h.bf16 %v10449_v15 }
 0x94b   : > { %v5230_v59 = vsel %vm2218_vm4, %v10547_v27, 0.0  ;;  %v12020_v51 = vunpack.c.l.bf16 %v10458_v7  ;;  %v12021_v25 = vunpack.c.h.bf16 %v10458_v7  ;;  %v5249_v15 = vsel %vm2218_vm4, %v5161_v62, 0.0 }
 0x94c   : > { %v5227_v56 = vsel %vm2218_vm4, %v12018_v52, 0.0  ;;  %v5228_v20 = vsel %vm2218_vm4, %v12019_v30, 0.0  ;;  %v5241_v52 = vsel %vm2218_vm4, %v10563_v58, 0.0  ;;  %v5260_v7 = vsel %vm2218_vm4, %v5164_v36, 0.0 }
 0x94d   : > { %v5229_v53 = vadd.f32 %v5228_v20, %v5227_v56  ;;  %v5238_v9 = vsel %vm2218_vm4, %v12020_v51, 0.0  ;;  %v5239_v11 = vsel %vm2218_vm4, %v12021_v25, 0.0  ;;  %v12022_v56 = vunpack.c.h.bf16 %v10469_v8 }
 0x94e   : > { %v5240_v2 = vadd.f32 %v5239_v11, %v5238_v9  ;;  %v5252_v51 = vsel %vm2218_vm4, %v10577_v5, 0.0  ;;  %v5261_v58 = vsel %vm2218_vm4, %v5165_v61, 0.0  ;;  %v5263_v25 = vsel %vm2218_vm4, %v5166_v14, 0.0 }
 0x94f   : > { %v5250_v27 = vsel %vm2218_vm4, %v12022_v56, 0.0  ;;  %v5231_v30 = vadd.f32 %v5230_v59, %v5229_v53  ;;  %v5271_v62 = vsel %vm2218_vm4, %v5167_v35, 0.0  ;;  %v5262_v23 = vadd.f32 %v5261_v58, %v5260_v7 }
 0x950   : > { %v5251_v20 = vadd.f32 %v5250_v27, %v5249_v15  ;;  %v5242_v9 = vadd.f32 %v5241_v52, %v5240_v2  ;;  %v5272_v53 = vsel %vm2218_vm4, %v5168_v21, 0.0  ;;  %v5274_v5 = vsel %vm2218_vm4, %v5169_v60, 0.0 }
 0x951   : > { %v5232_v11 = vrot.slane %v5231_v30, 4  ;;  %v5273_v15 = vadd.f32 %v5272_v53, %v5271_v62  ;;  %v5282_v41 = vsel %vm2218_vm4, %v5170_v33, 0.0  ;;  %v5264_v2 = vadd.f32 %v5263_v25, %v5262_v23 }
 0x952   : > { %v5253_v8 = vadd.f32 %v5252_v51, %v5251_v20  ;;  %v5243_v59 = vrot.slane %v5242_v9, 4  ;;  %v5283_v61 = vsel %vm2218_vm4, %v5171_v50, 0.0  ;;  %v5285_v35 = vsel %vm2218_vm4, %v10606_v37, 0.0 }
 0x953   : > { %v5233_v56 = vadd.f32 %v5232_v11, %v5231_v30  ;;  %v5275_v14 = vadd.f32 %v5274_v5, %v5273_v15  ;;  %v5284_v27 = vadd.f32 %v5283_v61, %v5282_v41  ;;  %v5265_v21 = vrot.slane %v5264_v2, 4 }
 0x954   : > { %v5254_v36 = vrot.slane %v5253_v8, 4  ;;  %v5244_v52 = vadd.f32 %v5243_v59, %v5242_v9  ;;  %v5293_v60 = vsel %vm2218_vm4, %v5173_v45, 0.0  ;;  %v5294_v50 = vsel %vm2218_vm4, %v5174_v10, 0.0 }
 0x955   : > { %v5234_v20 = vrot.slane %v5233_v56, 2  ;;  %v5276_v33 = vrot.slane %v5275_v14, 4  ;;  %v5286_v30 = vadd.f32 %v5285_v35, %v5284_v27  ;;  %v5266_v58 = vadd.f32 %v5265_v21, %v5264_v2 }
 0x956   : > { %v5255_v51 = vadd.f32 %v5254_v36, %v5253_v8  ;;  %v5245_v7 = vrot.slane %v5244_v52, 2  ;;  %v5295_v25 = vadd.f32 %v5294_v50, %v5293_v60  ;;  %v5296_v8 = vsel %vm2218_vm4, %v10614_v26, 0.0 }
 0x957   : > { %v5235_v23 = vadd.f32 %v5234_v20, %v5233_v56  ;;  %v5277_v37 = vadd.f32 %v5276_v33, %v5275_v14  ;;  %v5287_v11 = vrot.slane %v5286_v30, 4  ;;  %v5267_v45 = vrot.slane %v5266_v58, 2 }
 0x958   : > { %v5256_v9 = vrot.slane %v5255_v51, 2  ;;  %v5246_v62 = vadd.f32 %v5245_v7, %v5244_v52  ;;  %v5297_v15 = vadd.f32 %v5296_v8, %v5295_v25  ;;  %v5304_v12 = vsel %vm2218_vm4, %v5176_v55, 0.0 }
 0x959   : > { %v5236_v53 = vrot.slane %v5235_v23, 1  ;;  %v5278_v41 = vrot.slane %v5277_v37, 2  ;;  %v5288_v36 = vadd.f32 %v5287_v11, %v5286_v30  ;;  %v5268_v2 = vadd.f32 %v5267_v45, %v5266_v58 }
 0x95a   : > { %v5257_v59 = vadd.f32 %v5256_v9, %v5255_v51  ;;  %v5247_v5 = vrot.slane %v5246_v62, 1  ;;  %v5298_v61 = vrot.slane %v5297_v15, 4  ;;  %v5305_v27 = vsel %vm2218_vm4, %v5177_v46, 0.0 }
 0x95b   : > { %v10708_v10 = vadd.f32 %v5236_v53, %v5235_v23  ;;  %v5279_v14 = vadd.f32 %v5278_v41, %v5277_v37  ;;  %v5289_v26 = vrot.slane %v5288_v36, 2  ;;  %v5269_v20 = vrot.slane %v5268_v2, 1 }
 0x95c   : > { %v5258_v56 = vrot.slane %v5257_v59, 1  ;;  %v10710_v52 = vadd.f32 %v5247_v5, %v5246_v62  ;;  %v5299_v51 = vadd.f32 %v5298_v61, %v5297_v15  ;;  %v5306_v21 = vadd.f32 %v5305_v27, %v5304_v12 }
 0x95d   : > { %v5280_v60 = vrot.slane %v5279_v14, 1  ;;  %v5290_v55 = vadd.f32 %v5289_v26, %v5288_v36  ;;  %v5307_v7 = vsel %vm2218_vm4, %v10621_v34, 0.0  ;;  %v5315_v33 = vsel %vm2218_vm4, %v5179_v4, 0.0 }
 0x95e   : > { %v10715_v35 = vadd.f32 %v5258_v56, %v5257_v59  ;;  %v10722_v30 = vadd.f32 %v5269_v20, %v5268_v2  ;;  %v5300_v50 = vrot.slane %v5299_v51, 2  ;;  %v5308_v29 = vadd.f32 %v5307_v7, %v5306_v21 }
 0x95f   : > { %v5316_v46 = vsel %vm2218_vm4, %v5180_v48, 0.0  ;;  %v10727_v23 = vadd.f32 %v5280_v60, %v5279_v14  ;;  %v5291_v9 = vrot.slane %v5290_v55, 1  ;;  %v5318_v25 = vsel %vm2218_vm4, %v10628_v32, 0.0 }
 0x960   : > { %v5317_v58 = vadd.f32 %v5316_v46, %v5315_v33  ;;  %v5301_v34 = vadd.f32 %v5300_v50, %v5299_v51  ;;  %v5309_v62 = vrot.slane %v5308_v29, 4  ;;  %v5326_v4 = vsel %vm2218_vm4, %v5182_v43, 0.0 }
 0x961   : > { %v5327_v37 = vsel %vm2218_vm4, %v5183_v47, 0.0  ;;  %v10737_v16 = vadd.f32 %v5291_v9, %v5290_v55  ;;  %v5329_v8 = vsel %vm2218_vm4, %v10635_v6, 0.0  ;;  %v5337_v32 = vsel %vm2218_vm4, %v5185_v13, 0.0 }
 0x962   : > { %v5319_v48 = vadd.f32 %v5318_v25, %v5317_v58  ;;  %v5328_v11 = vadd.f32 %v5327_v37, %v5326_v4  ;;  %v5302_v53 = vrot.slane %v5301_v34, 1  ;;  %v5310_v59 = vadd.f32 %v5309_v62, %v5308_v29 }
 0x963   : > { %v5338_v43 = vsel %vm2218_vm4, %v5186_v42, 0.0  ;;  %v5340_v15 = vsel %vm2218_vm4, %v10639_v1, 0.0  ;;  %v5348_v6 = vsel %vm2218_vm4, %v5188_v22, 0.0  ;;  %v12023_v36 = vunpack.c.h.bf16 %v10566_v57 }
 0x964   : > { %v5320_v63 = vrot.slane %v5319_v48, 4  ;;  %v5330_v45 = vadd.f32 %v5329_v8, %v5328_v11  ;;  %v5339_v47 = vadd.f32 %v5338_v43, %v5337_v32  ;;  %v10749_v5 = vadd.f32 %v5302_v53, %v5301_v34 }
 0x965   : > { %v5311_v41 = vrot.slane %v5310_v59, 2  ;;  %v5349_v13 = vsel %vm2218_vm4, %v12023_v36, 0.0  ;;  %v5351_v61 = vsel %vm2218_vm4, %v10643_v39, 0.0  ;;  %v12024_v1 = vunpack.c.l.bf16 %v10572_v54 }
 0x966   : > { %v5321_v18 = vadd.f32 %v5320_v63, %v5319_v48  ;;  %v5331_v12 = vrot.slane %v5330_v45, 4  ;;  %v5341_v42 = vadd.f32 %v5340_v15, %v5339_v47  ;;  %v5350_v56 = vadd.f32 %v5349_v13, %v5348_v6 }
 0x967   : > { %v5312_v2 = vadd.f32 %v5311_v41, %v5310_v59  ;;  %v5359_v14 = vsel %vm2218_vm4, %v12024_v1, 0.0  ;;  %v12025_v26 = vunpack.c.h.bf16 %v10572_v54  ;;  %v5362_v55 = vsel %vm2218_vm4, %v10647_v24, 0.0 }
 0x968   : > { %v5322_v27 = vrot.slane %v5321_v18, 2  ;;  %v5332_v57 = vadd.f32 %v5331_v12, %v5330_v45  ;;  %v5342_v20 = vrot.slane %v5341_v42, 4  ;;  %v5352_v51 = vadd.f32 %v5351_v61, %v5350_v56 }
 0x969   : > { %v5360_v22 = vsel %vm2218_vm4, %v12025_v26, 0.0  ;;  %v5313_v21 = vrot.slane %v5312_v2, 1  ;;  %v12026_v7 = vunpack.c.l.bf16 %v10582_v44  ;;  %v12027_v58 = vunpack.c.h.bf16 %v10582_v44 }
 0x96a   : > { %v5361_v60 = vadd.f32 %v5360_v22, %v5359_v14  ;;  %v5323_v33 = vadd.f32 %v5322_v27, %v5321_v18  ;;  %v5333_v50 = vrot.slane %v5332_v57, 2  ;;  %v5343_v29 = vadd.f32 %v5342_v20, %v5341_v42 }
 0x96b   : > { %v5370_v39 = vsel %vm2218_vm4, %v12026_v7, 0.0  ;;  %v5353_v46 = vrot.slane %v5352_v51, 4  ;;  %v10770_v54 = vadd.f32 %v5313_v21, %v5312_v2  ;;  %v5371_v25 = vsel %vm2218_vm4, %v12027_v58, 0.0 }
 0x96c   : > { %v5363_v9 = vadd.f32 %v5362_v55, %v5361_v60  ;;  %v5373_v34 = vsel %vm2218_vm4, %v10651_v49, 0.0  ;;  %v5324_v62 = vrot.slane %v5323_v33, 1  ;;  %v5334_v24 = vadd.f32 %v5333_v50, %v5332_v57 }
 0x96d   : > { %v5344_v4 = vrot.slane %v5343_v29, 2  ;;  %v5354_v37 = vadd.f32 %v5353_v46, %v5352_v51  ;;  %v5372_v11 = vadd.f32 %v5371_v25, %v5370_v39  ;;  %v12028_v8 = vunpack.c.l.bf16 %v10590_v28 }
 0x96e   : > { %v5364_v48 = vrot.slane %v5363_v9, 4  ;;  %v12029_v59 = vunpack.c.h.bf16 %v10590_v28  ;;  %v5325_v44 = vadd.f32 %v5324_v62, %v5323_v33  ;;  %v5335_v43 = vrot.slane %v5334_v24, 1 }
 0x96f   : > { %v5381_v53 = vsel %vm2218_vm4, %v12028_v8, 0.0  ;;  %v5345_v63 = vadd.f32 %v5344_v4, %v5343_v29  ;;  %v5355_v45 = vrot.slane %v5354_v37, 2  ;;  %v5374_v49 = vadd.f32 %v5373_v34, %v5372_v11 }
 0x970   : > { %v5382_v32 = vsel %vm2218_vm4, %v12029_v59, 0.0  ;;  %v5365_v47 = vadd.f32 %v5364_v48, %v5363_v9  ;;  %v5384_v41 = vsel %vm2218_vm4, %v10655_v0, 0.0  ;;  %v5336_v6 = vadd.f32 %v5335_v43, %v5334_v24 }
 0x971   : > { %v5383_v15 = vadd.f32 %v5382_v32, %v5381_v53  ;;  %v5346_v36 = vrot.slane %v5345_v63, 1  ;;  %v5356_v13 = vadd.f32 %v5355_v45, %v5354_v37  ;;  %v12030_v18 = vunpack.c.l.bf16 %v10600_v31 }
 0x972   : > { %v5366_v28 = vrot.slane %v5365_v47, 2  ;;  %v5375_v42 = vrot.slane %v5374_v49, 4  ;;  %v12031_v2 = vunpack.c.h.bf16 %v10600_v31  ;;  %v5395_v0 = vsel %vm2218_vm4, %v10659_v3, 0.0 }
 0x973   : > { %v5392_v12 = vsel %vm2218_vm4, %v12030_v18, 0.0  ;;  %v5385_v56 = vadd.f32 %v5384_v41, %v5383_v15  ;;  %v5347_v1 = vadd.f32 %v5346_v36, %v5345_v63  ;;  %v5357_v14 = vrot.slane %v5356_v13, 1 }
 0x974   : > { %v5393_v61 = vsel %vm2218_vm4, %v12031_v2, 0.0  ;;  %v5367_v22 = vadd.f32 %v5366_v28, %v5365_v47  ;;  %v5376_v27 = vadd.f32 %v5375_v42, %v5374_v49  ;;  %v5491_v20 = vpack.c.bf16 %v10708_v10, %v10708_v10 }
 0x975   : > { %v5394_v26 = vadd.f32 %v5393_v61, %v5392_v12  ;;  %v5386_v57 = vrot.slane %v5385_v56, 4  ;;  %v5358_v51 = vadd.f32 %v5357_v14, %v5356_v13  ;;  %v5492_v60 = vpack.c.bf16 %v10710_v52, %v10710_v52 }
 0x976   : > { %v5493_v31 = vpack.c.bf16 %v10715_v35, %v10715_v35  ;;  %v5368_v55 = vrot.slane %v5367_v22, 1  ;;  %v5377_v7 = vrot.slane %v5376_v27, 2  ;;  %v5494_v3 = vpack.c.bf16 %v10722_v30, %v10722_v30 }
 0x977   : > { %v5396_v21 = vadd.f32 %v5395_v0, %v5394_v26  ;;  %v5387_v39 = vadd.f32 %v5386_v57, %v5385_v56  ;;  %v5495_v50 = vpack.c.bf16 %v10727_v23, %v10727_v23  ;;  %v5496_v10 = vpack.c.bf16 %v10737_v16, %v10737_v16  ;;  %v12035_v57 = vld [vmem:[#allocation98_spill] sm:$0xff] }
 0x978   : > { %v5497_v29 = vpack.c.bf16 %v10749_v5, %v10749_v5  ;;  %v5369_v52 = vadd.f32 %v5368_v55, %v5367_v22  ;;  %v5378_v46 = vadd.f32 %v5377_v7, %v5376_v27  ;;  %v5498_v35 = vpack.c.bf16 %v10770_v54, %v10770_v54  ;;  %v12037_v55 = vld [vmem:[#allocation81_spill] sm:$0xff] }
 0x979   : > { %v5397_v33 = vrot.slane %v5396_v21, 4  ;;  %v5388_v9 = vrot.slane %v5387_v39, 2  ;;  %v5499_v25 = vpack.c.bf16 %v5325_v44, %v5325_v44  ;;  %v5500_v34 = vpack.c.bf16 %v5336_v6, %v5336_v6 }
 0x97a   : > { %v5501_v30 = vpack.c.bf16 %v5347_v1, %v5347_v1  ;;  %v5379_v62 = vrot.slane %v5378_v46, 1  ;;  %v5502_v4 = vpack.c.bf16 %v5358_v51, %v5358_v51  ;;  %v5503_v23 = vpack.c.bf16 %v5369_v52, %v5369_v52  ;;  %v12033_v1 = vld [vmem:[#allocation114_spill] sm:$0xff] }
 0x97b   : > { %v5398_v58 = vadd.f32 %v5397_v33, %v5396_v21  ;;  %v5389_v24 = vadd.f32 %v5388_v9, %v5387_v39  ;;  %v5539_v48 = vunpack.c.l.b16 %v5491_v20  ;;  %v5540_v16 = vunpack.c.l.b16 %v5492_v60  ;;  %v12042_v52 = vld [vmem:[#allocation74_spill] sm:$0xff] }
 0x97c   : > { %v5541_v11 = vunpack.c.l.b16 %v5493_v31  ;;  %v5380_v8 = vadd.f32 %v5379_v62, %v5378_v46  ;;  %v5542_v53 = vunpack.c.l.b16 %v5494_v3  ;;  %v5543_v59 = vunpack.c.l.b16 %v5495_v50 }
 0x97d   : > { %v5399_v37 = vrot.slane %v5398_v58, 2  ;;  %v5390_v5 = vrot.slane %v5389_v24, 1  ;;  %v5544_v43 = vunpack.c.l.b16 %v5496_v10  ;;  %v5545_v63 = vunpack.c.l.b16 %v5497_v29  ;;  %v12040_v10 = vld [vmem:[#allocation105_spill] sm:$0xff] }
 0x97e   : > { %v5546_v54 = vunpack.c.l.b16 %v5498_v35  ;;  %v5504_v44 = vpack.c.bf16 %v5380_v8, %v5380_v8  ;;  %v5547_v47 = vunpack.c.l.b16 %v5499_v25  ;;  %v5548_v49 = vunpack.c.l.b16 %v5500_v34  ;;  %v12044_v34 = vld [vmem:[#allocation107_spill] sm:$0xff] }
 0x97f   : > { %v5400_v32 = vadd.f32 %v5399_v37, %v5398_v58  ;;  %v5391_v45 = vadd.f32 %v5390_v5, %v5389_v24  ;;  %v5549_v41 = vunpack.c.l.b16 %v5501_v30  ;;  %v5550_v6 = vunpack.c.l.b16 %v5502_v4  ;;  %v12047_v4 = vld [vmem:[#allocation97_spill] sm:$0xff]  ;;  %v12052_v5 = vld [vmem:[#allocation116_spill] sm:$0xff] }
 0x980   : > { %v5551_v36 = vunpack.c.l.b16 %v5503_v23  ;;  %v5552_v18 = vunpack.c.l.b16 %v5504_v44  ;;  %v5563_v12 = vsel %vm2555_vm6, %v5540_v16, %v5539_v48  ;;  %v5570_v28 = vsel %vm2555_vm6, %v5548_v49, %v5547_v47  ;;  %v12049_v48 = vld [vmem:[#allocation134_spill] sm:$0xff]  ;;  %v12057_v44 = vld [vmem:[#allocation109_spill] sm:$0xff] }
 0x981   : > { %v5401_v15 = vrot.slane %v5400_v32, 1  ;;  %v5505_v13 = vpack.c.bf16 %v5391_v45, %v5391_v45  ;;  %v5564_v56 = vsel %vm2557_vm10, %v5541_v11, %v5563_v12  ;;  %v5571_v2 = vsel %vm2557_vm10, %v5549_v41, %v5570_v28  ;;  %v12050_v11 = vld [vmem:[#allocation127_spill] sm:$0xff] }
 0x982   : > { %v12032_v61 = vadd.bf16 %v11982_v40, %v11984_v17  ;;  %v5565_v0 = vsel %vm2559_vm11, %v5542_v53, %v5564_v56  ;;  %v5572_v22 = vsel %vm2559_vm11, %v5550_v6, %v5571_v2  ;;  %v12034_v27 = vadd.bf16 %v11983_v19, %v11984_v17  ;;  %v12039_v17 = vld [vmem:[#allocation88_spill] sm:$0xff]  ;;  %v12065_v2 = vld [vmem:[#allocation101_spill] sm:$0xff] }
 0x983   : > { %v5402_v42 = vadd.f32 %v5401_v15, %v5400_v32  ;;  %v5553_v26 = vunpack.c.l.b16 %v5505_v13  ;;  %v5566_v21 = vsel %vm2561_vm13, %v5543_v59, %v5565_v0  ;;  %v5573_v60 = vsel %vm2561_vm13, %v5551_v36, %v5572_v22  ;;  %v12059_v15 = vld [vmem:[#allocation155_spill] sm:$0xff]  ;;  %v12060_v36 = vld [vmem:[#allocation142_spill] sm:$0xff] }
 0x984   : > { %v4849_v14 = vadd.bf16 %v12033_v1, %v12032_v61  ;;  %v4850_v20 = vadd.bf16 %v12035_v57, %v12034_v27  ;;  %v12036_v31 = vadd.bf16 %v11982_v40, %v11985_v38  ;;  %v5567_v39 = vsel %vm2563_vm14, %v5544_v43, %v5566_v21  ;;  %v12054_v43 = vld [vmem:[#allocation92_spill] sm:$0xff]  ;;  %v12066_v61 = vld [vmem:[#allocation129_spill] sm:$0xff] }
 0x985   : > { %v5506_v51 = vpack.c.bf16 %v5402_v42, %v5402_v42  ;;  %v5574_v3 = vsel %vm2563_vm14, %v5552_v18, %v5573_v60  ;;  %v12038_v33 = vadd.bf16 %v11983_v19, %v11985_v38  ;;  %v12041_v29 = vadd.bf16 %v11982_v40, %v12040_v10  ;;  %v12045_v38 = vld [vmem:[#allocation18_spill] sm:$0xff]  ;;  %v12064_v42 = vld [vmem:[#allocation112_spill] sm:$0xff] }
 0x986   : > { %v4851_v7 = vadd.bf16 %v12037_v55, %v12036_v31  ;;  %v5568_v35 = vsel %vm2565_vm15, %v5545_v63, %v5567_v39  ;;  %v5575_v58 = vsel %vm2565_vm15, %v5553_v26, %v5574_v3  ;;  %v12043_v25 = vadd.bf16 %v11983_v19, %v12040_v10  ;;  %v12062_v18 = vld [vmem:[#allocation102_spill] sm:$0xff]  ;;  %v12067_v26 = vld [vmem:[#allocation145_spill] sm:$0xff] }
 0x987   : > { %v4852_v50 = vadd.bf16 %v12039_v17, %v12038_v33  ;;  %v4853_v46 = vadd.bf16 %v12042_v52, %v12041_v29  ;;  %v5554_v9 = vunpack.c.l.b16 %v5506_v51  ;;  %v5569_v62 = vsel %vm2567_vm3, %v5546_v54, %v5568_v35  ;;  %v12055_v54 = vld [vmem:[#allocation133_spill] sm:$0xff] }
 0x988   : > { %v4854_v30 = vadd.bf16 %v12044_v34, %v12043_v25  ;;  %v12046_v24 = vadd.bf16 %v11982_v40, %v12045_v38  ;;  %v12048_v37 = vadd.bf16 %v11983_v19, %v12045_v38  ;;  %v12051_v8 = vadd.bf16 %v11982_v40, %v12050_v11 }
 0x989   : > { %v5576_v59 = vsel %vm2567_vm3, %v5554_v9, %v5575_v58  ;;  %v12053_v32 = vadd.bf16 %v11983_v19, %v12050_v11  ;;  %v12056_v45 = vadd.bf16 %v11982_v40, %v12055_v54  ;;  %v12058_v49 = vadd.bf16 %v11983_v19, %v12055_v54 }
 0x98a   : > { %v4855_v23 = vadd.bf16 %v12047_v4, %v12046_v24  ;;  %v4856_v16 = vadd.bf16 %v12049_v48, %v12048_v37  ;;  %v4857_v53 = vadd.bf16 %v12052_v5, %v12051_v8  ;;  %v5584_v6 = vpack.c.b16 %v5576_v59, %v5569_v62 }
 0x98b   : > { %v4858_v63 = vadd.bf16 %v12054_v43, %v12053_v32  ;;  %v4859_v47 = vadd.bf16 %v12057_v44, %v12056_v45  ;;  %v4860_v41 = vadd.bf16 %v12059_v15, %v12058_v49  ;;  %v12061_v13 = vadd.bf16 %v11982_v40, %v12060_v36 }
 0x98c   : > { %v12063_v28 = vadd.bf16 %v11983_v19, %v12060_v36  ;;  %v10881_v1 = vadd.bf16 %v12066_v61, %v12065_v2  ;;  %v10885_v0 = vadd.bf16 %v12066_v61, %v12067_v26  ;;  %v10888_v22 = vadd.bf16 %v12066_v61, %v4849_v14  ;;  %6117 = vmatprep.mubr.msk.bf16.mxu0 %vm2218_vm4, %v5584_v6 }
 0x98d   : > { %v4861_v12 = vadd.bf16 %v12062_v18, %v12061_v13  ;;  %v10891_v40 = vadd.bf16 %v12066_v61, %v4850_v20  ;;  %v10895_v19 = vadd.bf16 %v12066_v61, %v4851_v7  ;;  %v10898_v27 = vadd.bf16 %v12066_v61, %v4852_v50 }
 0x98e   : > { %v4862_v56 = vadd.bf16 %v12064_v42, %v12063_v28  ;;  %v10901_v57 = vadd.bf16 %v12066_v61, %v4853_v46  ;;  %v4947_v51 = vmul.bf16 1056980736, %v10881_v1  ;;  %v10905_v21 = vadd.bf16 %v12066_v61, %v4854_v30 }
 0x98f   : > { %v4948_v14 = vmul.bf16 1056980736, %v10885_v0  ;;  %v4949_v20 = vmul.bf16 1056980736, %v10888_v22  ;;  %v4950_v60 = vmul.bf16 1056980736, %v10891_v40  ;;  %v10911_v31 = vadd.bf16 %v12066_v61, %v4855_v23 }
 0x990   : > { %v4951_v55 = vmul.bf16 1056980736, %v10895_v19  ;;  %6502 = vtanh.bf16 %v4947_v51  ;;  %v10915_v7 = vadd.bf16 %v12066_v61, %v4856_v16  ;;  %v4952_v39 = vmul.bf16 1056980736, %v10898_v27 }
 0x991   : > { %6504 = vtanh.bf16 %v4948_v14  ;;  %v10919_v3 = vadd.bf16 %v12066_v61, %v4857_v53  ;;  %v4953_v33 = vmul.bf16 1056980736, %v10901_v57  ;;  %v10923_v17 = vadd.bf16 %v12066_v61, %v4858_v63 }
 0x992   : > { %6506 = vtanh.bf16 %v4949_v20  ;;  %v4954_v50 = vmul.bf16 1056980736, %v10905_v21  ;;  %v10927_v10 = vadd.bf16 %v12066_v61, %v4859_v47  ;;  %v4955_v29 = vmul.bf16 1056980736, %v10911_v31 }
 0x993   : > { %6508 = vtanh.bf16 %v4950_v60  ;;  %v10931_v52 = vadd.bf16 %v12066_v61, %v4860_v41  ;;  %v4956_v46 = vmul.bf16 1056980736, %v10915_v7  ;;  %v10935_v9 = vadd.bf16 %v12066_v61, %v4861_v12 }
 0x994   : > { %6510 = vtanh.bf16 %v4951_v55  ;;  %v4957_v35 = vmul.bf16 1056980736, %v10919_v3  ;;  %v10939_v58 = vadd.bf16 %v12066_v61, %v4862_v56  ;;  %v4958_v25 = vmul.bf16 1056980736, %v10923_v17 }
 0x995   : > { %6512 = vtanh.bf16 %v4952_v39  ;;  %v4959_v34 = vmul.bf16 1056980736, %v10927_v10  ;;  %v4960_v30 = vmul.bf16 1056980736, %v10931_v52  ;;  %v4961_v62 = vmul.bf16 1056980736, %v10935_v9 }
 0x996   : > { %6514 = vtanh.bf16 %v4953_v33  ;;  %v4962_v24 = vmul.bf16 1056980736, %v10939_v58 }
 0x997   : > { %6516 = vtanh.bf16 %v4954_v50 }
 0x998   : > { %6518 = vtanh.bf16 %v4955_v29 }
 0x999   : > { %6520 = vtanh.bf16 %v4956_v46 }
 0x99a   : > { %6522 = vtanh.bf16 %v4957_v35 }
 0x99b   : > { %v6503_v38 = vpop.eup %6502  ;;  %6524 = vtanh.bf16 %v4958_v25 }
 0x99c   : > { %v6505_v4 = vpop.eup %6504  ;;  %6526 = vtanh.bf16 %v4959_v34  ;;  %v5043_v23 = vmul.bf16 1056980736, %v6503_v38 }
 0x99d   : > { %v6507_v37 = vpop.eup %6506  ;;  %6528 = vtanh.bf16 %v4960_v30  ;;  %v5044_v48 = vmul.bf16 1056980736, %v6505_v4 }
 0x99e   : > { %v6509_v16 = vpop.eup %6508  ;;  %6530 = vtanh.bf16 %v4961_v62  ;;  %v5045_v11 = vmul.bf16 1056980736, %v6507_v37  ;;  %v5091_v8 = vadd.bf16 1056980736, %v5043_v23 }
 0x99f   : > { %v6511_v5 = vpop.eup %6510  ;;  %6532 = vtanh.bf16 %v4962_v24  ;;  %v5046_v53 = vmul.bf16 1056980736, %v6509_v16  ;;  %v5092_v59 = vadd.bf16 1056980736, %v5044_v48 }
 0x9a0   : > { %v6513_v32 = vpop.eup %6512  ;;  %v5047_v43 = vmul.bf16 1056980736, %v6511_v5  ;;  %v5093_v63 = vadd.bf16 1056980736, %v5045_v11  ;;  %v10947_v54 = vmul.bf16 %v5091_v8, %v10881_v1 }
 0x9a1   : > { %v6515_v45 = vpop.eup %6514  ;;  %v5048_v44 = vmul.bf16 1056980736, %v6513_v32  ;;  %v5094_v47 = vadd.bf16 1056980736, %v5046_v53  ;;  %v5140_v49 = vmul.bf16 %v5092_v59, %v10885_v0 }
 0x9a2   : > { %v6517_v15 = vpop.eup %6516  ;;  %v5049_v41 = vmul.bf16 1056980736, %v6515_v45  ;;  %v5095_v6 = vadd.bf16 1056980736, %v5047_v43  ;;  %v10951_v36 = vmul.bf16 %v5093_v63, %v10888_v22  ;;  %v5203_v13 = vunpack.c.l.bf16 %v10947_v54 }
 0x9a3   : > { %v6519_v18 = vpop.eup %6518  ;;  %v5050_v12 = vmul.bf16 1056980736, %v6517_v15  ;;  %v5096_v28 = vadd.bf16 1056980736, %v5048_v44  ;;  %v5142_v42 = vmul.bf16 %v5094_v47, %v10891_v40  ;;  %v5204_v56 = vunpack.c.h.bf16 %v10947_v54 }
 0x9a4   : > { %v6521_v2 = vpop.eup %6520  ;;  %v5051_v61 = vmul.bf16 1056980736, %v6519_v18  ;;  %v5097_v1 = vadd.bf16 1056980736, %v5049_v41  ;;  %v10957_v26 = vmul.bf16 %v5095_v6, %v10895_v19  ;;  %v5205_v0 = vunpack.c.l.bf16 %v5140_v49 }
 0x9a5   : > { %v6523_v51 = vpop.eup %6522  ;;  %v5052_v14 = vmul.bf16 1056980736, %v6521_v2  ;;  %v5098_v22 = vadd.bf16 1056980736, %v5050_v12  ;;  %v5144_v20 = vmul.bf16 %v5096_v28, %v10898_v27  ;;  %v5206_v60 = vunpack.c.l.bf16 %v10951_v36 }
 0x9a6   : > { %v6525_v55 = vpop.eup %6524  ;;  %v5053_v39 = vmul.bf16 1056980736, %v6523_v51  ;;  %v5099_v33 = vadd.bf16 1056980736, %v5051_v61  ;;  %v5145_v40 = vmul.bf16 %v5097_v1, %v10901_v57  ;;  %v5207_v50 = vunpack.c.h.bf16 %v10951_v36 }
 0x9a7   : > { %v6527_v29 = vpop.eup %6526  ;;  %v5054_v46 = vmul.bf16 1056980736, %v6525_v55  ;;  %v5100_v35 = vadd.bf16 1056980736, %v5052_v14  ;;  %v5146_v19 = vmul.bf16 %v5098_v22, %v10905_v21  ;;  %v5208_v25 = vunpack.c.l.bf16 %v5142_v42 }
 0x9a8   : > { %v6529_v34 = vpop.eup %6528  ;;  %v5055_v30 = vmul.bf16 1056980736, %v6527_v29  ;;  %v5101_v62 = vadd.bf16 1056980736, %v5053_v39  ;;  %v5147_v27 = vmul.bf16 %v5099_v33, %v10911_v31  ;;  %v5209_v38 = vunpack.c.l.bf16 %v10957_v26 }
 0x9a9   : > { %v6531_v24 = vpop.eup %6530  ;;  %v5056_v4 = vmul.bf16 1056980736, %v6529_v34  ;;  %v5102_v23 = vadd.bf16 1056980736, %v5054_v46  ;;  %v5148_v57 = vmul.bf16 %v5100_v35, %v10915_v7  ;;  %v5210_v37 = vunpack.c.h.bf16 %v10957_v26 }
 0x9aa   : > { %v6533_v48 = vpop.eup %6532  ;;  %v5057_v16 = vmul.bf16 1056980736, %v6531_v24  ;;  %v5103_v11 = vadd.bf16 1056980736, %v5055_v30  ;;  %v5149_v21 = vmul.bf16 %v5101_v62, %v10919_v3  ;;  %v5211_v8 = vunpack.c.l.bf16 %v5144_v20 }
 0x9ab   : > { %v5058_v5 = vmul.bf16 1056980736, %v6533_v48  ;;  %v5104_v53 = vadd.bf16 1056980736, %v5056_v4  ;;  %v5150_v59 = vmul.bf16 %v5102_v23, %v10923_v17  ;;  %v5212_v31 = vunpack.c.l.bf16 %v5145_v40 }
 0x9ac   : > { %v5105_v32 = vadd.bf16 1056980736, %v5057_v16  ;;  %v5151_v43 = vmul.bf16 %v5103_v11, %v10927_v10  ;;  %v5213_v63 = vunpack.c.h.bf16 %v5145_v40  ;;  %v5214_v45 = vunpack.c.l.bf16 %v5146_v19 }
 0x9ad   : > { %v5106_v44 = vadd.bf16 1056980736, %v5058_v5  ;;  %v5152_v7 = vmul.bf16 %v5104_v53, %v10931_v52  ;;  %v5215_v47 = vunpack.c.l.bf16 %v5147_v27  ;;  %v5216_v49 = vunpack.c.h.bf16 %v5147_v27 }
 0x9ae   : > { %v10973_v15 = vmul.bf16 %v5105_v32, %v10935_v9  ;;  %v5217_v3 = vunpack.c.l.bf16 %v5148_v57  ;;  %v5218_v41 = vunpack.c.l.bf16 %v5149_v21  ;;  %v5219_v6 = vunpack.c.h.bf16 %v5149_v21 }
 0x9af   : > { %v5154_v36 = vmul.bf16 %v5106_v44, %v10939_v58  ;;  %v5220_v17 = vunpack.c.l.bf16 %v5150_v59  ;;  %v5221_v18 = vunpack.c.l.bf16 %v5151_v43  ;;  %v5222_v12 = vunpack.c.h.bf16 %v5151_v43 }
 0x9b0   : > { %v5223_v28 = vunpack.c.l.bf16 %v5152_v7  ;;  %v5224_v10 = vunpack.c.l.bf16 %v10973_v15  ;;  %v5225_v42 = vunpack.c.h.bf16 %v10973_v15  ;;  %v5403_v52 = vsel %vm2218_vm4, %v5203_v13, 0.0 }
 0x9b1   : > { %v10981_v2 = vunpack.c.l.bf16 %v5154_v36  ;;  %v5404_v9 = vsel %vm2218_vm4, %v5204_v56, 0.0  ;;  %v5406_v61 = vsel %vm2218_vm4, %v5205_v0, 0.0  ;;  %v5414_v58 = vsel %vm2218_vm4, %v5206_v60, 0.0 }
 0x9b2   : > { %v5405_v1 = vadd.f32 %v5404_v9, %v5403_v52  ;;  %v5415_v26 = vsel %vm2218_vm4, %v5207_v50, 0.0  ;;  %v5417_v51 = vsel %vm2218_vm4, %v5208_v25, 0.0  ;;  %v5425_v14 = vsel %vm2218_vm4, %v5209_v38, 0.0 }
 0x9b3   : > { %v5416_v22 = vadd.f32 %v5415_v26, %v5414_v58  ;;  %v5426_v54 = vsel %vm2218_vm4, %v5210_v37, 0.0  ;;  %v5428_v13 = vsel %vm2218_vm4, %v5211_v8, 0.0  ;;  %v5436_v20 = vsel %vm2218_vm4, %v5212_v31, 0.0 }
 0x9b4   : > { %v5407_v55 = vadd.f32 %v5406_v61, %v5405_v1  ;;  %v5427_v56 = vadd.f32 %v5426_v54, %v5425_v14  ;;  %v5437_v0 = vsel %vm2218_vm4, %v5213_v63, 0.0  ;;  %v5439_v60 = vsel %vm2218_vm4, %v5214_v45, 0.0 }
 0x9b5   : > { %v5418_v39 = vadd.f32 %v5417_v51, %v5416_v22  ;;  %v5438_v33 = vadd.f32 %v5437_v0, %v5436_v20  ;;  %v5447_v40 = vsel %vm2218_vm4, %v5215_v47, 0.0  ;;  %v5448_v50 = vsel %vm2218_vm4, %v5216_v49, 0.0 }
 0x9b6   : > { %v5408_v29 = vrot.slane %v5407_v55, 4  ;;  %v5429_v46 = vadd.f32 %v5428_v13, %v5427_v56  ;;  %v5449_v35 = vadd.f32 %v5448_v50, %v5447_v40  ;;  %v5450_v19 = vsel %vm2218_vm4, %v5217_v3, 0.0 }
 0x9b7   : > { %v5419_v25 = vrot.slane %v5418_v39, 4  ;;  %v5440_v34 = vadd.f32 %v5439_v60, %v5438_v33  ;;  %v5458_v30 = vsel %vm2218_vm4, %v5218_v41, 0.0  ;;  %v5459_v62 = vsel %vm2218_vm4, %v5219_v6, 0.0 }
 0x9b8   : > { %v5409_v27 = vadd.f32 %v5408_v29, %v5407_v55  ;;  %v5430_v38 = vrot.slane %v5429_v46, 4  ;;  %v5451_v24 = vadd.f32 %v5450_v19, %v5449_v35  ;;  %v5460_v4 = vadd.f32 %v5459_v62, %v5458_v30 }
 0x9b9   : > { %v5420_v23 = vadd.f32 %v5419_v25, %v5418_v39  ;;  %v5441_v57 = vrot.slane %v5440_v34, 4  ;;  %v5461_v37 = vsel %vm2218_vm4, %v5220_v17, 0.0  ;;  %v5469_v48 = vsel %vm2218_vm4, %v5221_v18, 0.0 }
 0x9ba   : > { %v5410_v16 = vrot.slane %v5409_v27, 2  ;;  %v5431_v11 = vadd.f32 %v5430_v38, %v5429_v46  ;;  %v5452_v21 = vrot.slane %v5451_v24, 4  ;;  %v5462_v8 = vadd.f32 %v5461_v37, %v5460_v4 }
 0x9bb   : > { %v5421_v5 = vrot.slane %v5420_v23, 2  ;;  %v5442_v53 = vadd.f32 %v5441_v57, %v5440_v34  ;;  %v5470_v59 = vsel %vm2218_vm4, %v5222_v12, 0.0  ;;  %v5472_v31 = vsel %vm2218_vm4, %v5223_v28, 0.0 }
 0x9bc   : > { %v5411_v32 = vadd.f32 %v5410_v16, %v5409_v27  ;;  %v5432_v43 = vrot.slane %v5431_v11, 2  ;;  %v5453_v63 = vadd.f32 %v5452_v21, %v5451_v24  ;;  %v5463_v45 = vrot.slane %v5462_v8, 4 }
 0x9bd   : > { %v5422_v44 = vadd.f32 %v5421_v5, %v5420_v23  ;;  %v5443_v7 = vrot.slane %v5442_v53, 2  ;;  %v5471_v47 = vadd.f32 %v5470_v59, %v5469_v48  ;;  %v5480_v49 = vsel %vm2218_vm4, %v5224_v10, 0.0 }
 0x9be   : > { %v5412_v15 = vrot.slane %v5411_v32, 1  ;;  %v5433_v3 = vadd.f32 %v5432_v43, %v5431_v11  ;;  %v5454_v41 = vrot.slane %v5453_v63, 2  ;;  %v5464_v6 = vadd.f32 %v5463_v45, %v5462_v8 }
 0x9bf   : > { %v5423_v36 = vrot.slane %v5422_v44, 1  ;;  %v5444_v17 = vadd.f32 %v5443_v7, %v5442_v53  ;;  %v5473_v18 = vadd.f32 %v5472_v31, %v5471_v47  ;;  %v5481_v12 = vsel %vm2218_vm4, %v5225_v42, 0.0  ;;  %v12068_v7 = vld [vmem:[#allocation21_spill] sm:$0xff] }
 0x9c0   : > { %v5413_v52 = vadd.f32 %v5412_v15, %v5411_v32  ;;  %v5434_v28 = vrot.slane %v5433_v3, 1  ;;  %v5455_v9 = vadd.f32 %v5454_v41, %v5453_v63  ;;  %v5465_v61 = vrot.slane %v5464_v6, 2  ;;  %v12070_v41 = vld [vmem:[#allocation141_spill] sm:$0xff] }
 0x9c1   : > { %v5424_v58 = vadd.f32 %v5423_v36, %v5422_v44  ;;  %v5445_v1 = vrot.slane %v5444_v17, 1  ;;  %v5474_v26 = vrot.slane %v5473_v18, 4  ;;  %v5482_v51 = vadd.f32 %v5481_v12, %v5480_v49  ;;  %v6562_v44 = vld [vmem:[%s11124_s2 + $0x8] sm:$0xff]  ;;  %v12069_v49 = vld [vmem:[#allocation139_spill] sm:$0xff] }
 0x9c2   : > { %v5435_v14 = vadd.f32 %v5434_v28, %v5433_v3  ;;  %v5456_v22 = vrot.slane %v5455_v9, 1  ;;  %v5466_v10 = vadd.f32 %v5465_v61, %v5464_v6  ;;  %v5483_v54 = vsel %vm2218_vm4, %v10981_v2, 0.0 }
 0x9c3   : > { %v5446_v13 = vadd.f32 %v5445_v1, %v5444_v17  ;;  %v5475_v20 = vadd.f32 %v5474_v26, %v5473_v18  ;;  %v5484_v55 = vadd.f32 %v5483_v54, %v5482_v51  ;;  %v5507_v56 = vpack.c.bf16 %v5413_v52, %v5413_v52  ;;  %v12071_v52 = vld [vmem:[#allocation138_spill] sm:$0xff] }
 0x9c4   : > { %v5457_v0 = vadd.f32 %v5456_v22, %v5455_v9  ;;  %v5467_v42 = vrot.slane %v5466_v10, 1  ;;  %v5508_v60 = vpack.c.bf16 %v5424_v58, %v5424_v58  ;;  %v5509_v39 = vpack.c.bf16 %v5435_v14, %v5435_v14 }
 0x9c5   : > { %v5476_v33 = vrot.slane %v5475_v20, 2  ;;  %v5485_v40 = vrot.slane %v5484_v55, 4  ;;  %v5510_v50 = vpack.c.bf16 %v5446_v13, %v5446_v13  ;;  %v5555_v29 = vunpack.c.l.b16 %v5507_v56 }
 0x9c6   : > { %v5468_v46 = vadd.f32 %v5467_v42, %v5466_v10  ;;  %v5511_v35 = vpack.c.bf16 %v5457_v0, %v5457_v0  ;;  %v5556_v19 = vunpack.c.l.b16 %v5508_v60  ;;  %v5557_v25 = vunpack.c.l.b16 %v5509_v39 }
 0x9c7   : > { %v5477_v34 = vadd.f32 %v5476_v33, %v5475_v20  ;;  %v5486_v30 = vadd.f32 %v5485_v40, %v5484_v55  ;;  %v5558_v2 = vunpack.c.l.b16 %v5510_v50  ;;  %v5667_v47 = vrot.slane %v6562_v44, %v12068_v7 }
 0x9c8   : > { %v5512_v62 = vpack.c.bf16 %v5468_v46, %v5468_v46  ;;  %v5577_v27 = vsel %vm2555_vm6, %v5556_v19, %v5555_v29  ;;  %v5559_v4 = vunpack.c.l.b16 %v5511_v35 }
 0x9c9   : > { %v5478_v38 = vrot.slane %v5477_v34, 1  ;;  %v5487_v24 = vrot.slane %v5486_v30, 2  ;;  %v5578_v23 = vsel %vm2557_vm10, %v5557_v25, %v5577_v27  ;;  %v5670_v15 = vmul.f32 %v5667_v47, %v12069_v49  ;;  %v12072_v25 = vld [vmem:[#allocation63_spill] sm:$0xff]  ;;  %v12074_v27 = vld [vmem:[#allocation9_spill] sm:$0xff] }
 0x9ca   : > { %v5560_v57 = vunpack.c.l.b16 %v5512_v62  ;;  %v5579_v37 = vsel %vm2559_vm11, %v5558_v2, %v5578_v23  ;;  %v5668_v6 = vmul.f32 %v5667_v47, %v12070_v41  ;;  %v5669_v28 = vmul.f32 %v5667_v47, %v12071_v52  ;;  %v12080_v52 = vld [vmem:[#allocation14_spill] sm:$0xff] }
 0x9cb   : > { %v5479_v48 = vadd.f32 %v5478_v38, %v5477_v34  ;;  %v5488_v16 = vadd.f32 %v5487_v24, %v5486_v30  ;;  %v5580_v11 = vsel %vm2561_vm13, %v5559_v4, %v5579_v37  ;;  %v12073_v30 = vld [vmem:[#allocation64_spill] sm:$0xff]  ;;  %v5686_v38 = vadd.f32 0.14, %v12074_v27  ;;  %v12075_v4 = vld [vmem:[#allocation65_spill] sm:$0xff] }
 0x9cc   : > { %v5581_v21 = vsel %vm2563_vm14, %v5560_v57, %v5580_v11  ;;  %v12076_v37 = vld [vmem:[#allocation69_spill] sm:$0xff]  ;;  %v12077_v11 = vld [vmem:[#allocation7_spill] sm:$0xff] }
 0x9cd   : > { %v5489_v8 = vrot.slane %v5488_v16, 1  ;;  %v5513_v5 = vpack.c.bf16 %v5479_v48, %v5479_v48 }
 0x9cf   : > { %v5490_v53 = vadd.f32 %v5489_v8, %v5488_v16  ;;  %v5561_v59 = vunpack.c.l.b16 %v5513_v5  ;;  %v5687_v16 = vmul.f32 %v5686_v38, %v5686_v38 }
 0x9d1   : > { %v5514_v31 = vpack.c.bf16 %v5490_v53, %v5490_v53  ;;  %v5582_v32 = vsel %vm2565_vm15, %v5561_v59, %v5581_v21  ;;  %v5692_v5 = vrot.slane %v5687_v16, %v12077_v11  ;;  %v6563_v53 = vld [vmem:[%s11123_s1] sm:$0x7] }
 0x9d2   : > { %v5813_v59 = vmul.f32 %v6563_v53, %v6563_v53 }
 0x9d3   : > { %v5562_v43 = vunpack.c.l.b16 %v5514_v31 }
 0x9d4   : > { %v5814_v31 = vmul.f32 -68.5828, %v5813_v59 }
 0x9d5   : > { %v5583_v63 = vsel %vm2567_vm3, %v5562_v43, %v5582_v32 }
 0x9d6   : > { %v5585_v45 = vpack.c.b16 %v5583_v63, %v5583_v63  ;;  %v12078_v63 = vld [vmem:[#allocation6_spill] sm:$0xff] }
 0x9d8   : > { %6118 = vmatmul.mubr.msk.bf16.vlgmr.msra.gmra.mrb[8].mxu0 %vm2218_vm4, %v5585_v45 }
 0xaab   : > { %v6119_v3 = vpop.f32.mrb[8].mxu0 }
 0xaac   : > { %v5673_v36 = vadd.f32 %v6119_v3, %v5670_v15  ;;  %v5650_v17 = vpop.f32.mrb[9].mxu0 }
 0xaad   : > { %v5671_v18 = vadd.f32 %v5668_v6, %v5650_v17  ;;  %v6120_v12 = vpop.f32.mrb[10].mxu0  ;;  %v12079_v17 = vld [vmem:[#allocation13_spill] sm:$0xff] }
 0xaae   : > { %v5676_v9 = vmul.f32 0.5, %v5673_v36  ;;  %v5653_v61 = vpop.f32.mrb[11].mxu0 }
 0xaaf   : > { %v5674_v58 = vmul.f32 0.5, %v5671_v18  ;;  %v5672_v1 = vadd.f32 %v5669_v28, %v5653_v61  ;;  %v5772_v18 = vmul.f32 -0.25, %v12079_v17  ;;  %v5771_v28 = vmul.f32 -0.25, %v12080_v52 }
 0xab0   : > { %6534 = vtanh.f32 %v5676_v9 }
 0xab1   : > { %6536 = vtanh.f32 %v5674_v58  ;;  %v5675_v26 = vmul.f32 0.5, %v5672_v1  ;;  %v12081_v1 = vld [vmem:[#allocation16_spill] sm:$0xff] }
 0xab3   : > { %6538 = vtanh.f32 %v5675_v26  ;;  %v5773_v26 = vmul.f32 -0.25, %v12081_v1 }
 0xaba   : > { %v6535_v51 = vpop.eup %6534 }
 0xabb   : > { %v6537_v14 = vpop.eup %6536  ;;  %v5682_v22 = vmul.f32 0.5, %v6535_v51 }
 0xabc   : > { %v5680_v10 = vmul.f32 0.5, %v6537_v14 }
 0xabd   : > { %v6539_v54 = vpop.eup %6538  ;;  %v11022_v13 = vadd.f32 0.5, %v5682_v22 }
 0xabe   : > { %v5683_v20 = vadd.f32 0.5, %v5680_v10  ;;  %v5681_v55 = vmul.f32 0.5, %v6539_v54 }
 0xabf   : > { %v5715_v56 = vmul.f32 0.5, %v11022_v13 }
 0xac0   : > { %v5713_v0 = vmul.f32 0.5, %v5683_v20  ;;  %v11025_v42 = vadd.f32 0.5, %v5681_v55 }
 0xac1   : > { %v5718_v33 = vmul.f32 2.0, %v5715_v56 }
 0xac2   : > { %v5716_v60 = vmul.f32 2.0, %v5713_v0  ;;  %v5714_v39 = vmul.f32 0.5, %v11025_v42 }
 0xac3   : > { %v5721_v46 = vadd.f32 0.5, %v5718_v33 }
 0xac4   : > { %v5717_v40 = vmul.f32 2.0, %v5714_v39  ;;  %v5719_v50 = vadd.f32 0.5, %v5716_v60 }
 0xac6   : > { %5726 = vperm.xlu0 %6167, %v5719_v50   ;;  %v5720_v29 = vadd.f32 0.5, %v5717_v40 }
 0xac8   : > { %5729 = vperm.xlu1 %6166, %v5720_v29   ;;  %v12082_v29 = vld [vmem:[#allocation10_spill] sm:$0xff] }
 0xaca   : > { %5732 = vperm.xlu0 %6167, %v5721_v46   ;;  %v12083_v46 = vld [vmem:[#allocation22_spill] sm:$0xff] }
 0xb45   : > { %v5727_v35 = vpop.permute.xlu0 %5726 }
 0xb46   : > { %v5737_v34 = vrot.slane %v5727_v35, %v12072_v25  ;;  %v5751_v35 = vmul.f32 %v12083_v46, %v12082_v29 }
 0xb47   : > { %v5730_v19 = vpop.permute.xlu1 %5729 }
 0xb48   : > { %v5741_v62 = vrot.slane %v5730_v19, %v12073_v30  ;;  %v12084_v19 = vld [vmem:[#allocation24_spill] sm:$0xff] }
 0xb49   : > { %v5733_v2 = vpop.permute.xlu0 %5732 }
 0xb4a   : > { %v5742_v24 = vsel %vm586_vm8, %v5741_v62, %v5737_v34  ;;  %v5746_v23 = vrot.slane %v5733_v2, %v12075_v4  ;;  %v5750_v34 = vmul.f32 %v12084_v19, %v12082_v29  ;;  %v5796_v62 = vmul.f32 -68.5828, %v5751_v35  ;;  %v12085_v2 = vld [vmem:[#allocation23_spill] sm:$0xff] }
 0xb4b   : > { %v5752_v27 = vmul.f32 %v12085_v2, %v12082_v29 }
 0xb4c   : > { %v5747_v57 = vsel %vm593_vm9, %v5746_v23, %v5742_v24  ;;  %v5795_v24 = vmul.f32 -68.5828, %v5750_v34 }
 0xb4d   : > { %v5749_v48 = vmul.f32 %v12076_v37, %v5747_v57 }
 0xb4f   : > { %v5756_v21 = vrot.slane %v5749_v48, %v12077_v11  ;;  %v5816_v8 = vrot.slane %v5749_v48, 1  ;;  %v5797_v48 = vmul.f32 -68.5828, %v5752_v27 }
 0xb51   : > { %6540 = vrcp.f32 %v5816_v8  ;;  %5762 = vbcast.lane.b32.xlu0 %v5756_v21, 264  ;;  %5758 = vbcast.lane.b32.xlu1 %v5756_v21, 256 }
 0xb55   : > { %5694 = vbcast.lane.b32.xlu0 %v5692_v5, 256  ;;  %5766 = vbcast.lane.b32.xlu1 %v5756_v21, 272 }
 0xb59   : > { %5702 = vbcast.lane.b32.xlu0 %v5692_v5, 272  ;;  %5698 = vbcast.lane.b32.xlu1 %v5692_v5, 264 }
 0xb5b   : > { %v6541_v32 = vpop.eup %6540 }
 0xb5c   : > { %v5819_v43 = vmul.f32 %v6541_v32, %v5814_v31 }
 0xb5e   : > { %v5824_v45 = vrot.slane %v5819_v43, %v12078_v63 }
 0xb60   : > { %5830 = vbcast.lane.b32.xlu0 %v5824_v45, 264 }
 0xbc3   : > { %v5763_v44 = vpop.permute.xlu0 %5762  ;;  %v5759_v7 = vpop.permute.xlu1 %5758 }
 0xbc4   : > { %v5769_v47 = vmul.f32 %v5763_v44, %v5756_v21  ;;  %v5768_v49 = vmul.f32 %v5759_v7, %v5756_v21 }
 0xbc6   : > { %6542 = vrcp.f32 %v5769_v47 }
 0xbc7   : > { %6544 = vrcp.f32 %v5768_v49  ;;  %v5695_v15 = vpop.permute.xlu0 %5694  ;;  %v5767_v3 = vpop.permute.xlu1 %5766 }
 0xbc8   : > { %v5707_v41 = vmul.f32 %v5695_v15, %v5683_v20  ;;  %v5770_v6 = vmul.f32 %v5767_v3, %v5756_v21 }
 0xbca   : > { %v5710_v36 = vmul.f32 2.267728, %v5707_v41  ;;  %6546 = vrcp.f32 %v5770_v6 }
 0xbcb   : > { %v5703_v44 = vpop.permute.xlu0 %5702 }
 0xbcc   : > { %5845 = vrot.lane.b32.xlu1 %v5710_v36, %s6633_s17  ;;  %v5709_v7 = vmul.f32 %v5703_v44, %v11022_v13 }
 0xbd0   : > { %v6543_v12 = vpop.eup %6542  ;;  %5826 = vbcast.lane.b32.xlu1 %v5824_v45, 256 }
 0xbd1   : > { %v6545_v9 = vpop.eup %6544  ;;  %v5777_v61 = vmul.f32 %v6543_v12, %v5772_v18 }
 0xbd2   : > { %v5775_v58 = vmul.f32 %v6545_v9, %v5771_v28  ;;  %v5831_v36 = vpop.permute.xlu0 %5830 }
 0xbd3   : > { %v5782_v51 = vmul.f32 1.442695, %v5777_v61 }
 0xbd4   : > { %v6547_v14 = vpop.eup %6546  ;;  %v5780_v22 = vmul.f32 1.442695, %v5775_v58  ;;  %5834 = vbcast.lane.b32.xlu1 %v5824_v45, 272 }
 0xbd5   : > { %6548 = vpow2.f32 %v5782_v51  ;;  %v5779_v10 = vmul.f32 %v6547_v14, %v5773_v26 }
 0xbd6   : > { %6550 = vpow2.f32 %v5780_v22 }
 0xbd7   : > { %v5784_v54 = vmul.f32 1.442695, %v5779_v10 }
 0xbd9   : > { %6552 = vpow2.f32 %v5784_v54 }
 0xbdf   : > { %v6549_v20 = vpop.eup %6548 }
 0xbe0   : > { %v6551_v55 = vpop.eup %6550  ;;  %v5787_v56 = vmul.f32 %v6549_v20, %v5769_v47  ;;  %v5699_v47 = vpop.permute.xlu1 %5698 }
 0xbe1   : > { %v5786_v0 = vmul.f32 %v6551_v55, %v5768_v49  ;;  %v5712_v49 = vmul.f32 2.267728, %v5709_v7  ;;  %v5708_v15 = vmul.f32 %v5699_v47, %v11025_v42 }
 0xbe2   : > { %v5790_v60 = vadd.f32 %v5787_v56, %v12079_v17 }
 0xbe3   : > { %v6553_v39 = vpop.eup %6552  ;;  %v5789_v33 = vadd.f32 %v5786_v0, %v12080_v52  ;;  %v5711_v3 = vmul.f32 2.267728, %v5708_v15 }
 0xbe4   : > { %6554 = vrsqrt.f32 %v5790_v60  ;;  %v5788_v40 = vmul.f32 %v6553_v39, %v5770_v6 }
 0xbe5   : > { %6556 = vrsqrt.f32 %v5789_v33 }
 0xbe6   : > { %v5791_v50 = vadd.f32 %v5788_v40, %v12081_v1 }
 0xbe8   : > { %6558 = vrsqrt.f32 %v5791_v50 }
 0xbee   : > { %v6555_v38 = vpop.eup %6554 }
 0xbef   : > { %v6557_v23 = vpop.eup %6556  ;;  %v5799_v57 = vmul.f32 %v6555_v38, %v5796_v62 }
 0xbf0   : > { %v5798_v37 = vmul.f32 %v6557_v23, %v5795_v24 }
 0xbf1   : > { %v5802_v21 = vsel %vm272_vm0, %v5799_v57, 0.0  ;;  %vm5884_vm0 = vcmask 188416  }
 0xbf2   : > { %v6559_v8 = vpop.eup %6558  ;;  %v5807_v5 = vsel %vm482_vm12, %v5802_v21, 0.0  ;;  %v5801_v31 = vsel %vm271_vm1, %v5798_v37, 0.0 }
 0xbf3   : > { %5808 = vadd.xlane.f32.xlu0 %v5807_v5  ;;  %v5800_v53 = vmul.f32 %v6559_v8, %v5797_v48  ;;  %v5804_v45 = vsel %vm482_vm12, %v5801_v31, 0.0 }
 0xbf5   : > { %v5803_v43 = vsel %vm273_vm2, %v5800_v53, 0.0 }
 0xbf6   : > { %v5810_v63 = vsel %vm482_vm12, %v5803_v43, 0.0 }
 0xbf7   : > { %5811 = vadd.xlane.f32.xlu0 %v5810_v63 }
 0xbf8   : > { %5805 = vadd.xlane.f32.xlu1 %v5804_v45 }
 0xc09   : > { %5849 = vrot.lane.b32.xlu1 %v5712_v49, %s6633_s17 }
 0xc0d   : > { %5847 = vrot.lane.b32.xlu0 %v5711_v3, %s6633_s17 }
 0xc3e   : > { %v5846_v41 = vpop.permute.xlu1 %5845 }
 0xc42   : > { %v5827_v6 = vpop.permute.xlu1 %5826 }
 0xc46   : > { %v5835_v18 = vpop.permute.xlu1 %5834 }
 0xc80   : > { %v5809_v17 = vpop.xlane.xlu0 %5808 }
 0xc81   : > { %v5840_v13 = vadd.f32 %v5831_v36, %v5809_v17 }
 0xc84   : > { %v5812_v12 = vpop.xlane.xlu0 %5811 }
 0xc85   : > { %v5806_v52 = vpop.xlane.xlu1 %5805  ;;  %v5841_v1 = vadd.f32 %v5835_v18, %v5812_v12 }
 0xc86   : > { %v5839_v28 = vadd.f32 %v5827_v6, %v5806_v52 }
 0xc88   : > { %v5854_v9 = vadd.f32 %v5846_v41, %v5839_v28  ;;  %v5848_v61 = vpop.permute.xlu0 %5847 }
 0xc89   : > { %v5855_v58 = vadd.f32 %v5848_v61, %v5840_v13  ;;  %v5850_v42 = vpop.permute.xlu1 %5849 }
 0xc8a   : > { %5861 = vperm.xlu0 %6167, %v5854_v9   ;;  %v5856_v26 = vadd.f32 %v5850_v42, %v5841_v1 }
 0xc8b   : > { %5864 = vperm.xlu1 %6166, %v5855_v58  }
 0xc8e   : > { %5867 = vperm.xlu0 %6167, %v5856_v26  }
 0xd09   : > { %v5862_v51 = vpop.permute.xlu0 %5861 }
 0xd0a   : > { %v5865_v14 = vpop.permute.xlu1 %5864  ;;  %v5872_v22 = vrot.slane %v5862_v51, %v12072_v25 }
 0xd0b   : > { %v5876_v10 = vrot.slane %v5865_v14, %v12073_v30 }
 0xd0d   : > { %v5868_v54 = vpop.permute.xlu0 %5867  ;;  %v5877_v55 = vsel %vm586_vm8, %v5876_v10, %v5872_v22 }
 0xd0e   : > { %v5881_v20 = vrot.slane %v5868_v54, %v12075_v4 }
 0xd10   : > { %v5882_v25 = vsel %vm593_vm9, %v5881_v20, %v5877_v55 }
 0xd11   : > { %5885 = vst.msk [vmem:[%s214_s26] sm:$0x1] %vm5884_vm0, %v5882_v25 }
 0xd12   : > { %6577 = shalt.err (!%p6574_p3)
}
 0xd13   : > { %s6578_s10 = scalar_lea.hbm %s11079_s8, 16  ;;  %s6582_s16 = scalar_lea.hbm %s11127_s5, 32 }
 0xd14   : > { %p6579_p4 = scmp.ne.s32.totalorder %s11079_s8, %s6578_s10  ;;  %p6583_p9 = scmp.lt.u32.totalorder %s11079_s8, %s11127_s5 }
 0xd15   : > { %p6584_p10 = scmp.lt.u32.totalorder %s6582_s16, %s6578_s10  ;;  %p6586_p12 = scmp.lt.u32.totalorder %s6578_s10, %s11079_s8 }
 0xd16   : > { %p6580_p7 = pnand %p6579_p4, %p6703_p5 }
 0xd17   : > { %p6585_p11 = por %p6584_p10, %p6583_p9 }
 0xd18   : > { %p6581_p8 = pneg %p6580_p7 }
 0xd19   : > { %p6587_p13 = por %p6586_p12, %p6585_p11 }
 0xd1b   : > { %p6588_p0 = pnand %p6587_p13, %p6581_p8 }
 0xd1d   : > { %6591 = shalt.err (!%p6588_p0)
}
 0xd1e   : > { %6121 = dma.vmem_to_hbm [thread:$0]  (%p6703_p5), %s11081_s30, 16, %s11079_s8, %s5887_s22  }
 0xd1f PF: > { %p6127_p1 = scmp.ge.s32.totalorder %s6626_s21, 2  ;;  %s5911_s25 = sand.u32 1, %s6614_s18  }
 0xd20   : > { %s5912_s26 = scalar_lea.sflag [#allocation3], %s5911_s25 }
 0xd21   : > { %p6124_p2 = pnand %p6127_p1, %p6707_p6 }
 0xd23   : > { %6609 = dma.done.wait (!%p6124_p2), %s5912_s26, 16  }
 0xd24   : > { %6611 = vsyncadd (!%p6124_p2), %s5912_s26, 4294967280  ;;  %p15_p3 = scmp.ge.s32.totalorder %s6690_s24, 4   ;;  %s12090_s18 = smov %s6618_s19 }
 0xd25   : > { %s12091_s19 = smov %s6622_s20  ;;  %s12092_s20 = smov %s6701_s27 }
 0xd26   : > { %s12093_s21 = smov %s6690_s24  ;;  %17 = sbr.rel (!%p15_p3) target bundleno = 3 (0x3), region = 75 }
 0xd2d   :  { %5916 = vsyncpa [#allocation3], 1 }
 0xd2e   :  { %5918 = vsyncpa [#allocation3 + $0x1], 1 }

</bundles_post_ra>
